<compile_context>
chip_gen: v7x
topology: tpu7x:2x2x1
jax: 0.10.0
libtpu: 0.0.40
codegen_flags: <defaults>
</compile_context>

<pallas_src>
import random

import jax
import jax.numpy as jnp
from jax.experimental import pallas as pl
from jax.experimental.pallas import tpu as pltpu

C_IN = 64                    # input channels
C_OUT = 64                   # output channels
H = W = 56                   # spatial size implied by the module's reshapes
ROW_W = W + 2                # 58 : W-padded row width of the flattened input
NSP_USE = H * ROW_W          # 3248 columns that decode to real output pixels
KTAPS = 9                    # 3x3 taps
KDIM = KTAPS * C_IN          # 576 contraction length

CHUNK = 256                  # matmul N-chunk (full MXU width on v6e/v7x)
NCHUNKS = 7                  # chunks per grid step (per core on v7x)
HALF = CHUNK * NCHUNKS       # 1792 output columns per grid step
NSP_PAD = 2 * HALF           # 3584 padded output columns  (>= NSP_USE)
SLAB_W = 1920                # per-core input slab width (>= HALF + 2*ROW_W + 2)
XPF_W = HALF + SLAB_W        # 3712 flattened activation width (>= 58*58 = 3364)

assert SLAB_W >= HALF + 2 * ROW_W + 2 and SLAB_W % 128 == 0
assert XPF_W >= ROW_W * ROW_W and NSP_PAD >= NSP_USE


def _conv3x3_kernel(xp_ref, w_ref, o_ref, p2d_a, p2d_b):
    """One grid step (= one core on v7x): 1792 output columns.

    Assemble im2col chunks into alternating VMEM buffers and issue one MXU
    matmul per chunk so the scheduler overlaps the vst-bound assembly of
    chunk j+1 with the MXU stream of chunk j.
    """
    w = w_ref[...]                                   # (64, 576) bf16, resident
    bufs = (p2d_a, p2d_b)
    for j in range(NCHUNKS):
        buf = bufs[j & 1]                            # double-buffered scratch
        col0 = j * CHUNK
        for kh in range(3):
            for kw in range(3):
                t = kh * 3 + kw
                start = kh * ROW_W + kw + col0       # static lane offset
                buf[t * C_IN:(t + 1) * C_IN, :] = xp_ref[0, :, start:start + CHUNK]
        # (64, 576) @ (576, 256), bf16 inputs, f32 accumulation
        o_ref[:, col0:col0 + CHUNK] = jnp.dot(
            w, buf[...], preferred_element_type=jnp.float32)
    # TODO(synk): optionally stage per-chunk output in VMEM and issue manual
    # async copies (out memory_space=pl.ANY) to also hide the last writeback.


def conv3x3_pallas(xp_slabs, w2d):
    return pl.pallas_call(
        _conv3x3_kernel,
        out_shape=jax.ShapeDtypeStruct((C_OUT, NSP_PAD), jnp.float32),
        grid=(2,),
        in_specs=[
            pl.BlockSpec((1, C_IN, SLAB_W), lambda i: (i, 0, 0)),   # per-core slab
            pl.BlockSpec((C_OUT, KDIM), lambda i: (0, 0)),          # folded weight
        ],
        out_specs=pl.BlockSpec((C_OUT, HALF), lambda i: (0, i)),
        scratch_shapes=[pltpu.VMEM((KDIM, CHUNK), jnp.bfloat16),
                        pltpu.VMEM((KDIM, CHUNK), jnp.bfloat16)],
        compiler_params=pltpu.CompilerParams(
            dimension_semantics=("parallel",)),
        cost_estimate=pl.CostEstimate(
            flops=2 * C_OUT * KDIM * NSP_PAD,
            transcendentals=0,
            bytes_accessed=(2 * C_IN * SLAB_W * 2 + C_OUT * KDIM * 2
                            + C_OUT * NSP_PAD * 4)),
    )(xp_slabs, w2d)


def kernel_generated_0_forward(x, w0, w1, shift_direction):
    s = int(shift_direction)

    # ---- fold w1 + the channel pair-sum into the conv weight (once) ----
    # W_eff[i, c, kh, kw] = w0[i, c//2, kh, kw, 0] * w1[c, kh, 0]
    w_eff = jnp.repeat(w0[:, :, :, :, 0], 2, axis=1) * w1[None, :, :, 0, None]
    # contraction axis laid out as (tap, channel): K = (kh*3+kw)*64 + c
    w2d = jnp.transpose(w_eff, (0, 2, 3, 1)).reshape(C_OUT, KDIM)
    w2d = w2d.astype(jnp.bfloat16)

    # ---- activation prep (bf16): roll H & W, pad 1 all around, flatten ----
    xr = jnp.roll(x[0].astype(jnp.bfloat16), (s, s), axis=(1, 2))   # (64,56,56)
    xp = jnp.pad(xr, ((0, 0), (1, 1), (1, 1)))                      # (64,58,58)
    xpf = xp.reshape(C_IN, ROW_W * ROW_W)                           # (64,3364)
    xpf = jnp.pad(xpf, ((0, 0), (0, XPF_W - ROW_W * ROW_W)))        # (64,3712)
    # per-core overlapping slabs (the 128-col halo covers the 3x3 tap reach)
    xp_slabs = jnp.stack([xpf[:, :SLAB_W], xpf[:, HALF:HALF + SLAB_W]], axis=0)

    y2d = conv3x3_pallas(xp_slabs, w2d)                             # (64,3584) f32
    # drop the padded columns and the 2 junk columns per 58-wide row
    y = y2d[:, :NSP_USE].reshape(C_OUT, H, ROW_W)[:, :, :W]
    return y.reshape(1, C_OUT, H, W)


def reference_forward(x, w0, w1, shift_direction):
    """Pure-JAX mirror of the PyTorch module (f32, HIGHEST precision)."""
    s = int(shift_direction)
    t3 = jnp.roll(x, s, axis=2).reshape(1, 64, 56, 56)
    t3p = jnp.pad(t3, ((0, 0), (0, 0), (1, 1), (0, 0)))
    t3u = jnp.stack([t3p[:, :, k:k + 56, :] for k in range(3)], axis=2)
    t4 = jnp.einsum('ljkmn,jki->ljkmni', t3u, w1)
    t5 = t4.reshape(1, 32, 2, 3, 56, 56, 1).sum(axis=2)
    t6 = jnp.roll(t5, s, axis=4).reshape(1, 32 * 3 * 56, 56, 1)
    t6p = jnp.pad(t6, ((0, 0), (0, 0), (1, 1), (0, 0)))
    t6u = jnp.stack([t6p[:, :, k:k + 56, :] for k in range(3)], axis=2)
    t6u = t6u.reshape(1, 32, 3, 56, 3, 56, 1)
    return jnp.einsum('nlkojpm,ilkjm->niop', t6u, w0,
                      precision=jax.lax.Precision.HIGHEST)


if __name__ == "__main__":
    # deterministic "random" shift_direction, like the torch module's __init__
    random.seed(0)
    shift_direction = int((random.random() > 0.5) * 2 - 1)

    key = jax.random.PRNGKey(0)
    kx, kw0, kw1 = jax.random.split(key, 3)
    x = jax.random.normal(kx, (1, 64, 56, 56), dtype=jnp.float32)
    w0 = jax.random.normal(kw0, (64, 32, 3, 3, 1), dtype=jnp.float32)   # weights[0]
    w1 = jax.random.normal(kw1, (64, 3, 1), dtype=jnp.float32)          # weights[1]

    fwd = jax.jit(kernel_generated_0_forward, static_argnums=(3,))
    y = jax.block_until_ready(fwd(x, w0, w1, shift_direction))
    assert y.shape == (1, 64, 56, 56) and y.dtype == jnp.float32

    y_ref = jax.block_until_ready(
        jax.jit(reference_forward, static_argnums=(3,))(x, w0, w1, shift_direction))
    max_err = float(jnp.max(jnp.abs(y - y_ref)))
    assert jnp.allclose(y, y_ref, rtol=5e-2, atol=1.0), \
        f"mismatch vs reference (max abs err {max_err})"

    print("KERNEL_OK")
</pallas_src>

<mosaic_0001>
module attributes {stable_mosaic.version = 11 : i64} {
  func.func @_conv3x3_kernel(%arg0: i32, %arg1: memref<1x64x1920xbf16, #tpu.memory_space<vmem>>, %arg2: memref<64x576xbf16, #tpu.memory_space<vmem>>, %arg3: memref<64x1792xf32, #tpu.memory_space<vmem>>, %arg4: memref<576x256xbf16, #tpu.memory_space<vmem>>, %arg5: memref<576x256xbf16, #tpu.memory_space<vmem>>) attributes {dimension_semantics = [#tpu.dimension_semantics<parallel>], iteration_bounds = array<i64: 2>, scalar_prefetch = 0 : i64, scratch_operands = 2 : i64, tpu.core_type = #tpu.core_type<tc>, window_params = [{transform_indices = @transform_0, window_bounds = array<i64: 1, 64, 1920>}, {pipeline_mode = #tpu.pipeline_mode<synchronous>, transform_indices = @transform_1, window_bounds = array<i64: 64, 576>}, {transform_indices = @transform_2, window_bounds = array<i64: 64, 1792>}]} {
    %c0 = arith.constant 0 : index
    %c0_0 = arith.constant 0 : index
    %0 = vector.load %arg2[%c0, %c0_0] : memref<64x576xbf16, #tpu.memory_space<vmem>>, vector<64x576xbf16>
    %c0_1 = arith.constant 0 : index
    %c0_2 = arith.constant 0 : index
    %c0_3 = arith.constant 0 : index
    %1 = vector.load %arg1[%c0_1, %c0_2, %c0_3] : memref<1x64x1920xbf16, #tpu.memory_space<vmem>>, vector<1x64x256xbf16>
    %2 = vector.shape_cast %1 : vector<1x64x256xbf16> to vector<64x256xbf16>
    %c0_4 = arith.constant 0 : index
    %c0_5 = arith.constant 0 : index
    %3 = vector.load %arg4[%c0_4, %c0_5] : memref<576x256xbf16, #tpu.memory_space<vmem>>, vector<64x256xbf16>
    tpu.vector_store %arg4[%c0_4, %c0_5], %2 {strides = array<i32>} : memref<576x256xbf16, #tpu.memory_space<vmem>>, vector<64x256xbf16>,
    %c0_6 = arith.constant 0 : index
    %c0_7 = arith.constant 0 : index
    %c1 = arith.constant 1 : index
    %4 = vector.load %arg1[%c0_6, %c0_7, %c1] : memref<1x64x1920xbf16, #tpu.memory_space<vmem>>, vector<1x64x256xbf16>
    %5 = vector.shape_cast %4 : vector<1x64x256xbf16> to vector<64x256xbf16>
    %c64 = arith.constant 64 : index
    %c0_8 = arith.constant 0 : index
    %6 = vector.load %arg4[%c64, %c0_8] : memref<576x256xbf16, #tpu.memory_space<vmem>>, vector<64x256xbf16>
    tpu.vector_store %arg4[%c64, %c0_8], %5 {strides = array<i32>} : memref<576x256xbf16, #tpu.memory_space<vmem>>, vector<64x256xbf16>,
    %c0_9 = arith.constant 0 : index
    %c0_10 = arith.constant 0 : index
    %c2 = arith.constant 2 : index
    %7 = vector.load %arg1[%c0_9, %c0_10, %c2] : memref<1x64x1920xbf16, #tpu.memory_space<vmem>>, vector<1x64x256xbf16>
    %8 = vector.shape_cast %7 : vector<1x64x256xbf16> to vector<64x256xbf16>
    %c128 = arith.constant 128 : index
    %c0_11 = arith.constant 0 : index
    %9 = vector.load %arg4[%c128, %c0_11] : memref<576x256xbf16, #tpu.memory_space<vmem>>, vector<64x256xbf16>
    tpu.vector_store %arg4[%c128, %c0_11], %8 {strides = array<i32>} : memref<576x256xbf16, #tpu.memory_space<vmem>>, vector<64x256xbf16>,
    %c0_12 = arith.constant 0 : index
    %c0_13 = arith.constant 0 : index
    %c58 = arith.constant 58 : index
    %10 = vector.load %arg1[%c0_12, %c0_13, %c58] : memref<1x64x1920xbf16, #tpu.memory_space<vmem>>, vector<1x64x256xbf16>
    %11 = vector.shape_cast %10 : vector<1x64x256xbf16> to vector<64x256xbf16>
    %c192 = arith.constant 192 : index
    %c0_14 = arith.constant 0 : index
    %12 = vector.load %arg4[%c192, %c0_14] : memref<576x256xbf16, #tpu.memory_space<vmem>>, vector<64x256xbf16>
    tpu.vector_store %arg4[%c192, %c0_14], %11 {strides = array<i32>} : memref<576x256xbf16, #tpu.memory_space<vmem>>, vector<64x256xbf16>,
    %c0_15 = arith.constant 0 : index
    %c0_16 = arith.constant 0 : index
    %c59 = arith.constant 59 : index
    %13 = vector.load %arg1[%c0_15, %c0_16, %c59] : memref<1x64x1920xbf16, #tpu.memory_space<vmem>>, vector<1x64x256xbf16>
    %14 = vector.shape_cast %13 : vector<1x64x256xbf16> to vector<64x256xbf16>
    %c256 = arith.constant 256 : index
    %c0_17 = arith.constant 0 : index
    %15 = vector.load %arg4[%c256, %c0_17] : memref<576x256xbf16, #tpu.memory_space<vmem>>, vector<64x256xbf16>
    tpu.vector_store %arg4[%c256, %c0_17], %14 {strides = array<i32>} : memref<576x256xbf16, #tpu.memory_space<vmem>>, vector<64x256xbf16>,
    %c0_18 = arith.constant 0 : index
    %c0_19 = arith.constant 0 : index
    %c60 = arith.constant 60 : index
    %16 = vector.load %arg1[%c0_18, %c0_19, %c60] : memref<1x64x1920xbf16, #tpu.memory_space<vmem>>, vector<1x64x256xbf16>
    %17 = vector.shape_cast %16 : vector<1x64x256xbf16> to vector<64x256xbf16>
    %c320 = arith.constant 320 : index
    %c0_20 = arith.constant 0 : index
    %18 = vector.load %arg4[%c320, %c0_20] : memref<576x256xbf16, #tpu.memory_space<vmem>>, vector<64x256xbf16>
    tpu.vector_store %arg4[%c320, %c0_20], %17 {strides = array<i32>} : memref<576x256xbf16, #tpu.memory_space<vmem>>, vector<64x256xbf16>,
    %c0_21 = arith.constant 0 : index
    %c0_22 = arith.constant 0 : index
    %c116 = arith.constant 116 : index
    %19 = vector.load %arg1[%c0_21, %c0_22, %c116] : memref<1x64x1920xbf16, #tpu.memory_space<vmem>>, vector<1x64x256xbf16>
    %20 = vector.shape_cast %19 : vector<1x64x256xbf16> to vector<64x256xbf16>
    %c384 = arith.constant 384 : index
    %c0_23 = arith.constant 0 : index
    %21 = vector.load %arg4[%c384, %c0_23] : memref<576x256xbf16, #tpu.memory_space<vmem>>, vector<64x256xbf16>
    tpu.vector_store %arg4[%c384, %c0_23], %20 {strides = array<i32>} : memref<576x256xbf16, #tpu.memory_space<vmem>>, vector<64x256xbf16>,
    %c0_24 = arith.constant 0 : index
    %c0_25 = arith.constant 0 : index
    %c117 = arith.constant 117 : index
    %22 = vector.load %arg1[%c0_24, %c0_25, %c117] : memref<1x64x1920xbf16, #tpu.memory_space<vmem>>, vector<1x64x256xbf16>
    %23 = vector.shape_cast %22 : vector<1x64x256xbf16> to vector<64x256xbf16>
    %c448 = arith.constant 448 : index
    %c0_26 = arith.constant 0 : index
    %24 = vector.load %arg4[%c448, %c0_26] : memref<576x256xbf16, #tpu.memory_space<vmem>>, vector<64x256xbf16>
    tpu.vector_store %arg4[%c448, %c0_26], %23 {strides = array<i32>} : memref<576x256xbf16, #tpu.memory_space<vmem>>, vector<64x256xbf16>,
    %c0_27 = arith.constant 0 : index
    %c0_28 = arith.constant 0 : index
    %c118 = arith.constant 118 : index
    %25 = vector.load %arg1[%c0_27, %c0_28, %c118] : memref<1x64x1920xbf16, #tpu.memory_space<vmem>>, vector<1x64x256xbf16>
    %26 = vector.shape_cast %25 : vector<1x64x256xbf16> to vector<64x256xbf16>
    %c512 = arith.constant 512 : index
    %c0_29 = arith.constant 0 : index
    %27 = vector.load %arg4[%c512, %c0_29] : memref<576x256xbf16, #tpu.memory_space<vmem>>, vector<64x256xbf16>
    tpu.vector_store %arg4[%c512, %c0_29], %26 {strides = array<i32>} : memref<576x256xbf16, #tpu.memory_space<vmem>>, vector<64x256xbf16>,
    %c0_30 = arith.constant 0 : index
    %c0_31 = arith.constant 0 : index
    %28 = vector.load %arg4[%c0_30, %c0_31] : memref<576x256xbf16, #tpu.memory_space<vmem>>, vector<576x256xbf16>
    %cst = arith.constant dense<0.000000e+00> : vector<64x256xf32>
    %29 = tpu.matmul %0, %28, %cst {dimension_numbers = #tpu.dot_dimension_numbers<[1], [0], [0], [1], [0, 0, 1, 1], [], []>} : vector<64x576xbf16>, vector<576x256xbf16>, vector<64x256xf32> -> vector<64x256xf32>
    %c0_32 = arith.constant 0 : index
    %c0_33 = arith.constant 0 : index
    %30 = vector.load %arg3[%c0_32, %c0_33] : memref<64x1792xf32, #tpu.memory_space<vmem>>, vector<64x256xf32>
    tpu.vector_store %arg3[%c0_32, %c0_33], %29 {strides = array<i32>} : memref<64x1792xf32, #tpu.memory_space<vmem>>, vector<64x256xf32>,
    %c0_34 = arith.constant 0 : index
    %c0_35 = arith.constant 0 : index
    %c256_36 = arith.constant 256 : index
    %31 = vector.load %arg1[%c0_34, %c0_35, %c256_36] : memref<1x64x1920xbf16, #tpu.memory_space<vmem>>, vector<1x64x256xbf16>
    %32 = vector.shape_cast %31 : vector<1x64x256xbf16> to vector<64x256xbf16>
    %c0_37 = arith.constant 0 : index
    %c0_38 = arith.constant 0 : index
    %33 = vector.load %arg5[%c0_37, %c0_38] : memref<576x256xbf16, #tpu.memory_space<vmem>>, vector<64x256xbf16>
    tpu.vector_store %arg5[%c0_37, %c0_38], %32 {strides = array<i32>} : memref<576x256xbf16, #tpu.memory_space<vmem>>, vector<64x256xbf16>,
    %c0_39 = arith.constant 0 : index
    %c0_40 = arith.constant 0 : index
    %c257 = arith.constant 257 : index
    %34 = vector.load %arg1[%c0_39, %c0_40, %c257] : memref<1x64x1920xbf16, #tpu.memory_space<vmem>>, vector<1x64x256xbf16>
    %35 = vector.shape_cast %34 : vector<1x64x256xbf16> to vector<64x256xbf16>
    %c64_41 = arith.constant 64 : index
    %c0_42 = arith.constant 0 : index
    %36 = vector.load %arg5[%c64_41, %c0_42] : memref<576x256xbf16, #tpu.memory_space<vmem>>, vector<64x256xbf16>
    tpu.vector_store %arg5[%c64_41, %c0_42], %35 {strides = array<i32>} : memref<576x256xbf16, #tpu.memory_space<vmem>>, vector<64x256xbf16>,
    %c0_43 = arith.constant 0 : index
    %c0_44 = arith.constant 0 : index
    %c258 = arith.constant 258 : index
    %37 = vector.load %arg1[%c0_43, %c0_44, %c258] : memref<1x64x1920xbf16, #tpu.memory_space<vmem>>, vector<1x64x256xbf16>
    %38 = vector.shape_cast %37 : vector<1x64x256xbf16> to vector<64x256xbf16>
    %c128_45 = arith.constant 128 : index
    %c0_46 = arith.constant 0 : index
    %39 = vector.load %arg5[%c128_45, %c0_46] : memref<576x256xbf16, #tpu.memory_space<vmem>>, vector<64x256xbf16>
    tpu.vector_store %arg5[%c128_45, %c0_46], %38 {strides = array<i32>} : memref<576x256xbf16, #tpu.memory_space<vmem>>, vector<64x256xbf16>,
    %c0_47 = arith.constant 0 : index
    %c0_48 = arith.constant 0 : index
    %c314 = arith.constant 314 : index
    %40 = vector.load %arg1[%c0_47, %c0_48, %c314] : memref<1x64x1920xbf16, #tpu.memory_space<vmem>>, vector<1x64x256xbf16>
    %41 = vector.shape_cast %40 : vector<1x64x256xbf16> to vector<64x256xbf16>
    %c192_49 = arith.constant 192 : index
    %c0_50 = arith.constant 0 : index
    %42 = vector.load %arg5[%c192_49, %c0_50] : memref<576x256xbf16, #tpu.memory_space<vmem>>, vector<64x256xbf16>
    tpu.vector_store %arg5[%c192_49, %c0_50], %41 {strides = array<i32>} : memref<576x256xbf16, #tpu.memory_space<vmem>>, vector<64x256xbf16>,
    %c0_51 = arith.constant 0 : index
    %c0_52 = arith.constant 0 : index
    %c315 = arith.constant 315 : index
    %43 = vector.load %arg1[%c0_51, %c0_52, %c315] : memref<1x64x1920xbf16, #tpu.memory_space<vmem>>, vector<1x64x256xbf16>
    %44 = vector.shape_cast %43 : vector<1x64x256xbf16> to vector<64x256xbf16>
    %c256_53 = arith.constant 256 : index
    %c0_54 = arith.constant 0 : index
    %45 = vector.load %arg5[%c256_53, %c0_54] : memref<576x256xbf16, #tpu.memory_space<vmem>>, vector<64x256xbf16>
    tpu.vector_store %arg5[%c256_53, %c0_54], %44 {strides = array<i32>} : memref<576x256xbf16, #tpu.memory_space<vmem>>, vector<64x256xbf16>,
    %c0_55 = arith.constant 0 : index
    %c0_56 = arith.constant 0 : index
    %c316 = arith.constant 316 : index
    %46 = vector.load %arg1[%c0_55, %c0_56, %c316] : memref<1x64x1920xbf16, #tpu.memory_space<vmem>>, vector<1x64x256xbf16>
    %47 = vector.shape_cast %46 : vector<1x64x256xbf16> to vector<64x256xbf16>
    %c320_57 = arith.constant 320 : index
    %c0_58 = arith.constant 0 : index
    %48 = vector.load %arg5[%c320_57, %c0_58] : memref<576x256xbf16, #tpu.memory_space<vmem>>, vector<64x256xbf16>
    tpu.vector_store %arg5[%c320_57, %c0_58], %47 {strides = array<i32>} : memref<576x256xbf16, #tpu.memory_space<vmem>>, vector<64x256xbf16>,
    %c0_59 = arith.constant 0 : index
    %c0_60 = arith.constant 0 : index
    %c372 = arith.constant 372 : index
    %49 = vector.load %arg1[%c0_59, %c0_60, %c372] : memref<1x64x1920xbf16, #tpu.memory_space<vmem>>, vector<1x64x256xbf16>
    %50 = vector.shape_cast %49 : vector<1x64x256xbf16> to vector<64x256xbf16>
    %c384_61 = arith.constant 384 : index
    %c0_62 = arith.constant 0 : index
    %51 = vector.load %arg5[%c384_61, %c0_62] : memref<576x256xbf16, #tpu.memory_space<vmem>>, vector<64x256xbf16>
    tpu.vector_store %arg5[%c384_61, %c0_62], %50 {strides = array<i32>} : memref<576x256xbf16, #tpu.memory_space<vmem>>, vector<64x256xbf16>,
    %c0_63 = arith.constant 0 : index
    %c0_64 = arith.constant 0 : index
    %c373 = arith.constant 373 : index
    %52 = vector.load %arg1[%c0_63, %c0_64, %c373] : memref<1x64x1920xbf16, #tpu.memory_space<vmem>>, vector<1x64x256xbf16>
    %53 = vector.shape_cast %52 : vector<1x64x256xbf16> to vector<64x256xbf16>
    %c448_65 = arith.constant 448 : index
    %c0_66 = arith.constant 0 : index
    %54 = vector.load %arg5[%c448_65, %c0_66] : memref<576x256xbf16, #tpu.memory_space<vmem>>, vector<64x256xbf16>
    tpu.vector_store %arg5[%c448_65, %c0_66], %53 {strides = array<i32>} : memref<576x256xbf16, #tpu.memory_space<vmem>>, vector<64x256xbf16>,
    %c0_67 = arith.constant 0 : index
    %c0_68 = arith.constant 0 : index
    %c374 = arith.constant 374 : index
    %55 = vector.load %arg1[%c0_67, %c0_68, %c374] : memref<1x64x1920xbf16, #tpu.memory_space<vmem>>, vector<1x64x256xbf16>
    %56 = vector.shape_cast %55 : vector<1x64x256xbf16> to vector<64x256xbf16>
    %c512_69 = arith.constant 512 : index
    %c0_70 = arith.constant 0 : index
    %57 = vector.load %arg5[%c512_69, %c0_70] : memref<576x256xbf16, #tpu.memory_space<vmem>>, vector<64x256xbf16>
    tpu.vector_store %arg5[%c512_69, %c0_70], %56 {strides = array<i32>} : memref<576x256xbf16, #tpu.memory_space<vmem>>, vector<64x256xbf16>,
    %c0_71 = arith.constant 0 : index
    %c0_72 = arith.constant 0 : index
    %58 = vector.load %arg5[%c0_71, %c0_72] : memref<576x256xbf16, #tpu.memory_space<vmem>>, vector<576x256xbf16>
    %cst_73 = arith.constant dense<0.000000e+00> : vector<64x256xf32>
    %59 = tpu.matmul %0, %58, %cst_73 {dimension_numbers = #tpu.dot_dimension_numbers<[1], [0], [0], [1], [0, 0, 1, 1], [], []>} : vector<64x576xbf16>, vector<576x256xbf16>, vector<64x256xf32> -> vector<64x256xf32>
    %c0_74 = arith.constant 0 : index
    %c256_75 = arith.constant 256 : index
    %60 = vector.load %arg3[%c0_74, %c256_75] : memref<64x1792xf32, #tpu.memory_space<vmem>>, vector<64x256xf32>
    tpu.vector_store %arg3[%c0_74, %c256_75], %59 {strides = array<i32>} : memref<64x1792xf32, #tpu.memory_space<vmem>>, vector<64x256xf32>,
    %c0_76 = arith.constant 0 : index
    %c0_77 = arith.constant 0 : index
    %c512_78 = arith.constant 512 : index
    %61 = vector.load %arg1[%c0_76, %c0_77, %c512_78] : memref<1x64x1920xbf16, #tpu.memory_space<vmem>>, vector<1x64x256xbf16>
    %62 = vector.shape_cast %61 : vector<1x64x256xbf16> to vector<64x256xbf16>
    %c0_79 = arith.constant 0 : index
    %c0_80 = arith.constant 0 : index
    %63 = vector.load %arg4[%c0_79, %c0_80] : memref<576x256xbf16, #tpu.memory_space<vmem>>, vector<64x256xbf16>
    tpu.vector_store %arg4[%c0_79, %c0_80], %62 {strides = array<i32>} : memref<576x256xbf16, #tpu.memory_space<vmem>>, vector<64x256xbf16>,
    %c0_81 = arith.constant 0 : index
    %c0_82 = arith.constant 0 : index
    %c513 = arith.constant 513 : index
    %64 = vector.load %arg1[%c0_81, %c0_82, %c513] : memref<1x64x1920xbf16, #tpu.memory_space<vmem>>, vector<1x64x256xbf16>
    %65 = vector.shape_cast %64 : vector<1x64x256xbf16> to vector<64x256xbf16>
    %c64_83 = arith.constant 64 : index
    %c0_84 = arith.constant 0 : index
    %66 = vector.load %arg4[%c64_83, %c0_84] : memref<576x256xbf16, #tpu.memory_space<vmem>>, vector<64x256xbf16>
    tpu.vector_store %arg4[%c64_83, %c0_84], %65 {strides = array<i32>} : memref<576x256xbf16, #tpu.memory_space<vmem>>, vector<64x256xbf16>,
    %c0_85 = arith.constant 0 : index
    %c0_86 = arith.constant 0 : index
    %c514 = arith.constant 514 : index
    %67 = vector.load %arg1[%c0_85, %c0_86, %c514] : memref<1x64x1920xbf16, #tpu.memory_space<vmem>>, vector<1x64x256xbf16>
    %68 = vector.shape_cast %67 : vector<1x64x256xbf16> to vector<64x256xbf16>
    %c128_87 = arith.constant 128 : index
    %c0_88 = arith.constant 0 : index
    %69 = vector.load %arg4[%c128_87, %c0_88] : memref<576x256xbf16, #tpu.memory_space<vmem>>, vector<64x256xbf16>
    tpu.vector_store %arg4[%c128_87, %c0_88], %68 {strides = array<i32>} : memref<576x256xbf16, #tpu.memory_space<vmem>>, vector<64x256xbf16>,
    %c0_89 = arith.constant 0 : index
    %c0_90 = arith.constant 0 : index
    %c570 = arith.constant 570 : index
    %70 = vector.load %arg1[%c0_89, %c0_90, %c570] : memref<1x64x1920xbf16, #tpu.memory_space<vmem>>, vector<1x64x256xbf16>
    %71 = vector.shape_cast %70 : vector<1x64x256xbf16> to vector<64x256xbf16>
    %c192_91 = arith.constant 192 : index
    %c0_92 = arith.constant 0 : index
    %72 = vector.load %arg4[%c192_91, %c0_92] : memref<576x256xbf16, #tpu.memory_space<vmem>>, vector<64x256xbf16>
    tpu.vector_store %arg4[%c192_91, %c0_92], %71 {strides = array<i32>} : memref<576x256xbf16, #tpu.memory_space<vmem>>, vector<64x256xbf16>,
    %c0_93 = arith.constant 0 : index
    %c0_94 = arith.constant 0 : index
    %c571 = arith.constant 571 : index
    %73 = vector.load %arg1[%c0_93, %c0_94, %c571] : memref<1x64x1920xbf16, #tpu.memory_space<vmem>>, vector<1x64x256xbf16>
    %74 = vector.shape_cast %73 : vector<1x64x256xbf16> to vector<64x256xbf16>
    %c256_95 = arith.constant 256 : index
    %c0_96 = arith.constant 0 : index
    %75 = vector.load %arg4[%c256_95, %c0_96] : memref<576x256xbf16, #tpu.memory_space<vmem>>, vector<64x256xbf16>
    tpu.vector_store %arg4[%c256_95, %c0_96], %74 {strides = array<i32>} : memref<576x256xbf16, #tpu.memory_space<vmem>>, vector<64x256xbf16>,
    %c0_97 = arith.constant 0 : index
    %c0_98 = arith.constant 0 : index
    %c572 = arith.constant 572 : index
    %76 = vector.load %arg1[%c0_97, %c0_98, %c572] : memref<1x64x1920xbf16, #tpu.memory_space<vmem>>, vector<1x64x256xbf16>
    %77 = vector.shape_cast %76 : vector<1x64x256xbf16> to vector<64x256xbf16>
    %c320_99 = arith.constant 320 : index
    %c0_100 = arith.constant 0 : index
    %78 = vector.load %arg4[%c320_99, %c0_100] : memref<576x256xbf16, #tpu.memory_space<vmem>>, vector<64x256xbf16>
    tpu.vector_store %arg4[%c320_99, %c0_100], %77 {strides = array<i32>} : memref<576x256xbf16, #tpu.memory_space<vmem>>, vector<64x256xbf16>,
    %c0_101 = arith.constant 0 : index
    %c0_102 = arith.constant 0 : index
    %c628 = arith.constant 628 : index
    %79 = vector.load %arg1[%c0_101, %c0_102, %c628] : memref<1x64x1920xbf16, #tpu.memory_space<vmem>>, vector<1x64x256xbf16>
    %80 = vector.shape_cast %79 : vector<1x64x256xbf16> to vector<64x256xbf16>
    %c384_103 = arith.constant 384 : index
    %c0_104 = arith.constant 0 : index
    %81 = vector.load %arg4[%c384_103, %c0_104] : memref<576x256xbf16, #tpu.memory_space<vmem>>, vector<64x256xbf16>
    tpu.vector_store %arg4[%c384_103, %c0_104], %80 {strides = array<i32>} : memref<576x256xbf16, #tpu.memory_space<vmem>>, vector<64x256xbf16>,
    %c0_105 = arith.constant 0 : index
    %c0_106 = arith.constant 0 : index
    %c629 = arith.constant 629 : index
    %82 = vector.load %arg1[%c0_105, %c0_106, %c629] : memref<1x64x1920xbf16, #tpu.memory_space<vmem>>, vector<1x64x256xbf16>
    %83 = vector.shape_cast %82 : vector<1x64x256xbf16> to vector<64x256xbf16>
    %c448_107 = arith.constant 448 : index
    %c0_108 = arith.constant 0 : index
    %84 = vector.load %arg4[%c448_107, %c0_108] : memref<576x256xbf16, #tpu.memory_space<vmem>>, vector<64x256xbf16>
    tpu.vector_store %arg4[%c448_107, %c0_108], %83 {strides = array<i32>} : memref<576x256xbf16, #tpu.memory_space<vmem>>, vector<64x256xbf16>,
    %c0_109 = arith.constant 0 : index
    %c0_110 = arith.constant 0 : index
    %c630 = arith.constant 630 : index
    %85 = vector.load %arg1[%c0_109, %c0_110, %c630] : memref<1x64x1920xbf16, #tpu.memory_space<vmem>>, vector<1x64x256xbf16>
    %86 = vector.shape_cast %85 : vector<1x64x256xbf16> to vector<64x256xbf16>
    %c512_111 = arith.constant 512 : index
    %c0_112 = arith.constant 0 : index
    %87 = vector.load %arg4[%c512_111, %c0_112] : memref<576x256xbf16, #tpu.memory_space<vmem>>, vector<64x256xbf16>
    tpu.vector_store %arg4[%c512_111, %c0_112], %86 {strides = array<i32>} : memref<576x256xbf16, #tpu.memory_space<vmem>>, vector<64x256xbf16>,
    %c0_113 = arith.constant 0 : index
    %c0_114 = arith.constant 0 : index
    %88 = vector.load %arg4[%c0_113, %c0_114] : memref<576x256xbf16, #tpu.memory_space<vmem>>, vector<576x256xbf16>
    %cst_115 = arith.constant dense<0.000000e+00> : vector<64x256xf32>
    %89 = tpu.matmul %0, %88, %cst_115 {dimension_numbers = #tpu.dot_dimension_numbers<[1], [0], [0], [1], [0, 0, 1, 1], [], []>} : vector<64x576xbf16>, vector<576x256xbf16>, vector<64x256xf32> -> vector<64x256xf32>
    %c0_116 = arith.constant 0 : index
    %c512_117 = arith.constant 512 : index
    %90 = vector.load %arg3[%c0_116, %c512_117] : memref<64x1792xf32, #tpu.memory_space<vmem>>, vector<64x256xf32>
    tpu.vector_store %arg3[%c0_116, %c512_117], %89 {strides = array<i32>} : memref<64x1792xf32, #tpu.memory_space<vmem>>, vector<64x256xf32>,
    %c0_118 = arith.constant 0 : index
    %c0_119 = arith.constant 0 : index
    %c768 = arith.constant 768 : index
    %91 = vector.load %arg1[%c0_118, %c0_119, %c768] : memref<1x64x1920xbf16, #tpu.memory_space<vmem>>, vector<1x64x256xbf16>
    %92 = vector.shape_cast %91 : vector<1x64x256xbf16> to vector<64x256xbf16>
    %c0_120 = arith.constant 0 : index
    %c0_121 = arith.constant 0 : index
    %93 = vector.load %arg5[%c0_120, %c0_121] : memref<576x256xbf16, #tpu.memory_space<vmem>>, vector<64x256xbf16>
    tpu.vector_store %arg5[%c0_120, %c0_121], %92 {strides = array<i32>} : memref<576x256xbf16, #tpu.memory_space<vmem>>, vector<64x256xbf16>,
    %c0_122 = arith.constant 0 : index
    %c0_123 = arith.constant 0 : index
    %c769 = arith.constant 769 : index
    %94 = vector.load %arg1[%c0_122, %c0_123, %c769] : memref<1x64x1920xbf16, #tpu.memory_space<vmem>>, vector<1x64x256xbf16>
    %95 = vector.shape_cast %94 : vector<1x64x256xbf16> to vector<64x256xbf16>
    %c64_124 = arith.constant 64 : index
    %c0_125 = arith.constant 0 : index
    %96 = vector.load %arg5[%c64_124, %c0_125] : memref<576x256xbf16, #tpu.memory_space<vmem>>, vector<64x256xbf16>
    tpu.vector_store %arg5[%c64_124, %c0_125], %95 {strides = array<i32>} : memref<576x256xbf16, #tpu.memory_space<vmem>>, vector<64x256xbf16>,
    %c0_126 = arith.constant 0 : index
    %c0_127 = arith.constant 0 : index
    %c770 = arith.constant 770 : index
    %97 = vector.load %arg1[%c0_126, %c0_127, %c770] : memref<1x64x1920xbf16, #tpu.memory_space<vmem>>, vector<1x64x256xbf16>
    %98 = vector.shape_cast %97 : vector<1x64x256xbf16> to vector<64x256xbf16>
    %c128_128 = arith.constant 128 : index
    %c0_129 = arith.constant 0 : index
    %99 = vector.load %arg5[%c128_128, %c0_129] : memref<576x256xbf16, #tpu.memory_space<vmem>>, vector<64x256xbf16>
    tpu.vector_store %arg5[%c128_128, %c0_129], %98 {strides = array<i32>} : memref<576x256xbf16, #tpu.memory_space<vmem>>, vector<64x256xbf16>,
    %c0_130 = arith.constant 0 : index
    %c0_131 = arith.constant 0 : index
    %c826 = arith.constant 826 : index
    %100 = vector.load %arg1[%c0_130, %c0_131, %c826] : memref<1x64x1920xbf16, #tpu.memory_space<vmem>>, vector<1x64x256xbf16>
    %101 = vector.shape_cast %100 : vector<1x64x256xbf16> to vector<64x256xbf16>
    %c192_132 = arith.constant 192 : index
    %c0_133 = arith.constant 0 : index
    %102 = vector.load %arg5[%c192_132, %c0_133] : memref<576x256xbf16, #tpu.memory_space<vmem>>, vector<64x256xbf16>
    tpu.vector_store %arg5[%c192_132, %c0_133], %101 {strides = array<i32>} : memref<576x256xbf16, #tpu.memory_space<vmem>>, vector<64x256xbf16>,
    %c0_134 = arith.constant 0 : index
    %c0_135 = arith.constant 0 : index
    %c827 = arith.constant 827 : index
    %103 = vector.load %arg1[%c0_134, %c0_135, %c827] : memref<1x64x1920xbf16, #tpu.memory_space<vmem>>, vector<1x64x256xbf16>
    %104 = vector.shape_cast %103 : vector<1x64x256xbf16> to vector<64x256xbf16>
    %c256_136 = arith.constant 256 : index
    %c0_137 = arith.constant 0 : index
    %105 = vector.load %arg5[%c256_136, %c0_137] : memref<576x256xbf16, #tpu.memory_space<vmem>>, vector<64x256xbf16>
    tpu.vector_store %arg5[%c256_136, %c0_137], %104 {strides = array<i32>} : memref<576x256xbf16, #tpu.memory_space<vmem>>, vector<64x256xbf16>,
    %c0_138 = arith.constant 0 : index
    %c0_139 = arith.constant 0 : index
    %c828 = arith.constant 828 : index
    %106 = vector.load %arg1[%c0_138, %c0_139, %c828] : memref<1x64x1920xbf16, #tpu.memory_space<vmem>>, vector<1x64x256xbf16>
    %107 = vector.shape_cast %106 : vector<1x64x256xbf16> to vector<64x256xbf16>
    %c320_140 = arith.constant 320 : index
    %c0_141 = arith.constant 0 : index
    %108 = vector.load %arg5[%c320_140, %c0_141] : memref<576x256xbf16, #tpu.memory_space<vmem>>, vector<64x256xbf16>
    tpu.vector_store %arg5[%c320_140, %c0_141], %107 {strides = array<i32>} : memref<576x256xbf16, #tpu.memory_space<vmem>>, vector<64x256xbf16>,
    %c0_142 = arith.constant 0 : index
    %c0_143 = arith.constant 0 : index
    %c884 = arith.constant 884 : index
    %109 = vector.load %arg1[%c0_142, %c0_143, %c884] : memref<1x64x1920xbf16, #tpu.memory_space<vmem>>, vector<1x64x256xbf16>
    %110 = vector.shape_cast %109 : vector<1x64x256xbf16> to vector<64x256xbf16>
    %c384_144 = arith.constant 384 : index
    %c0_145 = arith.constant 0 : index
    %111 = vector.load %arg5[%c384_144, %c0_145] : memref<576x256xbf16, #tpu.memory_space<vmem>>, vector<64x256xbf16>
    tpu.vector_store %arg5[%c384_144, %c0_145], %110 {strides = array<i32>} : memref<576x256xbf16, #tpu.memory_space<vmem>>, vector<64x256xbf16>,
    %c0_146 = arith.constant 0 : index
    %c0_147 = arith.constant 0 : index
    %c885 = arith.constant 885 : index
    %112 = vector.load %arg1[%c0_146, %c0_147, %c885] : memref<1x64x1920xbf16, #tpu.memory_space<vmem>>, vector<1x64x256xbf16>
    %113 = vector.shape_cast %112 : vector<1x64x256xbf16> to vector<64x256xbf16>
    %c448_148 = arith.constant 448 : index
    %c0_149 = arith.constant 0 : index
    %114 = vector.load %arg5[%c448_148, %c0_149] : memref<576x256xbf16, #tpu.memory_space<vmem>>, vector<64x256xbf16>
    tpu.vector_store %arg5[%c448_148, %c0_149], %113 {strides = array<i32>} : memref<576x256xbf16, #tpu.memory_space<vmem>>, vector<64x256xbf16>,
    %c0_150 = arith.constant 0 : index
    %c0_151 = arith.constant 0 : index
    %c886 = arith.constant 886 : index
    %115 = vector.load %arg1[%c0_150, %c0_151, %c886] : memref<1x64x1920xbf16, #tpu.memory_space<vmem>>, vector<1x64x256xbf16>
    %116 = vector.shape_cast %115 : vector<1x64x256xbf16> to vector<64x256xbf16>
    %c512_152 = arith.constant 512 : index
    %c0_153 = arith.constant 0 : index
    %117 = vector.load %arg5[%c512_152, %c0_153] : memref<576x256xbf16, #tpu.memory_space<vmem>>, vector<64x256xbf16>
    tpu.vector_store %arg5[%c512_152, %c0_153], %116 {strides = array<i32>} : memref<576x256xbf16, #tpu.memory_space<vmem>>, vector<64x256xbf16>,
    %c0_154 = arith.constant 0 : index
    %c0_155 = arith.constant 0 : index
    %118 = vector.load %arg5[%c0_154, %c0_155] : memref<576x256xbf16, #tpu.memory_space<vmem>>, vector<576x256xbf16>
    %cst_156 = arith.constant dense<0.000000e+00> : vector<64x256xf32>
    %119 = tpu.matmul %0, %118, %cst_156 {dimension_numbers = #tpu.dot_dimension_numbers<[1], [0], [0], [1], [0, 0, 1, 1], [], []>} : vector<64x576xbf16>, vector<576x256xbf16>, vector<64x256xf32> -> vector<64x256xf32>
    %c0_157 = arith.constant 0 : index
    %c768_158 = arith.constant 768 : index
    %120 = vector.load %arg3[%c0_157, %c768_158] : memref<64x1792xf32, #tpu.memory_space<vmem>>, vector<64x256xf32>
    tpu.vector_store %arg3[%c0_157, %c768_158], %119 {strides = array<i32>} : memref<64x1792xf32, #tpu.memory_space<vmem>>, vector<64x256xf32>,
    %c0_159 = arith.constant 0 : index
    %c0_160 = arith.constant 0 : index
    %c1024 = arith.constant 1024 : index
    %121 = vector.load %arg1[%c0_159, %c0_160, %c1024] : memref<1x64x1920xbf16, #tpu.memory_space<vmem>>, vector<1x64x256xbf16>
    %122 = vector.shape_cast %121 : vector<1x64x256xbf16> to vector<64x256xbf16>
    %c0_161 = arith.constant 0 : index
    %c0_162 = arith.constant 0 : index
    %123 = vector.load %arg4[%c0_161, %c0_162] : memref<576x256xbf16, #tpu.memory_space<vmem>>, vector<64x256xbf16>
    tpu.vector_store %arg4[%c0_161, %c0_162], %122 {strides = array<i32>} : memref<576x256xbf16, #tpu.memory_space<vmem>>, vector<64x256xbf16>,
    %c0_163 = arith.constant 0 : index
    %c0_164 = arith.constant 0 : index
    %c1025 = arith.constant 1025 : index
    %124 = vector.load %arg1[%c0_163, %c0_164, %c1025] : memref<1x64x1920xbf16, #tpu.memory_space<vmem>>, vector<1x64x256xbf16>
    %125 = vector.shape_cast %124 : vector<1x64x256xbf16> to vector<64x256xbf16>
    %c64_165 = arith.constant 64 : index
    %c0_166 = arith.constant 0 : index
    %126 = vector.load %arg4[%c64_165, %c0_166] : memref<576x256xbf16, #tpu.memory_space<vmem>>, vector<64x256xbf16>
    tpu.vector_store %arg4[%c64_165, %c0_166], %125 {strides = array<i32>} : memref<576x256xbf16, #tpu.memory_space<vmem>>, vector<64x256xbf16>,
    %c0_167 = arith.constant 0 : index
    %c0_168 = arith.constant 0 : index
    %c1026 = arith.constant 1026 : index
    %127 = vector.load %arg1[%c0_167, %c0_168, %c1026] : memref<1x64x1920xbf16, #tpu.memory_space<vmem>>, vector<1x64x256xbf16>
    %128 = vector.shape_cast %127 : vector<1x64x256xbf16> to vector<64x256xbf16>
    %c128_169 = arith.constant 128 : index
    %c0_170 = arith.constant 0 : index
    %129 = vector.load %arg4[%c128_169, %c0_170] : memref<576x256xbf16, #tpu.memory_space<vmem>>, vector<64x256xbf16>
    tpu.vector_store %arg4[%c128_169, %c0_170], %128 {strides = array<i32>} : memref<576x256xbf16, #tpu.memory_space<vmem>>, vector<64x256xbf16>,
    %c0_171 = arith.constant 0 : index
    %c0_172 = arith.constant 0 : index
    %c1082 = arith.constant 1082 : index
    %130 = vector.load %arg1[%c0_171, %c0_172, %c1082] : memref<1x64x1920xbf16, #tpu.memory_space<vmem>>, vector<1x64x256xbf16>
    %131 = vector.shape_cast %130 : vector<1x64x256xbf16> to vector<64x256xbf16>
    %c192_173 = arith.constant 192 : index
    %c0_174 = arith.constant 0 : index
    %132 = vector.load %arg4[%c192_173, %c0_174] : memref<576x256xbf16, #tpu.memory_space<vmem>>, vector<64x256xbf16>
    tpu.vector_store %arg4[%c192_173, %c0_174], %131 {strides = array<i32>} : memref<576x256xbf16, #tpu.memory_space<vmem>>, vector<64x256xbf16>,
    %c0_175 = arith.constant 0 : index
    %c0_176 = arith.constant 0 : index
    %c1083 = arith.constant 1083 : index
    %133 = vector.load %arg1[%c0_175, %c0_176, %c1083] : memref<1x64x1920xbf16, #tpu.memory_space<vmem>>, vector<1x64x256xbf16>
    %134 = vector.shape_cast %133 : vector<1x64x256xbf16> to vector<64x256xbf16>
    %c256_177 = arith.constant 256 : index
    %c0_178 = arith.constant 0 : index
    %135 = vector.load %arg4[%c256_177, %c0_178] : memref<576x256xbf16, #tpu.memory_space<vmem>>, vector<64x256xbf16>
    tpu.vector_store %arg4[%c256_177, %c0_178], %134 {strides = array<i32>} : memref<576x256xbf16, #tpu.memory_space<vmem>>, vector<64x256xbf16>,
    %c0_179 = arith.constant 0 : index
    %c0_180 = arith.constant 0 : index
    %c1084 = arith.constant 1084 : index
    %136 = vector.load %arg1[%c0_179, %c0_180, %c1084] : memref<1x64x1920xbf16, #tpu.memory_space<vmem>>, vector<1x64x256xbf16>
    %137 = vector.shape_cast %136 : vector<1x64x256xbf16> to vector<64x256xbf16>
    %c320_181 = arith.constant 320 : index
    %c0_182 = arith.constant 0 : index
    %138 = vector.load %arg4[%c320_181, %c0_182] : memref<576x256xbf16, #tpu.memory_space<vmem>>, vector<64x256xbf16>
    tpu.vector_store %arg4[%c320_181, %c0_182], %137 {strides = array<i32>} : memref<576x256xbf16, #tpu.memory_space<vmem>>, vector<64x256xbf16>,
    %c0_183 = arith.constant 0 : index
    %c0_184 = arith.constant 0 : index
    %c1140 = arith.constant 1140 : index
    %139 = vector.load %arg1[%c0_183, %c0_184, %c1140] : memref<1x64x1920xbf16, #tpu.memory_space<vmem>>, vector<1x64x256xbf16>
    %140 = vector.shape_cast %139 : vector<1x64x256xbf16> to vector<64x256xbf16>
    %c384_185 = arith.constant 384 : index
    %c0_186 = arith.constant 0 : index
    %141 = vector.load %arg4[%c384_185, %c0_186] : memref<576x256xbf16, #tpu.memory_space<vmem>>, vector<64x256xbf16>
    tpu.vector_store %arg4[%c384_185, %c0_186], %140 {strides = array<i32>} : memref<576x256xbf16, #tpu.memory_space<vmem>>, vector<64x256xbf16>,
    %c0_187 = arith.constant 0 : index
    %c0_188 = arith.constant 0 : index
    %c1141 = arith.constant 1141 : index
    %142 = vector.load %arg1[%c0_187, %c0_188, %c1141] : memref<1x64x1920xbf16, #tpu.memory_space<vmem>>, vector<1x64x256xbf16>
    %143 = vector.shape_cast %142 : vector<1x64x256xbf16> to vector<64x256xbf16>
    %c448_189 = arith.constant 448 : index
    %c0_190 = arith.constant 0 : index
    %144 = vector.load %arg4[%c448_189, %c0_190] : memref<576x256xbf16, #tpu.memory_space<vmem>>, vector<64x256xbf16>
    tpu.vector_store %arg4[%c448_189, %c0_190], %143 {strides = array<i32>} : memref<576x256xbf16, #tpu.memory_space<vmem>>, vector<64x256xbf16>,
    %c0_191 = arith.constant 0 : index
    %c0_192 = arith.constant 0 : index
    %c1142 = arith.constant 1142 : index
    %145 = vector.load %arg1[%c0_191, %c0_192, %c1142] : memref<1x64x1920xbf16, #tpu.memory_space<vmem>>, vector<1x64x256xbf16>
    %146 = vector.shape_cast %145 : vector<1x64x256xbf16> to vector<64x256xbf16>
    %c512_193 = arith.constant 512 : index
    %c0_194 = arith.constant 0 : index
    %147 = vector.load %arg4[%c512_193, %c0_194] : memref<576x256xbf16, #tpu.memory_space<vmem>>, vector<64x256xbf16>
    tpu.vector_store %arg4[%c512_193, %c0_194], %146 {strides = array<i32>} : memref<576x256xbf16, #tpu.memory_space<vmem>>, vector<64x256xbf16>,
    %c0_195 = arith.constant 0 : index
    %c0_196 = arith.constant 0 : index
    %148 = vector.load %arg4[%c0_195, %c0_196] : memref<576x256xbf16, #tpu.memory_space<vmem>>, vector<576x256xbf16>
    %cst_197 = arith.constant dense<0.000000e+00> : vector<64x256xf32>
    %149 = tpu.matmul %0, %148, %cst_197 {dimension_numbers = #tpu.dot_dimension_numbers<[1], [0], [0], [1], [0, 0, 1, 1], [], []>} : vector<64x576xbf16>, vector<576x256xbf16>, vector<64x256xf32> -> vector<64x256xf32>
    %c0_198 = arith.constant 0 : index
    %c1024_199 = arith.constant 1024 : index
    %150 = vector.load %arg3[%c0_198, %c1024_199] : memref<64x1792xf32, #tpu.memory_space<vmem>>, vector<64x256xf32>
    tpu.vector_store %arg3[%c0_198, %c1024_199], %149 {strides = array<i32>} : memref<64x1792xf32, #tpu.memory_space<vmem>>, vector<64x256xf32>,
    %c0_200 = arith.constant 0 : index
    %c0_201 = arith.constant 0 : index
    %c1280 = arith.constant 1280 : index
    %151 = vector.load %arg1[%c0_200, %c0_201, %c1280] : memref<1x64x1920xbf16, #tpu.memory_space<vmem>>, vector<1x64x256xbf16>
    %152 = vector.shape_cast %151 : vector<1x64x256xbf16> to vector<64x256xbf16>
    %c0_202 = arith.constant 0 : index
    %c0_203 = arith.constant 0 : index
    %153 = vector.load %arg5[%c0_202, %c0_203] : memref<576x256xbf16, #tpu.memory_space<vmem>>, vector<64x256xbf16>
    tpu.vector_store %arg5[%c0_202, %c0_203], %152 {strides = array<i32>} : memref<576x256xbf16, #tpu.memory_space<vmem>>, vector<64x256xbf16>,
    %c0_204 = arith.constant 0 : index
    %c0_205 = arith.constant 0 : index
    %c1281 = arith.constant 1281 : index
    %154 = vector.load %arg1[%c0_204, %c0_205, %c1281] : memref<1x64x1920xbf16, #tpu.memory_space<vmem>>, vector<1x64x256xbf16>
    %155 = vector.shape_cast %154 : vector<1x64x256xbf16> to vector<64x256xbf16>
    %c64_206 = arith.constant 64 : index
    %c0_207 = arith.constant 0 : index
    %156 = vector.load %arg5[%c64_206, %c0_207] : memref<576x256xbf16, #tpu.memory_space<vmem>>, vector<64x256xbf16>
    tpu.vector_store %arg5[%c64_206, %c0_207], %155 {strides = array<i32>} : memref<576x256xbf16, #tpu.memory_space<vmem>>, vector<64x256xbf16>,
    %c0_208 = arith.constant 0 : index
    %c0_209 = arith.constant 0 : index
    %c1282 = arith.constant 1282 : index
    %157 = vector.load %arg1[%c0_208, %c0_209, %c1282] : memref<1x64x1920xbf16, #tpu.memory_space<vmem>>, vector<1x64x256xbf16>
    %158 = vector.shape_cast %157 : vector<1x64x256xbf16> to vector<64x256xbf16>
    %c128_210 = arith.constant 128 : index
    %c0_211 = arith.constant 0 : index
    %159 = vector.load %arg5[%c128_210, %c0_211] : memref<576x256xbf16, #tpu.memory_space<vmem>>, vector<64x256xbf16>
    tpu.vector_store %arg5[%c128_210, %c0_211], %158 {strides = array<i32>} : memref<576x256xbf16, #tpu.memory_space<vmem>>, vector<64x256xbf16>,
    %c0_212 = arith.constant 0 : index
    %c0_213 = arith.constant 0 : index
    %c1338 = arith.constant 1338 : index
    %160 = vector.load %arg1[%c0_212, %c0_213, %c1338] : memref<1x64x1920xbf16, #tpu.memory_space<vmem>>, vector<1x64x256xbf16>
    %161 = vector.shape_cast %160 : vector<1x64x256xbf16> to vector<64x256xbf16>
    %c192_214 = arith.constant 192 : index
    %c0_215 = arith.constant 0 : index
    %162 = vector.load %arg5[%c192_214, %c0_215] : memref<576x256xbf16, #tpu.memory_space<vmem>>, vector<64x256xbf16>
    tpu.vector_store %arg5[%c192_214, %c0_215], %161 {strides = array<i32>} : memref<576x256xbf16, #tpu.memory_space<vmem>>, vector<64x256xbf16>,
    %c0_216 = arith.constant 0 : index
    %c0_217 = arith.constant 0 : index
    %c1339 = arith.constant 1339 : index
    %163 = vector.load %arg1[%c0_216, %c0_217, %c1339] : memref<1x64x1920xbf16, #tpu.memory_space<vmem>>, vector<1x64x256xbf16>
    %164 = vector.shape_cast %163 : vector<1x64x256xbf16> to vector<64x256xbf16>
    %c256_218 = arith.constant 256 : index
    %c0_219 = arith.constant 0 : index
    %165 = vector.load %arg5[%c256_218, %c0_219] : memref<576x256xbf16, #tpu.memory_space<vmem>>, vector<64x256xbf16>
    tpu.vector_store %arg5[%c256_218, %c0_219], %164 {strides = array<i32>} : memref<576x256xbf16, #tpu.memory_space<vmem>>, vector<64x256xbf16>,
    %c0_220 = arith.constant 0 : index
    %c0_221 = arith.constant 0 : index
    %c1340 = arith.constant 1340 : index
    %166 = vector.load %arg1[%c0_220, %c0_221, %c1340] : memref<1x64x1920xbf16, #tpu.memory_space<vmem>>, vector<1x64x256xbf16>
    %167 = vector.shape_cast %166 : vector<1x64x256xbf16> to vector<64x256xbf16>
    %c320_222 = arith.constant 320 : index
    %c0_223 = arith.constant 0 : index
    %168 = vector.load %arg5[%c320_222, %c0_223] : memref<576x256xbf16, #tpu.memory_space<vmem>>, vector<64x256xbf16>
    tpu.vector_store %arg5[%c320_222, %c0_223], %167 {strides = array<i32>} : memref<576x256xbf16, #tpu.memory_space<vmem>>, vector<64x256xbf16>,
    %c0_224 = arith.constant 0 : index
    %c0_225 = arith.constant 0 : index
    %c1396 = arith.constant 1396 : index
    %169 = vector.load %arg1[%c0_224, %c0_225, %c1396] : memref<1x64x1920xbf16, #tpu.memory_space<vmem>>, vector<1x64x256xbf16>
    %170 = vector.shape_cast %169 : vector<1x64x256xbf16> to vector<64x256xbf16>
    %c384_226 = arith.constant 384 : index
    %c0_227 = arith.constant 0 : index
    %171 = vector.load %arg5[%c384_226, %c0_227] : memref<576x256xbf16, #tpu.memory_space<vmem>>, vector<64x256xbf16>
    tpu.vector_store %arg5[%c384_226, %c0_227], %170 {strides = array<i32>} : memref<576x256xbf16, #tpu.memory_space<vmem>>, vector<64x256xbf16>,
    %c0_228 = arith.constant 0 : index
    %c0_229 = arith.constant 0 : index
    %c1397 = arith.constant 1397 : index
    %172 = vector.load %arg1[%c0_228, %c0_229, %c1397] : memref<1x64x1920xbf16, #tpu.memory_space<vmem>>, vector<1x64x256xbf16>
    %173 = vector.shape_cast %172 : vector<1x64x256xbf16> to vector<64x256xbf16>
    %c448_230 = arith.constant 448 : index
    %c0_231 = arith.constant 0 : index
    %174 = vector.load %arg5[%c448_230, %c0_231] : memref<576x256xbf16, #tpu.memory_space<vmem>>, vector<64x256xbf16>
    tpu.vector_store %arg5[%c448_230, %c0_231], %173 {strides = array<i32>} : memref<576x256xbf16, #tpu.memory_space<vmem>>, vector<64x256xbf16>,
    %c0_232 = arith.constant 0 : index
    %c0_233 = arith.constant 0 : index
    %c1398 = arith.constant 1398 : index
    %175 = vector.load %arg1[%c0_232, %c0_233, %c1398] : memref<1x64x1920xbf16, #tpu.memory_space<vmem>>, vector<1x64x256xbf16>
    %176 = vector.shape_cast %175 : vector<1x64x256xbf16> to vector<64x256xbf16>
    %c512_234 = arith.constant 512 : index
    %c0_235 = arith.constant 0 : index
    %177 = vector.load %arg5[%c512_234, %c0_235] : memref<576x256xbf16, #tpu.memory_space<vmem>>, vector<64x256xbf16>
    tpu.vector_store %arg5[%c512_234, %c0_235], %176 {strides = array<i32>} : memref<576x256xbf16, #tpu.memory_space<vmem>>, vector<64x256xbf16>,
    %c0_236 = arith.constant 0 : index
    %c0_237 = arith.constant 0 : index
    %178 = vector.load %arg5[%c0_236, %c0_237] : memref<576x256xbf16, #tpu.memory_space<vmem>>, vector<576x256xbf16>
    %cst_238 = arith.constant dense<0.000000e+00> : vector<64x256xf32>
    %179 = tpu.matmul %0, %178, %cst_238 {dimension_numbers = #tpu.dot_dimension_numbers<[1], [0], [0], [1], [0, 0, 1, 1], [], []>} : vector<64x576xbf16>, vector<576x256xbf16>, vector<64x256xf32> -> vector<64x256xf32>
    %c0_239 = arith.constant 0 : index
    %c1280_240 = arith.constant 1280 : index
    %180 = vector.load %arg3[%c0_239, %c1280_240] : memref<64x1792xf32, #tpu.memory_space<vmem>>, vector<64x256xf32>
    tpu.vector_store %arg3[%c0_239, %c1280_240], %179 {strides = array<i32>} : memref<64x1792xf32, #tpu.memory_space<vmem>>, vector<64x256xf32>,
    %c0_241 = arith.constant 0 : index
    %c0_242 = arith.constant 0 : index
    %c1536 = arith.constant 1536 : index
    %181 = vector.load %arg1[%c0_241, %c0_242, %c1536] : memref<1x64x1920xbf16, #tpu.memory_space<vmem>>, vector<1x64x256xbf16>
    %182 = vector.shape_cast %181 : vector<1x64x256xbf16> to vector<64x256xbf16>
    %c0_243 = arith.constant 0 : index
    %c0_244 = arith.constant 0 : index
    %183 = vector.load %arg4[%c0_243, %c0_244] : memref<576x256xbf16, #tpu.memory_space<vmem>>, vector<64x256xbf16>
    tpu.vector_store %arg4[%c0_243, %c0_244], %182 {strides = array<i32>} : memref<576x256xbf16, #tpu.memory_space<vmem>>, vector<64x256xbf16>,
    %c0_245 = arith.constant 0 : index
    %c0_246 = arith.constant 0 : index
    %c1537 = arith.constant 1537 : index
    %184 = vector.load %arg1[%c0_245, %c0_246, %c1537] : memref<1x64x1920xbf16, #tpu.memory_space<vmem>>, vector<1x64x256xbf16>
    %185 = vector.shape_cast %184 : vector<1x64x256xbf16> to vector<64x256xbf16>
    %c64_247 = arith.constant 64 : index
    %c0_248 = arith.constant 0 : index
    %186 = vector.load %arg4[%c64_247, %c0_248] : memref<576x256xbf16, #tpu.memory_space<vmem>>, vector<64x256xbf16>
    tpu.vector_store %arg4[%c64_247, %c0_248], %185 {strides = array<i32>} : memref<576x256xbf16, #tpu.memory_space<vmem>>, vector<64x256xbf16>,
    %c0_249 = arith.constant 0 : index
    %c0_250 = arith.constant 0 : index
    %c1538 = arith.constant 1538 : index
    %187 = vector.load %arg1[%c0_249, %c0_250, %c1538] : memref<1x64x1920xbf16, #tpu.memory_space<vmem>>, vector<1x64x256xbf16>
    %188 = vector.shape_cast %187 : vector<1x64x256xbf16> to vector<64x256xbf16>
    %c128_251 = arith.constant 128 : index
    %c0_252 = arith.constant 0 : index
    %189 = vector.load %arg4[%c128_251, %c0_252] : memref<576x256xbf16, #tpu.memory_space<vmem>>, vector<64x256xbf16>
    tpu.vector_store %arg4[%c128_251, %c0_252], %188 {strides = array<i32>} : memref<576x256xbf16, #tpu.memory_space<vmem>>, vector<64x256xbf16>,
    %c0_253 = arith.constant 0 : index
    %c0_254 = arith.constant 0 : index
    %c1594 = arith.constant 1594 : index
    %190 = vector.load %arg1[%c0_253, %c0_254, %c1594] : memref<1x64x1920xbf16, #tpu.memory_space<vmem>>, vector<1x64x256xbf16>
    %191 = vector.shape_cast %190 : vector<1x64x256xbf16> to vector<64x256xbf16>
    %c192_255 = arith.constant 192 : index
    %c0_256 = arith.constant 0 : index
    %192 = vector.load %arg4[%c192_255, %c0_256] : memref<576x256xbf16, #tpu.memory_space<vmem>>, vector<64x256xbf16>
    tpu.vector_store %arg4[%c192_255, %c0_256], %191 {strides = array<i32>} : memref<576x256xbf16, #tpu.memory_space<vmem>>, vector<64x256xbf16>,
    %c0_257 = arith.constant 0 : index
    %c0_258 = arith.constant 0 : index
    %c1595 = arith.constant 1595 : index
    %193 = vector.load %arg1[%c0_257, %c0_258, %c1595] : memref<1x64x1920xbf16, #tpu.memory_space<vmem>>, vector<1x64x256xbf16>
    %194 = vector.shape_cast %193 : vector<1x64x256xbf16> to vector<64x256xbf16>
    %c256_259 = arith.constant 256 : index
    %c0_260 = arith.constant 0 : index
    %195 = vector.load %arg4[%c256_259, %c0_260] : memref<576x256xbf16, #tpu.memory_space<vmem>>, vector<64x256xbf16>
    tpu.vector_store %arg4[%c256_259, %c0_260], %194 {strides = array<i32>} : memref<576x256xbf16, #tpu.memory_space<vmem>>, vector<64x256xbf16>,
    %c0_261 = arith.constant 0 : index
    %c0_262 = arith.constant 0 : index
    %c1596 = arith.constant 1596 : index
    %196 = vector.load %arg1[%c0_261, %c0_262, %c1596] : memref<1x64x1920xbf16, #tpu.memory_space<vmem>>, vector<1x64x256xbf16>
    %197 = vector.shape_cast %196 : vector<1x64x256xbf16> to vector<64x256xbf16>
    %c320_263 = arith.constant 320 : index
    %c0_264 = arith.constant 0 : index
    %198 = vector.load %arg4[%c320_263, %c0_264] : memref<576x256xbf16, #tpu.memory_space<vmem>>, vector<64x256xbf16>
    tpu.vector_store %arg4[%c320_263, %c0_264], %197 {strides = array<i32>} : memref<576x256xbf16, #tpu.memory_space<vmem>>, vector<64x256xbf16>,
    %c0_265 = arith.constant 0 : index
    %c0_266 = arith.constant 0 : index
    %c1652 = arith.constant 1652 : index
    %199 = vector.load %arg1[%c0_265, %c0_266, %c1652] : memref<1x64x1920xbf16, #tpu.memory_space<vmem>>, vector<1x64x256xbf16>
    %200 = vector.shape_cast %199 : vector<1x64x256xbf16> to vector<64x256xbf16>
    %c384_267 = arith.constant 384 : index
    %c0_268 = arith.constant 0 : index
    %201 = vector.load %arg4[%c384_267, %c0_268] : memref<576x256xbf16, #tpu.memory_space<vmem>>, vector<64x256xbf16>
    tpu.vector_store %arg4[%c384_267, %c0_268], %200 {strides = array<i32>} : memref<576x256xbf16, #tpu.memory_space<vmem>>, vector<64x256xbf16>,
    %c0_269 = arith.constant 0 : index
    %c0_270 = arith.constant 0 : index
    %c1653 = arith.constant 1653 : index
    %202 = vector.load %arg1[%c0_269, %c0_270, %c1653] : memref<1x64x1920xbf16, #tpu.memory_space<vmem>>, vector<1x64x256xbf16>
    %203 = vector.shape_cast %202 : vector<1x64x256xbf16> to vector<64x256xbf16>
    %c448_271 = arith.constant 448 : index
    %c0_272 = arith.constant 0 : index
    %204 = vector.load %arg4[%c448_271, %c0_272] : memref<576x256xbf16, #tpu.memory_space<vmem>>, vector<64x256xbf16>
    tpu.vector_store %arg4[%c448_271, %c0_272], %203 {strides = array<i32>} : memref<576x256xbf16, #tpu.memory_space<vmem>>, vector<64x256xbf16>,
    %c0_273 = arith.constant 0 : index
    %c0_274 = arith.constant 0 : index
    %c1654 = arith.constant 1654 : index
    %205 = vector.load %arg1[%c0_273, %c0_274, %c1654] : memref<1x64x1920xbf16, #tpu.memory_space<vmem>>, vector<1x64x256xbf16>
    %206 = vector.shape_cast %205 : vector<1x64x256xbf16> to vector<64x256xbf16>
    %c512_275 = arith.constant 512 : index
    %c0_276 = arith.constant 0 : index
    %207 = vector.load %arg4[%c512_275, %c0_276] : memref<576x256xbf16, #tpu.memory_space<vmem>>, vector<64x256xbf16>
    tpu.vector_store %arg4[%c512_275, %c0_276], %206 {strides = array<i32>} : memref<576x256xbf16, #tpu.memory_space<vmem>>, vector<64x256xbf16>,
    %c0_277 = arith.constant 0 : index
    %c0_278 = arith.constant 0 : index
    %208 = vector.load %arg4[%c0_277, %c0_278] : memref<576x256xbf16, #tpu.memory_space<vmem>>, vector<576x256xbf16>
    %cst_279 = arith.constant dense<0.000000e+00> : vector<64x256xf32>
    %209 = tpu.matmul %0, %208, %cst_279 {dimension_numbers = #tpu.dot_dimension_numbers<[1], [0], [0], [1], [0, 0, 1, 1], [], []>} : vector<64x576xbf16>, vector<576x256xbf16>, vector<64x256xf32> -> vector<64x256xf32>
    %c0_280 = arith.constant 0 : index
    %c1536_281 = arith.constant 1536 : index
    %210 = vector.load %arg3[%c0_280, %c1536_281] : memref<64x1792xf32, #tpu.memory_space<vmem>>, vector<64x256xf32>
    tpu.vector_store %arg3[%c0_280, %c1536_281], %209 {strides = array<i32>} : memref<64x1792xf32, #tpu.memory_space<vmem>>, vector<64x256xf32>,
    return
  }
  func.func @transform_0(%arg0: i32) -> (i32, i32, i32) {
    %c0_i32 = arith.constant 0 : i32
    %c0_i32_0 = arith.constant 0 : i32
    %c0_i32_1 = arith.constant 0 : i32
    return %arg0, %c0_i32, %c0_i32_0 : i32, i32, i32
  }
  func.func @transform_1(%arg0: i32) -> (i32, i32) {
    %c0_i32 = arith.constant 0 : i32
    %c0_i32_0 = arith.constant 0 : i32
    %c0_i32_1 = arith.constant 0 : i32
    return %c0_i32, %c0_i32_0 : i32, i32
  }
  func.func @transform_2(%arg0: i32) -> (i32, i32) {
    %c0_i32 = arith.constant 0 : i32
    %c0_i32_0 = arith.constant 0 : i32
    return %c0_i32, %arg0 : i32, i32
  }
}

</mosaic_0001>

<bundles_post_ra>
// kernel: kernel_generated_0_forward.1
= control target key start
LH: loop header
LB: loop body
LE: loop exit
PB: predicated region body
PF: predicated region fallthrough
CT: control target
= control target key end

     0   :  { %s11210_s9 = smov 0   ;;  %s11212_s10 = smov 0   ;;  %s14190_s0 = inlined_call_operand.vmem [shape: bf16[2,64,1920], index: 0, kind: input, shape index: {}]   ;;  %s14191_s1 = inlined_call_operand.vmem [shape: bf16[64,576], index: 1, kind: input, shape index: {}]   ;;  %s14192_s2 = inlined_call_operand.vmem [shape: f32[64,3584], index: 2, kind: output, shape index: {}]  }
   0x1   :  { %s11214_s11 = smov 0  }
   0x2 LB: > { %s11223_s12 = sadd.s32 4294967295, %s11184_s11   ;;  %s11225_s13 = sadd.s32 1, %s11184_s11   ;;  %s11184_s11 = sphi %s11214_s11, %s14196_s11   ;;  %s11180_s10 = sphi %s11212_s10, %s14195_s10   ;;  %s11176_s9 = sphi %s11210_s9, %s14194_s9  }
   0x3   : > { %s63_s14 = ssub.s32 %s11184_s11, %s11225_s13  ;;  %s66_s15 = sadd.s32 1, %s11180_s10 }
   0x4   : > { %p64_p0 = scmp.eq.s32.totalorder %s63_s14, 0  ;;  %p76_p1 = scmp.ne.s32.totalorder %s11180_s10, %s11176_s9 }
   0x5   : > { %p77_p2 = scmp.eq.s32.totalorder %s11223_s12, 1  ;;  %p9625_p3 = scmp.ge.s32.totalorder %s11184_s11, 1 }
   0x6   : > { %s11233_s16 = scalar_select %p64_p0, %s11180_s10, %s66_s15  }
   0x7   : > { %p11235_p4 = por %p77_p2, %p76_p1  ;;  %p112_p5 = scmp.lt.s32.totalorder %s11184_s11, 3 }
   0x9   : > { %p113_p6 = pnand %p9625_p3, %p112_p5 }
   0xa   : > { %p133_p7 = scmp.lt.s32.totalorder (!%p113_p6), %s11223_s12, 1  ;;  %s11186_s23 = smov (!%p113_p6), 127   ;;  %vm312_vm0 = vcmask (!%p113_p6), 1039360   ;;  %vm429_vm1 = vcmask (!%p113_p6), 1031168   ;;  %vm546_vm2 = vcmask (!%p113_p6), 572416   ;;  %vm663_vm3 = vcmask (!%p113_p6), 564224  }
   0xb   : > { %116 = sbr.rel (%p113_p6) target bundleno = 1741 (0x6cd), region = 28  ;;  %s11187_s24 = smov (!%p113_p6), 126   ;;  %vm780_vm4 = vcmask (!%p113_p6), 556032   ;;  %vm897_vm5 = vcmask (!%p113_p6), 97280   ;;  %vm1014_vm6 = vcmask (!%p113_p6), 89088   ;;  %vm1131_vm7 = vcmask (!%p113_p6), 80896  }
   0xc   : > { %s11188_s25 = smov (!%p113_p6), 70   ;;  %s11189_s26 = smov (!%p113_p6), 69   ;;  %vm1328_vm8 = vcmask (!%p113_p6), 523264  }
   0xd   : > { %s11190_s27 = smov (!%p113_p6), 68   ;;  %s11191_s28 = smov (!%p113_p6), 12  }
   0xe   : > { %s11192_s29 = smov (!%p113_p6), 11   ;;  %s11193_s6 = smov (!%p113_p6), 10  }
   0xf   : > { %s130_s14 = sand.u32 (!%p113_p6), 1, %s11176_s9  }
  0x10   : > { %s10639_s15 = smul.u32 (!%p113_p6), 896, %s130_s14 }
  0x12   : > { %s134_s18 = scalar_select %p133_p7, %s11223_s12, 1 }
  0x13   : > { %s13125_s9 = scalar_lea.vmem [#allocation4], %s10639_s15 }
  0x14   : > { %s10640_s19 = smul.u32 480, %s134_s18 }
  0x16   : > { %s11244_s22 = scalar_lea.vmem %s14190_s0, %s10640_s19 }
  0x17   : > { %v10674_v0 = vld [vmem:[%s11244_s22 + $0x8] ss:$60 sps:$4 sm:$0xff]   ;;  %v11248_v1 = vld [vmem:[%s11244_s22] ss:$60 sps:$4 sm:$0xff]   ;;  %v11257_v3 = vld [vmem:[%s11244_s22 + $0x78] ss:$60 sps:$4 sm:$0xff]  }
  0x18   : > { %292 = vrot.lane.b32.xlu1 %v10674_v0, %s11186_s23  ;;  %v11252_v2 = vld [vmem:[%s11244_s22 + $0x4] ss:$60 sps:$4 sm:$0xff]   ;;  %288 = vrot.lane.b32.xlu0 %v11248_v1, %s11186_s23  ;;  %v11260_v4 = vld [vmem:[%s11244_s22 + $0x7c] ss:$60 sps:$4 sm:$0xff]  }
  0x19   : > { %1341 = vmatprep.subr.bf16.mxu1 %v11252_v2  ;;  %v10680_v5 = vld [vmem:[%s11244_s22 + $0x80] ss:$60 sps:$4 sm:$0xff]   ;;  %v11271_v6 = vld [vmem:[%s11244_s22 + $0xf4] ss:$60 sps:$4 sm:$0xff]   ;;  %v11282_v8 = vld [vmem:[%s11244_s22 + $0x16c] ss:$60 sps:$4 sm:$0xff]  }
  0x1a   : > { %1342 = vmatpush1.bf16.msra.mxu1 %v11248_v1  ;;  %v11279_v7 = vld [vmem:[%s11244_s22 + $0xf0] ss:$60 sps:$4 sm:$0xff]   ;;  %v11288_v9 = vld [vmem:[%s11244_s22 + $0x168] ss:$60 sps:$4 sm:$0xff]   ;;  %v10687_v10 = vld [vmem:[%s11244_s22 + $0xf8] ss:$60 sps:$4 sm:$0xff]  }
  0x1b   : > { %1343 = vmatprep.subr.bf16.mxu1 %v11260_v4  ;;  %v10688_v11 = vld [vmem:[%s11244_s22 + $0x170] ss:$60 sps:$4 sm:$0xff]   ;;  %v10690_v12 = vld [vmem:[%s11244_s22 + $0x8] ss:$60 sps:$4 sm:$0xff]   ;;  %v10691_v13 = vld [vmem:[%s11244_s22 + $0x80] ss:$60 sps:$4 sm:$0xff]  }
  0x1c   : > { %294 = vrot.lane.b32.xlu1 %v11257_v3, %s11186_s23  ;;  %290 = vrot.lane.b32.xlu0 %v11252_v2, %s11186_s23  ;;  %v10692_v14 = vld [vmem:[%s11244_s22 + $0xf8] ss:$60 sps:$4 sm:$0xff]   ;;  %v10693_v15 = vld [vmem:[%s11244_s22 + $0x170] ss:$60 sps:$4 sm:$0xff]  }
  0x1d   : > { %v10694_v16 = vld [vmem:[%s11244_s22 + $0x8] ss:$60 sps:$4 sm:$0xff]   ;;  %v10695_v17 = vld [vmem:[%s11244_s22 + $0x80] ss:$60 sps:$4 sm:$0xff]   ;;  %v10696_v18 = vld [vmem:[%s11244_s22 + $0xf8] ss:$60 sps:$4 sm:$0xff]  }
  0x1e   : > { %1344 = vmatpush1.bf16.msra.mxu1 %v11257_v3  ;;  %v10697_v19 = vld [vmem:[%s11244_s22 + $0x170] ss:$60 sps:$4 sm:$0xff]   ;;  %v10698_v20 = vld [vmem:[%s11244_s22 + $0x8] ss:$60 sps:$4 sm:$0xff]   ;;  %v10699_v21 = vld [vmem:[%s11244_s22 + $0x80] ss:$60 sps:$4 sm:$0xff]  }
  0x1f   : > { %1345 = vmatprep.subr.bf16.mxu1 %v11271_v6  ;;  %v10700_v22 = vld [vmem:[%s11244_s22 + $0xf8] ss:$60 sps:$4 sm:$0xff]   ;;  %v10701_v23 = vld [vmem:[%s11244_s22 + $0x170] ss:$60 sps:$4 sm:$0xff]   ;;  %v10702_v24 = vld [vmem:[%s11244_s22 + $0x8] ss:$60 sps:$4 sm:$0xff]  }
  0x20   : > { %298 = vrot.lane.b32.xlu1 %v10680_v5, %s11186_s23  ;;  %296 = vrot.lane.b32.xlu0 %v11260_v4, %s11186_s23  ;;  %v10703_v25 = vld [vmem:[%s11244_s22 + $0x80] ss:$60 sps:$4 sm:$0xff]   ;;  %v10704_v26 = vld [vmem:[%s11244_s22 + $0xf8] ss:$60 sps:$4 sm:$0xff]  }
  0x21   : > { %v10705_v27 = vld [vmem:[%s11244_s22 + $0x170] ss:$60 sps:$4 sm:$0xff]   ;;  %v10706_v32 = vld [vmem:[%s11244_s22 + $0x8] ss:$60 sps:$4 sm:$0xff]   ;;  %v10707_v36 = vld [vmem:[%s11244_s22 + $0x80] ss:$60 sps:$4 sm:$0xff]  }
  0x22   : > { %1346 = vmatpush1.bf16.msra.mxu1 %v11279_v7  ;;  %v10708_v44 = vld [vmem:[%s11244_s22 + $0xf8] ss:$60 sps:$4 sm:$0xff]   ;;  %v10709_v48 = vld [vmem:[%s11244_s22 + $0x170] ss:$60 sps:$4 sm:$0xff]   ;;  %v10710_v56 = vld [vmem:[%s11244_s22 + $0x8] ss:$60 sps:$4 sm:$0xff]  }
  0x23   : > { %1347 = vmatprep.subr.bf16.mxu1 %v11282_v8  ;;  %v11094_v57 = vld [vmem:[%s11244_s22 + $0x4] ss:$60 sps:$4 sm:$0xff]   ;;  %v11096_v0 = vld [vmem:[%s11244_s22 + $0x78] ss:$60 sps:$4 sm:$0xff]  }
  0x24   : > { %302 = vrot.lane.b32.xlu1 %v11271_v6, %s11186_s23  ;;  %300 = vrot.lane.b32.xlu0 %v11279_v7, %s11186_s23  ;;  %v11095_v59 = vld [vmem:[%s11244_s22] ss:$60 sps:$4 sm:$0xff]  }
  0x25   : > { %v10711_v62 = vld [vmem:[%s11244_s22 + $0x80] ss:$60 sps:$4 sm:$0xff]  }
  0x26   : > { %1348 = vmatpush1.bf16.msra.mxu1 %v11288_v9  ;;  %v11097_v5 = vld [vmem:[%s11244_s22 + $0x7c] ss:$60 sps:$4 sm:$0xff]  }
  0x28   : > { %306 = vrot.lane.b32.xlu1 %v11288_v9, %s11186_s23  ;;  %304 = vrot.lane.b32.xlu0 %v10687_v10, %s11186_s23 }
  0x2c   : > { %310 = vrot.lane.b32.xlu1 %v10688_v11, %s11186_s23  ;;  %308 = vrot.lane.b32.xlu0 %v11282_v8, %s11186_s23  ;;  %v11099_v11 = vld [vmem:[%s11244_s22 + $0xf0] ss:$60 sps:$4 sm:$0xff]  }
  0x30   : > { %407 = vrot.lane.b32.xlu1 %v11252_v2, %s11187_s24  ;;  %405 = vrot.lane.b32.xlu0 %v11248_v1, %s11187_s24 }
  0x34   : > { %411 = vrot.lane.b32.xlu1 %v11257_v3, %s11187_s24  ;;  %409 = vrot.lane.b32.xlu0 %v10690_v12, %s11187_s24 }
  0x38   : > { %415 = vrot.lane.b32.xlu1 %v10691_v13, %s11187_s24  ;;  %413 = vrot.lane.b32.xlu0 %v11260_v4, %s11187_s24 }
  0x3c   : > { %419 = vrot.lane.b32.xlu1 %v11271_v6, %s11187_s24  ;;  %417 = vrot.lane.b32.xlu0 %v11279_v7, %s11187_s24 }
  0x40   : > { %423 = vrot.lane.b32.xlu1 %v11288_v9, %s11187_s24  ;;  %421 = vrot.lane.b32.xlu0 %v10692_v14, %s11187_s24 }
  0x44   : > { %427 = vrot.lane.b32.xlu1 %v10693_v15, %s11187_s24  ;;  %425 = vrot.lane.b32.xlu0 %v11282_v8, %s11187_s24  ;;  %v10746_v15 = vld [vmem:[%s14191_s1 + $0xc] ss:$20 sps:$4 sm:$0xff]  }
  0x45   : > { %1446 = vmatprep.mubr.bf16.mxu0 %v10746_v15 }
  0x48   : > { %524 = vrot.lane.b32.xlu1 %v11252_v2, %s11188_s25  ;;  %522 = vrot.lane.b32.xlu0 %v11248_v1, %s11188_s25 }
  0x4c   : > { %528 = vrot.lane.b32.xlu1 %v11257_v3, %s11188_s25  ;;  %526 = vrot.lane.b32.xlu0 %v10694_v16, %s11188_s25  ;;  %v11100_v16 = vld [vmem:[%s11244_s22 + $0x168] ss:$60 sps:$4 sm:$0xff]  }
  0x50   : > { %532 = vrot.lane.b32.xlu1 %v10695_v17, %s11188_s25  ;;  %530 = vrot.lane.b32.xlu0 %v11260_v4, %s11188_s25 }
  0x54   : > { %536 = vrot.lane.b32.xlu1 %v11271_v6, %s11188_s25  ;;  %534 = vrot.lane.b32.xlu0 %v11279_v7, %s11188_s25 }
  0x58   : > { %540 = vrot.lane.b32.xlu1 %v11288_v9, %s11188_s25  ;;  %538 = vrot.lane.b32.xlu0 %v10696_v18, %s11188_s25 }
  0x5c   : > { %544 = vrot.lane.b32.xlu1 %v10697_v19, %s11188_s25  ;;  %542 = vrot.lane.b32.xlu0 %v11282_v8, %s11188_s25  ;;  %v10713_v19 = vld [vmem:[%s11244_s22 + $0x170] ss:$60 sps:$4 sm:$0xff]  }
  0x60   : > { %641 = vrot.lane.b32.xlu1 %v11252_v2, %s11189_s26  ;;  %639 = vrot.lane.b32.xlu0 %v11248_v1, %s11189_s26 }
  0x64   : > { %645 = vrot.lane.b32.xlu1 %v11257_v3, %s11189_s26  ;;  %643 = vrot.lane.b32.xlu0 %v10698_v20, %s11189_s26 }
  0x68   : > { %649 = vrot.lane.b32.xlu1 %v10699_v21, %s11189_s26  ;;  %647 = vrot.lane.b32.xlu0 %v11260_v4, %s11189_s26 }
  0x6c   : > { %653 = vrot.lane.b32.xlu1 %v11271_v6, %s11189_s26  ;;  %651 = vrot.lane.b32.xlu0 %v11279_v7, %s11189_s26 }
  0x70   : > { %657 = vrot.lane.b32.xlu1 %v11288_v9, %s11189_s26  ;;  %655 = vrot.lane.b32.xlu0 %v10700_v22, %s11189_s26  ;;  %v11101_v22 = vld [vmem:[%s11244_s22 + $0x16c] ss:$60 sps:$4 sm:$0xff]  }
  0x74   : > { %661 = vrot.lane.b32.xlu1 %v10701_v23, %s11189_s26  ;;  %659 = vrot.lane.b32.xlu0 %v11282_v8, %s11189_s26 }
  0x78   : > { %758 = vrot.lane.b32.xlu1 %v11252_v2, %s11190_s27  ;;  %756 = vrot.lane.b32.xlu0 %v11248_v1, %s11190_s27 }
  0x7c   : > { %762 = vrot.lane.b32.xlu1 %v11257_v3, %s11190_s27  ;;  %760 = vrot.lane.b32.xlu0 %v10702_v24, %s11190_s27 }
  0x80   : > { %766 = vrot.lane.b32.xlu1 %v10703_v25, %s11190_s27  ;;  %764 = vrot.lane.b32.xlu0 %v11260_v4, %s11190_s27  ;;  %v11468_v25 = vld [vmem:[%s14191_s1 + $0x4] ss:$20 sps:$4 sm:$0xff]  }
  0x81   : > { %1373 = vmatprep.mubr.bf16.mxu1 %v11468_v25 }
  0x84   : > { %770 = vrot.lane.b32.xlu1 %v11271_v6, %s11190_s27  ;;  %768 = vrot.lane.b32.xlu0 %v11279_v7, %s11190_s27 }
  0x88   : > { %774 = vrot.lane.b32.xlu1 %v11288_v9, %s11190_s27  ;;  %772 = vrot.lane.b32.xlu0 %v10704_v26, %s11190_s27 }
  0x8a   : > { %v293_v28 = vpop.permute.xlu1 %292  ;;  %v289_v29 = vpop.permute.xlu0 %288 }
  0x8c   : > { %778 = vrot.lane.b32.xlu1 %v10705_v27, %s11190_s27  ;;  %776 = vrot.lane.b32.xlu0 %v11282_v8, %s11190_s27  ;;  %v10714_v27 = vld [vmem:[%s11244_s22 + $0x8] ss:$60 sps:$4 sm:$0xff]  }
  0x8e   : > { %v295_v30 = vpop.permute.xlu1 %294  ;;  %v291_v31 = vpop.permute.xlu0 %290 }
  0x8f   : > { %v314_v33 = vsel %vm312_vm0, %v291_v31, %v293_v28  ;;  %v313_v34 = vsel %vm312_vm0, %v289_v29, %v291_v31 }
  0x90   : > { %875 = vrot.lane.b32.xlu1 %v11252_v2, %s11191_s28  ;;  %873 = vrot.lane.b32.xlu0 %v11248_v1, %s11191_s28 }
  0x91   : > { %1349 = vmatprep.subr.bf16.mxu1 %v314_v33 }
  0x92   : > { %1350 = vmatpush1.bf16.msra.mxu1 %v313_v34  ;;  %v299_v35 = vpop.permute.xlu1 %298  ;;  %v297_v37 = vpop.permute.xlu0 %296 }
  0x93   : > { %v316_v38 = vsel %vm312_vm0, %v297_v37, %v299_v35  ;;  %v315_v39 = vsel %vm312_vm0, %v295_v30, %v297_v37  ;;  %v10715_v30 = vld [vmem:[%s11244_s22 + $0x80] ss:$60 sps:$4 sm:$0xff]  }
  0x94   : > { %879 = vrot.lane.b32.xlu1 %v11257_v3, %s11191_s28  ;;  %877 = vrot.lane.b32.xlu0 %v10706_v32, %s11191_s28 }
  0x95   : > { %1351 = vmatprep.subr.bf16.mxu1 %v316_v38  ;;  %v10716_v38 = vld [vmem:[%s11244_s22 + $0xf8] ss:$60 sps:$4 sm:$0xff]  }
  0x96   : > { %1352 = vmatpush1.bf16.msra.mxu1 %v315_v39  ;;  %v303_v40 = vpop.permute.xlu1 %302  ;;  %v301_v41 = vpop.permute.xlu0 %300 }
  0x97   : > { %v317_v46 = vsel %vm312_vm0, %v301_v41, %v303_v40 }
  0x98   : > { %883 = vrot.lane.b32.xlu1 %v10707_v36, %s11191_s28  ;;  %881 = vrot.lane.b32.xlu0 %v11260_v4, %s11191_s28 }
  0x9a   : > { %v307_v42 = vpop.permute.xlu1 %306  ;;  %v305_v43 = vpop.permute.xlu0 %304 }
  0x9b   : > { %v318_v45 = vsel %vm312_vm0, %v303_v40, %v305_v43 }
  0x9c   : > { %887 = vrot.lane.b32.xlu1 %v11271_v6, %s11191_s28  ;;  %885 = vrot.lane.b32.xlu0 %v11279_v7, %s11191_s28 }
  0x9d   : > { %1353 = vmatprep.subr.bf16.mxu1 %v318_v45  ;;  %v10753_v45 = vld [vmem:[%s14191_s1] ss:$20 sps:$4 sm:$0xff]  }
  0x9e   : > { %1354 = vmatpush1.bf16.msra.mxu1 %v317_v46  ;;  %v311_v47 = vpop.permute.xlu1 %310  ;;  %v309_v49 = vpop.permute.xlu0 %308 }
  0x9f   : > { %v320_v50 = vsel %vm312_vm0, %v309_v49, %v311_v47  ;;  %v319_v51 = vsel %vm312_vm0, %v307_v42, %v309_v49  ;;  %v10717_v42 = vld [vmem:[%s11244_s22 + $0x170] ss:$60 sps:$4 sm:$0xff]   ;;  %v11500_v49 = vld [vmem:[%s11244_s22 + $0x8] ss:$60 sps:$4 sm:$0xff]  }
  0xa0   : > { %891 = vrot.lane.b32.xlu1 %v11288_v9, %s11191_s28  ;;  %889 = vrot.lane.b32.xlu0 %v10708_v44, %s11191_s28  ;;  %v11098_v9 = vld [vmem:[%s11244_s22 + $0xf4] ss:$60 sps:$4 sm:$0xff]   ;;  %v11490_v44 = vld [vmem:[%s11244_s22 + $0xc] ss:$60 sps:$4 sm:$0xff]  }
  0xa1   : > { %1355 = vmatprep.subr.bf16.mxu1 %v320_v50 }
  0xa2   : > { %1356 = vmatpush1.bf16.msra.mxu1 %v319_v51  ;;  %v408_v52 = vpop.permute.xlu1 %407  ;;  %v406_v53 = vpop.permute.xlu0 %405  ;;  %v11503_v51 = vld [vmem:[%s11244_s22 + $0x84] ss:$60 sps:$4 sm:$0xff]  }
  0xa3   : > { %v430_v60 = vsel %vm429_vm1, %v406_v53, %v408_v52  ;;  %v11509_v53 = vld [vmem:[%s11244_s22 + $0x80] ss:$60 sps:$4 sm:$0xff]  }
  0xa4   : > { %895 = vrot.lane.b32.xlu1 %v10709_v48, %s11191_s28  ;;  %893 = vrot.lane.b32.xlu0 %v11282_v8, %s11191_s28  ;;  %v10712_v8 = vld [vmem:[%s11244_s22 + $0xf8] ss:$60 sps:$4 sm:$0xff]  }
  0xa6   : > { %v412_v54 = vpop.permute.xlu1 %411  ;;  %v410_v55 = vpop.permute.xlu0 %409 }
  0xa7   : > { %v431_v58 = vsel %vm429_vm1, %v408_v52, %v410_v55  ;;  %v10723_v55 = vld [vmem:[%s11244_s22 + $0x10] ss:$60 sps:$4 sm:$0xff]  }
  0xa8   : > { %992 = vrot.lane.b32.xlu1 %v11094_v57, %s11192_s29  ;;  %990 = vrot.lane.b32.xlu0 %v11095_v59, %s11192_s29 }
  0xa9   : > { %1357 = vmatprep.subr.bf16.mxu1 %v431_v58 }
  0xaa   : > { %1358 = vmatpush1.bf16.msra.mxu1 %v430_v60  ;;  %v416_v61 = vpop.permute.xlu1 %415  ;;  %v414_v63 = vpop.permute.xlu0 %413  ;;  %v10724_v60 = vld [vmem:[%s11244_s22 + $0x88] ss:$60 sps:$4 sm:$0xff]  }
  0xab   : > { %v433_v1 = vsel %vm429_vm1, %v414_v63, %v416_v61  ;;  %v432_v2 = vsel %vm429_vm1, %v412_v54, %v414_v63  ;;  %v11525_v61 = vld [vmem:[%s11244_s22 + $0xf8] ss:$60 sps:$4 sm:$0xff]  }
  0xac   : > { %996 = vrot.lane.b32.xlu1 %v11096_v0, %s11192_s29  ;;  %994 = vrot.lane.b32.xlu0 %v10710_v56, %s11192_s29  ;;  %v11514_v56 = vld [vmem:[%s11244_s22 + $0xfc] ss:$60 sps:$4 sm:$0xff]   ;;  %v11529_v63 = vld [vmem:[%s11244_s22 + $0x174] ss:$60 sps:$4 sm:$0xff]  }
  0xad   : > { %1359 = vmatprep.subr.bf16.mxu1 %v433_v1 }
  0xae   : > { %1360 = vmatpush1.bf16.msra.mxu1 %v432_v2  ;;  %v420_v3 = vpop.permute.xlu1 %419  ;;  %v418_v4 = vpop.permute.xlu0 %417 }
  0xaf   : > { %v434_v12 = vsel %vm429_vm1, %v418_v4, %v420_v3  ;;  %v11539_v4 = vld [vmem:[%s11244_s22 + $0x170] ss:$60 sps:$4 sm:$0xff]  }
  0xb0   : > { %1000 = vrot.lane.b32.xlu1 %v10711_v62, %s11192_s29  ;;  %998 = vrot.lane.b32.xlu0 %v11097_v5, %s11192_s29 }
  0xb2   : > { %v424_v6 = vpop.permute.xlu1 %423  ;;  %v422_v7 = vpop.permute.xlu0 %421 }
  0xb3   : > { %v435_v10 = vsel %vm429_vm1, %v420_v3, %v422_v7  ;;  %v10731_v7 = vld [vmem:[%s11244_s22 + $0x100] ss:$60 sps:$4 sm:$0xff]  }
  0xb4   : > { %1004 = vrot.lane.b32.xlu1 %v11098_v9, %s11192_s29  ;;  %1002 = vrot.lane.b32.xlu0 %v11099_v11, %s11192_s29 }
  0xb5   : > { %1361 = vmatprep.subr.bf16.mxu1 %v435_v10 }
  0xb6   : > { %1362 = vmatpush1.bf16.msra.mxu1 %v434_v12  ;;  %v428_v13 = vpop.permute.xlu1 %427  ;;  %v426_v14 = vpop.permute.xlu0 %425 }
  0xb7   : > { %v437_v17 = vsel %vm429_vm1, %v426_v14, %v428_v13  ;;  %v436_v18 = vsel %vm429_vm1, %v424_v6, %v426_v14 }
  0xb8   : > { %1008 = vrot.lane.b32.xlu1 %v11100_v16, %s11192_s29  ;;  %1006 = vrot.lane.b32.xlu0 %v10712_v8, %s11192_s29 }
  0xb9   : > { %1363 = vmatprep.subr.bf16.mxu1 %v437_v17 }
  0xba   : > { %1364 = vmatpush1.bf16.msra.mxu1 %v436_v18  ;;  %v525_v20 = vpop.permute.xlu1 %524  ;;  %v523_v21 = vpop.permute.xlu0 %522 }
  0xbb   : > { %v547_v28 = vsel %vm546_vm2, %v523_v21, %v525_v20  ;;  %v10734_v21 = vld [vmem:[%s11244_s22 + $0x10] ss:$60 sps:$4 sm:$0xff]  }
  0xbc   : > { %1012 = vrot.lane.b32.xlu1 %v10713_v19, %s11192_s29  ;;  %1010 = vrot.lane.b32.xlu0 %v11101_v22, %s11192_s29 }
  0xbe   : > { %v529_v23 = vpop.permute.xlu1 %528  ;;  %v527_v24 = vpop.permute.xlu0 %526 }
  0xbf   : > { %v548_v26 = vsel %vm546_vm2, %v525_v20, %v527_v24 }
  0xc0   : > { %1109 = vrot.lane.b32.xlu1 %v11094_v57, %s11193_s6  ;;  %1107 = vrot.lane.b32.xlu0 %v11095_v59, %s11193_s6 }
  0xc1   : > { %1365 = vmatprep.subr.bf16.mxu1 %v548_v26 }
  0xc2   : > { %1366 = vmatpush1.bf16.msra.mxu1 %v547_v28  ;;  %v533_v29 = vpop.permute.xlu1 %532  ;;  %v531_v31 = vpop.permute.xlu0 %530 }
  0xc3   : > { %v550_v32 = vsel %vm546_vm2, %v531_v31, %v533_v29  ;;  %v549_v33 = vsel %vm546_vm2, %v529_v23, %v531_v31 }
  0xc4   : > { %1113 = vrot.lane.b32.xlu1 %v11096_v0, %s11193_s6  ;;  %1111 = vrot.lane.b32.xlu0 %v10714_v27, %s11193_s6  ;;  %v10735_v27 = vld [vmem:[%s11244_s22 + $0x88] ss:$60 sps:$4 sm:$0xff]  }
  0xc5   : > { %1367 = vmatprep.subr.bf16.mxu1 %v550_v32 }
  0xc6   : > { %1368 = vmatpush1.bf16.msra.mxu1 %v549_v33  ;;  %v537_v34 = vpop.permute.xlu1 %536  ;;  %v535_v35 = vpop.permute.xlu0 %534 }
  0xc7   : > { %v551_v40 = vsel %vm546_vm2, %v535_v35, %v537_v34 }
  0xc8   : > { %1117 = vrot.lane.b32.xlu1 %v10715_v30, %s11193_s6  ;;  %1115 = vrot.lane.b32.xlu0 %v11097_v5, %s11193_s6 }
  0xca   : > { %v541_v36 = vpop.permute.xlu1 %540  ;;  %v539_v37 = vpop.permute.xlu0 %538 }
  0xcb   : > { %v552_v39 = vsel %vm546_vm2, %v537_v34, %v539_v37  ;;  %v10736_v34 = vld [vmem:[%s11244_s22 + $0x100] ss:$60 sps:$4 sm:$0xff]  }
  0xcc   : > { %1121 = vrot.lane.b32.xlu1 %v11098_v9, %s11193_s6  ;;  %1119 = vrot.lane.b32.xlu0 %v11099_v11, %s11193_s6  ;;  %v10732_v11 = vld [vmem:[%s11244_s22 + $0x178] ss:$60 sps:$4 sm:$0xff]   ;;  %v11588_v37 = vld [vmem:[%s14191_s1 + $0x2c] ss:$20 sps:$4 sm:$0xff]  }
  0xcd   : > { %1369 = vmatprep.subr.bf16.mxu1 %v552_v39 }
  0xce   : > { %1370 = vmatpush1.bf16.msra.mxu1 %v551_v40  ;;  %v545_v41 = vpop.permute.xlu1 %544  ;;  %v543_v43 = vpop.permute.xlu0 %542  ;;  %v10737_v40 = vld [vmem:[%s11244_s22 + $0x178] ss:$60 sps:$4 sm:$0xff]  }
  0xcf   : > { %v554_v46 = vsel %vm546_vm2, %v543_v43, %v545_v41  ;;  %v553_v47 = vsel %vm546_vm2, %v541_v36, %v543_v43  ;;  %v11598_v41 = vld [vmem:[%s14191_s1 + $0x28] ss:$20 sps:$4 sm:$0xff]  }
  0xd0   : > { %1125 = vrot.lane.b32.xlu1 %v11100_v16, %s11193_s6  ;;  %1123 = vrot.lane.b32.xlu0 %v10716_v38, %s11193_s6 }
  0xd1   : > { %1371 = vmatprep.subr.bf16.mxu1 %v554_v46 }
  0xd2   : > { %1372 = vmatpush1.bf16.msra.mxu1 %v553_v47  ;;  %v642_v48 = vpop.permute.xlu1 %641  ;;  %v640_v50 = vpop.permute.xlu0 %639  ;;  %v11609_v47 = vld [vmem:[%s14191_s1 + $0x54] ss:$20 sps:$4 sm:$0xff]  }
  0xd3   : > { %2632 = vmatprep.subr.bf16.mxu1 %v11490_v44  ;;  %v664_v58 = vsel %vm663_vm3, %v640_v50, %v642_v48  ;;  %v11617_v50 = vld [vmem:[%s14191_s1 + $0x50] ss:$20 sps:$4 sm:$0xff]  }
  0xd4   : > { %1129 = vrot.lane.b32.xlu1 %v10717_v42, %s11193_s6  ;;  %1127 = vrot.lane.b32.xlu0 %v11101_v22, %s11193_s6 }
  0xd5   : > { %1374 = vmatmul.mubr.bf16.vlgmr.msra.gmra.mrb[0].mxu1 %v10753_v45 }
  0xd6   : > { %v646_v52 = vpop.permute.xlu1 %645  ;;  %2633 = vmatpush1.bf16.msra.mxu1 %v11500_v49  ;;  %v644_v54 = vpop.permute.xlu0 %643  ;;  %1383 = vmatprep.mubr.bf16.mxu1 %v11588_v37 }
  0xd7   : > { %2634 = vmatprep.subr.bf16.mxu1 %v11503_v51  ;;  %v665_v57 = vsel %vm663_vm3, %v642_v48, %v644_v54  ;;  %v10738_v54 = vld [vmem:[%s11244_s22 + $0x10] ss:$60 sps:$4 sm:$0xff]  }
  0xd8   : > { %1702 = vrot.lane.b32.xlu1 %v11490_v44, %s11186_s23  ;;  %1700 = vrot.lane.b32.xlu0 %v11500_v49, %s11186_s23 }
  0xd9   : > { %1414 = vmatprep.subr.bf16.mxu0 %v665_v57 }
  0xda   : > { %1415 = vmatpush1.bf16.msra.mxu0 %v664_v58  ;;  %v650_v59 = vpop.permute.xlu1 %649  ;;  %2635 = vmatpush1.bf16.msra.mxu1 %v11509_v53  ;;  %v648_v62 = vpop.permute.xlu0 %647 }
  0xdb   : > { %2636 = vmatprep.subr.bf16.mxu1 %v11514_v56  ;;  %v667_v0 = vsel %vm663_vm3, %v648_v62, %v650_v59  ;;  %v666_v1 = vsel %vm663_vm3, %v646_v52, %v648_v62 }
  0xdc   : > { %1706 = vrot.lane.b32.xlu1 %v11509_v53, %s11186_s23  ;;  %1704 = vrot.lane.b32.xlu0 %v10723_v55, %s11186_s23 }
  0xdd   : > { %1416 = vmatprep.subr.bf16.mxu0 %v667_v0  ;;  %1384 = vmatmul.mubr.bf16.gmra.mrb[4].mxu1 %v11598_v41 }
  0xde   : > { %1417 = vmatpush1.bf16.msra.mxu0 %v666_v1  ;;  %v654_v2 = vpop.permute.xlu1 %653  ;;  %2637 = vmatpush1.bf16.msra.mxu1 %v11525_v61  ;;  %v652_v3 = vpop.permute.xlu0 %651  ;;  %v11634_v1 = vld [vmem:[%s14191_s1 + $0x7c] ss:$20 sps:$4 sm:$0xff]  }
  0xdf   : > { %2638 = vmatprep.subr.bf16.mxu1 %v11529_v63  ;;  %v668_v9 = vsel %vm663_vm3, %v652_v3, %v654_v2  ;;  %1393 = vmatprep.mubr.bf16.mxu1 %v11609_v47 }
  0xe0   : > { %1710 = vrot.lane.b32.xlu1 %v10724_v60, %s11186_s23  ;;  %1708 = vrot.lane.b32.xlu0 %v11503_v51, %s11186_s23  ;;  %v10739_v60 = vld [vmem:[%s11244_s22 + $0x88] ss:$60 sps:$4 sm:$0xff]  }
  0xe2   : > { %v658_v5 = vpop.permute.xlu1 %657  ;;  %2639 = vmatpush1.bf16.msra.mxu1 %v11539_v4  ;;  %v656_v6 = vpop.permute.xlu0 %655 }
  0xe3   : > { %v669_v8 = vsel %vm663_vm3, %v654_v2, %v656_v6  ;;  %v11640_v2 = vld [vmem:[%s14191_s1 + $0x78] ss:$20 sps:$4 sm:$0xff]  }
  0xe4   : > { %1714 = vrot.lane.b32.xlu1 %v11514_v56, %s11186_s23  ;;  %1712 = vrot.lane.b32.xlu0 %v11525_v61, %s11186_s23 }
  0xe5   : > { %1418 = vmatprep.subr.bf16.mxu0 %v669_v8  ;;  %1394 = vmatmul.mubr.bf16.gmra.mrb[8].mxu1 %v11617_v50  ;;  %v10740_v8 = vld [vmem:[%s11244_s22 + $0x100] ss:$60 sps:$4 sm:$0xff]  }
  0xe6   : > { %1419 = vmatpush1.bf16.msra.mxu0 %v668_v9  ;;  %v662_v10 = vpop.permute.xlu1 %661  ;;  %v660_v12 = vpop.permute.xlu0 %659  ;;  %1403 = vmatprep.mubr.bf16.mxu1 %v11634_v1 }
  0xe7   : > { %v671_v13 = vsel %vm663_vm3, %v660_v12, %v662_v10  ;;  %v670_v14 = vsel %vm663_vm3, %v658_v5, %v660_v12 }
  0xe8   : > { %1718 = vrot.lane.b32.xlu1 %v11539_v4, %s11186_s23  ;;  %1716 = vrot.lane.b32.xlu0 %v10731_v7, %s11186_s23 }
  0xe9   : > { %1420 = vmatprep.subr.bf16.mxu0 %v671_v13  ;;  %v10741_v13 = vld [vmem:[%s11244_s22 + $0x178] ss:$60 sps:$4 sm:$0xff]  }
  0xea   : > { %1421 = vmatpush1.bf16.msra.mxu0 %v670_v14  ;;  %v759_v15 = vpop.permute.xlu1 %758  ;;  %v757_v16 = vpop.permute.xlu0 %756 }
  0xeb   : > { %v781_v20 = vsel %vm780_vm4, %v757_v16, %v759_v15 }
  0xec   : > { %1722 = vrot.lane.b32.xlu1 %v10732_v11, %s11186_s23  ;;  %1720 = vrot.lane.b32.xlu0 %v11529_v63, %s11186_s23 }
  0xed   : > { %1404 = vmatmul.mubr.bf16.gmra.mrb[12].mxu1 %v11640_v2 }
  0xee   : > { %v763_v17 = vpop.permute.xlu1 %762  ;;  %v761_v18 = vpop.permute.xlu0 %760  ;;  %2664 = vmatprep.mubr.bf16.mxu1 %v11468_v25 }
  0xef   : > { %v782_v19 = vsel %vm780_vm4, %v759_v15, %v761_v18 }
  0xf0   : > { %1818 = vrot.lane.b32.xlu1 %v11490_v44, %s11187_s24  ;;  %1816 = vrot.lane.b32.xlu0 %v11500_v49, %s11187_s24 }
  0xf1   : > { %1422 = vmatprep.subr.bf16.mxu0 %v782_v19  ;;  %v10742_v19 = vld [vmem:[%s11244_s22 + $0x10] ss:$60 sps:$4 sm:$0xff]  }
  0xf2   : > { %1423 = vmatpush1.bf16.msra.mxu0 %v781_v20  ;;  %v767_v22 = vpop.permute.xlu1 %766  ;;  %v765_v23 = vpop.permute.xlu0 %764 }
  0xf3   : > { %v784_v24 = vsel %vm780_vm4, %v765_v23, %v767_v22  ;;  %v783_v26 = vsel %vm780_vm4, %v763_v17, %v765_v23 }
  0xf4   : > { %1822 = vrot.lane.b32.xlu1 %v11509_v53, %s11187_s24  ;;  %1820 = vrot.lane.b32.xlu0 %v10734_v21, %s11187_s24 }
  0xf5   : > { %1424 = vmatprep.subr.bf16.mxu0 %v784_v24  ;;  %v10743_v24 = vld [vmem:[%s11244_s22 + $0x88] ss:$60 sps:$4 sm:$0xff]  }
  0xf6   : > { %1425 = vmatpush1.bf16.msra.mxu0 %v783_v26  ;;  %v771_v28 = vpop.permute.xlu1 %770  ;;  %v769_v29 = vpop.permute.xlu0 %768 }
  0xf7   : > { %v785_v33 = vsel %vm780_vm4, %v769_v29, %v771_v28 }
  0xf8   : > { %1826 = vrot.lane.b32.xlu1 %v10735_v27, %s11187_s24  ;;  %1824 = vrot.lane.b32.xlu0 %v11503_v51, %s11187_s24 }
  0xfa   : > { %v775_v30 = vpop.permute.xlu1 %774  ;;  %v773_v31 = vpop.permute.xlu0 %772 }
  0xfb   : > { %v786_v32 = vsel %vm780_vm4, %v771_v28, %v773_v31 }
  0xfc   : > { %1830 = vrot.lane.b32.xlu1 %v11514_v56, %s11187_s24  ;;  %1828 = vrot.lane.b32.xlu0 %v11525_v61, %s11187_s24 }
  0xfd   : > { %1426 = vmatprep.subr.bf16.mxu0 %v786_v32  ;;  %v10744_v32 = vld [vmem:[%s11244_s22 + $0x100] ss:$60 sps:$4 sm:$0xff]  }
  0xfe   : > { %1427 = vmatpush1.bf16.msra.mxu0 %v785_v33  ;;  %v779_v35 = vpop.permute.xlu1 %778  ;;  %v777_v36 = vpop.permute.xlu0 %776 }
  0xff   : > { %v788_v38 = vsel %vm780_vm4, %v777_v36, %v779_v35  ;;  %v787_v39 = vsel %vm780_vm4, %v775_v30, %v777_v36 }
 0x100   : > { %1834 = vrot.lane.b32.xlu1 %v11539_v4, %s11187_s24  ;;  %1832 = vrot.lane.b32.xlu0 %v10736_v34, %s11187_s24 }
 0x101   : > { %1428 = vmatprep.subr.bf16.mxu0 %v788_v38  ;;  %v10745_v38 = vld [vmem:[%s11244_s22 + $0x178] ss:$60 sps:$4 sm:$0xff]  }
 0x102   : > { %1429 = vmatpush1.bf16.msra.mxu0 %v787_v39  ;;  %v876_v42 = vpop.permute.xlu1 %875  ;;  %v874_v43 = vpop.permute.xlu0 %873  ;;  %v11695_v39 = vld [vmem:[%s14191_s1 + $0x8] ss:$20 sps:$4 sm:$0xff]  }
 0x103   : > { %v898_v52 = vsel %vm897_vm5, %v874_v43, %v876_v42 }
 0x104   : > { %1838 = vrot.lane.b32.xlu1 %v10737_v40, %s11187_s24  ;;  %1836 = vrot.lane.b32.xlu0 %v11529_v63, %s11187_s24 }
 0x106   : > { %v880_v45 = vpop.permute.xlu1 %879  ;;  %v878_v46 = vpop.permute.xlu0 %877 }
 0x107   : > { %v899_v48 = vsel %vm897_vm5, %v876_v42, %v878_v46 }
 0x108   : > { %1934 = vrot.lane.b32.xlu1 %v11490_v44, %s11188_s25  ;;  %1932 = vrot.lane.b32.xlu0 %v11500_v49, %s11188_s25 }
 0x109   : > { %1430 = vmatprep.subr.bf16.mxu0 %v899_v48 }
 0x10a   : > { %1431 = vmatpush1.bf16.msra.mxu0 %v898_v52  ;;  %v884_v55 = vpop.permute.xlu1 %883  ;;  %v882_v57 = vpop.permute.xlu0 %881  ;;  %v10749_v52 = vld [vmem:[%s11244_s22 + $0x10] ss:$60 sps:$4 sm:$0xff]  }
 0x10b   : > { %v901_v58 = vsel %vm897_vm5, %v882_v57, %v884_v55  ;;  %v900_v59 = vsel %vm897_vm5, %v880_v45, %v882_v57 }
 0x10c   : > { %1938 = vrot.lane.b32.xlu1 %v11509_v53, %s11188_s25  ;;  %1936 = vrot.lane.b32.xlu0 %v10738_v54, %s11188_s25 }
 0x10d   : > { %1432 = vmatprep.subr.bf16.mxu0 %v901_v58 }
 0x10e   : > { %1433 = vmatpush1.bf16.msra.mxu0 %v900_v59  ;;  %v888_v62 = vpop.permute.xlu1 %887  ;;  %v886_v0 = vpop.permute.xlu0 %885  ;;  %v10752_v59 = vld [vmem:[%s11244_s22 + $0x88] ss:$60 sps:$4 sm:$0xff]  }
 0x10f   : > { %v902_v7 = vsel %vm897_vm5, %v886_v0, %v888_v62 }
 0x110   : > { %1942 = vrot.lane.b32.xlu1 %v10739_v60, %s11188_s25  ;;  %1940 = vrot.lane.b32.xlu0 %v11503_v51, %s11188_s25 }
 0x112   : > { %v892_v3 = vpop.permute.xlu1 %891  ;;  %v890_v5 = vpop.permute.xlu0 %889 }
 0x113   : > { %v903_v6 = vsel %vm897_vm5, %v888_v62, %v890_v5 }
 0x114   : > { %1946 = vrot.lane.b32.xlu1 %v11514_v56, %s11188_s25  ;;  %1944 = vrot.lane.b32.xlu0 %v11525_v61, %s11188_s25 }
 0x115   : > { %1434 = vmatprep.subr.bf16.mxu0 %v903_v6 }
 0x116   : > { %1435 = vmatpush1.bf16.msra.mxu0 %v902_v7  ;;  %v896_v9 = vpop.permute.xlu1 %895  ;;  %v894_v10 = vpop.permute.xlu0 %893  ;;  %v10754_v7 = vld [vmem:[%s11244_s22 + $0x100] ss:$60 sps:$4 sm:$0xff]  }
 0x117   : > { %v905_v11 = vsel %vm897_vm5, %v894_v10, %v896_v9  ;;  %v904_v12 = vsel %vm897_vm5, %v892_v3, %v894_v10 }
 0x118   : > { %1950 = vrot.lane.b32.xlu1 %v11539_v4, %s11188_s25  ;;  %1948 = vrot.lane.b32.xlu0 %v10740_v8, %s11188_s25 }
 0x119   : > { %1436 = vmatprep.subr.bf16.mxu0 %v905_v11 }
 0x11a   : > { %1437 = vmatpush1.bf16.msra.mxu0 %v904_v12  ;;  %v993_v25 = vpop.permute.xlu1 %992  ;;  %v991_v14 = vpop.permute.xlu0 %990  ;;  %v10755_v12 = vld [vmem:[%s11244_s22 + $0x178] ss:$60 sps:$4 sm:$0xff]  }
 0x11b   : > { %v1015_v18 = vsel %vm1014_vm6, %v991_v14, %v993_v25 }
 0x11c   : > { %1954 = vrot.lane.b32.xlu1 %v10741_v13, %s11188_s25  ;;  %1952 = vrot.lane.b32.xlu0 %v11529_v63, %s11188_s25  ;;  %v11731_v13 = vld [vmem:[%s11244_s22 + $0x14] ss:$60 sps:$4 sm:$0xff]  }
 0x11e   : > { %v997_v15 = vpop.permute.xlu1 %996  ;;  %v995_v16 = vpop.permute.xlu0 %994 }
 0x11f   : > { %v1016_v17 = vsel %vm1014_vm6, %v993_v25, %v995_v16 }
 0x120   : > { %2050 = vrot.lane.b32.xlu1 %v11490_v44, %s11189_s26  ;;  %2048 = vrot.lane.b32.xlu0 %v11500_v49, %s11189_s26 }
 0x121   : > { %1438 = vmatprep.subr.bf16.mxu0 %v1016_v17 }
 0x122   : > { %1439 = vmatpush1.bf16.msra.mxu0 %v1015_v18  ;;  %v1001_v20 = vpop.permute.xlu1 %1000  ;;  %v999_v21 = vpop.permute.xlu0 %998 }
 0x123   : > { %v1018_v22 = vsel %vm1014_vm6, %v999_v21, %v1001_v20  ;;  %v1017_v23 = vsel %vm1014_vm6, %v997_v15, %v999_v21 }
 0x124   : > { %2054 = vrot.lane.b32.xlu1 %v11509_v53, %s11189_s26  ;;  %2052 = vrot.lane.b32.xlu0 %v10742_v19, %s11189_s26  ;;  %v10756_v19 = vld [vmem:[%s11244_s22 + $0x10] ss:$60 sps:$4 sm:$0xff]  }
 0x125   : > { %1440 = vmatprep.subr.bf16.mxu0 %v1018_v22 }
 0x126   : > { %1441 = vmatpush1.bf16.msra.mxu0 %v1017_v23  ;;  %v1005_v26 = vpop.permute.xlu1 %1004  ;;  %v1003_v27 = vpop.permute.xlu0 %1002 }
 0x127   : > { %v1019_v31 = vsel %vm1014_vm6, %v1003_v27, %v1005_v26 }
 0x128   : > { %2058 = vrot.lane.b32.xlu1 %v10743_v24, %s11189_s26  ;;  %2056 = vrot.lane.b32.xlu0 %v11503_v51, %s11189_s26  ;;  %v10757_v24 = vld [vmem:[%s11244_s22 + $0x88] ss:$60 sps:$4 sm:$0xff]  }
 0x12a   : > { %v1009_v28 = vpop.permute.xlu1 %1008  ;;  %v1007_v29 = vpop.permute.xlu0 %1006 }
 0x12b   : > { %v1020_v30 = vsel %vm1014_vm6, %v1005_v26, %v1007_v29 }
 0x12c   : > { %2062 = vrot.lane.b32.xlu1 %v11514_v56, %s11189_s26  ;;  %2060 = vrot.lane.b32.xlu0 %v11525_v61, %s11189_s26 }
 0x12d   : > { %1442 = vmatprep.subr.bf16.mxu0 %v1020_v30 }
 0x12e   : > { %1443 = vmatpush1.bf16.msra.mxu0 %v1019_v31  ;;  %v1013_v33 = vpop.permute.xlu1 %1012  ;;  %v1011_v34 = vpop.permute.xlu0 %1010 }
 0x12f   : > { %v1022_v35 = vsel %vm1014_vm6, %v1011_v34, %v1013_v33  ;;  %v1021_v36 = vsel %vm1014_vm6, %v1009_v28, %v1011_v34 }
 0x130   : > { %2066 = vrot.lane.b32.xlu1 %v11539_v4, %s11189_s26  ;;  %2064 = vrot.lane.b32.xlu0 %v10744_v32, %s11189_s26  ;;  %v10758_v32 = vld [vmem:[%s11244_s22 + $0x100] ss:$60 sps:$4 sm:$0xff]  }
 0x131   : > { %1444 = vmatprep.subr.bf16.mxu0 %v1022_v35 }
 0x132   : > { %1445 = vmatpush1.bf16.msra.mxu0 %v1021_v36  ;;  %v1110_v40 = vpop.permute.xlu1 %1109  ;;  %v1108_v42 = vpop.permute.xlu0 %1107 }
 0x133   : > { %v1132_v48 = vsel %vm1131_vm7, %v1108_v42, %v1110_v40 }
 0x134   : > { %2070 = vrot.lane.b32.xlu1 %v10745_v38, %s11189_s26  ;;  %2068 = vrot.lane.b32.xlu0 %v11529_v63, %s11189_s26  ;;  %v10759_v38 = vld [vmem:[%s11244_s22 + $0x178] ss:$60 sps:$4 sm:$0xff]  }
 0x135   : > { %1447 = vmatmul.mubr.bf16.vlgmr.msra.gmra.mrb[0].mxu0 %v11695_v39 }
 0x136   : > { %v1114_v43 = vpop.permute.xlu1 %1113  ;;  %v1112_v45 = vpop.permute.xlu0 %1111 }
 0x137   : > { %v1133_v46 = vsel %vm1131_vm7, %v1110_v40, %v1112_v45 }
 0x138   : > { %2166 = vrot.lane.b32.xlu1 %v11490_v44, %s11190_s27  ;;  %2164 = vrot.lane.b32.xlu0 %v11500_v49, %s11190_s27 }
 0x139   : > { %1487 = vmatprep.subr.bf16.mxu0 %v1133_v46  ;;  %v11772_v46 = vld [vmem:[%s14191_s1 + $0x34] ss:$20 sps:$4 sm:$0xff]  }
 0x13a   : > { %1488 = vmatpush1.bf16.msra.mxu0 %v1132_v48  ;;  %v1118_v54 = vpop.permute.xlu1 %1117  ;;  %v1116_v55 = vpop.permute.xlu0 %1115  ;;  %1456 = vmatprep.mubr.bf16.mxu0 %v11772_v46 }
 0x13b   : > { %v1135_v57 = vsel %vm1131_vm7, %v1116_v55, %v1118_v54  ;;  %v1134_v58 = vsel %vm1131_vm7, %v1114_v43, %v1116_v55  ;;  %v10760_v55 = vld [vmem:[%s11244_s22 + $0x10] ss:$60 sps:$4 sm:$0xff]  }
 0x13c   : > { %2170 = vrot.lane.b32.xlu1 %v11509_v53, %s11190_s27  ;;  %2168 = vrot.lane.b32.xlu0 %v10749_v52, %s11190_s27  ;;  %v11780_v52 = vld [vmem:[%s14191_s1 + $0x30] ss:$20 sps:$4 sm:$0xff]  }
 0x13d   : > { %1489 = vmatprep.subr.bf16.mxu0 %v1135_v57  ;;  %1457 = vmatmul.mubr.bf16.gmra.mrb[4].mxu0 %v11780_v52 }
 0x13e   : > { %1490 = vmatpush1.bf16.msra.mxu0 %v1134_v58  ;;  %v1122_v60 = vpop.permute.xlu1 %1121  ;;  %v1120_v62 = vpop.permute.xlu0 %1119 }
 0x13f   : > { %v1136_v6 = vsel %vm1131_vm7, %v1120_v62, %v1122_v60 }
 0x140   : > { %2174 = vrot.lane.b32.xlu1 %v10752_v59, %s11190_s27  ;;  %2172 = vrot.lane.b32.xlu0 %v11503_v51, %s11190_s27 }
 0x142   : > { %v1126_v0 = vpop.permute.xlu1 %1125  ;;  %v1124_v3 = vpop.permute.xlu0 %1123 }
 0x143   : > { %v1137_v5 = vsel %vm1131_vm7, %v1122_v60, %v1124_v3  ;;  %v10761_v60 = vld [vmem:[%s11244_s22 + $0x88] ss:$60 sps:$4 sm:$0xff]  }
 0x144   : > { %2178 = vrot.lane.b32.xlu1 %v11514_v56, %s11190_s27  ;;  %2176 = vrot.lane.b32.xlu0 %v11525_v61, %s11190_s27 }
 0x145   : > { %1491 = vmatprep.subr.bf16.mxu0 %v1137_v5 }
 0x146   : > { %1492 = vmatpush1.bf16.msra.mxu0 %v1136_v6  ;;  %v1130_v8 = vpop.permute.xlu1 %1129  ;;  %v1128_v9 = vpop.permute.xlu0 %1127 }
 0x147   : > { %v1139_v10 = vsel %vm1131_vm7, %v1128_v9, %v1130_v8  ;;  %v1138_v11 = vsel %vm1131_vm7, %v1126_v0, %v1128_v9  ;;  %v11797_v0 = vld [vmem:[%s14191_s1 + $0x5c] ss:$20 sps:$4 sm:$0xff]  }
 0x148   : > { %2182 = vrot.lane.b32.xlu1 %v11539_v4, %s11190_s27  ;;  %2180 = vrot.lane.b32.xlu0 %v10754_v7, %s11190_s27  ;;  %v10762_v8 = vld [vmem:[%s11244_s22 + $0x100] ss:$60 sps:$4 sm:$0xff]  }
 0x149   : > { %1493 = vmatprep.subr.bf16.mxu0 %v1139_v10  ;;  %1466 = vmatprep.mubr.bf16.mxu0 %v11797_v0  ;;  %v11819_v10 = vld [vmem:[%s14191_s1 + $0x84] ss:$20 sps:$4 sm:$0xff]  }
 0x14a   : > { %1494 = vmatpush1.bf16.msra.mxu0 %v1138_v11  ;;  %v1703_v25 = vpop.permute.xlu1 %1702  ;;  %v1701_v14 = vpop.permute.xlu0 %1700 }
 0x14b   : > { %3923 = vmatprep.subr.bf16.mxu0 %v11731_v13  ;;  %v1724_v18 = vsel %vm312_vm0, %v1701_v14, %v1703_v25  ;;  %v10764_v14 = vld [vmem:[%s11244_s22 + $0xc] ss:$60 sps:$4 sm:$0xff]  }
 0x14c   : > { %2186 = vrot.lane.b32.xlu1 %v10755_v12, %s11190_s27  ;;  %2184 = vrot.lane.b32.xlu0 %v11529_v63, %s11190_s27  ;;  %v11829_v12 = vld [vmem:[%s14191_s1 + $0x80] ss:$20 sps:$4 sm:$0xff]  }
 0x14e   : > { %v1707_v15 = vpop.permute.xlu1 %1706  ;;  %v1705_v16 = vpop.permute.xlu0 %1704 }
 0x14f   : > { %v1725_v17 = vsel %vm312_vm0, %v1703_v25, %v1705_v16 }
 0x150   : > { %2282 = vrot.lane.b32.xlu1 %v11490_v44, %s11191_s28  ;;  %2280 = vrot.lane.b32.xlu0 %v11500_v49, %s11191_s28 }
 0x151   : > { %2640 = vmatprep.subr.bf16.mxu1 %v1725_v17 }
 0x152   : > { %2641 = vmatpush1.bf16.msra.mxu1 %v1724_v18  ;;  %v1711_v20 = vpop.permute.xlu1 %1710  ;;  %v1709_v21 = vpop.permute.xlu0 %1708 }
 0x153   : > { %v1727_v22 = vsel %vm312_vm0, %v1709_v21, %v1711_v20  ;;  %v1726_v23 = vsel %vm312_vm0, %v1707_v15, %v1709_v21  ;;  %v10766_v15 = vld [vmem:[%s11244_s22 + $0x8] ss:$60 sps:$4 sm:$0xff]  }
 0x154   : > { %2286 = vrot.lane.b32.xlu1 %v11509_v53, %s11191_s28  ;;  %2284 = vrot.lane.b32.xlu0 %v10756_v19, %s11191_s28  ;;  %v10770_v19 = vld [vmem:[%s11244_s22 + $0x80] ss:$60 sps:$4 sm:$0xff]   ;;  %v11845_v20 = vld [vmem:[%s14191_s1 + $0x10] ss:$20 sps:$4 sm:$0xff]  }
 0x155   : > { %2642 = vmatprep.subr.bf16.mxu1 %v1727_v22 }
 0x156   : > { %2643 = vmatpush1.bf16.msra.mxu1 %v1726_v23  ;;  %v1715_v26 = vpop.permute.xlu1 %1714  ;;  %v1713_v27 = vpop.permute.xlu0 %1712  ;;  %v11851_v23 = vld [vmem:[%s11244_s22 + $0x10] ss:$60 sps:$4 sm:$0xff]  }
 0x157   : > { %v1728_v31 = vsel %vm312_vm0, %v1713_v27, %v1715_v26 }
 0x158   : > { %2290 = vrot.lane.b32.xlu1 %v10757_v24, %s11191_s28  ;;  %2288 = vrot.lane.b32.xlu0 %v11503_v51, %s11191_s28  ;;  %v11194_v24 = vmov 0  }
 0x15a   : > { %v1719_v28 = vpop.permute.xlu1 %1718  ;;  %v1717_v29 = vpop.permute.xlu0 %1716 }
 0x15b   : > { %v1729_v30 = vsel %vm312_vm0, %v1715_v26, %v1717_v29  ;;  %v10773_v29 = vld [vmem:[%s11244_s22 + $0x88] ss:$60 sps:$4 sm:$0xff]  }
 0x15c   : > { %2294 = vrot.lane.b32.xlu1 %v11514_v56, %s11191_s28  ;;  %2292 = vrot.lane.b32.xlu0 %v11525_v61, %s11191_s28 }
 0x15d   : > { %2644 = vmatprep.subr.bf16.mxu1 %v1729_v30  ;;  %v11861_v30 = vld [vmem:[%s11244_s22 + $0x8c] ss:$60 sps:$4 sm:$0xff]  }
 0x15e   : > { %2645 = vmatpush1.bf16.msra.mxu1 %v1728_v31  ;;  %v1723_v33 = vpop.permute.xlu1 %1722  ;;  %v1721_v34 = vpop.permute.xlu0 %1720  ;;  %v10774_v31 = vld [vmem:[%s11244_s22 + $0x84] ss:$60 sps:$4 sm:$0xff]  }
 0x15f   : > { %v1731_v35 = vsel %vm312_vm0, %v1721_v34, %v1723_v33  ;;  %v1730_v36 = vsel %vm312_vm0, %v1719_v28, %v1721_v34  ;;  %v11867_v33 = vld [vmem:[%s11244_s22 + $0x88] ss:$60 sps:$4 sm:$0xff]  }
 0x160   : > { %2298 = vrot.lane.b32.xlu1 %v11539_v4, %s11191_s28  ;;  %2296 = vrot.lane.b32.xlu0 %v10758_v32, %s11191_s28 }
 0x161   : > { %2646 = vmatprep.subr.bf16.mxu1 %v1731_v35  ;;  %v11871_v35 = vld [vmem:[%s11244_s22 + $0x104] ss:$60 sps:$4 sm:$0xff]  }
 0x162   : > { %2647 = vmatpush1.bf16.msra.mxu1 %v1730_v36  ;;  %v1819_v40 = vpop.permute.xlu1 %1818  ;;  %v1817_v42 = vpop.permute.xlu0 %1816  ;;  %v10778_v36 = vld [vmem:[%s11244_s22 + $0xfc] ss:$60 sps:$4 sm:$0xff]  }
 0x163   : > { %v1840_v54 = vsel %vm429_vm1, %v1817_v42, %v1819_v40  ;;  %v11881_v42 = vld [vmem:[%s11244_s22 + $0x100] ss:$60 sps:$4 sm:$0xff]  }
 0x164   : > { %2302 = vrot.lane.b32.xlu1 %v10759_v38, %s11191_s28  ;;  %2300 = vrot.lane.b32.xlu0 %v11529_v63, %s11191_s28  ;;  %v10780_v38 = vld [vmem:[%s11244_s22 + $0xf8] ss:$60 sps:$4 sm:$0xff]  }
 0x166   : > { %v1823_v43 = vpop.permute.xlu1 %1822  ;;  %v1821_v45 = vpop.permute.xlu0 %1820 }
 0x167   : > { %v1841_v48 = vsel %vm429_vm1, %v1819_v40, %v1821_v45 }
 0x168   : > { %2398 = vrot.lane.b32.xlu1 %v11490_v44, %s11192_s29  ;;  %2396 = vrot.lane.b32.xlu0 %v11500_v49, %s11192_s29 }
 0x169   : > { %2648 = vmatprep.subr.bf16.mxu1 %v1841_v48  ;;  %v10781_v48 = vld [vmem:[%s11244_s22 + $0x170] ss:$60 sps:$4 sm:$0xff]  }
 0x16a   : > { %2649 = vmatpush1.bf16.msra.mxu1 %v1840_v54  ;;  %v1827_v57 = vpop.permute.xlu1 %1826  ;;  %v1825_v58 = vpop.permute.xlu0 %1824  ;;  %v11887_v54 = vld [vmem:[%s11244_s22 + $0x17c] ss:$60 sps:$4 sm:$0xff]  }
 0x16b   : > { %v1843_v44 = vsel %vm429_vm1, %v1825_v58, %v1827_v57  ;;  %v1842_v59 = vsel %vm429_vm1, %v1823_v43, %v1825_v58  ;;  %v10783_v57 = vld [vmem:[%s11244_s22 + $0x100] ss:$60 sps:$4 sm:$0xff]  }
 0x16c   : > { %2402 = vrot.lane.b32.xlu1 %v11509_v53, %s11192_s29  ;;  %2400 = vrot.lane.b32.xlu0 %v10760_v55, %s11192_s29  ;;  %v11803_v53 = vld [vmem:[%s14191_s1 + $0x58] ss:$20 sps:$4 sm:$0xff]  }
 0x16d   : > { %2650 = vmatprep.subr.bf16.mxu1 %v1843_v44  ;;  %1467 = vmatmul.mubr.bf16.gmra.mrb[8].mxu0 %v11803_v53  ;;  %v11894_v44 = vld [vmem:[%s11244_s22 + $0x178] ss:$60 sps:$4 sm:$0xff]  }
 0x16e   : > { %2651 = vmatpush1.bf16.msra.mxu1 %v1842_v59  ;;  %v1831_v49 = vpop.permute.xlu1 %1830  ;;  %v1829_v62 = vpop.permute.xlu0 %1828  ;;  %1476 = vmatprep.mubr.bf16.mxu0 %v11819_v10 }
 0x16f   : > { %v1844_v7 = vsel %vm429_vm1, %v1829_v62, %v1831_v49  ;;  %v10787_v62 = vld [vmem:[%s11244_s22 + $0x178] ss:$60 sps:$4 sm:$0xff]  }
 0x170   : > { %2406 = vrot.lane.b32.xlu1 %v10761_v60, %s11192_s29  ;;  %2404 = vrot.lane.b32.xlu0 %v11503_v51, %s11192_s29 }
 0x172   : > { %v1835_v3 = vpop.permute.xlu1 %1834  ;;  %v1833_v5 = vpop.permute.xlu0 %1832 }
 0x173   : > { %v1845_v6 = vsel %vm429_vm1, %v1831_v49, %v1833_v5 }
 0x174   : > { %2410 = vrot.lane.b32.xlu1 %v11514_v56, %s11192_s29  ;;  %2408 = vrot.lane.b32.xlu0 %v11525_v61, %s11192_s29  ;;  %v10763_v61 = vld [vmem:[%s11244_s22 + $0x178] ss:$60 sps:$4 sm:$0xff]  }
 0x175   : > { %2652 = vmatprep.subr.bf16.mxu1 %v1845_v6  ;;  %1477 = vmatmul.mubr.bf16.gmra.mrb[12].mxu0 %v11829_v12 }
 0x176   : > { %2653 = vmatpush1.bf16.msra.mxu1 %v1844_v7  ;;  %v1839_v51 = vpop.permute.xlu1 %1838  ;;  %v1837_v9 = vpop.permute.xlu0 %1836  ;;  %1519 = vmatprep.mubr.bf16.mxu0 %v11194_v24  ;;  %v11909_v7 = vld [vmem:[%s14191_s1] ss:$20 sps:$4 sm:$0xff]  }
 0x177   : > { %v1847_v56 = vsel %vm429_vm1, %v1837_v9, %v1839_v51  ;;  %v1846_v11 = vsel %vm429_vm1, %v1835_v3, %v1837_v9  ;;  %v10788_v3 = vld [vmem:[%s11244_s22 + $0x174] ss:$60 sps:$4 sm:$0xff]  }
 0x178   : > { %2414 = vrot.lane.b32.xlu1 %v11539_v4, %s11192_s29  ;;  %2412 = vrot.lane.b32.xlu0 %v10762_v8, %s11192_s29 }
 0x179   : > { %2654 = vmatprep.subr.bf16.mxu1 %v1847_v56 }
 0x17a   : > { %2655 = vmatpush1.bf16.msra.mxu1 %v1846_v11  ;;  %v1935_v25 = vpop.permute.xlu1 %1934  ;;  %v1933_v4 = vpop.permute.xlu0 %1932  ;;  %v10794_v11 = vld [vmem:[%s11244_s22 + $0x18] ss:$60 sps:$4 sm:$0xff]  }
 0x17b   : > { %v1956_v21 = vsel %vm546_vm2, %v1933_v4, %v1935_v25 }
 0x17c   : > { %2418 = vrot.lane.b32.xlu1 %v10763_v61, %s11192_s29  ;;  %2416 = vrot.lane.b32.xlu0 %v11529_v63, %s11192_s29  ;;  %v10772_v63 = vld [vmem:[%s11244_s22 + $0x10] ss:$60 sps:$4 sm:$0xff]  }
 0x17d   : > { %9751 = vmatmul.mubr.msk.bf16.vlgmr.msra.gmra.mrb[0].mxu0 %vm1328_vm8, %v11845_v20 }
 0x17e   : > { %v1939_v16 = vpop.permute.xlu1 %1938  ;;  %v1937_v17 = vpop.permute.xlu0 %1936  ;;  %3924 = vmatpush1.bf16.msra.mxu0 %v11851_v23  ;;  %1529 = vmatprep.mubr.bf16.mxu0 %v11194_v24 }
 0x17f   : > { %v1957_v18 = vsel %vm546_vm2, %v1935_v25, %v1937_v17  ;;  %3925 = vmatprep.subr.bf16.mxu0 %v11861_v30 }
 0x180   : > { %2514 = vrot.lane.b32.xlu1 %v10764_v14, %s11193_s6  ;;  %2512 = vrot.lane.b32.xlu0 %v10766_v15, %s11193_s6  ;;  %v10795_v14 = vld [vmem:[%s11244_s22 + $0x90] ss:$60 sps:$4 sm:$0xff]  }
 0x181   : > { %2656 = vmatprep.subr.bf16.mxu1 %v1957_v18 }
 0x182   : > { %2657 = vmatpush1.bf16.msra.mxu1 %v1956_v21  ;;  %v1943_v22 = vpop.permute.xlu1 %1942  ;;  %v1941_v26 = vpop.permute.xlu0 %1940  ;;  %3926 = vmatpush1.bf16.msra.mxu0 %v11867_v33 }
 0x183   : > { %v1959_v27 = vsel %vm546_vm2, %v1941_v26, %v1943_v22  ;;  %v1958_v28 = vsel %vm546_vm2, %v1939_v16, %v1941_v26  ;;  %3927 = vmatprep.subr.bf16.mxu0 %v11871_v35 }
 0x184   : > { %2518 = vrot.lane.b32.xlu1 %v10770_v19, %s11193_s6  ;;  %2516 = vrot.lane.b32.xlu0 %v10772_v63, %s11193_s6 }
 0x185   : > { %2658 = vmatprep.subr.bf16.mxu1 %v1959_v27  ;;  %v10803_v27 = vld [vmem:[%s11244_s22 + $0x180] ss:$60 sps:$4 sm:$0xff]  }
 0x186   : > { %2659 = vmatpush1.bf16.msra.mxu1 %v1958_v28  ;;  %v1947_v32 = vpop.permute.xlu1 %1946  ;;  %v1945_v34 = vpop.permute.xlu0 %1944  ;;  %3928 = vmatpush1.bf16.msra.mxu0 %v11881_v42 }
 0x187   : > { %v1960_v55 = vsel %vm546_vm2, %v1945_v34, %v1947_v32  ;;  %3929 = vmatprep.subr.bf16.mxu0 %v11887_v54 }
 0x188   : > { %2522 = vrot.lane.b32.xlu1 %v10773_v29, %s11193_s6  ;;  %2520 = vrot.lane.b32.xlu0 %v10774_v31, %s11193_s6 }
 0x18a   : > { %v1951_v40 = vpop.permute.xlu1 %1950  ;;  %v1949_v43 = vpop.permute.xlu0 %1948  ;;  %3930 = vmatpush1.bf16.msra.mxu0 %v11894_v44 }
 0x18b   : > { %v1961_v45 = vsel %vm546_vm2, %v1947_v32, %v1949_v43  ;;  %v11956_v32 = vld [vmem:[%s14191_s1 + $0xc] ss:$20 sps:$4 sm:$0xff]  }
 0x18c   : > { %2526 = vrot.lane.b32.xlu1 %v10778_v36, %s11193_s6  ;;  %2524 = vrot.lane.b32.xlu0 %v10780_v38, %s11193_s6  ;;  %v10805_v36 = vld [vmem:[%s11244_s22 + $0x18] ss:$60 sps:$4 sm:$0xff]  }
 0x18d   : > { %2660 = vmatprep.subr.bf16.mxu1 %v1961_v45  ;;  %v10806_v45 = vld [vmem:[%s11244_s22 + $0x90] ss:$60 sps:$4 sm:$0xff]  }
 0x18e   : > { %2661 = vmatpush1.bf16.msra.mxu1 %v1960_v55  ;;  %v1955_v58 = vpop.permute.xlu1 %1954  ;;  %v1953_v59 = vpop.permute.xlu0 %1952 }
 0x18f   : > { %v1963_v60 = vsel %vm546_vm2, %v1953_v59, %v1955_v58  ;;  %v1962_v49 = vsel %vm546_vm2, %v1951_v40, %v1953_v59 }
 0x190   : > { %2530 = vrot.lane.b32.xlu1 %v10781_v48, %s11193_s6  ;;  %2528 = vrot.lane.b32.xlu0 %v10783_v57, %s11193_s6 }
 0x191   : > { %2662 = vmatprep.subr.bf16.mxu1 %v1963_v60 }
 0x192   : > { %2663 = vmatpush1.bf16.msra.mxu1 %v1962_v49  ;;  %v2051_v5 = vpop.permute.xlu1 %2050  ;;  %v2049_v6 = vpop.permute.xlu0 %2048  ;;  %v10807_v49 = vld [vmem:[%s11244_s22 + $0x108] ss:$60 sps:$4 sm:$0xff]  }
 0x193   : > { %v2072_v56 = vsel %vm663_vm3, %v2049_v6, %v2051_v5 }
 0x194   : > { %2534 = vrot.lane.b32.xlu1 %v10787_v62, %s11193_s6  ;;  %2532 = vrot.lane.b32.xlu0 %v10788_v3, %s11193_s6 }
 0x195   : > { %2665 = vmatmul.mubr.bf16.vlgmr.msra.gmra.mrb[16].mxu1 %v11909_v7 }
 0x196   : > { %v2055_v8 = vpop.permute.xlu1 %2054  ;;  %2674 = vmatprep.mubr.bf16.mxu1 %v11588_v37  ;;  %v2053_v51 = vpop.permute.xlu0 %2052 }
 0x197   : > { %v2073_v9 = vsel %vm663_vm3, %v2051_v5, %v2053_v51  ;;  %v11987_v51 = vld [vmem:[%s14191_s1 + $0x38] ss:$20 sps:$4 sm:$0xff]  }
 0x198   : > { %2993 = vrot.lane.b32.xlu1 %v11731_v13, %s11186_s23  ;;  %2991 = vrot.lane.b32.xlu0 %v11851_v23, %s11186_s23 }
 0x199   : > { %2705 = vmatprep.subr.bf16.mxu1 %v2073_v9  ;;  %9752 = vmatmul.mubr.msk.bf16.gmra.mrb[4].mxu0 %vm1328_vm8, %v11987_v51 }
 0x19a   : > { %2706 = vmatpush1.bf16.msra.mxu1 %v2072_v56  ;;  %v2059_v61 = vpop.permute.xlu1 %2058  ;;  %v2057_v25 = vpop.permute.xlu0 %2056  ;;  %1539 = vmatprep.mubr.bf16.mxu0 %v11194_v24 }
 0x19b   : > { %v2075_v37 = vsel %vm663_vm3, %v2057_v25, %v2059_v61  ;;  %v2074_v4 = vsel %vm663_vm3, %v2055_v8, %v2057_v25  ;;  %v10808_v8 = vld [vmem:[%s11244_s22 + $0x180] ss:$60 sps:$4 sm:$0xff]  }
 0x19c   : > { %2997 = vrot.lane.b32.xlu1 %v11867_v33, %s11186_s23  ;;  %2995 = vrot.lane.b32.xlu0 %v10794_v11, %s11186_s23 }
 0x19d   : > { %2707 = vmatprep.subr.bf16.mxu1 %v2075_v37  ;;  %2675 = vmatmul.mubr.bf16.gmra.mrb[20].mxu1 %v11598_v41  ;;  %v10802_v41 = vld [vmem:[%s11244_s22 + $0x108] ss:$60 sps:$4 sm:$0xff]   ;;  %v12002_v37 = vld [vmem:[%s14191_s1 + $0x60] ss:$20 sps:$4 sm:$0xff]  }
 0x19e   : > { %2708 = vmatpush1.bf16.msra.mxu1 %v2074_v4  ;;  %v2063_v15 = vpop.permute.xlu1 %2062  ;;  %v2061_v16 = vpop.permute.xlu0 %2060  ;;  %2684 = vmatprep.mubr.bf16.mxu1 %v11609_v47 }
 0x19f   : > { %v2076_v21 = vsel %vm663_vm3, %v2061_v16, %v2063_v15 }
 0x1a0   : > { %3001 = vrot.lane.b32.xlu1 %v10795_v14, %s11186_s23  ;;  %2999 = vrot.lane.b32.xlu0 %v11861_v30, %s11186_s23  ;;  %v10809_v14 = vld [vmem:[%s11244_s22 + $0x18] ss:$60 sps:$4 sm:$0xff]  }
 0x1a1   : > { %9753 = vmatmul.mubr.msk.bf16.gmra.mrb[8].mxu0 %vm1328_vm8, %v12002_v37 }
 0x1a2   : > { %v2067_v17 = vpop.permute.xlu1 %2066  ;;  %v2065_v18 = vpop.permute.xlu0 %2064  ;;  %1549 = vmatprep.mubr.bf16.mxu0 %v11194_v24 }
 0x1a3   : > { %v2077_v19 = vsel %vm663_vm3, %v2063_v15, %v2065_v18 }
 0x1a4   : > { %3005 = vrot.lane.b32.xlu1 %v11871_v35, %s11186_s23  ;;  %3003 = vrot.lane.b32.xlu0 %v11881_v42, %s11186_s23 }
 0x1a5   : > { %2709 = vmatprep.subr.bf16.mxu1 %v2077_v19  ;;  %2685 = vmatmul.mubr.bf16.gmra.mrb[24].mxu1 %v11617_v50  ;;  %v10810_v19 = vld [vmem:[%s11244_s22 + $0x90] ss:$60 sps:$4 sm:$0xff]  }
 0x1a6   : > { %2710 = vmatpush1.bf16.msra.mxu1 %v2076_v21  ;;  %v2071_v47 = vpop.permute.xlu1 %2070  ;;  %v2069_v63 = vpop.permute.xlu0 %2068  ;;  %2694 = vmatprep.mubr.bf16.mxu1 %v11634_v1 }
 0x1a7   : > { %v2079_v22 = vsel %vm663_vm3, %v2069_v63, %v2071_v47  ;;  %v2078_v26 = vsel %vm663_vm3, %v2067_v17, %v2069_v63  ;;  %v12021_v47 = vld [vmem:[%s14191_s1 + $0x88] ss:$20 sps:$4 sm:$0xff]  }
 0x1a8   : > { %3009 = vrot.lane.b32.xlu1 %v11894_v44, %s11186_s23  ;;  %3007 = vrot.lane.b32.xlu0 %v10802_v41, %s11186_s23 }
 0x1a9   : > { %2711 = vmatprep.subr.bf16.mxu1 %v2079_v22  ;;  %9754 = vmatmul.mubr.msk.bf16.gmra.mrb[12].mxu0 %vm1328_vm8, %v12021_v47 }
 0x1aa   : > { %2712 = vmatpush1.bf16.msra.mxu1 %v2078_v26  ;;  %v2167_v28 = vpop.permute.xlu1 %2166  ;;  %v2165_v29 = vpop.permute.xlu0 %2164  ;;  %v12030_v26 = vld [vmem:[%s14191_s1 + $0x4] ss:$20 sps:$4 sm:$0xff]  }
 0x1ab   : > { %v2188_v34 = vsel %vm780_vm4, %v2165_v29, %v2167_v28  ;;  %3955 = vmatprep.mubr.bf16.mxu0 %v12030_v26  ;;  %v10811_v29 = vld [vmem:[%s11244_s22 + $0x108] ss:$60 sps:$4 sm:$0xff]  }
 0x1ac   : > { %3013 = vrot.lane.b32.xlu1 %v10803_v27, %s11186_s23  ;;  %3011 = vrot.lane.b32.xlu0 %v11887_v54, %s11186_s23 }
 0x1ad   : > { %2695 = vmatmul.mubr.bf16.gmra.mrb[28].mxu1 %v11640_v2 }
 0x1ae   : > { %v2171_v50 = vpop.permute.xlu1 %2170  ;;  %v2169_v31 = vpop.permute.xlu0 %2168  ;;  %2737 = vmatprep.mubr.bf16.mxu1 %v11956_v32 }
 0x1af   : > { %v2189_v1 = vsel %vm780_vm4, %v2167_v28, %v2169_v31 }
 0x1b0   : > { %3109 = vrot.lane.b32.xlu1 %v11731_v13, %s11187_s24  ;;  %3107 = vrot.lane.b32.xlu0 %v11851_v23, %s11187_s24 }
 0x1b1   : > { %2713 = vmatprep.subr.bf16.mxu1 %v2189_v1 }
 0x1b2   : > { %2714 = vmatpush1.bf16.msra.mxu1 %v2188_v34  ;;  %v2175_v2 = vpop.permute.xlu1 %2174  ;;  %v2173_v38 = vpop.permute.xlu0 %2172 }
 0x1b3   : > { %v2191_v40 = vsel %vm780_vm4, %v2173_v38, %v2175_v2  ;;  %v2190_v43 = vsel %vm780_vm4, %v2171_v50, %v2173_v38 }
 0x1b4   : > { %3113 = vrot.lane.b32.xlu1 %v11867_v33, %s11187_s24  ;;  %3111 = vrot.lane.b32.xlu0 %v10805_v36, %s11187_s24  ;;  %v10812_v36 = vld [vmem:[%s11244_s22 + $0x180] ss:$60 sps:$4 sm:$0xff]  }
 0x1b5   : > { %2715 = vmatprep.subr.bf16.mxu1 %v2191_v40 }
 0x1b6   : > { %2716 = vmatpush1.bf16.msra.mxu1 %v2190_v43  ;;  %v2179_v48 = vpop.permute.xlu1 %2178  ;;  %v2177_v55 = vpop.permute.xlu0 %2176 }
 0x1b7   : > { %v2192_v60 = vsel %vm780_vm4, %v2177_v55, %v2179_v48  ;;  %v10813_v55 = vld [vmem:[%s11244_s22 + $0x18] ss:$60 sps:$4 sm:$0xff]  }
 0x1b8   : > { %3117 = vrot.lane.b32.xlu1 %v10806_v45, %s11187_s24  ;;  %3115 = vrot.lane.b32.xlu0 %v11861_v30, %s11187_s24 }
 0x1ba   : > { %v2183_v57 = vpop.permute.xlu1 %2182  ;;  %v2181_v58 = vpop.permute.xlu0 %2180 }
 0x1bb   : > { %v2193_v59 = vsel %vm780_vm4, %v2179_v48, %v2181_v58 }
 0x1bc   : > { %3121 = vrot.lane.b32.xlu1 %v11871_v35, %s11187_s24  ;;  %3119 = vrot.lane.b32.xlu0 %v11881_v42, %s11187_s24 }
 0x1bd   : > { %2717 = vmatprep.subr.bf16.mxu1 %v2193_v59 }
 0x1be   : > { %2718 = vmatpush1.bf16.msra.mxu1 %v2192_v60  ;;  %v2187_v62 = vpop.permute.xlu1 %2186  ;;  %v2185_v3 = vpop.permute.xlu0 %2184 }
 0x1bf   : > { %v2195_v5 = vsel %vm780_vm4, %v2185_v3, %v2187_v62  ;;  %v2194_v6 = vsel %vm780_vm4, %v2183_v57, %v2185_v3 }
 0x1c0   : > { %3125 = vrot.lane.b32.xlu1 %v11894_v44, %s11187_s24  ;;  %3123 = vrot.lane.b32.xlu0 %v10807_v49, %s11187_s24  ;;  %v10814_v49 = vld [vmem:[%s11244_s22 + $0x90] ss:$60 sps:$4 sm:$0xff]  }
 0x1c1   : > { %2719 = vmatprep.subr.bf16.mxu1 %v2195_v5 }
 0x1c2   : > { %2720 = vmatpush1.bf16.msra.mxu1 %v2194_v6  ;;  %v2283_v9 = vpop.permute.xlu1 %2282  ;;  %v2281_v56 = vpop.permute.xlu0 %2280 }
 0x1c3   : > { %v2304_v4 = vsel %vm897_vm5, %v2281_v56, %v2283_v9  ;;  %v10820_v56 = vld [vmem:[%s11244_s22 + $0x108] ss:$60 sps:$4 sm:$0xff]  }
 0x1c4   : > { %3129 = vrot.lane.b32.xlu1 %v10808_v8, %s11187_s24  ;;  %3127 = vrot.lane.b32.xlu0 %v11887_v54, %s11187_s24 }
 0x1c6   : > { %v2287_v11 = vpop.permute.xlu1 %2286  ;;  %v2285_v61 = vpop.permute.xlu0 %2284 }
 0x1c7   : > { %v2305_v25 = vsel %vm897_vm5, %v2283_v9, %v2285_v61 }
 0x1c8   : > { %3225 = vrot.lane.b32.xlu1 %v11731_v13, %s11188_s25  ;;  %3223 = vrot.lane.b32.xlu0 %v11851_v23, %s11188_s25 }
 0x1c9   : > { %2721 = vmatprep.subr.bf16.mxu1 %v2305_v25 }
 0x1ca   : > { %2722 = vmatpush1.bf16.msra.mxu1 %v2304_v4  ;;  %v2291_v15 = vpop.permute.xlu1 %2290  ;;  %v2289_v16 = vpop.permute.xlu0 %2288 }
 0x1cb   : > { %v2307_v17 = vsel %vm897_vm5, %v2289_v16, %v2291_v15  ;;  %v2306_v18 = vsel %vm897_vm5, %v2287_v11, %v2289_v16 }
 0x1cc   : > { %3229 = vrot.lane.b32.xlu1 %v11867_v33, %s11188_s25  ;;  %3227 = vrot.lane.b32.xlu0 %v10809_v14, %s11188_s25  ;;  %v10822_v14 = vld [vmem:[%s11244_s22 + $0x180] ss:$60 sps:$4 sm:$0xff]  }
 0x1cd   : > { %2723 = vmatprep.subr.bf16.mxu1 %v2307_v17 }
 0x1ce   : > { %2724 = vmatpush1.bf16.msra.mxu1 %v2306_v18  ;;  %v2295_v21 = vpop.permute.xlu1 %2294  ;;  %v2293_v41 = vpop.permute.xlu0 %2292 }
 0x1cf   : > { %v2308_v28 = vsel %vm897_vm5, %v2293_v41, %v2295_v21  ;;  %v10826_v41 = vld [vmem:[%s11244_s22 + $0x18] ss:$60 sps:$4 sm:$0xff]  }
 0x1d0   : > { %3233 = vrot.lane.b32.xlu1 %v10810_v19, %s11188_s25  ;;  %3231 = vrot.lane.b32.xlu0 %v11861_v30, %s11188_s25 }
 0x1d2   : > { %v2299_v63 = vpop.permute.xlu1 %2298  ;;  %v2297_v22 = vpop.permute.xlu0 %2296 }
 0x1d3   : > { %v2309_v27 = vsel %vm897_vm5, %v2295_v21, %v2297_v22 }
 0x1d4   : > { %3237 = vrot.lane.b32.xlu1 %v11871_v35, %s11188_s25  ;;  %3235 = vrot.lane.b32.xlu0 %v11881_v42, %s11188_s25 }
 0x1d5   : > { %2725 = vmatprep.subr.bf16.mxu1 %v2309_v27  ;;  %v10827_v27 = vld [vmem:[%s11244_s22 + $0x90] ss:$60 sps:$4 sm:$0xff]  }
 0x1d6   : > { %2726 = vmatpush1.bf16.msra.mxu1 %v2308_v28  ;;  %v2303_v50 = vpop.permute.xlu1 %2302  ;;  %v2301_v31 = vpop.permute.xlu0 %2300 }
 0x1d7   : > { %v2311_v1 = vsel %vm897_vm5, %v2301_v31, %v2303_v50  ;;  %v2310_v34 = vsel %vm897_vm5, %v2299_v63, %v2301_v31 }
 0x1d8   : > { %3241 = vrot.lane.b32.xlu1 %v11894_v44, %s11188_s25  ;;  %3239 = vrot.lane.b32.xlu0 %v10811_v29, %s11188_s25 }
 0x1d9   : > { %2727 = vmatprep.subr.bf16.mxu1 %v2311_v1 }
 0x1da   : > { %2728 = vmatpush1.bf16.msra.mxu1 %v2310_v34  ;;  %v2399_v2 = vpop.permute.xlu1 %2398  ;;  %v2397_v38 = vpop.permute.xlu0 %2396 }
 0x1db   : > { %v2420_v48 = vsel %vm1014_vm6, %v2397_v38, %v2399_v2 }
 0x1dc   : > { %3245 = vrot.lane.b32.xlu1 %v10812_v36, %s11188_s25  ;;  %3243 = vrot.lane.b32.xlu0 %v11887_v54, %s11188_s25 }
 0x1de   : > { %v2403_v40 = vpop.permute.xlu1 %2402  ;;  %v2401_v43 = vpop.permute.xlu0 %2400 }
 0x1df   : > { %v2421_v45 = vsel %vm1014_vm6, %v2399_v2, %v2401_v43  ;;  %v12117_v43 = vld [vmem:[%s11244_s22 + $0x1c] ss:$60 sps:$4 sm:$0xff]  }
 0x1e0   : > { %3341 = vrot.lane.b32.xlu1 %v11731_v13, %s11189_s26  ;;  %3339 = vrot.lane.b32.xlu0 %v11851_v23, %s11189_s26 }
 0x1e1   : > { %2729 = vmatprep.subr.bf16.mxu1 %v2421_v45 }
 0x1e2   : > { %2730 = vmatpush1.bf16.msra.mxu1 %v2420_v48  ;;  %v2407_v57 = vpop.permute.xlu1 %2406  ;;  %v2405_v58 = vpop.permute.xlu0 %2404 }
 0x1e3   : > { %v2423_v59 = vsel %vm1014_vm6, %v2405_v58, %v2407_v57  ;;  %v2422_v60 = vsel %vm1014_vm6, %v2403_v40, %v2405_v58  ;;  %v10830_v40 = vld [vmem:[%s11244_s22 + $0x180] ss:$60 sps:$4 sm:$0xff]   ;;  %v10831_v58 = vld [vmem:[%s11244_s22 + $0x18] ss:$60 sps:$4 sm:$0xff]  }
 0x1e4   : > { %3345 = vrot.lane.b32.xlu1 %v11867_v33, %s11189_s26  ;;  %3343 = vrot.lane.b32.xlu0 %v10813_v55, %s11189_s26 }
 0x1e5   : > { %2731 = vmatprep.subr.bf16.mxu1 %v2423_v59 }
 0x1e6   : > { %2732 = vmatpush1.bf16.msra.mxu1 %v2422_v60  ;;  %v2411_v62 = vpop.permute.xlu1 %2410  ;;  %v2409_v3 = vpop.permute.xlu0 %2408 }
 0x1e7   : > { %v2424_v9 = vsel %vm1014_vm6, %v2409_v3, %v2411_v62 }
 0x1e8   : > { %3349 = vrot.lane.b32.xlu1 %v10814_v49, %s11189_s26  ;;  %3347 = vrot.lane.b32.xlu0 %v11861_v30, %s11189_s26 }
 0x1ea   : > { %v2415_v5 = vpop.permute.xlu1 %2414  ;;  %v2413_v6 = vpop.permute.xlu0 %2412 }
 0x1eb   : > { %v2425_v8 = vsel %vm1014_vm6, %v2411_v62, %v2413_v6  ;;  %v10832_v62 = vld [vmem:[%s11244_s22 + $0x90] ss:$60 sps:$4 sm:$0xff]  }
 0x1ec   : > { %3353 = vrot.lane.b32.xlu1 %v11871_v35, %s11189_s26  ;;  %3351 = vrot.lane.b32.xlu0 %v11881_v42, %s11189_s26 }
 0x1ed   : > { %2733 = vmatprep.subr.bf16.mxu1 %v2425_v8  ;;  %v12142_v8 = vld [vmem:[%s11244_s22 + $0x94] ss:$60 sps:$4 sm:$0xff]  }
 0x1ee   : > { %2734 = vmatpush1.bf16.msra.mxu1 %v2424_v9  ;;  %v2419_v11 = vpop.permute.xlu1 %2418  ;;  %v2417_v61 = vpop.permute.xlu0 %2416 }
 0x1ef   : > { %v2427_v25 = vsel %vm1014_vm6, %v2417_v61, %v2419_v11  ;;  %v2426_v4 = vsel %vm1014_vm6, %v2415_v5, %v2417_v61  ;;  %v12139_v5 = vld [vmem:[%s11244_s22 + $0x18] ss:$60 sps:$4 sm:$0xff]   ;;  %v12159_v61 = vld [vmem:[%s11244_s22 + $0x10c] ss:$60 sps:$4 sm:$0xff]  }
 0x1f0   : > { %3357 = vrot.lane.b32.xlu1 %v11894_v44, %s11189_s26  ;;  %3355 = vrot.lane.b32.xlu0 %v10820_v56, %s11189_s26  ;;  %v12152_v56 = vld [vmem:[%s11244_s22 + $0x90] ss:$60 sps:$4 sm:$0xff]  }
 0x1f1   : > { %2735 = vmatprep.subr.bf16.mxu1 %v2427_v25 }
 0x1f2   : > { %2736 = vmatpush1.bf16.msra.mxu1 %v2426_v4  ;;  %v2515_v15 = vpop.permute.xlu1 %2514  ;;  %v2513_v16 = vpop.permute.xlu0 %2512  ;;  %v10833_v4 = vld [vmem:[%s11244_s22 + $0x108] ss:$60 sps:$4 sm:$0xff]  }
 0x1f3   : > { %v2536_v21 = vsel %vm1131_vm7, %v2513_v16, %v2515_v15 }
 0x1f4   : > { %3361 = vrot.lane.b32.xlu1 %v10822_v14, %s11189_s26  ;;  %3359 = vrot.lane.b32.xlu0 %v11887_v54, %s11189_s26 }
 0x1f5   : > { %2738 = vmatmul.mubr.bf16.vlgmr.msra.gmra.mrb[16].mxu1 %v11695_v39 }
 0x1f6   : > { %v2519_v17 = vpop.permute.xlu1 %2518  ;;  %2747 = vmatprep.mubr.bf16.mxu1 %v11772_v46  ;;  %v2517_v18 = vpop.permute.xlu0 %2516 }
 0x1f7   : > { %v2537_v19 = vsel %vm1131_vm7, %v2515_v15, %v2517_v18  ;;  %v12167_v15 = vld [vmem:[%s11244_s22 + $0x108] ss:$60 sps:$4 sm:$0xff]  }
 0x1f8   : > { %3457 = vrot.lane.b32.xlu1 %v11731_v13, %s11190_s27  ;;  %3455 = vrot.lane.b32.xlu0 %v11851_v23, %s11190_s27 }
 0x1f9   : > { %2778 = vmatprep.subr.bf16.mxu1 %v2537_v19  ;;  %v10834_v19 = vld [vmem:[%s11244_s22 + $0x180] ss:$60 sps:$4 sm:$0xff]  }
 0x1fa   : > { %2779 = vmatpush1.bf16.msra.mxu1 %v2536_v21  ;;  %v2523_v63 = vpop.permute.xlu1 %2522  ;;  %v2521_v39 = vpop.permute.xlu0 %2520  ;;  %v12178_v21 = vld [vmem:[%s11244_s22 + $0x184] ss:$60 sps:$4 sm:$0xff]  }
 0x1fb   : > { %v2539_v46 = vsel %vm1131_vm7, %v2521_v39, %v2523_v63  ;;  %v2538_v22 = vsel %vm1131_vm7, %v2519_v17, %v2521_v39  ;;  %v12183_v63 = vld [vmem:[%s11244_s22 + $0x180] ss:$60 sps:$4 sm:$0xff]  }
 0x1fc   : > { %3461 = vrot.lane.b32.xlu1 %v11867_v33, %s11190_s27  ;;  %3459 = vrot.lane.b32.xlu0 %v10826_v41, %s11190_s27 }
 0x1fd   : > { %2780 = vmatprep.subr.bf16.mxu1 %v2539_v46  ;;  %2748 = vmatmul.mubr.bf16.gmra.mrb[20].mxu1 %v11780_v52  ;;  %v10829_v52 = vld [vmem:[%s11244_s22 + $0x108] ss:$60 sps:$4 sm:$0xff]  }
 0x1fe   : > { %2781 = vmatpush1.bf16.msra.mxu1 %v2538_v22  ;;  %v2527_v28 = vpop.permute.xlu1 %2526  ;;  %v2525_v29 = vpop.permute.xlu0 %2524  ;;  %2757 = vmatprep.mubr.bf16.mxu1 %v11797_v0 }
 0x1ff   : > { %v2540_v34 = vsel %vm1131_vm7, %v2525_v29, %v2527_v28 }
 0x200   : > { %3465 = vrot.lane.b32.xlu1 %v10827_v27, %s11190_s27  ;;  %3463 = vrot.lane.b32.xlu0 %v11861_v30, %s11190_s27 }
 0x202   : > { %v2531_v50 = vpop.permute.xlu1 %2530  ;;  %v2529_v31 = vpop.permute.xlu0 %2528 }
 0x203   : > { %v2541_v1 = vsel %vm1131_vm7, %v2527_v28, %v2529_v31  ;;  %v10835_v28 = vld [vmem:[%s11244_s22 + $0x18] ss:$60 sps:$4 sm:$0xff]   ;;  %v10836_v31 = vld [vmem:[%s11244_s22 + $0x90] ss:$60 sps:$4 sm:$0xff]  }
 0x204   : > { %3469 = vrot.lane.b32.xlu1 %v11871_v35, %s11190_s27  ;;  %3467 = vrot.lane.b32.xlu0 %v11881_v42, %s11190_s27 }
 0x205   : > { %2782 = vmatprep.subr.bf16.mxu1 %v2541_v1  ;;  %2758 = vmatmul.mubr.bf16.gmra.mrb[24].mxu1 %v11803_v53 }
 0x206   : > { %2783 = vmatpush1.bf16.msra.mxu1 %v2540_v34  ;;  %v2535_v0 = vpop.permute.xlu1 %2534  ;;  %v2533_v36 = vpop.permute.xlu0 %2532  ;;  %2767 = vmatprep.mubr.bf16.mxu1 %v11819_v10 }
 0x207   : > { %v2543_v2 = vsel %vm1131_vm7, %v2533_v36, %v2535_v0  ;;  %v2542_v38 = vsel %vm1131_vm7, %v2531_v50, %v2533_v36 }
 0x208   : > { %3473 = vrot.lane.b32.xlu1 %v11894_v44, %s11190_s27  ;;  %3471 = vrot.lane.b32.xlu0 %v10829_v52, %s11190_s27 }
 0x209   : > { %2784 = vmatprep.subr.bf16.mxu1 %v2543_v2  ;;  %v10838_v2 = vld [vmem:[%s11244_s22 + $0x180] ss:$60 sps:$4 sm:$0xff]  }
 0x20a   : > { %2785 = vmatpush1.bf16.msra.mxu1 %v2542_v38  ;;  %v2994_v45 = vpop.permute.xlu1 %2993  ;;  %v2992_v48 = vpop.permute.xlu0 %2991 }
 0x20b   : > { %5214 = vmatprep.subr.bf16.mxu1 %v12117_v43  ;;  %v3015_v57 = vsel %vm312_vm0, %v2992_v48, %v2994_v45 }
 0x20c   : > { %3477 = vrot.lane.b32.xlu1 %v10830_v40, %s11190_s27  ;;  %3475 = vrot.lane.b32.xlu0 %v11887_v54, %s11190_s27  ;;  %v10839_v40 = vld [vmem:[%s11244_s22 + $0x14] ss:$60 sps:$4 sm:$0xff]  }
 0x20d   : > { %2768 = vmatmul.mubr.bf16.gmra.mrb[28].mxu1 %v11829_v12 }
 0x20e   : > { %v2998_v53 = vpop.permute.xlu1 %2997  ;;  %v2996_v55 = vpop.permute.xlu0 %2995  ;;  %2810 = vmatprep.mubr.bf16.mxu1 %v11194_v24 }
 0x20f   : > { %v3016_v10 = vsel %vm312_vm0, %v2994_v45, %v2996_v55  ;;  %v10843_v55 = vld [vmem:[%s11244_s22 + $0x88] ss:$60 sps:$4 sm:$0xff]  }
 0x210   : > { %3573 = vrot.lane.b32.xlu1 %v11731_v13, %s11191_s28  ;;  %3571 = vrot.lane.b32.xlu0 %v11851_v23, %s11191_s28 }
 0x211   : > { %3931 = vmatprep.subr.bf16.mxu0 %v3016_v10 }
 0x212   : > { %3932 = vmatpush1.bf16.msra.mxu0 %v3015_v57  ;;  %v3002_v59 = vpop.permute.xlu1 %3001  ;;  %v3000_v60 = vpop.permute.xlu0 %2999  ;;  %v10845_v57 = vld [vmem:[%s11244_s22 + $0x18] ss:$60 sps:$4 sm:$0xff]  }
 0x213   : > { %v3018_v12 = vsel %vm312_vm0, %v3000_v60, %v3002_v59  ;;  %v3017_v49 = vsel %vm312_vm0, %v2998_v53, %v3000_v60 }
 0x214   : > { %3577 = vrot.lane.b32.xlu1 %v11867_v33, %s11191_s28  ;;  %3575 = vrot.lane.b32.xlu0 %v10831_v58, %s11191_s28 }
 0x215   : > { %3933 = vmatprep.subr.bf16.mxu0 %v3018_v12  ;;  %9859 = vmatmul.mubr.msk.bf16.vlgmr.msra.gmra.mrb[16].mxu1 %vm1328_vm8, %v11845_v20  ;;  %v10846_v12 = vld [vmem:[%s11244_s22 + $0x90] ss:$60 sps:$4 sm:$0xff]  }
 0x216   : > { %3934 = vmatpush1.bf16.msra.mxu0 %v3017_v49  ;;  %v3006_v3 = vpop.permute.xlu1 %3005  ;;  %v3004_v6 = vpop.permute.xlu0 %3003  ;;  %5215 = vmatpush1.bf16.msra.mxu1 %v12139_v5  ;;  %v10847_v49 = vld [vmem:[%s11244_s22 + $0x8c] ss:$60 sps:$4 sm:$0xff]  }
 0x217   : > { %5216 = vmatprep.subr.bf16.mxu1 %v12142_v8  ;;  %2820 = vmatprep.mubr.bf16.mxu1 %v11194_v24  ;;  %v3019_v25 = vsel %vm312_vm0, %v3004_v6, %v3006_v3  ;;  %v10849_v6 = vld [vmem:[%s11244_s22 + $0x104] ss:$60 sps:$4 sm:$0xff]  }
 0x218   : > { %3581 = vrot.lane.b32.xlu1 %v10832_v62, %s11191_s28  ;;  %3579 = vrot.lane.b32.xlu0 %v11861_v30, %s11191_s28 }
 0x21a   : > { %v3010_v9 = vpop.permute.xlu1 %3009  ;;  %v3008_v11 = vpop.permute.xlu0 %3007  ;;  %5217 = vmatpush1.bf16.msra.mxu1 %v12152_v56 }
 0x21b   : > { %v3020_v20 = vsel %vm312_vm0, %v3006_v3, %v3008_v11  ;;  %5218 = vmatprep.subr.bf16.mxu1 %v12159_v61 }
 0x21c   : > { %3585 = vrot.lane.b32.xlu1 %v11871_v35, %s11191_s28  ;;  %3583 = vrot.lane.b32.xlu0 %v11881_v42, %s11191_s28 }
 0x21d   : > { %3935 = vmatprep.subr.bf16.mxu0 %v3020_v20  ;;  %9860 = vmatmul.mubr.msk.bf16.gmra.mrb[20].mxu1 %vm1328_vm8, %v11987_v51 }
 0x21e   : > { %3936 = vmatpush1.bf16.msra.mxu0 %v3019_v25  ;;  %v3014_v14 = vpop.permute.xlu1 %3013  ;;  %v3012_v16 = vpop.permute.xlu0 %3011  ;;  %5219 = vmatpush1.bf16.msra.mxu1 %v12167_v15 }
 0x21f   : > { %v3022_v17 = vsel %vm312_vm0, %v3012_v16, %v3014_v14  ;;  %v3021_v18 = vsel %vm312_vm0, %v3010_v9, %v3012_v16  ;;  %5220 = vmatprep.subr.bf16.mxu1 %v12178_v21  ;;  %2830 = vmatprep.mubr.bf16.mxu1 %v11194_v24  ;;  %v10851_v9 = vld [vmem:[%s11244_s22 + $0x100] ss:$60 sps:$4 sm:$0xff]   ;;  %v10854_v16 = vld [vmem:[%s11244_s22 + $0x108] ss:$60 sps:$4 sm:$0xff]  }
 0x220   : > { %3589 = vrot.lane.b32.xlu1 %v11894_v44, %s11191_s28  ;;  %3587 = vrot.lane.b32.xlu0 %v10833_v4, %s11191_s28  ;;  %v10852_v4 = vld [vmem:[%s11244_s22 + $0x178] ss:$60 sps:$4 sm:$0xff]  }
 0x221   : > { %3937 = vmatprep.subr.bf16.mxu0 %v3022_v17 }
 0x222   : > { %3938 = vmatpush1.bf16.msra.mxu0 %v3021_v18  ;;  %v3110_v41 = vpop.permute.xlu1 %3109  ;;  %v3108_v51 = vpop.permute.xlu0 %3107  ;;  %5221 = vmatpush1.bf16.msra.mxu1 %v12183_v63 }
 0x223   : > { %v3131_v27 = vsel %vm429_vm1, %v3108_v51, %v3110_v41  ;;  %v10856_v51 = vld [vmem:[%s11244_s22 + $0x180] ss:$60 sps:$4 sm:$0xff]  }
 0x224   : > { %3593 = vrot.lane.b32.xlu1 %v10834_v19, %s11191_s28  ;;  %3591 = vrot.lane.b32.xlu0 %v11887_v54, %s11191_s28 }
 0x225   : > { %9861 = vmatmul.mubr.msk.bf16.gmra.mrb[24].mxu1 %vm1328_vm8, %v12002_v37 }
 0x226   : > { %v3114_v39 = vpop.permute.xlu1 %3113  ;;  %v3112_v46 = vpop.permute.xlu0 %3111  ;;  %2840 = vmatprep.mubr.bf16.mxu1 %v11194_v24 }
 0x227   : > { %v3132_v22 = vsel %vm429_vm1, %v3110_v41, %v3112_v46 }
 0x228   : > { %3689 = vrot.lane.b32.xlu1 %v11731_v13, %s11192_s29  ;;  %3687 = vrot.lane.b32.xlu0 %v11851_v23, %s11192_s29 }
 0x229   : > { %3939 = vmatprep.subr.bf16.mxu0 %v3132_v22 }
 0x22a   : > { %3940 = vmatpush1.bf16.msra.mxu0 %v3131_v27  ;;  %v3118_v29 = vpop.permute.xlu1 %3117  ;;  %v3116_v50 = vpop.permute.xlu0 %3115 }
 0x22b   : > { %v3134_v37 = vsel %vm429_vm1, %v3116_v50, %v3118_v29  ;;  %v3133_v13 = vsel %vm429_vm1, %v3114_v39, %v3116_v50  ;;  %v10857_v39 = vld [vmem:[%s11244_s22 + $0x17c] ss:$60 sps:$4 sm:$0xff]  }
 0x22c   : > { %3693 = vrot.lane.b32.xlu1 %v11867_v33, %s11192_s29  ;;  %3691 = vrot.lane.b32.xlu0 %v10835_v28, %s11192_s29  ;;  %v12265_v28 = vld [vmem:[%s14191_s1 + $0x2c] ss:$20 sps:$4 sm:$0xff]  }
 0x22d   : > { %3941 = vmatprep.subr.bf16.mxu0 %v3134_v37  ;;  %9862 = vmatmul.mubr.msk.bf16.gmra.mrb[28].mxu1 %vm1328_vm8, %v12021_v47  ;;  %v10837_v47 = vld [vmem:[%s11244_s22 + $0x108] ss:$60 sps:$4 sm:$0xff]  }
 0x22e   : > { %3942 = vmatpush1.bf16.msra.mxu0 %v3133_v13  ;;  %v3122_v1 = vpop.permute.xlu1 %3121  ;;  %v3120_v23 = vpop.permute.xlu0 %3119  ;;  %5246 = vmatprep.mubr.bf16.mxu1 %v12030_v26 }
 0x22f   : > { %v3135_v0 = vsel %vm429_vm1, %v3120_v23, %v3122_v1 }
 0x230   : > { %3697 = vrot.lane.b32.xlu1 %v10836_v31, %s11192_s29  ;;  %3695 = vrot.lane.b32.xlu0 %v11861_v30, %s11192_s29 }
 0x232   : > { %v3126_v33 = vpop.permute.xlu1 %3125  ;;  %v3124_v34 = vpop.permute.xlu0 %3123 }
 0x233   : > { %v3136_v52 = vsel %vm429_vm1, %v3122_v1, %v3124_v34 }
 0x234   : > { %3701 = vrot.lane.b32.xlu1 %v11871_v35, %s11192_s29  ;;  %3699 = vrot.lane.b32.xlu0 %v11881_v42, %s11192_s29 }
 0x235   : > { %3943 = vmatprep.subr.bf16.mxu0 %v3136_v52 }
 0x236   : > { %3944 = vmatpush1.bf16.msra.mxu0 %v3135_v0  ;;  %v3130_v26 = vpop.permute.xlu1 %3129  ;;  %v3128_v36 = vpop.permute.xlu0 %3127  ;;  %v12284_v0 = vld [vmem:[%s14191_s1 + $0x28] ss:$20 sps:$4 sm:$0xff]  }
 0x237   : > { %v3138_v30 = vsel %vm429_vm1, %v3128_v36, %v3130_v26  ;;  %v3137_v35 = vsel %vm429_vm1, %v3126_v33, %v3128_v36  ;;  %v10864_v33 = vld [vmem:[%s11244_s22 + $0x98] ss:$60 sps:$4 sm:$0xff]  }
 0x238   : > { %3705 = vrot.lane.b32.xlu1 %v11894_v44, %s11192_s29  ;;  %3703 = vrot.lane.b32.xlu0 %v10837_v47, %s11192_s29  ;;  %v10841_v44 = vld [vmem:[%s11244_s22 + $0x10] ss:$60 sps:$4 sm:$0xff]   ;;  %v12291_v47 = vld [vmem:[%s14191_s1 + $0x54] ss:$20 sps:$4 sm:$0xff]  }
 0x239   : > { %3945 = vmatprep.subr.bf16.mxu0 %v3138_v30 }
 0x23a   : > { %3946 = vmatpush1.bf16.msra.mxu0 %v3137_v35  ;;  %v3226_v42 = vpop.permute.xlu1 %3225  ;;  %v3224_v38 = vpop.permute.xlu0 %3223 }
 0x23b   : > { %v3247_v10 = vsel %vm546_vm2, %v3224_v38, %v3226_v42 }
 0x23c   : > { %3709 = vrot.lane.b32.xlu1 %v10838_v2, %s11192_s29  ;;  %3707 = vrot.lane.b32.xlu0 %v11887_v54, %s11192_s29  ;;  %v10871_v2 = vld [vmem:[%s11244_s22 + $0x110] ss:$60 sps:$4 sm:$0xff]  }
 0x23e   : > { %v3230_v45 = vpop.permute.xlu1 %3229  ;;  %v3228_v48 = vpop.permute.xlu0 %3227 }
 0x23f   : > { %v3248_v53 = vsel %vm546_vm2, %v3226_v42, %v3228_v48  ;;  %v10872_v48 = vld [vmem:[%s11244_s22 + $0x188] ss:$60 sps:$4 sm:$0xff]  }
 0x240   : > { %3805 = vrot.lane.b32.xlu1 %v10839_v40, %s11193_s6  ;;  %3803 = vrot.lane.b32.xlu0 %v10841_v44, %s11193_s6  ;;  %v12306_v40 = vld [vmem:[%s14191_s1 + $0x50] ss:$20 sps:$4 sm:$0xff]  }
 0x241   : > { %3947 = vmatprep.subr.bf16.mxu0 %v3248_v53  ;;  %v12317_v53 = vld [vmem:[%s14191_s1 + $0x7c] ss:$20 sps:$4 sm:$0xff]  }
 0x242   : > { %3948 = vmatpush1.bf16.msra.mxu0 %v3247_v10  ;;  %v3234_v54 = vpop.permute.xlu1 %3233  ;;  %v3232_v58 = vpop.permute.xlu0 %3231 }
 0x243   : > { %v3250_v59 = vsel %vm546_vm2, %v3232_v58, %v3234_v54  ;;  %v3249_v60 = vsel %vm546_vm2, %v3230_v45, %v3232_v58  ;;  %v12327_v58 = vld [vmem:[%s14191_s1 + $0x78] ss:$20 sps:$4 sm:$0xff]  }
 0x244   : > { %3809 = vrot.lane.b32.xlu1 %v10843_v55, %s11193_s6  ;;  %3807 = vrot.lane.b32.xlu0 %v10845_v57, %s11193_s6 }
 0x245   : > { %3949 = vmatprep.subr.bf16.mxu0 %v3250_v59 }
 0x246   : > { %3950 = vmatpush1.bf16.msra.mxu0 %v3249_v60  ;;  %v3238_v62 = vpop.permute.xlu1 %3237  ;;  %v3236_v3 = vpop.permute.xlu0 %3235 }
 0x247   : > { %v3251_v14 = vsel %vm546_vm2, %v3236_v3, %v3238_v62 }
 0x248   : > { %3813 = vrot.lane.b32.xlu1 %v10846_v12, %s11193_s6  ;;  %3811 = vrot.lane.b32.xlu0 %v10847_v49, %s11193_s6  ;;  %v10874_v12 = vld [vmem:[%s11244_s22 + $0x20] ss:$60 sps:$4 sm:$0xff]  }
 0x24a   : > { %v3242_v11 = vpop.permute.xlu1 %3241  ;;  %v3240_v20 = vpop.permute.xlu0 %3239 }
 0x24b   : > { %v3252_v25 = vsel %vm546_vm2, %v3238_v62, %v3240_v20 }
 0x24c   : > { %3817 = vrot.lane.b32.xlu1 %v10849_v6, %s11193_s6  ;;  %3815 = vrot.lane.b32.xlu0 %v10851_v9, %s11193_s6  ;;  %v10875_v9 = vld [vmem:[%s11244_s22 + $0x98] ss:$60 sps:$4 sm:$0xff]  }
 0x24d   : > { %3951 = vmatprep.subr.bf16.mxu0 %v3252_v25 }
 0x24e   : > { %3952 = vmatpush1.bf16.msra.mxu0 %v3251_v14  ;;  %v3246_v17 = vpop.permute.xlu1 %3245  ;;  %v3244_v18 = vpop.permute.xlu0 %3243 }
 0x24f   : > { %v3254_v19 = vsel %vm546_vm2, %v3244_v18, %v3246_v17  ;;  %v3253_v41 = vsel %vm546_vm2, %v3242_v11, %v3244_v18 }
 0x250   : > { %3821 = vrot.lane.b32.xlu1 %v10852_v4, %s11193_s6  ;;  %3819 = vrot.lane.b32.xlu0 %v10854_v16, %s11193_s6  ;;  %v10876_v16 = vld [vmem:[%s11244_s22 + $0x110] ss:$60 sps:$4 sm:$0xff]  }
 0x251   : > { %3953 = vmatprep.subr.bf16.mxu0 %v3254_v19 }
 0x252   : > { %3954 = vmatpush1.bf16.msra.mxu0 %v3253_v41  ;;  %v3342_v46 = vpop.permute.xlu1 %3341  ;;  %v3340_v22 = vpop.permute.xlu0 %3339 }
 0x253   : > { %v3363_v37 = vsel %vm663_vm3, %v3340_v22, %v3342_v46 }
 0x254   : > { %3825 = vrot.lane.b32.xlu1 %v10856_v51, %s11193_s6  ;;  %3823 = vrot.lane.b32.xlu0 %v10857_v39, %s11193_s6  ;;  %v10877_v51 = vld [vmem:[%s11244_s22 + $0x188] ss:$60 sps:$4 sm:$0xff]  }
 0x255   : > { %3956 = vmatmul.mubr.bf16.vlgmr.msra.gmra.mrb[16].mxu0 %v11909_v7  ;;  %v10863_v7 = vld [vmem:[%s11244_s22 + $0x20] ss:$60 sps:$4 sm:$0xff]  }
 0x256   : > { %v3346_v27 = vpop.permute.xlu1 %3345  ;;  %3965 = vmatprep.mubr.bf16.mxu0 %v12265_v28  ;;  %v3344_v29 = vpop.permute.xlu0 %3343 }
 0x257   : > { %v3364_v50 = vsel %vm663_vm3, %v3342_v46, %v3344_v29 }
 0x258   : > { %4284 = vrot.lane.b32.xlu1 %v12117_v43, %s11186_s23  ;;  %4282 = vrot.lane.b32.xlu0 %v12139_v5, %s11186_s23 }
 0x259   : > { %3996 = vmatprep.subr.bf16.mxu0 %v3364_v50 }
 0x25a   : > { %3997 = vmatpush1.bf16.msra.mxu0 %v3363_v37  ;;  %v3350_v13 = vpop.permute.xlu1 %3349  ;;  %v3348_v31 = vpop.permute.xlu0 %3347  ;;  %v10878_v37 = vld [vmem:[%s11244_s22 + $0x20] ss:$60 sps:$4 sm:$0xff]  }
 0x25b   : > { %v3366_v1 = vsel %vm663_vm3, %v3348_v31, %v3350_v13  ;;  %v3365_v23 = vsel %vm663_vm3, %v3346_v27, %v3348_v31 }
 0x25c   : > { %4288 = vrot.lane.b32.xlu1 %v12152_v56, %s11186_s23  ;;  %4286 = vrot.lane.b32.xlu0 %v10863_v7, %s11186_s23 }
 0x25d   : > { %3998 = vmatprep.subr.bf16.mxu0 %v3366_v1  ;;  %3966 = vmatmul.mubr.bf16.gmra.mrb[20].mxu0 %v12284_v0 }
 0x25e   : > { %3999 = vmatpush1.bf16.msra.mxu0 %v3365_v23  ;;  %v3354_v34 = vpop.permute.xlu1 %3353  ;;  %v3352_v52 = vpop.permute.xlu0 %3351  ;;  %3975 = vmatprep.mubr.bf16.mxu0 %v12291_v47  ;;  %v10879_v23 = vld [vmem:[%s11244_s22 + $0x98] ss:$60 sps:$4 sm:$0xff]  }
 0x25f   : > { %v3367_v35 = vsel %vm663_vm3, %v3352_v52, %v3354_v34 }
 0x260   : > { %4292 = vrot.lane.b32.xlu1 %v10864_v33, %s11186_s23  ;;  %4290 = vrot.lane.b32.xlu0 %v12142_v8, %s11186_s23 }
 0x262   : > { %v3358_v26 = vpop.permute.xlu1 %3357  ;;  %v3356_v36 = vpop.permute.xlu0 %3355 }
 0x263   : > { %v3368_v30 = vsel %vm663_vm3, %v3354_v34, %v3356_v36 }
 0x264   : > { %4296 = vrot.lane.b32.xlu1 %v12159_v61, %s11186_s23  ;;  %4294 = vrot.lane.b32.xlu0 %v12167_v15, %s11186_s23 }
 0x265   : > { %4000 = vmatprep.subr.bf16.mxu0 %v3368_v30  ;;  %3976 = vmatmul.mubr.bf16.gmra.mrb[24].mxu0 %v12306_v40 }
 0x266   : > { %4001 = vmatpush1.bf16.msra.mxu0 %v3367_v35  ;;  %v3362_v42 = vpop.permute.xlu1 %3361  ;;  %v3360_v38 = vpop.permute.xlu0 %3359  ;;  %3985 = vmatprep.mubr.bf16.mxu0 %v12317_v53  ;;  %v10880_v35 = vld [vmem:[%s11244_s22 + $0x110] ss:$60 sps:$4 sm:$0xff]  }
 0x267   : > { %v3370_v44 = vsel %vm663_vm3, %v3360_v38, %v3362_v42  ;;  %v3369_v45 = vsel %vm663_vm3, %v3358_v26, %v3360_v38 }
 0x268   : > { %4300 = vrot.lane.b32.xlu1 %v12183_v63, %s11186_s23  ;;  %4298 = vrot.lane.b32.xlu0 %v10871_v2, %s11186_s23 }
 0x269   : > { %4002 = vmatprep.subr.bf16.mxu0 %v3370_v44 }
 0x26a   : > { %4003 = vmatpush1.bf16.msra.mxu0 %v3369_v45  ;;  %v3458_v55 = vpop.permute.xlu1 %3457  ;;  %v3456_v10 = vpop.permute.xlu0 %3455  ;;  %v10881_v45 = vld [vmem:[%s11244_s22 + $0x188] ss:$60 sps:$4 sm:$0xff]  }
 0x26b   : > { %v3479_v60 = vsel %vm780_vm4, %v3456_v10, %v3458_v55 }
 0x26c   : > { %4304 = vrot.lane.b32.xlu1 %v10872_v48, %s11186_s23  ;;  %4302 = vrot.lane.b32.xlu0 %v12178_v21, %s11186_s23 }
 0x26d   : > { %3986 = vmatmul.mubr.bf16.gmra.mrb[28].mxu0 %v12327_v58 }
 0x26e   : > { %v3462_v57 = vpop.permute.xlu1 %3461  ;;  %v3460_v54 = vpop.permute.xlu0 %3459  ;;  %4028 = vmatprep.mubr.bf16.mxu0 %v11956_v32 }
 0x26f   : > { %v3480_v59 = vsel %vm780_vm4, %v3458_v55, %v3460_v54 }
 0x270   : > { %4400 = vrot.lane.b32.xlu1 %v12117_v43, %s11187_s24  ;;  %4398 = vrot.lane.b32.xlu0 %v12139_v5, %s11187_s24 }
 0x271   : > { %4004 = vmatprep.subr.bf16.mxu0 %v3480_v59 }
 0x272   : > { %4005 = vmatpush1.bf16.msra.mxu0 %v3479_v60  ;;  %v3466_v49 = vpop.permute.xlu1 %3465  ;;  %v3464_v62 = vpop.permute.xlu0 %3463  ;;  %v10882_v60 = vld [vmem:[%s11244_s22 + $0x20] ss:$60 sps:$4 sm:$0xff]  }
 0x273   : > { %v3482_v3 = vsel %vm780_vm4, %v3464_v62, %v3466_v49  ;;  %v3481_v6 = vsel %vm780_vm4, %v3462_v57, %v3464_v62 }
 0x274   : > { %4404 = vrot.lane.b32.xlu1 %v12152_v56, %s11187_s24  ;;  %4402 = vrot.lane.b32.xlu0 %v10874_v12, %s11187_s24 }
 0x275   : > { %4006 = vmatprep.subr.bf16.mxu0 %v3482_v3 }
 0x276   : > { %4007 = vmatpush1.bf16.msra.mxu0 %v3481_v6  ;;  %v3470_v32 = vpop.permute.xlu1 %3469  ;;  %v3468_v11 = vpop.permute.xlu0 %3467  ;;  %v10883_v6 = vld [vmem:[%s11244_s22 + $0x98] ss:$60 sps:$4 sm:$0xff]  }
 0x277   : > { %v3483_v14 = vsel %vm780_vm4, %v3468_v11, %v3470_v32 }
 0x278   : > { %4408 = vrot.lane.b32.xlu1 %v10875_v9, %s11187_s24  ;;  %4406 = vrot.lane.b32.xlu0 %v12142_v8, %s11187_s24 }
 0x27a   : > { %v3474_v20 = vpop.permute.xlu1 %3473  ;;  %v3472_v25 = vpop.permute.xlu0 %3471 }
 0x27b   : > { %v3484_v4 = vsel %vm780_vm4, %v3470_v32, %v3472_v25 }
 0x27c   : > { %4412 = vrot.lane.b32.xlu1 %v12159_v61, %s11187_s24  ;;  %4410 = vrot.lane.b32.xlu0 %v12167_v15, %s11187_s24 }
 0x27d   : > { %4008 = vmatprep.subr.bf16.mxu0 %v3484_v4 }
 0x27e   : > { %4009 = vmatpush1.bf16.msra.mxu0 %v3483_v14  ;;  %v3478_v17 = vpop.permute.xlu1 %3477  ;;  %v3476_v18 = vpop.permute.xlu0 %3475  ;;  %v10884_v14 = vld [vmem:[%s11244_s22 + $0x110] ss:$60 sps:$4 sm:$0xff]  }
 0x27f   : > { %v3486_v19 = vsel %vm780_vm4, %v3476_v18, %v3478_v17  ;;  %v3485_v41 = vsel %vm780_vm4, %v3474_v20, %v3476_v18 }
 0x280   : > { %4416 = vrot.lane.b32.xlu1 %v12183_v63, %s11187_s24  ;;  %4414 = vrot.lane.b32.xlu0 %v10876_v16, %s11187_s24 }
 0x281   : > { %4010 = vmatprep.subr.bf16.mxu0 %v3486_v19 }
 0x282   : > { %4011 = vmatpush1.bf16.msra.mxu0 %v3485_v41  ;;  %v3574_v39 = vpop.permute.xlu1 %3573  ;;  %v3572_v46 = vpop.permute.xlu0 %3571  ;;  %v10885_v41 = vld [vmem:[%s11244_s22 + $0x188] ss:$60 sps:$4 sm:$0xff]  }
 0x283   : > { %v3595_v50 = vsel %vm897_vm5, %v3572_v46, %v3574_v39  ;;  %v12430_v46 = vld [vmem:[%s14191_s1 + $0x8] ss:$20 sps:$4 sm:$0xff]  }
 0x284   : > { %4420 = vrot.lane.b32.xlu1 %v10877_v51, %s11187_s24  ;;  %4418 = vrot.lane.b32.xlu0 %v12178_v21, %s11187_s24 }
 0x286   : > { %v3578_v22 = vpop.permute.xlu1 %3577  ;;  %v3576_v27 = vpop.permute.xlu0 %3575 }
 0x287   : > { %v3596_v29 = vsel %vm897_vm5, %v3574_v39, %v3576_v27  ;;  %v12436_v27 = vld [vmem:[%s14191_s1 + $0x34] ss:$20 sps:$4 sm:$0xff]  }
 0x288   : > { %4516 = vrot.lane.b32.xlu1 %v12117_v43, %s11188_s25  ;;  %4514 = vrot.lane.b32.xlu0 %v12139_v5, %s11188_s25 }
 0x289   : > { %4012 = vmatprep.subr.bf16.mxu0 %v3596_v29 }
 0x28a   : > { %4013 = vmatpush1.bf16.msra.mxu0 %v3595_v50  ;;  %v3582_v7 = vpop.permute.xlu1 %3581  ;;  %v3580_v13 = vpop.permute.xlu0 %3579 }
 0x28b   : > { %v3598_v31 = vsel %vm897_vm5, %v3580_v13, %v3582_v7  ;;  %v3597_v1 = vsel %vm897_vm5, %v3578_v22, %v3580_v13  ;;  %v10886_v7 = vld [vmem:[%s11244_s22 + $0x20] ss:$60 sps:$4 sm:$0xff]  }
 0x28c   : > { %4520 = vrot.lane.b32.xlu1 %v12152_v56, %s11188_s25  ;;  %4518 = vrot.lane.b32.xlu0 %v10878_v37, %s11188_s25 }
 0x28d   : > { %4014 = vmatprep.subr.bf16.mxu0 %v3598_v31 }
 0x28e   : > { %4015 = vmatpush1.bf16.msra.mxu0 %v3597_v1  ;;  %v3586_v33 = vpop.permute.xlu1 %3585  ;;  %v3584_v34 = vpop.permute.xlu0 %3583 }
 0x28f   : > { %v3599_v30 = vsel %vm897_vm5, %v3584_v34, %v3586_v33 }
 0x290   : > { %4524 = vrot.lane.b32.xlu1 %v10879_v23, %s11188_s25  ;;  %4522 = vrot.lane.b32.xlu0 %v12142_v8, %s11188_s25 }
 0x292   : > { %v3590_v52 = vpop.permute.xlu1 %3589  ;;  %v3588_v26 = vpop.permute.xlu0 %3587 }
 0x293   : > { %v3600_v36 = vsel %vm897_vm5, %v3586_v33, %v3588_v26  ;;  %v10887_v33 = vld [vmem:[%s11244_s22 + $0x98] ss:$60 sps:$4 sm:$0xff]   ;;  %v12455_v26 = vld [vmem:[%s14191_s1 + $0x30] ss:$20 sps:$4 sm:$0xff]  }
 0x294   : > { %4528 = vrot.lane.b32.xlu1 %v12159_v61, %s11188_s25  ;;  %4526 = vrot.lane.b32.xlu0 %v12167_v15, %s11188_s25 }
 0x295   : > { %4016 = vmatprep.subr.bf16.mxu0 %v3600_v36  ;;  %v12462_v36 = vld [vmem:[%s14191_s1 + $0x5c] ss:$20 sps:$4 sm:$0xff]  }
 0x296   : > { %4017 = vmatpush1.bf16.msra.mxu0 %v3599_v30  ;;  %v3594_v2 = vpop.permute.xlu1 %3593  ;;  %v3592_v42 = vpop.permute.xlu0 %3591 }
 0x297   : > { %v3602_v38 = vsel %vm897_vm5, %v3592_v42, %v3594_v2  ;;  %v3601_v44 = vsel %vm897_vm5, %v3590_v52, %v3592_v42 }
 0x298   : > { %4532 = vrot.lane.b32.xlu1 %v12183_v63, %s11188_s25  ;;  %4530 = vrot.lane.b32.xlu0 %v10880_v35, %s11188_s25 }
 0x299   : > { %4018 = vmatprep.subr.bf16.mxu0 %v3602_v38  ;;  %v10888_v38 = vld [vmem:[%s11244_s22 + $0x110] ss:$60 sps:$4 sm:$0xff]  }
 0x29a   : > { %4019 = vmatpush1.bf16.msra.mxu0 %v3601_v44  ;;  %v3690_v48 = vpop.permute.xlu1 %3689  ;;  %v3688_v55 = vpop.permute.xlu0 %3687 }
 0x29b   : > { %v3711_v59 = vsel %vm1014_vm6, %v3688_v55, %v3690_v48 }
 0x29c   : > { %4536 = vrot.lane.b32.xlu1 %v10881_v45, %s11188_s25  ;;  %4534 = vrot.lane.b32.xlu0 %v12178_v21, %s11188_s25 }
 0x29e   : > { %v3694_v10 = vpop.permute.xlu1 %3693  ;;  %v3692_v57 = vpop.permute.xlu0 %3691 }
 0x29f   : > { %v3712_v54 = vsel %vm1014_vm6, %v3690_v48, %v3692_v57  ;;  %v12477_v48 = vld [vmem:[%s14191_s1 + $0x58] ss:$20 sps:$4 sm:$0xff]   ;;  %v10889_v57 = vld [vmem:[%s11244_s22 + $0x188] ss:$60 sps:$4 sm:$0xff]  }
 0x2a0   : > { %4632 = vrot.lane.b32.xlu1 %v12117_v43, %s11189_s26  ;;  %4630 = vrot.lane.b32.xlu0 %v12139_v5, %s11189_s26 }
 0x2a1   : > { %4020 = vmatprep.subr.bf16.mxu0 %v3712_v54  ;;  %v12488_v54 = vld [vmem:[%s14191_s1 + $0x84] ss:$20 sps:$4 sm:$0xff]  }
 0x2a2   : > { %4021 = vmatpush1.bf16.msra.mxu0 %v3711_v59  ;;  %v3698_v12 = vpop.permute.xlu1 %3697  ;;  %v3696_v49 = vpop.permute.xlu0 %3695  ;;  %v12493_v59 = vld [vmem:[%s11244_s22 + $0x24] ss:$60 sps:$4 sm:$0xff]  }
 0x2a3   : > { %v3714_v62 = vsel %vm1014_vm6, %v3696_v49, %v3698_v12  ;;  %v3713_v3 = vsel %vm1014_vm6, %v3694_v10, %v3696_v49 }
 0x2a4   : > { %4636 = vrot.lane.b32.xlu1 %v12152_v56, %s11189_s26  ;;  %4634 = vrot.lane.b32.xlu0 %v10882_v60, %s11189_s26 }
 0x2a5   : > { %4022 = vmatprep.subr.bf16.mxu0 %v3714_v62 }
 0x2a6   : > { %4023 = vmatpush1.bf16.msra.mxu0 %v3713_v3  ;;  %v3702_v9 = vpop.permute.xlu1 %3701  ;;  %v3700_v32 = vpop.permute.xlu0 %3699  ;;  %v12502_v3 = vld [vmem:[%s14191_s1 + $0x80] ss:$20 sps:$4 sm:$0xff]  }
 0x2a7   : > { %v3715_v4 = vsel %vm1014_vm6, %v3700_v32, %v3702_v9  ;;  %v10890_v32 = vld [vmem:[%s11244_s22 + $0x20] ss:$60 sps:$4 sm:$0xff]  }
 0x2a8   : > { %4640 = vrot.lane.b32.xlu1 %v10883_v6, %s11189_s26  ;;  %4638 = vrot.lane.b32.xlu0 %v12142_v8, %s11189_s26 }
 0x2aa   : > { %v3706_v11 = vpop.permute.xlu1 %3705  ;;  %v3704_v20 = vpop.permute.xlu0 %3703 }
 0x2ab   : > { %v3716_v25 = vsel %vm1014_vm6, %v3702_v9, %v3704_v20 }
 0x2ac   : > { %4644 = vrot.lane.b32.xlu1 %v12159_v61, %s11189_s26  ;;  %4642 = vrot.lane.b32.xlu0 %v12167_v15, %s11189_s26 }
 0x2ad   : > { %4024 = vmatprep.subr.bf16.mxu0 %v3716_v25 }
 0x2ae   : > { %4025 = vmatpush1.bf16.msra.mxu0 %v3715_v4  ;;  %v3710_v16 = vpop.permute.xlu1 %3709  ;;  %v3708_v17 = vpop.permute.xlu0 %3707 }
 0x2af   : > { %v3718_v18 = vsel %vm1014_vm6, %v3708_v17, %v3710_v16  ;;  %v3717_v19 = vsel %vm1014_vm6, %v3706_v11, %v3708_v17  ;;  %v12520_v17 = vld [vmem:[%s11244_s22 + $0x20] ss:$60 sps:$4 sm:$0xff]  }
 0x2b0   : > { %4648 = vrot.lane.b32.xlu1 %v12183_v63, %s11189_s26  ;;  %4646 = vrot.lane.b32.xlu0 %v10884_v14, %s11189_s26  ;;  %v10891_v14 = vld [vmem:[%s11244_s22 + $0x98] ss:$60 sps:$4 sm:$0xff]  }
 0x2b1   : > { %4026 = vmatprep.subr.bf16.mxu0 %v3718_v18 }
 0x2b2   : > { %4027 = vmatpush1.bf16.msra.mxu0 %v3717_v19  ;;  %v3806_v51 = vpop.permute.xlu1 %3805  ;;  %v3804_v39 = vpop.permute.xlu0 %3803  ;;  %v12523_v19 = vld [vmem:[%s11244_s22 + $0x9c] ss:$60 sps:$4 sm:$0xff]  }
 0x2b3   : > { %v3827_v37 = vsel %vm1131_vm7, %v3804_v39, %v3806_v51  ;;  %v12535_v39 = vld [vmem:[%s11244_s22 + $0x98] ss:$60 sps:$4 sm:$0xff]  }
 0x2b4   : > { %4652 = vrot.lane.b32.xlu1 %v10885_v41, %s11189_s26  ;;  %4650 = vrot.lane.b32.xlu0 %v12178_v21, %s11189_s26  ;;  %v11118_v41 = vld [vmem:[%s14191_s1 + $0x10] ss:$20 sps:$4 sm:$0xff]  }
 0x2b5   : > { %4029 = vmatmul.mubr.bf16.vlgmr.msra.gmra.mrb[16].mxu0 %v12430_v46 }
 0x2b6   : > { %v3810_v22 = vpop.permute.xlu1 %3809  ;;  %4038 = vmatprep.mubr.bf16.mxu0 %v12436_v27  ;;  %v3808_v29 = vpop.permute.xlu0 %3807 }
 0x2b7   : > { %v3828_v50 = vsel %vm1131_vm7, %v3806_v51, %v3808_v29 }
 0x2b8   : > { %4748 = vrot.lane.b32.xlu1 %v12117_v43, %s11190_s27  ;;  %4746 = vrot.lane.b32.xlu0 %v12139_v5, %s11190_s27 }
 0x2b9   : > { %4069 = vmatprep.subr.bf16.mxu0 %v3828_v50  ;;  %v12542_v50 = vld [vmem:[%s11244_s22 + $0x114] ss:$60 sps:$4 sm:$0xff]  }
 0x2ba   : > { %4070 = vmatpush1.bf16.msra.mxu0 %v3827_v37  ;;  %v3814_v13 = vpop.permute.xlu1 %3813  ;;  %v3812_v31 = vpop.permute.xlu0 %3811 }
 0x2bb   : > { %v3830_v1 = vsel %vm1131_vm7, %v3812_v31, %v3814_v13  ;;  %v3829_v23 = vsel %vm1131_vm7, %v3810_v22, %v3812_v31  ;;  %v12550_v31 = vld [vmem:[%s11244_s22 + $0x110] ss:$60 sps:$4 sm:$0xff]  }
 0x2bc   : > { %4752 = vrot.lane.b32.xlu1 %v12152_v56, %s11190_s27  ;;  %4750 = vrot.lane.b32.xlu0 %v10886_v7, %s11190_s27  ;;  %v10892_v7 = vld [vmem:[%s11244_s22 + $0x110] ss:$60 sps:$4 sm:$0xff]  }
 0x2bd   : > { %4071 = vmatprep.subr.bf16.mxu0 %v3830_v1  ;;  %4039 = vmatmul.mubr.bf16.gmra.mrb[20].mxu0 %v12455_v26 }
 0x2be   : > { %4072 = vmatpush1.bf16.msra.mxu0 %v3829_v23  ;;  %v3818_v34 = vpop.permute.xlu1 %3817  ;;  %v3816_v52 = vpop.permute.xlu0 %3815  ;;  %4048 = vmatprep.mubr.bf16.mxu0 %v12462_v36  ;;  %v11119_v23 = vld [vmem:[%s14191_s1 + $0x38] ss:$20 sps:$4 sm:$0xff]  }
 0x2bf   : > { %v3831_v42 = vsel %vm1131_vm7, %v3816_v52, %v3818_v34  ;;  %v10893_v52 = vld [vmem:[%s11244_s22 + $0x188] ss:$60 sps:$4 sm:$0xff]  }
 0x2c0   : > { %4756 = vrot.lane.b32.xlu1 %v10887_v33, %s11190_s27  ;;  %4754 = vrot.lane.b32.xlu0 %v12142_v8, %s11190_s27 }
 0x2c2   : > { %v3822_v30 = vpop.permute.xlu1 %3821  ;;  %v3820_v35 = vpop.permute.xlu0 %3819 }
 0x2c3   : > { %v3832_v2 = vsel %vm1131_vm7, %v3818_v34, %v3820_v35 }
 0x2c4   : > { %4760 = vrot.lane.b32.xlu1 %v12159_v61, %s11190_s27  ;;  %4758 = vrot.lane.b32.xlu0 %v12167_v15, %s11190_s27 }
 0x2c5   : > { %4073 = vmatprep.subr.bf16.mxu0 %v3832_v2  ;;  %4049 = vmatmul.mubr.bf16.gmra.mrb[24].mxu0 %v12477_v48  ;;  %v12568_v2 = vld [vmem:[%s11244_s22 + $0x188] ss:$60 sps:$4 sm:$0xff]  }
 0x2c6   : > { %4074 = vmatpush1.bf16.msra.mxu0 %v3831_v42  ;;  %v3826_v44 = vpop.permute.xlu1 %3825  ;;  %v3824_v45 = vpop.permute.xlu0 %3823  ;;  %4058 = vmatprep.mubr.bf16.mxu0 %v12488_v54 }
 0x2c7   : > { %v3834_v55 = vsel %vm1131_vm7, %v3824_v45, %v3826_v44  ;;  %v3833_v10 = vsel %vm1131_vm7, %v3822_v30, %v3824_v45  ;;  %v12563_v30 = vld [vmem:[%s11244_s22 + $0x18c] ss:$60 sps:$4 sm:$0xff]   ;;  %v11120_v45 = vld [vmem:[%s14191_s1 + $0x60] ss:$20 sps:$4 sm:$0xff]  }
 0x2c8   : > { %4764 = vrot.lane.b32.xlu1 %v12183_v63, %s11190_s27  ;;  %4762 = vrot.lane.b32.xlu0 %v10888_v38, %s11190_s27 }
 0x2c9   : > { %4075 = vmatprep.subr.bf16.mxu0 %v3834_v55 }
 0x2ca   : > { %4076 = vmatpush1.bf16.msra.mxu0 %v3833_v10  ;;  %v4285_v60 = vpop.permute.xlu1 %4284  ;;  %v4283_v12 = vpop.permute.xlu0 %4282 }
 0x2cb   : > { %6505 = vmatprep.subr.bf16.mxu0 %v12493_v59  ;;  %v4306_v9 = vsel %vm312_vm0, %v4283_v12, %v4285_v60 }
 0x2cc   : > { %4768 = vrot.lane.b32.xlu1 %v10889_v57, %s11190_s27  ;;  %4766 = vrot.lane.b32.xlu0 %v12178_v21, %s11190_s27  ;;  %v10894_v57 = vld [vmem:[%s11244_s22 + $0x20] ss:$60 sps:$4 sm:$0xff]  }
 0x2cd   : > { %4059 = vmatmul.mubr.bf16.gmra.mrb[28].mxu0 %v12502_v3 }
 0x2ce   : > { %v4289_v49 = vpop.permute.xlu1 %4288  ;;  %v4287_v62 = vpop.permute.xlu0 %4286  ;;  %4101 = vmatprep.mubr.bf16.mxu0 %v11194_v24 }
 0x2cf   : > { %v4307_v6 = vsel %vm312_vm0, %v4285_v60, %v4287_v62  ;;  %v10895_v62 = vld [vmem:[%s11244_s22 + $0x98] ss:$60 sps:$4 sm:$0xff]  }
 0x2d0   : > { %4864 = vrot.lane.b32.xlu1 %v12117_v43, %s11191_s28  ;;  %4862 = vrot.lane.b32.xlu0 %v12139_v5, %s11191_s28 }
 0x2d1   : > { %5222 = vmatprep.subr.bf16.mxu1 %v4307_v6 }
 0x2d2   : > { %5223 = vmatpush1.bf16.msra.mxu1 %v4306_v9  ;;  %v4293_v11 = vpop.permute.xlu1 %4292  ;;  %v4291_v20 = vpop.permute.xlu0 %4290  ;;  %v11121_v9 = vld [vmem:[%s14191_s1 + $0x88] ss:$20 sps:$4 sm:$0xff]  }
 0x2d3   : > { %v4309_v25 = vsel %vm312_vm0, %v4291_v20, %v4293_v11  ;;  %v4308_v4 = vsel %vm312_vm0, %v4289_v49, %v4291_v20 }
 0x2d4   : > { %4868 = vrot.lane.b32.xlu1 %v12152_v56, %s11191_s28  ;;  %4866 = vrot.lane.b32.xlu0 %v10890_v32, %s11191_s28 }
 0x2d5   : > { %5224 = vmatprep.subr.bf16.mxu1 %v4309_v25  ;;  %9967 = vmatmul.mubr.msk.bf16.vlgmr.msra.gmra.mrb[16].mxu0 %vm1328_vm8, %v11118_v41 }
 0x2d6   : > { %5225 = vmatpush1.bf16.msra.mxu1 %v4308_v4  ;;  %v4297_v16 = vpop.permute.xlu1 %4296  ;;  %v4295_v18 = vpop.permute.xlu0 %4294  ;;  %6506 = vmatpush1.bf16.msra.mxu0 %v12520_v17  ;;  %v10896_v4 = vld [vmem:[%s11244_s22 + $0x110] ss:$60 sps:$4 sm:$0xff]  }
 0x2d7   : > { %6507 = vmatprep.subr.bf16.mxu0 %v12523_v19  ;;  %4111 = vmatprep.mubr.bf16.mxu0 %v11194_v24  ;;  %v4310_v37 = vsel %vm312_vm0, %v4295_v18, %v4297_v16  ;;  %v10897_v18 = vld [vmem:[%s11244_s22 + $0x188] ss:$60 sps:$4 sm:$0xff]  }
 0x2d8   : > { %4872 = vrot.lane.b32.xlu1 %v10891_v14, %s11191_s28  ;;  %4870 = vrot.lane.b32.xlu0 %v12142_v8, %s11191_s28 }
 0x2da   : > { %v4301_v51 = vpop.permute.xlu1 %4300  ;;  %v4299_v22 = vpop.permute.xlu0 %4298  ;;  %6508 = vmatpush1.bf16.msra.mxu0 %v12535_v39 }
 0x2db   : > { %v4311_v29 = vsel %vm312_vm0, %v4297_v16, %v4299_v22  ;;  %6509 = vmatprep.subr.bf16.mxu0 %v12542_v50 }
 0x2dc   : > { %4876 = vrot.lane.b32.xlu1 %v12159_v61, %s11191_s28  ;;  %4874 = vrot.lane.b32.xlu0 %v12167_v15, %s11191_s28 }
 0x2dd   : > { %5226 = vmatprep.subr.bf16.mxu1 %v4311_v29  ;;  %9968 = vmatmul.mubr.msk.bf16.gmra.mrb[20].mxu0 %vm1328_vm8, %v11119_v23 }
 0x2de   : > { %5227 = vmatpush1.bf16.msra.mxu1 %v4310_v37  ;;  %v4305_v13 = vpop.permute.xlu1 %4304  ;;  %v4303_v1 = vpop.permute.xlu0 %4302  ;;  %6510 = vmatpush1.bf16.msra.mxu0 %v12550_v31 }
 0x2df   : > { %v4313_v33 = vsel %vm312_vm0, %v4303_v1, %v4305_v13  ;;  %v4312_v34 = vsel %vm312_vm0, %v4301_v51, %v4303_v1  ;;  %6511 = vmatprep.subr.bf16.mxu0 %v12563_v30  ;;  %4121 = vmatprep.mubr.bf16.mxu0 %v11194_v24  ;;  %v10898_v51 = vld [vmem:[%s11244_s22 + $0x1c] ss:$60 sps:$4 sm:$0xff]  }
 0x2e0   : > { %4880 = vrot.lane.b32.xlu1 %v12183_v63, %s11191_s28  ;;  %4878 = vrot.lane.b32.xlu0 %v10892_v7, %s11191_s28  ;;  %v10901_v7 = vld [vmem:[%s11244_s22 + $0x90] ss:$60 sps:$4 sm:$0xff]   ;;  %v10903_v1 = vld [vmem:[%s11244_s22 + $0x20] ss:$60 sps:$4 sm:$0xff]  }
 0x2e1   : > { %5228 = vmatprep.subr.bf16.mxu1 %v4313_v33 }
 0x2e2   : > { %5229 = vmatpush1.bf16.msra.mxu1 %v4312_v34  ;;  %v4401_v35 = vpop.permute.xlu1 %4400  ;;  %v4399_v42 = vpop.permute.xlu0 %4398  ;;  %6512 = vmatpush1.bf16.msra.mxu0 %v12568_v2 }
 0x2e3   : > { %v4422_v10 = vsel %vm429_vm1, %v4399_v42, %v4401_v35 }
 0x2e4   : > { %4884 = vrot.lane.b32.xlu1 %v10893_v52, %s11191_s28  ;;  %4882 = vrot.lane.b32.xlu0 %v12178_v21, %s11191_s28  ;;  %v10904_v52 = vld [vmem:[%s11244_s22 + $0x98] ss:$60 sps:$4 sm:$0xff]  }
 0x2e5   : > { %9969 = vmatmul.mubr.msk.bf16.gmra.mrb[24].mxu0 %vm1328_vm8, %v11120_v45  ;;  %v10908_v45 = vld [vmem:[%s11244_s22 + $0x108] ss:$60 sps:$4 sm:$0xff]  }
 0x2e6   : > { %v4405_v38 = vpop.permute.xlu1 %4404  ;;  %v4403_v44 = vpop.permute.xlu0 %4402  ;;  %4131 = vmatprep.mubr.bf16.mxu0 %v11194_v24 }
 0x2e7   : > { %v4423_v55 = vsel %vm429_vm1, %v4401_v35, %v4403_v44  ;;  %v10905_v35 = vld [vmem:[%s11244_s22 + $0x94] ss:$60 sps:$4 sm:$0xff]   ;;  %v10906_v44 = vld [vmem:[%s11244_s22 + $0x10c] ss:$60 sps:$4 sm:$0xff]  }
 0x2e8   : > { %4980 = vrot.lane.b32.xlu1 %v12117_v43, %s11192_s29  ;;  %4978 = vrot.lane.b32.xlu0 %v12139_v5, %s11192_s29 }
 0x2e9   : > { %5230 = vmatprep.subr.bf16.mxu1 %v4423_v55 }
 0x2ea   : > { %5231 = vmatpush1.bf16.msra.mxu1 %v4422_v10  ;;  %v4409_v60 = vpop.permute.xlu1 %4408  ;;  %v4407_v12 = vpop.permute.xlu0 %4406 }
 0x2eb   : > { %v4425_v49 = vsel %vm429_vm1, %v4407_v12, %v4409_v60  ;;  %v4424_v43 = vsel %vm429_vm1, %v4405_v38, %v4407_v12  ;;  %v10909_v60 = vld [vmem:[%s11244_s22 + $0x28] ss:$60 sps:$4 sm:$0xff]  }
 0x2ec   : > { %4984 = vrot.lane.b32.xlu1 %v12152_v56, %s11192_s29  ;;  %4982 = vrot.lane.b32.xlu0 %v10894_v57, %s11192_s29  ;;  %v11122_v56 = vld [vmem:[%s14191_s1 + $0x4] ss:$20 sps:$4 sm:$0xff]  }
 0x2ed   : > { %5232 = vmatprep.subr.bf16.mxu1 %v4425_v49  ;;  %9970 = vmatmul.mubr.msk.bf16.gmra.mrb[28].mxu0 %vm1328_vm8, %v11121_v9 }
 0x2ee   : > { %5233 = vmatpush1.bf16.msra.mxu1 %v4424_v43  ;;  %v4413_v6 = vpop.permute.xlu1 %4412  ;;  %v4411_v5 = vpop.permute.xlu0 %4410  ;;  %6537 = vmatprep.mubr.bf16.mxu0 %v11122_v56  ;;  %v10916_v56 = vld [vmem:[%s11244_s22 + $0xa0] ss:$60 sps:$4 sm:$0xff]  }
 0x2ef   : > { %v4426_v25 = vsel %vm429_vm1, %v4411_v5, %v4413_v6 }
 0x2f0   : > { %4988 = vrot.lane.b32.xlu1 %v10895_v62, %s11192_s29  ;;  %4986 = vrot.lane.b32.xlu0 %v12142_v8, %s11192_s29 }
 0x2f2   : > { %v4417_v32 = vpop.permute.xlu1 %4416  ;;  %v4415_v11 = vpop.permute.xlu0 %4414 }
 0x2f3   : > { %v4427_v20 = vsel %vm429_vm1, %v4413_v6, %v4415_v11 }
 0x2f4   : > { %4992 = vrot.lane.b32.xlu1 %v12159_v61, %s11192_s29  ;;  %4990 = vrot.lane.b32.xlu0 %v12167_v15, %s11192_s29 }
 0x2f5   : > { %5234 = vmatprep.subr.bf16.mxu1 %v4427_v20 }
 0x2f6   : > { %5235 = vmatpush1.bf16.msra.mxu1 %v4426_v25  ;;  %v4421_v14 = vpop.permute.xlu1 %4420  ;;  %v4419_v16 = vpop.permute.xlu0 %4418 }
 0x2f7   : > { %v4429_v8 = vsel %vm429_vm1, %v4419_v16, %v4421_v14  ;;  %v4428_v61 = vsel %vm429_vm1, %v4417_v32, %v4419_v16  ;;  %v12656_v32 = vld [vmem:[%s14191_s1] ss:$20 sps:$4 sm:$0xff]  }
 0x2f8   : > { %4996 = vrot.lane.b32.xlu1 %v12183_v63, %s11192_s29  ;;  %4994 = vrot.lane.b32.xlu0 %v10896_v4, %s11192_s29  ;;  %v10900_v63 = vld [vmem:[%s11244_s22 + $0x18] ss:$60 sps:$4 sm:$0xff]  }
 0x2f9   : > { %5236 = vmatprep.subr.bf16.mxu1 %v4429_v8  ;;  %v10917_v4 = vld [vmem:[%s11244_s22 + $0x118] ss:$60 sps:$4 sm:$0xff]  }
 0x2fa   : > { %5237 = vmatpush1.bf16.msra.mxu1 %v4428_v61  ;;  %v4517_v15 = vpop.permute.xlu1 %4516  ;;  %v4515_v41 = vpop.permute.xlu0 %4514 }
 0x2fb   : > { %v4538_v13 = vsel %vm546_vm2, %v4515_v41, %v4517_v15  ;;  %v10924_v41 = vld [vmem:[%s11244_s22 + $0x190] ss:$60 sps:$4 sm:$0xff]  }
 0x2fc   : > { %5000 = vrot.lane.b32.xlu1 %v10897_v18, %s11192_s29  ;;  %4998 = vrot.lane.b32.xlu0 %v12178_v21, %s11192_s29 }
 0x2fe   : > { %v4521_v22 = vpop.permute.xlu1 %4520  ;;  %v4519_v29 = vpop.permute.xlu0 %4518 }
 0x2ff   : > { %v4539_v37 = vsel %vm546_vm2, %v4517_v15, %v4519_v29  ;;  %v10925_v29 = vld [vmem:[%s11244_s22 + $0x28] ss:$60 sps:$4 sm:$0xff]  }
 0x300   : > { %5096 = vrot.lane.b32.xlu1 %v10898_v51, %s11193_s6  ;;  %5094 = vrot.lane.b32.xlu0 %v10900_v63, %s11193_s6 }
 0x301   : > { %5238 = vmatprep.subr.bf16.mxu1 %v4539_v37 }
 0x302   : > { %5239 = vmatpush1.bf16.msra.mxu1 %v4538_v13  ;;  %v4525_v21 = vpop.permute.xlu1 %4524  ;;  %v4523_v23 = vpop.permute.xlu0 %4522 }
 0x303   : > { %v4541_v33 = vsel %vm546_vm2, %v4523_v23, %v4525_v21  ;;  %v4540_v34 = vsel %vm546_vm2, %v4521_v22, %v4523_v23 }
 0x304   : > { %5100 = vrot.lane.b32.xlu1 %v10901_v7, %s11193_s6  ;;  %5098 = vrot.lane.b32.xlu0 %v10903_v1, %s11193_s6 }
 0x305   : > { %5240 = vmatprep.subr.bf16.mxu1 %v4541_v33 }
 0x306   : > { %5241 = vmatpush1.bf16.msra.mxu1 %v4540_v34  ;;  %v4529_v42 = vpop.permute.xlu1 %4528  ;;  %v4527_v38 = vpop.permute.xlu0 %4526  ;;  %v10927_v34 = vld [vmem:[%s11244_s22 + $0x118] ss:$60 sps:$4 sm:$0xff]  }
 0x307   : > { %v4542_v12 = vsel %vm546_vm2, %v4527_v38, %v4529_v42 }
 0x308   : > { %5104 = vrot.lane.b32.xlu1 %v10904_v52, %s11193_s6  ;;  %5102 = vrot.lane.b32.xlu0 %v10905_v35, %s11193_s6  ;;  %v12704_v52 = vld [vmem:[%s14191_s1 + $0xc] ss:$20 sps:$4 sm:$0xff]  }
 0x30a   : > { %v4533_v55 = vpop.permute.xlu1 %4532  ;;  %v4531_v10 = vpop.permute.xlu0 %4530 }
 0x30b   : > { %v4543_v57 = vsel %vm546_vm2, %v4529_v42, %v4531_v10  ;;  %v10928_v10 = vld [vmem:[%s11244_s22 + $0x190] ss:$60 sps:$4 sm:$0xff]  }
 0x30c   : > { %5108 = vrot.lane.b32.xlu1 %v10906_v44, %s11193_s6  ;;  %5106 = vrot.lane.b32.xlu0 %v10908_v45, %s11193_s6 }
 0x30d   : > { %5242 = vmatprep.subr.bf16.mxu1 %v4543_v57 }
 0x30e   : > { %5243 = vmatpush1.bf16.msra.mxu1 %v4542_v12  ;;  %v4537_v49 = vpop.permute.xlu1 %4536  ;;  %v4535_v43 = vpop.permute.xlu0 %4534 }
 0x30f   : > { %v4545_v62 = vsel %vm546_vm2, %v4535_v43, %v4537_v49  ;;  %v4544_v6 = vsel %vm546_vm2, %v4533_v55, %v4535_v43  ;;  %v10929_v49 = vld [vmem:[%s11244_s22 + $0x28] ss:$60 sps:$4 sm:$0xff]  }
 0x310   : > { %5577 = vrot.lane.b32.xlu1 %v10909_v60, %s11186_s23  ;;  %5575 = vrot.lane.b32.xlu0 %v12493_v59, %s11186_s23 }
 0x311   : > { %5244 = vmatprep.subr.bf16.mxu1 %v4545_v62 }
 0x312   : > { %5245 = vmatpush1.bf16.msra.mxu1 %v4544_v6  ;;  %v4633_v5 = vpop.permute.xlu1 %4632  ;;  %v4631_v9 = vpop.permute.xlu0 %4630 }
 0x313   : > { %v4654_v14 = vsel %vm663_vm3, %v4631_v9, %v4633_v5 }
 0x314   : > { %5581 = vrot.lane.b32.xlu1 %v12523_v19, %s11186_s23  ;;  %5573 = vrot.lane.b32.xlu0 %v12520_v17, %s11186_s23 }
 0x315   : > { %5247 = vmatmul.mubr.bf16.vlgmr.msra.gmra.mrb[32].mxu1 %v12656_v32 }
 0x316   : > { %v4637_v11 = vpop.permute.xlu1 %4636  ;;  %5256 = vmatprep.mubr.bf16.mxu1 %v12265_v28  ;;  %v4635_v20 = vpop.permute.xlu0 %4634 }
 0x317   : > { %v4655_v25 = vsel %vm663_vm3, %v4633_v5, %v4635_v20  ;;  %v10930_v20 = vld [vmem:[%s11244_s22 + $0xa0] ss:$60 sps:$4 sm:$0xff]  }
 0x318   : > { %5579 = vrot.lane.b32.xlu1 %v12535_v39, %s11186_s23  ;;  %5583 = vrot.lane.b32.xlu0 %v10916_v56, %s11186_s23 }
 0x319   : > { %5287 = vmatprep.subr.bf16.mxu1 %v4655_v25 }
 0x31a   : > { %5288 = vmatpush1.bf16.msra.mxu1 %v4654_v14  ;;  %v4641_v16 = vpop.permute.xlu1 %4640  ;;  %v4639_v8 = vpop.permute.xlu0 %4638 }
 0x31b   : > { %v4657_v28 = vsel %vm663_vm3, %v4639_v8, %v4641_v16  ;;  %v4656_v61 = vsel %vm663_vm3, %v4637_v11, %v4639_v8  ;;  %v10931_v16 = vld [vmem:[%s11244_s22 + $0x118] ss:$60 sps:$4 sm:$0xff]  }
 0x31c   : > { %5589 = vrot.lane.b32.xlu1 %v10917_v4, %s11186_s23  ;;  %5587 = vrot.lane.b32.xlu0 %v12542_v50, %s11186_s23 }
 0x31d   : > { %5289 = vmatprep.subr.bf16.mxu1 %v4657_v28  ;;  %5257 = vmatmul.mubr.bf16.gmra.mrb[36].mxu1 %v12284_v0 }
 0x31e   : > { %5290 = vmatpush1.bf16.msra.mxu1 %v4656_v61  ;;  %v4645_v18 = vpop.permute.xlu1 %4644  ;;  %v4643_v15 = vpop.permute.xlu0 %4642  ;;  %5266 = vmatprep.mubr.bf16.mxu1 %v12291_v47 }
 0x31f   : > { %v4658_v37 = vsel %vm663_vm3, %v4643_v15, %v4645_v18 }
 0x320   : > { %5593 = vrot.lane.b32.xlu1 %v12563_v30, %s11186_s23  ;;  %5585 = vrot.lane.b32.xlu0 %v12550_v31, %s11186_s23 }
 0x322   : > { %v4649_v51 = vpop.permute.xlu1 %4648  ;;  %v4647_v63 = vpop.permute.xlu0 %4646 }
 0x323   : > { %v4659_v22 = vsel %vm663_vm3, %v4645_v18, %v4647_v63  ;;  %v10932_v63 = vld [vmem:[%s11244_s22 + $0x190] ss:$60 sps:$4 sm:$0xff]  }
 0x324   : > { %5591 = vrot.lane.b32.xlu1 %v12568_v2, %s11186_s23  ;;  %5595 = vrot.lane.b32.xlu0 %v10924_v41, %s11186_s23 }
 0x325   : > { %5291 = vmatprep.subr.bf16.mxu1 %v4659_v22  ;;  %5267 = vmatmul.mubr.bf16.gmra.mrb[40].mxu1 %v12306_v40  ;;  %v10926_v40 = vld [vmem:[%s11244_s22 + $0xa0] ss:$60 sps:$4 sm:$0xff]  }
 0x326   : > { %5292 = vmatpush1.bf16.msra.mxu1 %v4658_v37  ;;  %v4653_v0 = vpop.permute.xlu1 %4652  ;;  %v4651_v47 = vpop.permute.xlu0 %4650  ;;  %5276 = vmatprep.mubr.bf16.mxu1 %v12317_v53 }
 0x327   : > { %v4661_v7 = vsel %vm663_vm3, %v4651_v47, %v4653_v0  ;;  %v4660_v13 = vsel %vm663_vm3, %v4649_v51, %v4651_v47  ;;  %v10933_v0 = vld [vmem:[%s11244_s22 + $0x28] ss:$60 sps:$4 sm:$0xff]  }
 0x328   : > { %5693 = vrot.lane.b32.xlu1 %v10925_v29, %s11187_s24  ;;  %5691 = vrot.lane.b32.xlu0 %v12493_v59, %s11187_s24 }
 0x329   : > { %5293 = vmatprep.subr.bf16.mxu1 %v4661_v7 }
 0x32a   : > { %5294 = vmatpush1.bf16.msra.mxu1 %v4660_v13  ;;  %v4749_v1 = vpop.permute.xlu1 %4748  ;;  %v4747_v21 = vpop.permute.xlu0 %4746 }
 0x32b   : > { %v4770_v35 = vsel %vm780_vm4, %v4747_v21, %v4749_v1 }
 0x32c   : > { %5697 = vrot.lane.b32.xlu1 %v12523_v19, %s11187_s24  ;;  %5689 = vrot.lane.b32.xlu0 %v12520_v17, %s11187_s24 }
 0x32d   : > { %5277 = vmatmul.mubr.bf16.gmra.mrb[44].mxu1 %v12327_v58 }
 0x32e   : > { %v4753_v23 = vpop.permute.xlu1 %4752  ;;  %v4751_v33 = vpop.permute.xlu0 %4750  ;;  %5319 = vmatprep.mubr.bf16.mxu1 %v12704_v52 }
 0x32f   : > { %v4771_v53 = vsel %vm780_vm4, %v4749_v1, %v4751_v33  ;;  %v10934_v33 = vld [vmem:[%s11244_s22 + $0xa0] ss:$60 sps:$4 sm:$0xff]  }
 0x330   : > { %5695 = vrot.lane.b32.xlu1 %v12535_v39, %s11187_s24  ;;  %5699 = vrot.lane.b32.xlu0 %v10926_v40, %s11187_s24 }
 0x331   : > { %5295 = vmatprep.subr.bf16.mxu1 %v4771_v53 }
 0x332   : > { %5296 = vmatpush1.bf16.msra.mxu1 %v4770_v35  ;;  %v4757_v58 = vpop.permute.xlu1 %4756  ;;  %v4755_v42 = vpop.permute.xlu0 %4754 }
 0x333   : > { %v4773_v38 = vsel %vm780_vm4, %v4755_v42, %v4757_v58  ;;  %v4772_v44 = vsel %vm780_vm4, %v4753_v23, %v4755_v42  ;;  %v10935_v58 = vld [vmem:[%s11244_s22 + $0x118] ss:$60 sps:$4 sm:$0xff]  }
 0x334   : > { %5705 = vrot.lane.b32.xlu1 %v10927_v34, %s11187_s24  ;;  %5703 = vrot.lane.b32.xlu0 %v12542_v50, %s11187_s24 }
 0x335   : > { %5297 = vmatprep.subr.bf16.mxu1 %v4773_v38 }
 0x336   : > { %5298 = vmatpush1.bf16.msra.mxu1 %v4772_v44  ;;  %v4761_v45 = vpop.permute.xlu1 %4760  ;;  %v4759_v55 = vpop.permute.xlu0 %4758 }
 0x337   : > { %v4774_v43 = vsel %vm780_vm4, %v4759_v55, %v4761_v45 }
 0x338   : > { %5709 = vrot.lane.b32.xlu1 %v12563_v30, %s11187_s24  ;;  %5701 = vrot.lane.b32.xlu0 %v12550_v31, %s11187_s24 }
 0x33a   : > { %v4765_v57 = vpop.permute.xlu1 %4764  ;;  %v4763_v60 = vpop.permute.xlu0 %4762 }
 0x33b   : > { %v4775_v12 = vsel %vm780_vm4, %v4761_v45, %v4763_v60  ;;  %v10936_v60 = vld [vmem:[%s11244_s22 + $0x190] ss:$60 sps:$4 sm:$0xff]  }
 0x33c   : > { %5707 = vrot.lane.b32.xlu1 %v12568_v2, %s11187_s24  ;;  %5711 = vrot.lane.b32.xlu0 %v10928_v10, %s11187_s24 }
 0x33d   : > { %5299 = vmatprep.subr.bf16.mxu1 %v4775_v12 }
 0x33e   : > { %5300 = vmatpush1.bf16.msra.mxu1 %v4774_v43  ;;  %v4769_v62 = vpop.permute.xlu1 %4768  ;;  %v4767_v6 = vpop.permute.xlu0 %4766 }
 0x33f   : > { %v4777_v5 = vsel %vm780_vm4, %v4767_v6, %v4769_v62  ;;  %v4776_v9 = vsel %vm780_vm4, %v4765_v57, %v4767_v6  ;;  %v10937_v62 = vld [vmem:[%s11244_s22 + $0x28] ss:$60 sps:$4 sm:$0xff]  }
 0x340   : > { %5809 = vrot.lane.b32.xlu1 %v10929_v49, %s11188_s25  ;;  %5807 = vrot.lane.b32.xlu0 %v12493_v59, %s11188_s25 }
 0x341   : > { %5301 = vmatprep.subr.bf16.mxu1 %v4777_v5 }
 0x342   : > { %5302 = vmatpush1.bf16.msra.mxu1 %v4776_v9  ;;  %v4865_v56 = vpop.permute.xlu1 %4864  ;;  %v4863_v11 = vpop.permute.xlu0 %4862 }
 0x343   : > { %v4886_v8 = vsel %vm897_vm5, %v4863_v11, %v4865_v56 }
 0x344   : > { %5813 = vrot.lane.b32.xlu1 %v12523_v19, %s11188_s25  ;;  %5805 = vrot.lane.b32.xlu0 %v12520_v17, %s11188_s25 }
 0x346   : > { %v4869_v25 = vpop.permute.xlu1 %4868  ;;  %v4867_v4 = vpop.permute.xlu0 %4866 }
 0x347   : > { %v4887_v14 = vsel %vm897_vm5, %v4865_v56, %v4867_v4  ;;  %v10938_v4 = vld [vmem:[%s11244_s22 + $0xa0] ss:$60 sps:$4 sm:$0xff]  }
 0x348   : > { %5811 = vrot.lane.b32.xlu1 %v12535_v39, %s11188_s25  ;;  %5815 = vrot.lane.b32.xlu0 %v10930_v20, %s11188_s25 }
 0x349   : > { %5303 = vmatprep.subr.bf16.mxu1 %v4887_v14 }
 0x34a   : > { %5304 = vmatpush1.bf16.msra.mxu1 %v4886_v8  ;;  %v4873_v28 = vpop.permute.xlu1 %4872  ;;  %v4871_v61 = vpop.permute.xlu0 %4870 }
 0x34b   : > { %v4889_v18 = vsel %vm897_vm5, %v4871_v61, %v4873_v28  ;;  %v4888_v15 = vsel %vm897_vm5, %v4869_v25, %v4871_v61  ;;  %v10939_v28 = vld [vmem:[%s11244_s22 + $0x118] ss:$60 sps:$4 sm:$0xff]  }
 0x34c   : > { %5821 = vrot.lane.b32.xlu1 %v10931_v16, %s11188_s25  ;;  %5819 = vrot.lane.b32.xlu0 %v12542_v50, %s11188_s25 }
 0x34d   : > { %5305 = vmatprep.subr.bf16.mxu1 %v4889_v18 }
 0x34e   : > { %5306 = vmatpush1.bf16.msra.mxu1 %v4888_v15  ;;  %v4877_v41 = vpop.permute.xlu1 %4876  ;;  %v4875_v51 = vpop.permute.xlu0 %4874 }
 0x34f   : > { %v4890_v47 = vsel %vm897_vm5, %v4875_v51, %v4877_v41 }
 0x350   : > { %5825 = vrot.lane.b32.xlu1 %v12563_v30, %s11188_s25  ;;  %5817 = vrot.lane.b32.xlu0 %v12550_v31, %s11188_s25 }
 0x352   : > { %v4881_v22 = vpop.permute.xlu1 %4880  ;;  %v4879_v29 = vpop.permute.xlu0 %4878 }
 0x353   : > { %v4891_v37 = vsel %vm897_vm5, %v4877_v41, %v4879_v29 }
 0x354   : > { %5823 = vrot.lane.b32.xlu1 %v12568_v2, %s11188_s25  ;;  %5827 = vrot.lane.b32.xlu0 %v10932_v63, %s11188_s25  ;;  %v10940_v63 = vld [vmem:[%s11244_s22 + $0x190] ss:$60 sps:$4 sm:$0xff]  }
 0x355   : > { %5307 = vmatprep.subr.bf16.mxu1 %v4891_v37 }
 0x356   : > { %5308 = vmatpush1.bf16.msra.mxu1 %v4890_v47  ;;  %v4885_v7 = vpop.permute.xlu1 %4884  ;;  %v4883_v13 = vpop.permute.xlu0 %4882 }
 0x357   : > { %v4893_v1 = vsel %vm897_vm5, %v4883_v13, %v4885_v7  ;;  %v4892_v21 = vsel %vm897_vm5, %v4881_v22, %v4883_v13 }
 0x358   : > { %5925 = vrot.lane.b32.xlu1 %v10933_v0, %s11189_s26  ;;  %5923 = vrot.lane.b32.xlu0 %v12493_v59, %s11189_s26  ;;  %v10941_v0 = vld [vmem:[%s11244_s22 + $0x28] ss:$60 sps:$4 sm:$0xff]  }
 0x359   : > { %5309 = vmatprep.subr.bf16.mxu1 %v4893_v1 }
 0x35a   : > { %5310 = vmatpush1.bf16.msra.mxu1 %v4892_v21  ;;  %v4981_v40 = vpop.permute.xlu1 %4980  ;;  %v4979_v23 = vpop.permute.xlu0 %4978  ;;  %v10942_v21 = vld [vmem:[%s11244_s22 + $0xa0] ss:$60 sps:$4 sm:$0xff]  }
 0x35b   : > { %v5002_v42 = vsel %vm1014_vm6, %v4979_v23, %v4981_v40 }
 0x35c   : > { %5929 = vrot.lane.b32.xlu1 %v12523_v19, %s11189_s26  ;;  %5921 = vrot.lane.b32.xlu0 %v12520_v17, %s11189_s26 }
 0x35e   : > { %v4985_v53 = vpop.permute.xlu1 %4984  ;;  %v4983_v34 = vpop.permute.xlu0 %4982 }
 0x35f   : > { %v5003_v35 = vsel %vm1014_vm6, %v4981_v40, %v4983_v34 }
 0x360   : > { %5927 = vrot.lane.b32.xlu1 %v12535_v39, %s11189_s26  ;;  %5931 = vrot.lane.b32.xlu0 %v10934_v33, %s11189_s26  ;;  %v10943_v33 = vld [vmem:[%s11244_s22 + $0x118] ss:$60 sps:$4 sm:$0xff]  }
 0x361   : > { %5311 = vmatprep.subr.bf16.mxu1 %v5003_v35 }
 0x362   : > { %5312 = vmatpush1.bf16.msra.mxu1 %v5002_v42  ;;  %v4989_v38 = vpop.permute.xlu1 %4988  ;;  %v4987_v44 = vpop.permute.xlu0 %4986 }
 0x363   : > { %v5005_v45 = vsel %vm1014_vm6, %v4987_v44, %v4989_v38  ;;  %v5004_v55 = vsel %vm1014_vm6, %v4985_v53, %v4987_v44  ;;  %v10944_v44 = vld [vmem:[%s11244_s22 + $0x190] ss:$60 sps:$4 sm:$0xff]  }
 0x364   : > { %5937 = vrot.lane.b32.xlu1 %v10935_v58, %s11189_s26  ;;  %5935 = vrot.lane.b32.xlu0 %v12542_v50, %s11189_s26 }
 0x365   : > { %5313 = vmatprep.subr.bf16.mxu1 %v5005_v45 }
 0x366   : > { %5314 = vmatpush1.bf16.msra.mxu1 %v5004_v55  ;;  %v4993_v10 = vpop.permute.xlu1 %4992  ;;  %v4991_v57 = vpop.permute.xlu0 %4990 }
 0x367   : > { %v5006_v6 = vsel %vm1014_vm6, %v4991_v57, %v4993_v10  ;;  %v10945_v57 = vld [vmem:[%s11244_s22 + $0x28] ss:$60 sps:$4 sm:$0xff]  }
 0x368   : > { %5941 = vrot.lane.b32.xlu1 %v12563_v30, %s11189_s26  ;;  %5933 = vrot.lane.b32.xlu0 %v12550_v31, %s11189_s26 }
 0x36a   : > { %v4997_v12 = vpop.permute.xlu1 %4996  ;;  %v4995_v49 = vpop.permute.xlu0 %4994 }
 0x36b   : > { %v5007_v43 = vsel %vm1014_vm6, %v4993_v10, %v4995_v49 }
 0x36c   : > { %5939 = vrot.lane.b32.xlu1 %v12568_v2, %s11189_s26  ;;  %5943 = vrot.lane.b32.xlu0 %v10936_v60, %s11189_s26 }
 0x36d   : > { %5315 = vmatprep.subr.bf16.mxu1 %v5007_v43 }
 0x36e   : > { %5316 = vmatpush1.bf16.msra.mxu1 %v5006_v6  ;;  %v5001_v5 = vpop.permute.xlu1 %5000  ;;  %v4999_v9 = vpop.permute.xlu0 %4998 }
 0x36f   : > { %v5009_v56 = vsel %vm1014_vm6, %v4999_v9, %v5001_v5  ;;  %v5008_v11 = vsel %vm1014_vm6, %v4997_v12, %v4999_v9  ;;  %v10946_v9 = vld [vmem:[%s11244_s22 + $0x110] ss:$60 sps:$4 sm:$0xff]  }
 0x370   : > { %6041 = vrot.lane.b32.xlu1 %v10937_v62, %s11190_s27  ;;  %6039 = vrot.lane.b32.xlu0 %v12493_v59, %s11190_s27 }
 0x371   : > { %5317 = vmatprep.subr.bf16.mxu1 %v5009_v56  ;;  %v10947_v56 = vld [vmem:[%s11244_s22 + $0xa0] ss:$60 sps:$4 sm:$0xff]  }
 0x372   : > { %5318 = vmatpush1.bf16.msra.mxu1 %v5008_v11  ;;  %v5097_v20 = vpop.permute.xlu1 %5096  ;;  %v5095_v25 = vpop.permute.xlu0 %5094 }
 0x373   : > { %v5118_v61 = vsel %vm1131_vm7, %v5095_v25, %v5097_v20 }
 0x374   : > { %6045 = vrot.lane.b32.xlu1 %v12523_v19, %s11190_s27  ;;  %6037 = vrot.lane.b32.xlu0 %v12520_v17, %s11190_s27 }
 0x375   : > { %5320 = vmatmul.mubr.bf16.vlgmr.msra.gmra.mrb[32].mxu1 %v12430_v46 }
 0x376   : > { %v5101_v14 = vpop.permute.xlu1 %5100  ;;  %5329 = vmatprep.mubr.bf16.mxu1 %v12436_v27  ;;  %v5099_v16 = vpop.permute.xlu0 %5098 }
 0x377   : > { %v5119_v8 = vsel %vm1131_vm7, %v5097_v20, %v5099_v16 }
 0x378   : > { %6043 = vrot.lane.b32.xlu1 %v12535_v39, %s11190_s27  ;;  %6047 = vrot.lane.b32.xlu0 %v10938_v4, %s11190_s27 }
 0x379   : > { %5360 = vmatprep.subr.bf16.mxu1 %v5119_v8 }
 0x37a   : > { %5361 = vmatpush1.bf16.msra.mxu1 %v5118_v61  ;;  %v5105_v18 = vpop.permute.xlu1 %5104  ;;  %v5103_v15 = vpop.permute.xlu0 %5102 }
 0x37b   : > { %v5121_v46 = vsel %vm1131_vm7, %v5103_v15, %v5105_v18  ;;  %v5120_v27 = vsel %vm1131_vm7, %v5101_v14, %v5103_v15  ;;  %v10950_v14 = vld [vmem:[%s11244_s22 + $0x118] ss:$60 sps:$4 sm:$0xff]  }
 0x37c   : > { %6053 = vrot.lane.b32.xlu1 %v10939_v28, %s11190_s27  ;;  %6051 = vrot.lane.b32.xlu0 %v12542_v50, %s11190_s27 }
 0x37d   : > { %5362 = vmatprep.subr.bf16.mxu1 %v5121_v46  ;;  %5330 = vmatmul.mubr.bf16.gmra.mrb[36].mxu1 %v12455_v26  ;;  %v10952_v46 = vld [vmem:[%s11244_s22 + $0x180] ss:$60 sps:$4 sm:$0xff]  }
 0x37e   : > { %5363 = vmatpush1.bf16.msra.mxu1 %v5120_v27  ;;  %v12812_v41 = vpop.permute.xlu1 %5108  ;;  %v12814_v51 = vpop.permute.xlu0 %5106  ;;  %5339 = vmatprep.mubr.bf16.mxu1 %v12462_v36 }
 0x380   : > { %6057 = vrot.lane.b32.xlu1 %v12563_v30, %s11190_s27  ;;  %6049 = vrot.lane.b32.xlu0 %v12550_v31, %s11190_s27 }
 0x382   : > { %v5578_v22 = vpop.permute.xlu1 %5577  ;;  %v5576_v29 = vpop.permute.xlu0 %5575 }
 0x383   : > { %v5598_v37 = vsel %vm312_vm0, %v5576_v29, %v5578_v22 }
 0x384   : > { %6055 = vrot.lane.b32.xlu1 %v12568_v2, %s11190_s27  ;;  %6059 = vrot.lane.b32.xlu0 %v10940_v63, %s11190_s27 }
 0x385   : > { %6513 = vmatprep.subr.bf16.mxu0 %v5598_v37  ;;  %5340 = vmatmul.mubr.bf16.gmra.mrb[40].mxu1 %v12477_v48 }
 0x386   : > { %v5582_v26 = vpop.permute.xlu1 %5581  ;;  %v5574_v47 = vpop.permute.xlu0 %5573  ;;  %5349 = vmatprep.mubr.bf16.mxu1 %v12488_v54 }
 0x387   : > { %v5597_v36 = vsel %vm312_vm0, %v5574_v47, %v5576_v29  ;;  %v10954_v47 = vld [vmem:[%s11244_s22 + $0x30] ss:$60 sps:$4 sm:$0xff]  }
 0x388   : > { %6157 = vrot.lane.b32.xlu1 %v10941_v0, %s11191_s28  ;;  %6155 = vrot.lane.b32.xlu0 %v12493_v59, %s11191_s28 }
 0x389   : > { %6514 = vmatpush1.bf16.msra.mxu0 %v5597_v36 }
 0x38a   : > { %v5580_v7 = vpop.permute.xlu1 %5579  ;;  %v5584_v1 = vpop.permute.xlu0 %5583 }
 0x38b   : > { %v5599_v13 = vsel %vm312_vm0, %v5580_v7, %v5582_v26  ;;  %v5600_v48 = vsel %vm312_vm0, %v5582_v26, %v5584_v1  ;;  %v10957_v1 = vld [vmem:[%s11244_s22 + $0x24] ss:$60 sps:$4 sm:$0xff]  }
 0x38c   : > { %6161 = vrot.lane.b32.xlu1 %v12523_v19, %s11191_s28  ;;  %6153 = vrot.lane.b32.xlu0 %v12520_v17, %s11191_s28 }
 0x38d   : > { %6515 = vmatprep.subr.bf16.mxu0 %v5600_v48  ;;  %5350 = vmatmul.mubr.bf16.gmra.mrb[44].mxu1 %v12502_v3 }
 0x38e   : > { %6516 = vmatpush1.bf16.msra.mxu0 %v5599_v13  ;;  %v5590_v54 = vpop.permute.xlu1 %5589  ;;  %v5588_v40 = vpop.permute.xlu0 %5587  ;;  %5392 = vmatprep.mubr.bf16.mxu1 %v11194_v24 }
 0x38f   : > { %v5602_v23 = vsel %vm312_vm0, %v5588_v40, %v5590_v54 }
 0x390   : > { %6159 = vrot.lane.b32.xlu1 %v12535_v39, %s11191_s28  ;;  %6163 = vrot.lane.b32.xlu0 %v10942_v21, %s11191_s28 }
 0x391   : > { %6517 = vmatprep.subr.bf16.mxu0 %v5602_v23  ;;  %v10961_v23 = vld [vmem:[%s11244_s22 + $0x28] ss:$60 sps:$4 sm:$0xff]  }
 0x392   : > { %v5594_v53 = vpop.permute.xlu1 %5593  ;;  %v5586_v34 = vpop.permute.xlu0 %5585 }
 0x393   : > { %v5601_v35 = vsel %vm312_vm0, %v5586_v34, %v5588_v40  ;;  %v10960_v40 = vld [vmem:[%s11244_s22 + $0x20] ss:$60 sps:$4 sm:$0xff]  }
 0x394   : > { %6169 = vrot.lane.b32.xlu1 %v10943_v33, %s11191_s28  ;;  %6167 = vrot.lane.b32.xlu0 %v12542_v50, %s11191_s28 }
 0x395   : > { %6518 = vmatpush1.bf16.msra.mxu0 %v5601_v35 }
 0x396   : > { %v5592_v3 = vpop.permute.xlu1 %5591  ;;  %v5596_v42 = vpop.permute.xlu0 %5595 }
 0x397   : > { %v5603_v58 = vsel %vm312_vm0, %v5592_v3, %v5594_v53  ;;  %v5604_v38 = vsel %vm312_vm0, %v5594_v53, %v5596_v42  ;;  %v10962_v3 = vld [vmem:[%s11244_s22 + $0xa8] ss:$60 sps:$4 sm:$0xff]  }
 0x398   : > { %6173 = vrot.lane.b32.xlu1 %v12563_v30, %s11191_s28  ;;  %6165 = vrot.lane.b32.xlu0 %v12550_v31, %s11191_s28 }
 0x399   : > { %6519 = vmatprep.subr.bf16.mxu0 %v5604_v38 }
 0x39a   : > { %6520 = vmatpush1.bf16.msra.mxu0 %v5603_v58  ;;  %v5694_v45 = vpop.permute.xlu1 %5693  ;;  %v5692_v55 = vpop.permute.xlu0 %5691  ;;  %v12930_v58 = vld [vmem:[%s11244_s22 + $0xa4] ss:$60 sps:$4 sm:$0xff]  }
 0x39b   : > { %v5714_v10 = vsel %vm429_vm1, %v5692_v55, %v5694_v45  ;;  %v10965_v45 = vld [vmem:[%s11244_s22 + $0x9c] ss:$60 sps:$4 sm:$0xff]  }
 0x39c   : > { %6171 = vrot.lane.b32.xlu1 %v12568_v2, %s11191_s28  ;;  %6175 = vrot.lane.b32.xlu0 %v10944_v44, %s11191_s28 }
 0x39d   : > { %6521 = vmatprep.subr.bf16.mxu0 %v5714_v10 }
 0x39e   : > { %v5698_v60 = vpop.permute.xlu1 %5697  ;;  %v5690_v12 = vpop.permute.xlu0 %5689 }
 0x39f   : > { %v5713_v49 = vsel %vm429_vm1, %v5690_v12, %v5692_v55  ;;  %v12938_v55 = vld [vmem:[%s11244_s22 + $0xa0] ss:$60 sps:$4 sm:$0xff]  }
 0x3a0   : > { %6273 = vrot.lane.b32.xlu1 %v10945_v57, %s11192_s29  ;;  %6271 = vrot.lane.b32.xlu0 %v12493_v59, %s11192_s29 }
 0x3a1   : > { %6522 = vmatpush1.bf16.msra.mxu0 %v5713_v49  ;;  %v10968_v49 = vld [vmem:[%s11244_s22 + $0x98] ss:$60 sps:$4 sm:$0xff]  }
 0x3a2   : > { %v5696_v43 = vpop.permute.xlu1 %5695  ;;  %v5700_v6 = vpop.permute.xlu0 %5699 }
 0x3a3   : > { %v5715_v62 = vsel %vm429_vm1, %v5696_v43, %v5698_v60  ;;  %v5716_v5 = vsel %vm429_vm1, %v5698_v60, %v5700_v6  ;;  %v11125_v60 = vld [vmem:[%s14191_s1 + $0x2c] ss:$20 sps:$4 sm:$0xff]  }
 0x3a4   : > { %6277 = vrot.lane.b32.xlu1 %v12523_v19, %s11192_s29  ;;  %6269 = vrot.lane.b32.xlu0 %v12520_v17, %s11192_s29  ;;  %v10948_v17 = vld [vmem:[%s11244_s22 + $0x184] ss:$60 sps:$4 sm:$0xff]  }
 0x3a5   : > { %6523 = vmatprep.subr.bf16.mxu0 %v5716_v5  ;;  %v10969_v43 = vld [vmem:[%s11244_s22 + $0xa0] ss:$60 sps:$4 sm:$0xff]  }
 0x3a6   : > { %6524 = vmatpush1.bf16.msra.mxu0 %v5715_v62  ;;  %v5706_v59 = vpop.permute.xlu1 %5705  ;;  %v5704_v11 = vpop.permute.xlu0 %5703 }
 0x3a7   : > { %v5718_v20 = vsel %vm429_vm1, %v5704_v11, %v5706_v59 }
 0x3a8   : > { %5110 = vrot.lane.b32.xlu1 %v10946_v9, %s11193_s6  ;;  %6279 = vrot.lane.b32.xlu0 %v10947_v56, %s11192_s29  ;;  %v10970_v9 = vld [vmem:[%s11244_s22 + $0x120] ss:$60 sps:$4 sm:$0xff]  }
 0x3a9   : > { %6525 = vmatprep.subr.bf16.mxu0 %v5718_v20  ;;  %v12956_v56 = vld [vmem:[%s11244_s22 + $0x11c] ss:$60 sps:$4 sm:$0xff]  }
 0x3aa   : > { %v5710_v19 = vpop.permute.xlu1 %5709  ;;  %v5702_v25 = vpop.permute.xlu0 %5701  ;;  %v11126_v20 = vld [vmem:[%s14191_s1 + $0x28] ss:$20 sps:$4 sm:$0xff]  }
 0x3ab   : > { %v5717_v4 = vsel %vm429_vm1, %v5702_v25, %v5704_v11  ;;  %v10973_v25 = vld [vmem:[%s11244_s22 + $0x114] ss:$60 sps:$4 sm:$0xff]  }
 0x3ac   : > { %6283 = vrot.lane.b32.xlu1 %v12542_v50, %s11192_s29  ;;  %6275 = vrot.lane.b32.xlu0 %v12535_v39, %s11192_s29  ;;  %v10951_v50 = vld [vmem:[%s11244_s22 + $0x188] ss:$60 sps:$4 sm:$0xff]  }
 0x3ad   : > { %6526 = vmatpush1.bf16.msra.mxu0 %v5717_v4  ;;  %v11127_v4 = vld [vmem:[%s14191_s1 + $0x54] ss:$20 sps:$4 sm:$0xff]  }
 0x3ae   : > { %v5708_v16 = vpop.permute.xlu1 %5707  ;;  %v5712_v28 = vpop.permute.xlu0 %5711 }
 0x3af   : > { %v5719_v8 = vsel %vm429_vm1, %v5708_v16, %v5710_v19  ;;  %v5720_v61 = vsel %vm429_vm1, %v5710_v19, %v5712_v28  ;;  %v10976_v28 = vld [vmem:[%s11244_s22 + $0x110] ss:$60 sps:$4 sm:$0xff]  }
 0x3b0   : > { %5114 = vrot.lane.b32.xlu1 %v10948_v17, %s11193_s6  ;;  %6285 = vrot.lane.b32.xlu0 %v10950_v14, %s11192_s29  ;;  %v12970_v17 = vld [vmem:[%s11244_s22 + $0x118] ss:$60 sps:$4 sm:$0xff]  }
 0x3b1   : > { %6527 = vmatprep.subr.bf16.mxu0 %v5720_v61  ;;  %v10977_v61 = vld [vmem:[%s11244_s22 + $0x118] ss:$60 sps:$4 sm:$0xff]  }
 0x3b2   : > { %6528 = vmatpush1.bf16.msra.mxu0 %v5719_v8  ;;  %v5810_v18 = vpop.permute.xlu1 %5809  ;;  %v5808_v15 = vpop.permute.xlu0 %5807 }
 0x3b3   : > { %v5830_v39 = vsel %vm546_vm2, %v5808_v15, %v5810_v18 }
 0x3b4   : > { %6281 = vrot.lane.b32.xlu1 %v12550_v31, %s11192_s29  ;;  %5116 = vrot.lane.b32.xlu0 %v10951_v50, %s11193_s6  ;;  %v10953_v31 = vld [vmem:[%s11244_s22 + $0x190] ss:$60 sps:$4 sm:$0xff]  }
 0x3b5   : > { %6529 = vmatprep.subr.bf16.mxu0 %v5830_v39  ;;  %v11128_v39 = vld [vmem:[%s14191_s1 + $0x50] ss:$20 sps:$4 sm:$0xff]  }
 0x3b6   : > { %v5814_v27 = vpop.permute.xlu1 %5813  ;;  %v5806_v63 = vpop.permute.xlu0 %5805 }
 0x3b7   : > { %v5829_v22 = vsel %vm546_vm2, %v5806_v63, %v5808_v15  ;;  %v11129_v63 = vld [vmem:[%s14191_s1 + $0x7c] ss:$20 sps:$4 sm:$0xff]  }
 0x3b8   : > { %6289 = vrot.lane.b32.xlu1 %v12563_v30, %s11192_s29  ;;  %5112 = vrot.lane.b32.xlu0 %v10952_v46, %s11193_s6  ;;  %v12908_v30 = vld [vmem:[%s11244_s22 + $0x2c] ss:$60 sps:$4 sm:$0xff]  }
 0x3b9   : > { %6530 = vmatpush1.bf16.msra.mxu0 %v5829_v22  ;;  %v12990_v22 = vld [vmem:[%s11244_s22 + $0x194] ss:$60 sps:$4 sm:$0xff]  }
 0x3ba   : > { %v5812_v29 = vpop.permute.xlu1 %5811  ;;  %v5816_v0 = vpop.permute.xlu0 %5815 }
 0x3bb   : > { %v5831_v37 = vsel %vm546_vm2, %v5812_v29, %v5814_v27  ;;  %v5832_v26 = vsel %vm546_vm2, %v5814_v27, %v5816_v0  ;;  %v10978_v27 = vld [vmem:[%s11244_s22 + $0x198] ss:$60 sps:$4 sm:$0xff]   ;;  %v10981_v0 = vld [vmem:[%s11244_s22 + $0x18c] ss:$60 sps:$4 sm:$0xff]  }
 0x3bc   : > { %6287 = vrot.lane.b32.xlu1 %v12568_v2, %s11192_s29  ;;  %6291 = vrot.lane.b32.xlu0 %v10953_v31, %s11192_s29  ;;  %v12916_v2 = vld [vmem:[%s11244_s22 + $0x28] ss:$60 sps:$4 sm:$0xff]  }
 0x3bd   : > { %6531 = vmatprep.subr.bf16.mxu0 %v5832_v26  ;;  %v12998_v26 = vld [vmem:[%s11244_s22 + $0x190] ss:$60 sps:$4 sm:$0xff]  }
 0x3be   : > { %6532 = vmatpush1.bf16.msra.mxu0 %v5831_v37  ;;  %v5822_v36 = vpop.permute.xlu1 %5821  ;;  %v5820_v7 = vpop.permute.xlu0 %5819 }
 0x3bf   : > { %v5834_v13 = vsel %vm546_vm2, %v5820_v7, %v5822_v36 }
 0x3c0   : > { %6868 = vrot.lane.b32.xlu1 %v10954_v47, %s11186_s23  ;;  %6866 = vrot.lane.b32.xlu0 %v12908_v30, %s11186_s23 }
 0x3c1   : > { %6533 = vmatprep.subr.bf16.mxu0 %v5834_v13 }
 0x3c2   : > { %v5826_v48 = vpop.permute.xlu1 %5825  ;;  %v5818_v21 = vpop.permute.xlu0 %5817 }
 0x3c3   : > { %v5833_v54 = vsel %vm546_vm2, %v5818_v21, %v5820_v7  ;;  %v11130_v7 = vld [vmem:[%s14191_s1 + $0x78] ss:$20 sps:$4 sm:$0xff]  }
 0x3c4   : > { %6387 = vrot.lane.b32.xlu1 %v10957_v1, %s11193_s6  ;;  %6864 = vrot.lane.b32.xlu0 %v12916_v2, %s11186_s23  ;;  %v10984_v1 = vld [vmem:[%s11244_s22 + $0x188] ss:$60 sps:$4 sm:$0xff]  }
 0x3c5   : > { %6534 = vmatpush1.bf16.msra.mxu0 %v5833_v54 }
 0x3c6   : > { %v5824_v33 = vpop.permute.xlu1 %5823  ;;  %v5828_v34 = vpop.permute.xlu0 %5827 }
 0x3c7   : > { %v5835_v53 = vsel %vm546_vm2, %v5824_v33, %v5826_v48  ;;  %v5836_v35 = vsel %vm546_vm2, %v5826_v48, %v5828_v34  ;;  %v10985_v48 = vld [vmem:[%s11244_s22 + $0x190] ss:$60 sps:$4 sm:$0xff]  }
 0x3c8   : > { %6385 = vrot.lane.b32.xlu1 %v10960_v40, %s11193_s6  ;;  %6389 = vrot.lane.b32.xlu0 %v10961_v23, %s11193_s6  ;;  %v10986_v33 = vld [vmem:[%s11244_s22 + $0x30] ss:$60 sps:$4 sm:$0xff]  }
 0x3c9   : > { %6535 = vmatprep.subr.bf16.mxu0 %v5836_v35 }
 0x3ca   : > { %6536 = vmatpush1.bf16.msra.mxu0 %v5835_v53  ;;  %v5926_v42 = vpop.permute.xlu1 %5925  ;;  %v5924_v38 = vpop.permute.xlu0 %5923 }
 0x3cb   : > { %v5946_v44 = vsel %vm663_vm3, %v5924_v38, %v5926_v42 }
 0x3cc   : > { %6874 = vrot.lane.b32.xlu1 %v10962_v3, %s11186_s23  ;;  %6872 = vrot.lane.b32.xlu0 %v12930_v58, %s11186_s23 }
 0x3cd   : > { %6578 = vmatprep.subr.bf16.mxu0 %v5946_v44  ;;  %6538 = vmatmul.mubr.bf16.vlgmr.msra.gmra.mrb[32].mxu0 %v12656_v32 }
 0x3ce   : > { %v5930_v10 = vpop.permute.xlu1 %5929  ;;  %v5922_v57 = vpop.permute.xlu0 %5921  ;;  %6547 = vmatprep.mubr.bf16.mxu0 %v11125_v60  ;;  %v10988_v60 = vld [vmem:[%s11244_s22 + $0x120] ss:$60 sps:$4 sm:$0xff]  }
 0x3cf   : > { %v5945_v12 = vsel %vm663_vm3, %v5922_v57, %v5924_v38  ;;  %v10987_v38 = vld [vmem:[%s11244_s22 + $0xa8] ss:$60 sps:$4 sm:$0xff]  }
 0x3d0   : > { %6393 = vrot.lane.b32.xlu1 %v10965_v45, %s11193_s6  ;;  %6870 = vrot.lane.b32.xlu0 %v12938_v55, %s11186_s23 }
 0x3d1   : > { %6579 = vmatpush1.bf16.msra.mxu0 %v5945_v12 }
 0x3d2   : > { %v5928_v62 = vpop.permute.xlu1 %5927  ;;  %v5932_v6 = vpop.permute.xlu0 %5931 }
 0x3d3   : > { %v5947_v32 = vsel %vm663_vm3, %v5928_v62, %v5930_v10  ;;  %v5948_v5 = vsel %vm663_vm3, %v5930_v10, %v5932_v6 }
 0x3d4   : > { %6391 = vrot.lane.b32.xlu1 %v10968_v49, %s11193_s6  ;;  %6395 = vrot.lane.b32.xlu0 %v10969_v43, %s11193_s6 }
 0x3d5   : > { %6580 = vmatprep.subr.bf16.mxu0 %v5948_v5  ;;  %6548 = vmatmul.mubr.bf16.gmra.mrb[36].mxu0 %v11126_v20  ;;  %v10989_v5 = vld [vmem:[%s11244_s22 + $0x198] ss:$60 sps:$4 sm:$0xff]  }
 0x3d6   : > { %6581 = vmatpush1.bf16.msra.mxu0 %v5947_v32  ;;  %v5938_v59 = vpop.permute.xlu1 %5937  ;;  %v5936_v11 = vpop.permute.xlu0 %5935  ;;  %6557 = vmatprep.mubr.bf16.mxu0 %v11127_v4 }
 0x3d7   : > { %v5950_v19 = vsel %vm663_vm3, %v5936_v11, %v5938_v59 }
 0x3d8   : > { %6880 = vrot.lane.b32.xlu1 %v10970_v9, %s11186_s23  ;;  %6878 = vrot.lane.b32.xlu0 %v12956_v56, %s11186_s23 }
 0x3d9   : > { %6582 = vmatprep.subr.bf16.mxu0 %v5950_v19  ;;  %v10990_v19 = vld [vmem:[%s11244_s22 + $0x30] ss:$60 sps:$4 sm:$0xff]  }
 0x3da   : > { %v5942_v14 = vpop.permute.xlu1 %5941  ;;  %v5934_v16 = vpop.permute.xlu0 %5933 }
 0x3db   : > { %v5949_v8 = vsel %vm663_vm3, %v5934_v16, %v5936_v11  ;;  %v13050_v16 = vld [vmem:[%s11244_s22 + $0x34] ss:$60 sps:$4 sm:$0xff]  }
 0x3dc   : > { %6399 = vrot.lane.b32.xlu1 %v10973_v25, %s11193_s6  ;;  %6876 = vrot.lane.b32.xlu0 %v12970_v17, %s11186_s23 }
 0x3dd   : > { %6583 = vmatpush1.bf16.msra.mxu0 %v5949_v8 }
 0x3de   : > { %v5940_v50 = vpop.permute.xlu1 %5939  ;;  %v5944_v15 = vpop.permute.xlu0 %5943  ;;  %6558 = vmatmul.mubr.bf16.gmra.mrb[40].mxu0 %v11128_v39 }
 0x3df   : > { %v5951_v18 = vsel %vm663_vm3, %v5940_v50, %v5942_v14  ;;  %v5952_v46 = vsel %vm663_vm3, %v5942_v14, %v5944_v15  ;;  %6567 = vmatprep.mubr.bf16.mxu0 %v11129_v63  ;;  %v13058_v50 = vld [vmem:[%s11244_s22 + $0x30] ss:$60 sps:$4 sm:$0xff]   ;;  %v10995_v63 = vld [vmem:[%s11244_s22 + $0xa8] ss:$60 sps:$4 sm:$0xff]  }
 0x3e0   : > { %6397 = vrot.lane.b32.xlu1 %v10976_v28, %s11193_s6  ;;  %6401 = vrot.lane.b32.xlu0 %v10977_v61, %s11193_s6 }
 0x3e1   : > { %6584 = vmatprep.subr.bf16.mxu0 %v5952_v46 }
 0x3e2   : > { %6585 = vmatpush1.bf16.msra.mxu0 %v5951_v18  ;;  %v6042_v31 = vpop.permute.xlu1 %6041  ;;  %v6040_v29 = vpop.permute.xlu0 %6039  ;;  %v10994_v18 = vld [vmem:[%s11244_s22 + $0x38] ss:$60 sps:$4 sm:$0xff]  }
 0x3e3   : > { %v6062_v37 = vsel %vm780_vm4, %v6040_v29, %v6042_v31 }
 0x3e4   : > { %6886 = vrot.lane.b32.xlu1 %v10978_v27, %s11186_s23  ;;  %6884 = vrot.lane.b32.xlu0 %v12990_v22, %s11186_s23 }
 0x3e5   : > { %6586 = vmatprep.subr.bf16.mxu0 %v6062_v37 }
 0x3e6   : > { %v6046_v47 = vpop.permute.xlu1 %6045  ;;  %v6038_v36 = vpop.permute.xlu0 %6037  ;;  %6568 = vmatmul.mubr.bf16.gmra.mrb[44].mxu0 %v11130_v7 }
 0x3e7   : > { %v6061_v13 = vsel %vm780_vm4, %v6038_v36, %v6040_v29  ;;  %6610 = vmatprep.mubr.bf16.mxu0 %v12704_v52 }
 0x3e8   : > { %6405 = vrot.lane.b32.xlu1 %v10981_v0, %s11193_s6  ;;  %6882 = vrot.lane.b32.xlu0 %v12998_v26, %s11186_s23  ;;  %v13072_v0 = vld [vmem:[%s11244_s22 + $0xac] ss:$60 sps:$4 sm:$0xff]  }
 0x3e9   : > { %6587 = vmatpush1.bf16.msra.mxu0 %v6061_v13  ;;  %v13080_v13 = vld [vmem:[%s11244_s22 + $0xa8] ss:$60 sps:$4 sm:$0xff]  }
 0x3ea   : > { %v6044_v21 = vpop.permute.xlu1 %6043  ;;  %v6048_v40 = vpop.permute.xlu0 %6047 }
 0x3eb   : > { %v6063_v54 = vsel %vm780_vm4, %v6044_v21, %v6046_v47  ;;  %v6064_v23 = vsel %vm780_vm4, %v6046_v47, %v6048_v40 }
 0x3ec   : > { %6403 = vrot.lane.b32.xlu1 %v10984_v1, %s11193_s6  ;;  %6407 = vrot.lane.b32.xlu0 %v10985_v48, %s11193_s6  ;;  %v10999_v1 = vld [vmem:[%s11244_s22 + $0xb0] ss:$60 sps:$4 sm:$0xff]  }
 0x3ed   : > { %6588 = vmatprep.subr.bf16.mxu0 %v6064_v23  ;;  %v11000_v23 = vld [vmem:[%s11244_s22 + $0x120] ss:$60 sps:$4 sm:$0xff]  }
 0x3ee   : > { %6589 = vmatpush1.bf16.msra.mxu0 %v6063_v54  ;;  %v6054_v52 = vpop.permute.xlu1 %6053  ;;  %v6052_v53 = vpop.permute.xlu0 %6051 }
 0x3ef   : > { %v6066_v34 = vsel %vm780_vm4, %v6052_v53, %v6054_v52  ;;  %v8095_v52 = vld [vmem:[%s11244_s22 + $0x120] sm:$0xff] }
 0x3f0   : > { %6984 = vrot.lane.b32.xlu1 %v10986_v33, %s11187_s24  ;;  %6982 = vrot.lane.b32.xlu0 %v12908_v30, %s11187_s24  ;;  %v5122_v33 = vsel %vm1131_vm7, %v12814_v51, %v12812_v41 }
 0x3f1   : > { %6590 = vmatprep.subr.bf16.mxu0 %v6066_v34 }
 0x3f2   : > { %v6058_v35 = vpop.permute.xlu1 %6057  ;;  %v6050_v3 = vpop.permute.xlu0 %6049 }
 0x3f3   : > { %v6065_v42 = vsel %vm780_vm4, %v6050_v3, %v6052_v53  ;;  %v8097_v53 = vld [vmem:[%s11244_s22 + $0x15c] sm:$0xff] }
 0x3f4   : > { %6988 = vrot.lane.b32.xlu1 %v12930_v58, %s11187_s24  ;;  %6980 = vrot.lane.b32.xlu0 %v12916_v2, %s11187_s24 }
 0x3f5   : > { %6591 = vmatpush1.bf16.msra.mxu0 %v6065_v42  ;;  %v13099_v42 = vcombine.high %v8095_v52, %v8097_v53 }
 0x3f6   : > { %v6056_v44 = vpop.permute.xlu1 %6055  ;;  %v6060_v10 = vpop.permute.xlu0 %6059 }
 0x3f7   : > { %v6067_v45 = vsel %vm780_vm4, %v6056_v44, %v6058_v35  ;;  %v6068_v57 = vsel %vm780_vm4, %v6058_v35, %v6060_v10  ;;  %v13106_v44 = vcombine.low %v8095_v52, %v8097_v53 }
 0x3f8   : > { %6986 = vrot.lane.b32.xlu1 %v12938_v55, %s11187_s24  ;;  %6990 = vrot.lane.b32.xlu0 %v10987_v38, %s11187_s24 }
 0x3f9   : > { %6592 = vmatprep.subr.bf16.mxu0 %v6068_v57 }
 0x3fa   : > { %6593 = vmatpush1.bf16.msra.mxu0 %v6067_v45  ;;  %v6158_v12 = vpop.permute.xlu1 %6157  ;;  %v6156_v49 = vpop.permute.xlu0 %6155  ;;  %v11003_v45 = vld [vmem:[%s11244_s22 + $0x128] ss:$60 sps:$4 sm:$0xff]  }
 0x3fb   : > { %v6178_v43 = vsel %vm897_vm5, %v6156_v49, %v6158_v12  ;;  %v1521_v12 = vpop.f32.mrb[0].mxu0 }
 0x3fc   : > { %6996 = vrot.lane.b32.xlu1 %v10988_v60, %s11187_s24  ;;  %6994 = vrot.lane.b32.xlu0 %v12956_v56, %s11187_s24 }
 0x3fd   : > { %6594 = vmatprep.subr.bf16.mxu0 %v6178_v43  ;;  %v11004_v43 = vld [vmem:[%s11244_s22 + $0x198] ss:$60 sps:$4 sm:$0xff]  }
 0x3fe   : > { %v6162_v62 = vpop.permute.xlu1 %6161  ;;  %v6154_v32 = vpop.permute.xlu0 %6153 }
 0x3ff   : > { %v6177_v6 = vsel %vm897_vm5, %v6154_v32, %v6156_v49  ;;  %v1523_v32 = vpop.f32.mrb[1].mxu0 }
 0x400   : > { %7000 = vrot.lane.b32.xlu1 %v12990_v22, %s11187_s24  ;;  %6992 = vrot.lane.b32.xlu0 %v12970_v17, %s11187_s24 }
 0x401   : > { %6595 = vmatpush1.bf16.msra.mxu0 %v6177_v6 }
 0x402   : > { %v6160_v9 = vpop.permute.xlu1 %6159  ;;  %v6164_v11 = vpop.permute.xlu0 %6163 }
 0x403   : > { %v6179_v59 = vsel %vm897_vm5, %v6160_v9, %v6162_v62  ;;  %v6180_v20 = vsel %vm897_vm5, %v6162_v62, %v6164_v11  ;;  %v1375_v62 = vpop.f32.mrb[0].mxu1 }
 0x404   : > { %6998 = vrot.lane.b32.xlu1 %v12998_v26, %s11187_s24  ;;  %7002 = vrot.lane.b32.xlu0 %v10989_v5, %s11187_s24  ;;  %v1377_v6 = vpop.f32.mrb[1].mxu1  ;;  %v1525_v5 = vpop.f32.mrb[2].mxu0 }
 0x405   : > { %6596 = vmatprep.subr.bf16.mxu0 %v6180_v20  ;;  %v10415_v20 = vadd.f32 %v1521_v12, %v1375_v62 }
 0x406   : > { %6597 = vmatpush1.bf16.msra.mxu0 %v6179_v59  ;;  %v6170_v25 = vpop.permute.xlu1 %6169  ;;  %v6168_v4 = vpop.permute.xlu0 %6167 }
 0x407   : > { %v6182_v14 = vsel %vm897_vm5, %v6168_v4, %v6170_v25  ;;  %v1379_v59 = vpop.f32.mrb[2].mxu1  ;;  %1560 = vst [vmem:[%s13125_s9] sm:$0xff] %v10415_v20 }
 0x408   : > { %7100 = vrot.lane.b32.xlu1 %v10990_v19, %s11188_s25  ;;  %7098 = vrot.lane.b32.xlu0 %v12908_v30, %s11188_s25  ;;  %v10416_v19 = vadd.f32 %v1523_v32, %v1377_v6  ;;  %v10417_v25 = vadd.f32 %v1525_v5, %v1379_v59  ;;  %v11010_v6 = vld [vmem:[%s11244_s22 + $0x38] ss:$60 sps:$4 sm:$0xff]  }
 0x409   : > { %6598 = vmatprep.subr.bf16.mxu0 %v6182_v14 }
 0x40a   : > { %v6174_v8 = vpop.permute.xlu1 %6173  ;;  %v6166_v28 = vpop.permute.xlu0 %6165  ;;  %1561 = vst [vmem:[%s13125_s9 + $0x8] sm:$0xff] %v10416_v19  ;;  %1562 = vst [vmem:[%s13125_s9 + $0x70] sm:$0xff] %v10417_v25 }
 0x40b   : > { %v6181_v61 = vsel %vm897_vm5, %v6166_v28, %v6168_v4  ;;  %v1381_v4 = vpop.f32.mrb[3].mxu1  ;;  %v1527_v28 = vpop.f32.mrb[3].mxu0 }
 0x40c   : > { %8157 = vrot.lane.b32.xlu1 %v13050_v16, %s11186_s23  ;;  %7096 = vrot.lane.b32.xlu0 %v12916_v2, %s11188_s25 }
 0x40d   : > { %6599 = vmatpush1.bf16.msra.mxu0 %v6181_v61  ;;  %v10418_v61 = vadd.f32 %v1527_v28, %v1381_v4 }
 0x40e   : > { %v6172_v15 = vpop.permute.xlu1 %6171  ;;  %v6176_v46 = vpop.permute.xlu0 %6175 }
 0x40f   : > { %v6183_v39 = vsel %vm897_vm5, %v6172_v15, %v6174_v8  ;;  %v6184_v27 = vsel %vm897_vm5, %v6174_v8, %v6176_v46  ;;  %v13121_v8 = vld [vmem:[%s11244_s22 + $0x19c] ss:$60 sps:$4 sm:$0xff]   ;;  %1563 = vst [vmem:[%s13125_s9 + $0x78] sm:$0xff] %v10418_v61  ;;  %v13138_v46 = vld [vmem:[%s14191_s1 + $0x10] ss:$20 sps:$4 sm:$0xff]  }
 0x410   : > { %8155 = vrot.lane.b32.xlu1 %v13058_v50, %s11186_s23  ;;  %8159 = vrot.lane.b32.xlu0 %v10994_v18, %s11186_s23  ;;  %v11011_v61 = vld [vmem:[%s11244_s22 + $0xa8] ss:$60 sps:$4 sm:$0xff]  }
 0x411   : > { %6600 = vmatprep.subr.bf16.mxu0 %v6184_v27 }
 0x412   : > { %6601 = vmatpush1.bf16.msra.mxu0 %v6183_v39  ;;  %v6274_v31 = vpop.permute.xlu1 %6273  ;;  %v6272_v29 = vpop.permute.xlu0 %6271 }
 0x413   : > { %v6294_v37 = vsel %vm1014_vm6, %v6272_v29, %v6274_v31  ;;  %v11008_v31 = vld [vmem:[%s11244_s22 + $0x1a0] ss:$60 sps:$4 sm:$0xff]  }
 0x414   : > { %7106 = vrot.lane.b32.xlu1 %v10995_v63, %s11188_s25  ;;  %7104 = vrot.lane.b32.xlu0 %v12930_v58, %s11188_s25  ;;  %v13144_v63 = vld [vmem:[%s11244_s22 + $0x198] ss:$60 sps:$4 sm:$0xff]  }
 0x415   : > { %6602 = vmatprep.subr.bf16.mxu0 %v6294_v37  ;;  %v1385_v37 = vpop.f32.mrb[4].mxu1 }
 0x416   : > { %v6278_v47 = vpop.permute.xlu1 %6277  ;;  %v6270_v36 = vpop.permute.xlu0 %6269 }
 0x417   : > { %v6293_v7 = vsel %vm1014_vm6, %v6270_v36, %v6272_v29  ;;  %v1531_v29 = vpop.f32.mrb[4].mxu0  ;;  %v1387_v36 = vpop.f32.mrb[5].mxu1 }
 0x418   : > { %8163 = vrot.lane.b32.xlu1 %v13072_v0, %s11186_s23  ;;  %7102 = vrot.lane.b32.xlu0 %v12938_v55, %s11188_s25 }
 0x419   : > { %6603 = vmatpush1.bf16.msra.mxu0 %v6293_v7 }
 0x41a   : > { %v5111_v48 = vpop.permute.xlu1 %5110  ;;  %v6280_v21 = vpop.permute.xlu0 %6279 }
 0x41b   : > { %v5123_v54 = vsel %vm1131_vm7, %v12812_v41, %v5111_v48  ;;  %v6296_v40 = vsel %vm1014_vm6, %v6278_v47, %v6280_v21  ;;  %v11009_v48 = vld [vmem:[%s11244_s22 + $0x30] ss:$60 sps:$4 sm:$0xff]  }
 0x41c   : > { %8161 = vrot.lane.b32.xlu1 %v13080_v13, %s11186_s23  ;;  %5364 = vmatprep.subr.bf16.mxu1 %v5123_v54  ;;  %v1389_v54 = vpop.f32.mrb[6].mxu1 }
 0x41d   : > { %8165 = vrot.lane.b32.xlu0 %v10999_v1, %s11186_s23  ;;  %6604 = vmatprep.subr.bf16.mxu0 %v6296_v40  ;;  %v1533_v1 = vpop.f32.mrb[5].mxu0  ;;  %v11132_v40 = vld [vmem:[%s14191_s1 + $0x8] ss:$20 sps:$4 sm:$0xff]   ;;  %v1391_v53 = vpop.f32.mrb[7].mxu1 }
 0x41e   : > { %5365 = vmatpush1.bf16.msra.mxu1 %v5122_v33  ;;  %v6284_v34 = vpop.permute.xlu1 %6283  ;;  %v6276_v35 = vpop.permute.xlu0 %6275  ;;  %v10420_v33 = vadd.f32 %v1533_v1, %v1387_v36 }
 0x41f   : > { %v6295_v3 = vsel %vm1014_vm6, %v6276_v35, %v6278_v47  ;;  %v1535_v21 = vpop.f32.mrb[6].mxu0 }
 0x420   : > { %7112 = vrot.lane.b32.xlu1 %v11000_v23, %s11188_s25  ;;  %6605 = vmatpush1.bf16.msra.mxu0 %v6295_v3  ;;  %v10419_v23 = vadd.f32 %v1531_v29, %v1385_v37  ;;  %v10421_v52 = vadd.f32 %v1535_v21, %v1389_v54  ;;  %v11133_v3 = vld [vmem:[%s14191_s1 + $0x34] ss:$20 sps:$4 sm:$0xff]   ;;  %1565 = vst [vmem:[%s13125_s9 + $0xe8] sm:$0xff] %v10420_v33 }
 0x421   : > { %7110 = vrot.lane.b32.xlu0 %v12956_v56, %s11188_s25 }
 0x422   : > { %v5115_v41 = vpop.permute.xlu1 %5114  ;;  %v6286_v51 = vpop.permute.xlu0 %6285  ;;  %1564 = vst [vmem:[%s13125_s9 + $0xe0] sm:$0xff] %v10419_v23  ;;  %1566 = vst [vmem:[%s13125_s9 + $0x150] sm:$0xff] %v10421_v52 }
 0x423   : > { %v6298_v38 = vsel %vm1014_vm6, %v6284_v34, %v6286_v51 }
 0x424   : > { %8169 = vrot.lane.b32.xlu1 %v13099_v42, %s11186_s23  ;;  %6606 = vmatprep.subr.bf16.mxu0 %v6298_v38  ;;  %v13173_v38 = vld [vmem:[%s14191_s1 + $0x38] ss:$20 sps:$4 sm:$0xff]  }
 0x425   : > { %7108 = vrot.lane.b32.xlu0 %v12970_v17, %s11188_s25 }
 0x426   : > { %v6282_v10 = vpop.permute.xlu1 %6281  ;;  %v5117_v60 = vpop.permute.xlu0 %5116 }
 0x427   : > { %v6297_v57 = vsel %vm1014_vm6, %v6282_v10, %v6284_v34  ;;  %v5125_v49 = vsel %vm1131_vm7, %v5115_v41, %v5117_v60  ;;  %v1537_v34 = vpop.f32.mrb[7].mxu0  ;;  %v1395_v10 = vpop.f32.mrb[8].mxu1 }
 0x428   : > { %8167 = vrot.lane.b32.xlu1 %v13106_v44, %s11186_s23  ;;  %6607 = vmatpush1.bf16.msra.mxu0 %v6297_v57  ;;  %v1397_v60 = vpop.f32.mrb[9].mxu1 }
 0x429   : > { %8171 = vrot.lane.b32.xlu0 %v11003_v45, %s11186_s23  ;;  %5366 = vmatprep.subr.bf16.mxu1 %v5125_v49  ;;  %v1541_v45 = vpop.f32.mrb[8].mxu0  ;;  %v1399_v32 = vpop.f32.mrb[10].mxu1 }
 0x42a   : > { %v6290_v9 = vpop.permute.xlu1 %6289  ;;  %v5113_v11 = vpop.permute.xlu0 %5112  ;;  %v10423_v5 = vadd.f32 %v1541_v45, %v1395_v10  ;;  %v13242_v10 = vld [vmem:[%s14191_s1 + $0x88] ss:$20 sps:$4 sm:$0xff]  }
 0x42b   : > { %v5124_v14 = vsel %vm1131_vm7, %v5113_v11, %v5115_v41  ;;  %v10422_v41 = vadd.f32 %v1537_v34, %v1391_v53  ;;  %v1401_v11 = vpop.f32.mrb[11].mxu1 }
 0x42c   : > { %7118 = vrot.lane.b32.xlu1 %v11004_v43, %s11188_s25  ;;  %5367 = vmatpush1.bf16.msra.mxu1 %v5124_v14  ;;  %v1543_v43 = vpop.f32.mrb[9].mxu0  ;;  %v11135_v14 = vld [vmem:[%s14191_s1 + $0x30] ss:$20 sps:$4 sm:$0xff]   ;;  %1568 = vst [vmem:[%s13125_s9 + $0x1c0] sm:$0xff] %v10423_v5 }
 0x42d   : > { %7116 = vrot.lane.b32.xlu0 %v12990_v22, %s11188_s25  ;;  %7796 = vmatprep.subr.bf16.mxu1 %v12908_v30  ;;  %1567 = vst [vmem:[%s13125_s9 + $0x158] sm:$0xff] %v10422_v41  ;;  %v1545_v62 = vpop.f32.mrb[10].mxu0  ;;  %v11139_v41 = vld [vmem:[%s14191_s1 + $0x84] ss:$20 sps:$4 sm:$0xff]  }
 0x42e   : > { %v6288_v18 = vpop.permute.xlu1 %6287  ;;  %v6292_v39 = vpop.permute.xlu0 %6291  ;;  %v10425_v59 = vadd.f32 %v1545_v62, %v1399_v32 }
 0x42f   : > { %v6299_v15 = vsel %vm1014_vm6, %v6288_v18, %v6290_v9  ;;  %10075 = vmatmul.mubr.msk.bf16.vlgmr.msra.gmra.mrb[32].mxu1 %vm1328_vm8, %v13138_v46  ;;  %v6300_v27 = vsel %vm1014_vm6, %v6290_v9, %v6292_v39  ;;  %v10424_v9 = vadd.f32 %v1543_v43, %v1397_v60  ;;  %v1547_v20 = vpop.f32.mrb[11].mxu0  ;;  %v11136_v18 = vld [vmem:[%s14191_s1 + $0x5c] ss:$20 sps:$4 sm:$0xff]   ;;  %v13213_v39 = vld [vmem:[%s14191_s1 + $0x60] ss:$20 sps:$4 sm:$0xff]  }
 0x430   : > { %8175 = vrot.lane.b32.xlu1 %v13121_v8, %s11186_s23  ;;  %6608 = vmatprep.subr.bf16.mxu0 %v6300_v27  ;;  %1570 = vst [vmem:[%s13125_s9 + $0x230] sm:$0xff] %v10425_v59  ;;  %v1551_v27 = vpop.f32.mrb[12].mxu0  ;;  %v13249_v60 = vld [vmem:[%s14191_s1 + $0x4] ss:$20 sps:$4 sm:$0xff]  }
 0x431   : > { %7114 = vrot.lane.b32.xlu0 %v12998_v26, %s11188_s25  ;;  %7797 = vmatpush1.bf16.msra.mxu1 %v12916_v2  ;;  %1569 = vst [vmem:[%s13125_s9 + $0x1c8] sm:$0xff] %v10424_v9  ;;  %v1553_v36 = vpop.f32.mrb[13].mxu0  ;;  %v11014_v59 = vld [vmem:[%s11244_s22 + $0x128] ss:$60 sps:$4 sm:$0xff]  }
 0x432   : > { %6609 = vmatpush1.bf16.msra.mxu0 %v6299_v15  ;;  %v6869_v47 = vpop.permute.xlu1 %6868  ;;  %v13150_v7 = vpop.permute.xlu0 %6866  ;;  %7798 = vmatprep.subr.bf16.mxu1 %v12930_v58 }
 0x433   : > { %5402 = vmatprep.mubr.bf16.mxu1 %v11194_v24  ;;  %v6889_v19 = vsel %vm312_vm0, %v13150_v7, %v6869_v47  ;;  %v1555_v1 = vpop.f32.mrb[14].mxu0 }
 0x434   : > { %8173 = vrot.lane.b32.xlu1 %v13144_v63, %s11186_s23  ;;  %v1557_v33 = vpop.f32.mrb[15].mxu0 }
 0x435   : > { %8177 = vrot.lane.b32.xlu0 %v11008_v31, %s11186_s23  ;;  %6611 = vmatmul.mubr.bf16.vlgmr.msra.gmra.mrb[32].mxu0 %v11132_v40  ;;  %v1405_v31 = vpop.f32.mrb[12].mxu1 }
 0x436   : > { %7799 = vmatpush1.bf16.msra.mxu1 %v12938_v55  ;;  %v6388_v35 = vpop.permute.xlu1 %6387  ;;  %6620 = vmatprep.mubr.bf16.mxu0 %v11133_v3  ;;  %v6865_v51 = vpop.permute.xlu0 %6864  ;;  %v10427_v21 = vadd.f32 %v1551_v27, %v1405_v31  ;;  %v11138_v3 = vld [vmem:[%s14191_s1 + $0x58] ss:$20 sps:$4 sm:$0xff]  }
 0x437   : > { %7800 = vmatprep.subr.bf16.mxu1 %v12956_v56  ;;  %10076 = vmatmul.mubr.msk.bf16.gmra.mrb[36].mxu1 %vm1328_vm8, %v13173_v38  ;;  %v6888_v15 = vsel %vm312_vm0, %v6865_v51, %v13150_v7  ;;  %v1407_v37 = vpop.f32.mrb[13].mxu1  ;;  %v11012_v51 = vld [vmem:[%s11244_s22 + $0xb0] ss:$60 sps:$4 sm:$0xff]  }
 0x438   : > { %7216 = vrot.lane.b32.xlu1 %v11009_v48, %s11189_s26  ;;  %5412 = vmatprep.mubr.bf16.mxu1 %v11194_v24  ;;  %v1409_v48 = vpop.f32.mrb[14].mxu1  ;;  %v10428_v54 = vadd.f32 %v1553_v36, %v1407_v37  ;;  %1572 = vst [vmem:[%s13125_s9 + $0x2a0] sm:$0xff] %v10427_v21  ;;  %v11017_v31 = vld [vmem:[%s11244_s22 + $0x30] ss:$60 sps:$4 sm:$0xff]  }
 0x439   : > { %7214 = vrot.lane.b32.xlu0 %v12908_v30, %s11189_s26  ;;  %v10429_v40 = vadd.f32 %v1555_v1, %v1409_v48  ;;  %v1411_v23 = vpop.f32.mrb[15].mxu1 }
 0x43a   : > { %7801 = vmatpush1.bf16.msra.mxu1 %v12970_v17  ;;  %v6386_v57 = vpop.permute.xlu1 %6385  ;;  %v6390_v49 = vpop.permute.xlu0 %6389  ;;  %v10430_v53 = vadd.f32 %v1557_v33, %v1411_v23  ;;  %1573 = vst [vmem:[%s13125_s9 + $0x2a8] sm:$0xff] %v10428_v54  ;;  %v11021_v33 = vld [vmem:[%s11244_s22 + $0x38] ss:$60 sps:$4 sm:$0xff]  }
 0x43b   : > { %v6409_v12 = vsel %vm1131_vm7, %v6386_v57, %v6388_v35  ;;  %7802 = vmatprep.subr.bf16.mxu1 %v12990_v22  ;;  %v6410_v30 = vsel %vm1131_vm7, %v6388_v35, %v6390_v49  ;;  %1574 = vst [vmem:[%s13125_s9 + $0x310] sm:$0xff] %v10429_v40 }
 0x43c   : > { %8273 = vrot.lane.b32.xlu1 %v13050_v16, %s11187_s24  ;;  %6651 = vmatprep.subr.bf16.mxu0 %v6410_v30  ;;  %1575 = vst [vmem:[%s13125_s9 + $0x318] sm:$0xff] %v10430_v53  ;;  %v11142_v30 = vld [vmem:[%s14191_s1 + $0x80] ss:$20 sps:$4 sm:$0xff]  }
 0x43d   : > { %7212 = vrot.lane.b32.xlu0 %v12916_v2, %s11189_s26  ;;  %6652 = vmatpush1.bf16.msra.mxu0 %v6409_v12  ;;  %v10426_v2 = vadd.f32 %v1547_v20, %v1401_v11  ;;  %v11013_v12 = vld [vmem:[%s11244_s22 + $0x120] ss:$60 sps:$4 sm:$0xff]  }
 0x43e   : > { %7803 = vmatpush1.bf16.msra.mxu1 %v12998_v26  ;;  %v6875_v25 = vpop.permute.xlu1 %6874  ;;  %v6873_v4 = vpop.permute.xlu0 %6872  ;;  %6621 = vmatmul.mubr.bf16.gmra.mrb[36].mxu0 %v11135_v14 }
 0x43f   : > { %7804 = vmatprep.subr.bf16.mxu1 %v6889_v19  ;;  %v6891_v28 = vsel %vm312_vm0, %v6873_v4, %v6875_v25  ;;  %6630 = vmatprep.mubr.bf16.mxu0 %v11136_v18  ;;  %1571 = vst [vmem:[%s13125_s9 + $0x238] sm:$0xff] %v10426_v2  ;;  %v11015_v19 = vld [vmem:[%s11244_s22 + $0x198] ss:$60 sps:$4 sm:$0xff]   ;;  %v11016_v18 = vld [vmem:[%s11244_s22 + $0x1a0] ss:$60 sps:$4 sm:$0xff]  }
 0x440   : > { %8271 = vrot.lane.b32.xlu1 %v13058_v50, %s11187_s24  ;;  %10077 = vmatmul.mubr.msk.bf16.gmra.mrb[40].mxu1 %vm1328_vm8, %v13213_v39 }
 0x441   : > { %8275 = vrot.lane.b32.xlu0 %v11010_v6, %s11187_s24  ;;  %5422 = vmatprep.mubr.bf16.mxu1 %v11194_v24 }
 0x442   : > { %7805 = vmatpush1.bf16.msra.mxu1 %v6888_v15  ;;  %v6394_v29 = vpop.permute.xlu1 %6393  ;;  %v6871_v47 = vpop.permute.xlu0 %6870 }
 0x443   : > { %7806 = vmatprep.subr.bf16.mxu1 %v6891_v28  ;;  %v6890_v7 = vsel %vm312_vm0, %v6871_v47, %v6873_v4  ;;  %v2812_v47 = vpop.f32.mrb[16].mxu1 }
 0x444   : > { %7222 = vrot.lane.b32.xlu1 %v11011_v61, %s11189_s26  ;;  %2851 = vst [vmem:[%s13125_s9 + $0x10] sm:$0xff] %v2812_v47 }
 0x445   : > { %7220 = vrot.lane.b32.xlu0 %v12930_v58, %s11189_s26 }
 0x446   : > { %7807 = vmatpush1.bf16.msra.mxu1 %v6890_v7  ;;  %v6392_v52 = vpop.permute.xlu1 %6391  ;;  %v6396_v35 = vpop.permute.xlu0 %6395  ;;  %6631 = vmatmul.mubr.bf16.gmra.mrb[40].mxu0 %v11138_v3  ;;  %v13333_v3 = vld [vmem:[%s11244_s22 + $0xa4] ss:$60 sps:$4 sm:$0xff]  }
 0x447   : > { %v6411_v34 = vsel %vm1131_vm7, %v6392_v52, %v6394_v29  ;;  %v6412_v58 = vsel %vm1131_vm7, %v6394_v29, %v6396_v35  ;;  %6640 = vmatprep.mubr.bf16.mxu0 %v11139_v41  ;;  %v2814_v7 = vpop.f32.mrb[17].mxu1  ;;  %v11022_v35 = vld [vmem:[%s11244_s22 + $0xa8] ss:$60 sps:$4 sm:$0xff]  }
 0x448   : > { %8279 = vrot.lane.b32.xlu1 %v13072_v0, %s11187_s24  ;;  %6653 = vmatprep.subr.bf16.mxu0 %v6412_v58  ;;  %2852 = vst [vmem:[%s13125_s9 + $0x18] sm:$0xff] %v2814_v7  ;;  %v2816_v1 = vpop.f32.mrb[18].mxu1 }
 0x449   : > { %7218 = vrot.lane.b32.xlu0 %v12938_v55, %s11189_s26  ;;  %6654 = vmatpush1.bf16.msra.mxu0 %v6411_v34  ;;  %2853 = vst [vmem:[%s13125_s9 + $0x80] sm:$0xff] %v2816_v1  ;;  %v2818_v21 = vpop.f32.mrb[19].mxu1 }
 0x44a   : > { %v6881_v45 = vpop.permute.xlu1 %6880  ;;  %10078 = vmatmul.mubr.msk.bf16.gmra.mrb[44].mxu1 %vm1328_vm8, %v13242_v10  ;;  %v6879_v57 = vpop.permute.xlu0 %6878  ;;  %2854 = vst [vmem:[%s13125_s9 + $0x88] sm:$0xff] %v2818_v21  ;;  %v11036_v21 = vld [vmem:[%s11244_s22 + $0x1a0] ss:$60 sps:$4 sm:$0xff]  }
 0x44b   : > { %7828 = vmatprep.mubr.bf16.mxu1 %v13249_v60  ;;  %v6893_v55 = vsel %vm312_vm0, %v6879_v57, %v6881_v45 }
 0x44c   : > { %8277 = vrot.lane.b32.xlu1 %v13080_v13, %s11187_s24  ;;  %7808 = vmatprep.subr.bf16.mxu1 %v6893_v55 }
 0x44d   : > { %8281 = vrot.lane.b32.xlu0 %v11012_v51, %s11187_s24  ;;  %v13341_v51 = vld [vmem:[%s11244_s22 + $0xa0] ss:$60 sps:$4 sm:$0xff]  }
 0x44e   : > { %v6400_v49 = vpop.permute.xlu1 %6399  ;;  %v6877_v43 = vpop.permute.xlu0 %6876  ;;  %6641 = vmatmul.mubr.bf16.gmra.mrb[44].mxu0 %v11142_v30 }
 0x44f   : > { %v6892_v62 = vsel %vm312_vm0, %v6877_v43, %v6879_v57  ;;  %6683 = vmatprep.mubr.bf16.mxu0 %v11194_v24 }
 0x450   : > { %7228 = vrot.lane.b32.xlu1 %v11013_v12, %s11189_s26  ;;  %7809 = vmatpush1.bf16.msra.mxu1 %v6892_v62  ;;  %v11027_v62 = vld [vmem:[%s11244_s22 + $0x120] ss:$60 sps:$4 sm:$0xff]  }
 0x451   : > { %7226 = vrot.lane.b32.xlu0 %v12956_v56, %s11189_s26 }
 0x452   : > { %v6398_v32 = vpop.permute.xlu1 %6397  ;;  %v6402_v5 = vpop.permute.xlu0 %6401 }
 0x453   : > { %v6413_v6 = vsel %vm1131_vm7, %v6398_v32, %v6400_v49  ;;  %v6414_v9 = vsel %vm1131_vm7, %v6400_v49, %v6402_v5  ;;  %v11026_v49 = vld [vmem:[%s11244_s22 + $0xb0] ss:$60 sps:$4 sm:$0xff]   ;;  %v13359_v32 = vld [vmem:[%s11244_s22 + $0x11c] ss:$60 sps:$4 sm:$0xff]  }
 0x454   : > { %8285 = vrot.lane.b32.xlu1 %v13099_v42, %s11187_s24  ;;  %6655 = vmatprep.subr.bf16.mxu0 %v6414_v9 }
 0x455   : > { %7224 = vrot.lane.b32.xlu0 %v12970_v17, %s11189_s26  ;;  %6656 = vmatpush1.bf16.msra.mxu0 %v6413_v6 }
 0x456   : > { %v6887_v11 = vpop.permute.xlu1 %6886  ;;  %v6885_v20 = vpop.permute.xlu0 %6884 }
 0x457   : > { %v6895_v56 = vsel %vm312_vm0, %v6885_v20, %v6887_v11 }
 0x458   : > { %8283 = vrot.lane.b32.xlu1 %v13106_v44, %s11187_s24  ;;  %7810 = vmatprep.subr.bf16.mxu1 %v6895_v56 }
 0x459   : > { %8287 = vrot.lane.b32.xlu0 %v11014_v59, %s11187_s24  ;;  %v13369_v59 = vld [vmem:[%s11244_s22 + $0x118] ss:$60 sps:$4 sm:$0xff]  }
 0x45a   : > { %v6406_v25 = vpop.permute.xlu1 %6405  ;;  %v6883_v2 = vpop.permute.xlu0 %6882 }
 0x45b   : > { %v6894_v4 = vsel %vm312_vm0, %v6883_v2, %v6885_v20 }
 0x45c   : > { %7234 = vrot.lane.b32.xlu1 %v11015_v19, %s11189_s26  ;;  %7811 = vmatpush1.bf16.msra.mxu1 %v6894_v4  ;;  %v11032_v4 = vld [vmem:[%s11244_s22 + $0x198] ss:$60 sps:$4 sm:$0xff]  }
 0x45d   : > { %7232 = vrot.lane.b32.xlu0 %v12990_v22, %s11189_s26 }
 0x45e   : > { %v6404_v17 = vpop.permute.xlu1 %6403  ;;  %v6408_v28 = vpop.permute.xlu0 %6407 }
 0x45f   : > { %v6415_v14 = vsel %vm1131_vm7, %v6404_v17, %v6406_v25  ;;  %v6416_v61 = vsel %vm1131_vm7, %v6406_v25, %v6408_v28  ;;  %v13384_v17 = vld [vmem:[%s11244_s22 + $0x194] ss:$60 sps:$4 sm:$0xff]  }
 0x460   : > { %8291 = vrot.lane.b32.xlu1 %v13121_v8, %s11187_s24  ;;  %6657 = vmatprep.subr.bf16.mxu0 %v6416_v61 }
 0x461   : > { %7230 = vrot.lane.b32.xlu0 %v12998_v26, %s11189_s26  ;;  %6658 = vmatpush1.bf16.msra.mxu0 %v6415_v14  ;;  %v13295_v26 = vld [vmem:[%s11244_s22 + $0x2c] ss:$60 sps:$4 sm:$0xff]   ;;  %v4103_v14 = vpop.f32.mrb[16].mxu0 }
 0x462   : > { %v6985_v15 = vpop.permute.xlu1 %6984  ;;  %v6983_v22 = vpop.permute.xlu0 %6982  ;;  %9087 = vmatprep.subr.bf16.mxu0 %v13050_v16  ;;  %4142 = vst [vmem:[%s13125_s9 + $0x20] sm:$0xff] %v4103_v14 }
 0x463   : > { %v7005_v27 = vsel %vm429_vm1, %v6983_v22, %v6985_v15  ;;  %v4105_v61 = vpop.f32.mrb[17].mxu0 }
 0x464   : > { %8289 = vrot.lane.b32.xlu1 %v13144_v63, %s11187_s24  ;;  %7812 = vmatprep.subr.bf16.mxu1 %v7005_v27  ;;  %4143 = vst [vmem:[%s13125_s9 + $0x28] sm:$0xff] %v4105_v61  ;;  %v4107_v15 = vpop.f32.mrb[18].mxu0 }
 0x465   : > { %8293 = vrot.lane.b32.xlu0 %v11016_v18, %s11187_s24  ;;  %10183 = vmatmul.mubr.msk.bf16.vlgmr.msra.gmra.mrb[32].mxu0 %vm1328_vm8, %v13138_v46  ;;  %v13308_v46 = vld [vmem:[%s11244_s22 + $0x28] ss:$60 sps:$4 sm:$0xff]   ;;  %4144 = vst [vmem:[%s13125_s9 + $0x90] sm:$0xff] %v4107_v15  ;;  %v4109_v27 = vpop.f32.mrb[19].mxu0 }
 0x466   : > { %v6989_v29 = vpop.permute.xlu1 %6988  ;;  %v6981_v37 = vpop.permute.xlu0 %6980  ;;  %9088 = vmatpush1.bf16.msra.mxu0 %v13058_v50  ;;  %6693 = vmatprep.mubr.bf16.mxu0 %v11194_v24  ;;  %4145 = vst [vmem:[%s13125_s9 + $0x98] sm:$0xff] %v4109_v27  ;;  %v13470_v27 = vld [vmem:[%s14191_s1 + $0x28] ss:$20 sps:$4 sm:$0xff]  }
 0x467   : > { %v7004_v36 = vsel %vm429_vm1, %v6981_v37, %v6983_v22  ;;  %9089 = vmatprep.subr.bf16.mxu0 %v13072_v0  ;;  %v2822_v37 = vpop.f32.mrb[20].mxu1 }
 0x468   : > { %7332 = vrot.lane.b32.xlu1 %v11017_v31, %s11190_s27  ;;  %7813 = vmatpush1.bf16.msra.mxu1 %v7004_v36  ;;  %v13394_v31 = vld [vmem:[%s11244_s22 + $0x190] ss:$60 sps:$4 sm:$0xff]   ;;  %2855 = vst [vmem:[%s13125_s9 + $0xf0] sm:$0xff] %v2822_v37  ;;  %v2824_v7 = vpop.f32.mrb[21].mxu1 }
 0x469   : > { %7330 = vrot.lane.b32.xlu0 %v13295_v26, %s11190_s27  ;;  %2856 = vst [vmem:[%s13125_s9 + $0xf8] sm:$0xff] %v2824_v7 }
 0x46a   : > { %v6987_v48 = vpop.permute.xlu1 %6986  ;;  %v6991_v40 = vpop.permute.xlu0 %6990  ;;  %9090 = vmatpush1.bf16.msra.mxu0 %v13080_v13 }
 0x46b   : > { %v7006_v54 = vsel %vm429_vm1, %v6987_v48, %v6989_v29  ;;  %v7007_v23 = vsel %vm429_vm1, %v6989_v29, %v6991_v40  ;;  %9091 = vmatprep.subr.bf16.mxu0 %v13099_v42  ;;  %v2826_v48 = vpop.f32.mrb[22].mxu1 }
 0x46c   : > { %8389 = vrot.lane.b32.xlu1 %v13050_v16, %s11188_s25  ;;  %7814 = vmatprep.subr.bf16.mxu1 %v7007_v23  ;;  %2857 = vst [vmem:[%s13125_s9 + $0x160] sm:$0xff] %v2826_v48 }
 0x46d   : > { %7328 = vrot.lane.b32.xlu0 %v13308_v46, %s11190_s27  ;;  %7815 = vmatpush1.bf16.msra.mxu1 %v7006_v54  ;;  %v2828_v54 = vpop.f32.mrb[23].mxu1 }
 0x46e   : > { %v6997_v52 = vpop.permute.xlu1 %6996  ;;  %10184 = vmatmul.mubr.msk.bf16.gmra.mrb[36].mxu0 %vm1328_vm8, %v13173_v38  ;;  %v6995_v53 = vpop.permute.xlu0 %6994  ;;  %2858 = vst [vmem:[%s13125_s9 + $0x168] sm:$0xff] %v2828_v54 }
 0x46f   : > { %9092 = vmatpush1.bf16.msra.mxu0 %v13106_v44  ;;  %6703 = vmatprep.mubr.bf16.mxu0 %v11194_v24  ;;  %v7009_v34 = vsel %vm429_vm1, %v6995_v53, %v6997_v52 }
 0x470   : > { %8387 = vrot.lane.b32.xlu1 %v13058_v50, %s11188_s25  ;;  %9093 = vmatprep.subr.bf16.mxu0 %v13121_v8 }
 0x471   : > { %8391 = vrot.lane.b32.xlu0 %v11021_v33, %s11188_s25  ;;  %7816 = vmatprep.subr.bf16.mxu1 %v7009_v34  ;;  %v11037_v33 = vld [vmem:[%s11244_s22 + $0x30] ss:$60 sps:$4 sm:$0xff]  }
 0x472   : > { %v7001_v38 = vpop.permute.xlu1 %7000  ;;  %v6993_v58 = vpop.permute.xlu0 %6992 }
 0x473   : > { %9094 = vmatpush1.bf16.msra.mxu0 %v13144_v63  ;;  %v7008_v41 = vsel %vm429_vm1, %v6993_v58, %v6995_v53  ;;  %v2832_v53 = vpop.f32.mrb[24].mxu1 }
 0x474   : > { %7338 = vrot.lane.b32.xlu1 %v11022_v35, %s11190_s27  ;;  %7817 = vmatpush1.bf16.msra.mxu1 %v7008_v41  ;;  %2859 = vst [vmem:[%s13125_s9 + $0x1d0] sm:$0xff] %v2832_v53  ;;  %v2834_v35 = vpop.f32.mrb[25].mxu1 }
 0x475   : > { %7336 = vrot.lane.b32.xlu0 %v13333_v3, %s11190_s27  ;;  %2860 = vst [vmem:[%s13125_s9 + $0x1d8] sm:$0xff] %v2834_v35 }
 0x476   : > { %v6999_v45 = vpop.permute.xlu1 %6998  ;;  %10185 = vmatmul.mubr.msk.bf16.gmra.mrb[40].mxu0 %vm1328_vm8, %v13213_v39  ;;  %v7003_v55 = vpop.permute.xlu0 %7002 }
 0x477   : > { %v7010_v57 = vsel %vm429_vm1, %v6999_v45, %v7001_v38  ;;  %6713 = vmatprep.mubr.bf16.mxu0 %v11194_v24  ;;  %v7011_v12 = vsel %vm429_vm1, %v7001_v38, %v7003_v55 }
 0x478   : > { %8395 = vrot.lane.b32.xlu1 %v13072_v0, %s11188_s25  ;;  %7818 = vmatprep.subr.bf16.mxu1 %v7011_v12  ;;  %v11038_v12 = vld [vmem:[%s11244_s22 + $0x38] ss:$60 sps:$4 sm:$0xff]  }
 0x479   : > { %7334 = vrot.lane.b32.xlu0 %v13341_v51, %s11190_s27  ;;  %7819 = vmatpush1.bf16.msra.mxu1 %v7010_v57 }
 0x47a   : > { %v7101_v43 = vpop.permute.xlu1 %7100  ;;  %v7099_v39 = vpop.permute.xlu0 %7098 }
 0x47b   : > { %v7121_v30 = vsel %vm546_vm2, %v7099_v39, %v7101_v43 }
 0x47c   : > { %8393 = vrot.lane.b32.xlu1 %v13080_v13, %s11188_s25  ;;  %7820 = vmatprep.subr.bf16.mxu1 %v7121_v30 }
 0x47d   : > { %8397 = vrot.lane.b32.xlu0 %v11026_v49, %s11188_s25 }
 0x47e   : > { %v8158_v6 = vpop.permute.xlu1 %8157  ;;  %10186 = vmatmul.mubr.msk.bf16.gmra.mrb[44].mxu0 %vm1328_vm8, %v13242_v10  ;;  %v7097_v5 = vpop.permute.xlu0 %7096 }
 0x47f   : > { %9119 = vmatprep.mubr.bf16.mxu0 %v13249_v60  ;;  %v7120_v9 = vsel %vm546_vm2, %v7097_v5, %v7099_v39  ;;  %v11031_v60 = vld [vmem:[%s11244_s22 + $0x128] ss:$60 sps:$4 sm:$0xff]  }
 0x480   : > { %7344 = vrot.lane.b32.xlu1 %v11027_v62, %s11190_s27  ;;  %7821 = vmatpush1.bf16.msra.mxu1 %v7120_v9  ;;  %v11039_v62 = vld [vmem:[%s11244_s22 + $0xa8] ss:$60 sps:$4 sm:$0xff]  }
 0x481   : > { %7342 = vrot.lane.b32.xlu0 %v13359_v32, %s11190_s27 }
 0x482   : > { %v8156_v11 = vpop.permute.xlu1 %8155  ;;  %v8160_v56 = vpop.permute.xlu0 %8159 }
 0x483   : > { %v8179_v20 = vsel %vm312_vm0, %v8156_v11, %v8158_v6  ;;  %v8180_v10 = vsel %vm312_vm0, %v8158_v6, %v8160_v56 }
 0x484   : > { %8401 = vrot.lane.b32.xlu1 %v13099_v42, %s11188_s25  ;;  %9095 = vmatprep.subr.bf16.mxu0 %v8180_v10 }
 0x485   : > { %7340 = vrot.lane.b32.xlu0 %v13369_v59, %s11190_s27  ;;  %9096 = vmatpush1.bf16.msra.mxu0 %v8179_v20 }
 0x486   : > { %v7107_v19 = vpop.permute.xlu1 %7106  ;;  %v7105_v25 = vpop.permute.xlu0 %7104 }
 0x487   : > { %v7123_v2 = vsel %vm546_vm2, %v7105_v25, %v7107_v19  ;;  %v13448_v19 = vld [vmem:[%s14191_s1] ss:$20 sps:$4 sm:$0xff]  }
 0x488   : > { %8399 = vrot.lane.b32.xlu1 %v13106_v44, %s11188_s25  ;;  %7822 = vmatprep.subr.bf16.mxu1 %v7123_v2 }
 0x489   : > { %8403 = vrot.lane.b32.xlu0 %v11031_v60, %s11188_s25 }
 0x48a   : > { %v8164_v28 = vpop.permute.xlu1 %8163  ;;  %v7103_v18 = vpop.permute.xlu0 %7102 }
 0x48b   : > { %v7122_v22 = vsel %vm546_vm2, %v7103_v18, %v7105_v25  ;;  %v11040_v25 = vld [vmem:[%s11244_s22 + $0xb0] ss:$60 sps:$4 sm:$0xff]  }
 0x48c   : > { %7350 = vrot.lane.b32.xlu1 %v11032_v4, %s11190_s27  ;;  %7823 = vmatpush1.bf16.msra.mxu1 %v7122_v22  ;;  %v4113_v22 = vpop.f32.mrb[20].mxu0 }
 0x48d   : > { %7348 = vrot.lane.b32.xlu0 %v13384_v17, %s11190_s27  ;;  %4146 = vst [vmem:[%s13125_s9 + $0x100] sm:$0xff] %v4113_v22  ;;  %v11054_v22 = vld [vmem:[%s11244_s22 + $0xa8] ss:$60 sps:$4 sm:$0xff]  }
 0x48e   : > { %v8162_v29 = vpop.permute.xlu1 %8161 }
 0x48f   : > { %v8181_v47 = vsel %vm312_vm0, %v8162_v29, %v8164_v28  ;;  %v8166_v36 = vpop.permute.xlu0 %8165 }
 0x490   : > { %8407 = vrot.lane.b32.xlu1 %v13121_v8, %s11188_s25  ;;  %v8182_v1 = vsel %vm312_vm0, %v8164_v28, %v8166_v36  ;;  %v11041_v28 = vld [vmem:[%s11244_s22 + $0x120] ss:$60 sps:$4 sm:$0xff]  }
 0x491   : > { %7346 = vrot.lane.b32.xlu0 %v13394_v31, %s11190_s27  ;;  %9097 = vmatprep.subr.bf16.mxu0 %v8182_v1 }
 0x492   : > { %9098 = vmatpush1.bf16.msra.mxu0 %v8181_v47  ;;  %v7113_v40 = vpop.permute.xlu1 %7112  ;;  %v13480_v47 = vld [vmem:[%s14191_s1 + $0x54] ss:$20 sps:$4 sm:$0xff]  }
 0x493   : > { %v7111_v23 = vpop.permute.xlu0 %7110 }
 0x494   : > { %8405 = vrot.lane.b32.xlu1 %v13144_v63, %s11188_s25  ;;  %v7125_v8 = vsel %vm546_vm2, %v7111_v23, %v7113_v40  ;;  %v2836_v63 = vpop.f32.mrb[26].mxu1 }
 0x495   : > { %8409 = vrot.lane.b32.xlu0 %v11036_v21, %s11188_s25  ;;  %7824 = vmatprep.subr.bf16.mxu1 %v7125_v8  ;;  %2861 = vst [vmem:[%s13125_s9 + $0x240] sm:$0xff] %v2836_v63  ;;  %v2838_v58 = vpop.f32.mrb[27].mxu1  ;;  %v11043_v21 = vld [vmem:[%s11244_s22 + $0x128] ss:$60 sps:$4 sm:$0xff]  }
 0x496   : > { %v8170_v52 = vpop.permute.xlu1 %8169  ;;  %2862 = vst [vmem:[%s13125_s9 + $0x248] sm:$0xff] %v2838_v58  ;;  %v2842_v43 = vpop.f32.mrb[28].mxu1  ;;  %v13515_v58 = vld [vmem:[%s11244_s22 + $0x19c] ss:$60 sps:$4 sm:$0xff]  }
 0x497   : > { %v7109_v34 = vpop.permute.xlu0 %7108  ;;  %2863 = vst [vmem:[%s13125_s9 + $0x2b0] sm:$0xff] %v2842_v43  ;;  %v2844_v30 = vpop.f32.mrb[29].mxu1  ;;  %v13530_v43 = vld [vmem:[%s14191_s1 + $0x78] ss:$20 sps:$4 sm:$0xff]  }
 0x498   : > { %v7124_v38 = vsel %vm546_vm2, %v7109_v34, %v7111_v23  ;;  %7448 = vrot.lane.b32.xlu1 %v11037_v33, %s11191_s28  ;;  %2864 = vst [vmem:[%s13125_s9 + $0x2b8] sm:$0xff] %v2844_v30  ;;  %v2846_v6 = vpop.f32.mrb[30].mxu1  ;;  %v13499_v33 = vld [vmem:[%s14191_s1 + $0x50] ss:$20 sps:$4 sm:$0xff]  }
 0x499   : > { %7446 = vrot.lane.b32.xlu0 %v13295_v26, %s11191_s28  ;;  %7825 = vmatpush1.bf16.msra.mxu1 %v7124_v38  ;;  %2865 = vst [vmem:[%s13125_s9 + $0x320] sm:$0xff] %v2846_v6  ;;  %v2848_v5 = vpop.f32.mrb[31].mxu1  ;;  %v13508_v34 = vld [vmem:[%s14191_s1 + $0x7c] ss:$20 sps:$4 sm:$0xff]   ;;  %v13541_v6 = vld [vmem:[%s14191_s1 + $0xc] ss:$20 sps:$4 sm:$0xff]  }
 0x49a   : > { %v8168_v41 = vpop.permute.xlu1 %8167  ;;  %2866 = vst [vmem:[%s13125_s9 + $0x328] sm:$0xff] %v2848_v5 }
 0x49b   : > { %v8183_v45 = vsel %vm312_vm0, %v8168_v41, %v8170_v52  ;;  %v8172_v57 = vpop.permute.xlu0 %8171 }
 0x49c   : > { %8505 = vrot.lane.b32.xlu1 %v13050_v16, %s11189_s26  ;;  %v8184_v55 = vsel %vm312_vm0, %v8170_v52, %v8172_v57 }
 0x49d   : > { %7444 = vrot.lane.b32.xlu0 %v13308_v46, %s11191_s28  ;;  %9099 = vmatprep.subr.bf16.mxu0 %v8184_v55 }
 0x49e   : > { %9100 = vmatpush1.bf16.msra.mxu0 %v8183_v45  ;;  %v7119_v49 = vpop.permute.xlu1 %7118 }
 0x49f   : > { %v7117_v39 = vpop.permute.xlu0 %7116 }
 0x4a0   : > { %8503 = vrot.lane.b32.xlu1 %v13058_v50, %s11189_s26  ;;  %v7127_v16 = vsel %vm546_vm2, %v7117_v39, %v7119_v49 }
 0x4a1   : > { %8507 = vrot.lane.b32.xlu0 %v11038_v12, %s11189_s26  ;;  %7826 = vmatprep.subr.bf16.mxu1 %v7127_v16  ;;  %v13525_v12 = vld [vmem:[%s11244_s22 + $0x198] ss:$60 sps:$4 sm:$0xff]  }
 0x4a2   : > { %v8176_v9 = vpop.permute.xlu1 %8175 }
 0x4a3   : > { %v7115_v11 = vpop.permute.xlu0 %7114 }
 0x4a4   : > { %v7126_v20 = vsel %vm546_vm2, %v7115_v11, %v7117_v39  ;;  %7454 = vrot.lane.b32.xlu1 %v11039_v62, %s11191_s28  ;;  %v11048_v39 = vld [vmem:[%s11244_s22 + $0x1a0] ss:$60 sps:$4 sm:$0xff]  }
 0x4a5   : > { %7452 = vrot.lane.b32.xlu0 %v13333_v3, %s11191_s28  ;;  %7827 = vmatpush1.bf16.msra.mxu1 %v7126_v20  ;;  %v11049_v20 = vld [vmem:[%s11244_s22 + $0x30] ss:$60 sps:$4 sm:$0xff]  }
 0x4a6   : > { %v8174_v50 = vpop.permute.xlu1 %8173 }
 0x4a7   : > { %v8185_v56 = vsel %vm312_vm0, %v8174_v50, %v8176_v9  ;;  %v8178_v10 = vpop.permute.xlu0 %8177 }
 0x4a8   : > { %8511 = vrot.lane.b32.xlu1 %v13072_v0, %s11189_s26  ;;  %v8186_v60 = vsel %vm312_vm0, %v8176_v9, %v8178_v10  ;;  %7829 = vmatmul.mubr.bf16.vlgmr.msra.gmra.mrb[48].mxu1 %v13448_v19  ;;  %v13457_v0 = vld [vmem:[%s14191_s1 + $0x2c] ss:$20 sps:$4 sm:$0xff]  }
 0x4a9   : > { %7450 = vrot.lane.b32.xlu0 %v13341_v51, %s11191_s28  ;;  %9101 = vmatprep.subr.bf16.mxu0 %v8186_v60  ;;  %v13554_v60 = vld [vmem:[%s11244_s22 + $0x34] ss:$60 sps:$4 sm:$0xff]  }
 0x4aa   : > { %9102 = vmatpush1.bf16.msra.mxu0 %v8185_v56  ;;  %v7217_v2 = vpop.permute.xlu1 %7216  ;;  %7838 = vmatprep.mubr.bf16.mxu1 %v13457_v0 }
 0x4ab   : > { %v7215_v4 = vpop.permute.xlu0 %7214 }
 0x4ac   : > { %8509 = vrot.lane.b32.xlu1 %v13080_v13, %s11189_s26  ;;  %v7237_v14 = vsel %vm663_vm3, %v7215_v4, %v7217_v2  ;;  %v4115_v13 = vpop.f32.mrb[21].mxu0 }
 0x4ad   : > { %8513 = vrot.lane.b32.xlu0 %v11040_v25, %s11189_s26  ;;  %7869 = vmatprep.subr.bf16.mxu1 %v7237_v14  ;;  %4147 = vst [vmem:[%s13125_s9 + $0x108] sm:$0xff] %v4115_v13  ;;  %v4117_v37 = vpop.f32.mrb[22].mxu0 }
 0x4ae   : > { %v8274_v61 = vpop.permute.xlu1 %8273  ;;  %4148 = vst [vmem:[%s13125_s9 + $0x170] sm:$0xff] %v4117_v37  ;;  %v4119_v1 = vpop.f32.mrb[23].mxu0  ;;  %v13576_v37 = vld [vmem:[%s11244_s22 + $0xac] ss:$60 sps:$4 sm:$0xff]  }
 0x4af   : > { %v7213_v18 = vpop.permute.xlu0 %7212  ;;  %4149 = vst [vmem:[%s13125_s9 + $0x178] sm:$0xff] %v4119_v1  ;;  %v4123_v8 = vpop.f32.mrb[24].mxu0 }
 0x4b0   : > { %v7236_v15 = vsel %vm663_vm3, %v7213_v18, %v7215_v4  ;;  %7460 = vrot.lane.b32.xlu1 %v11041_v28, %s11191_s28  ;;  %7839 = vmatmul.mubr.bf16.gmra.mrb[52].mxu1 %v13470_v27  ;;  %4150 = vst [vmem:[%s13125_s9 + $0x1e0] sm:$0xff] %v4123_v8  ;;  %v4125_v52 = vpop.f32.mrb[25].mxu0  ;;  %v13563_v28 = vld [vmem:[%s11244_s22 + $0x30] ss:$60 sps:$4 sm:$0xff]  }
 0x4b1   : > { %7458 = vrot.lane.b32.xlu0 %v13359_v32, %s11191_s28  ;;  %7870 = vmatpush1.bf16.msra.mxu1 %v7236_v15  ;;  %4151 = vst [vmem:[%s13125_s9 + $0x1e8] sm:$0xff] %v4125_v52  ;;  %v4127_v53 = vpop.f32.mrb[26].mxu0 }
 0x4b2   : > { %v8272_v29 = vpop.permute.xlu1 %8271  ;;  %7848 = vmatprep.mubr.bf16.mxu1 %v13480_v47  ;;  %4152 = vst [vmem:[%s13125_s9 + $0x250] sm:$0xff] %v4127_v53  ;;  %v4129_v38 = vpop.f32.mrb[27].mxu0 }
 0x4b3   : > { %v8295_v36 = vsel %vm429_vm1, %v8272_v29, %v8274_v61  ;;  %v8276_v7 = vpop.permute.xlu0 %8275  ;;  %4153 = vst [vmem:[%s13125_s9 + $0x258] sm:$0xff] %v4129_v38  ;;  %v4133_v49 = vpop.f32.mrb[28].mxu0 }
 0x4b4   : > { %8517 = vrot.lane.b32.xlu1 %v13099_v42, %s11189_s26  ;;  %v8296_v48 = vsel %vm429_vm1, %v8274_v61, %v8276_v7  ;;  %v11044_v42 = vld [vmem:[%s11244_s22 + $0x198] ss:$60 sps:$4 sm:$0xff]   ;;  %4154 = vst [vmem:[%s13125_s9 + $0x2c0] sm:$0xff] %v4133_v49  ;;  %v4135_v30 = vpop.f32.mrb[29].mxu0 }
 0x4b5   : > { %7456 = vrot.lane.b32.xlu0 %v13369_v59, %s11191_s28  ;;  %9103 = vmatprep.subr.bf16.mxu0 %v8296_v48  ;;  %4155 = vst [vmem:[%s13125_s9 + $0x2c8] sm:$0xff] %v4135_v30  ;;  %v4137_v62 = vpop.f32.mrb[30].mxu0  ;;  %v11053_v61 = vld [vmem:[%s11244_s22 + $0x38] ss:$60 sps:$4 sm:$0xff]  }
 0x4b6   : > { %9104 = vmatpush1.bf16.msra.mxu0 %v8295_v36  ;;  %v7223_v54 = vpop.permute.xlu1 %7222  ;;  %4156 = vst [vmem:[%s13125_s9 + $0x330] sm:$0xff] %v4137_v62  ;;  %v4139_v9 = vpop.f32.mrb[31].mxu0  ;;  %v11064_v49 = vld [vmem:[%s11244_s22 + $0x198] ss:$60 sps:$4 sm:$0xff]  }
 0x4b7   : > { %v7221_v40 = vpop.permute.xlu0 %7220  ;;  %4157 = vst [vmem:[%s13125_s9 + $0x338] sm:$0xff] %v4139_v9 }
 0x4b8   : > { %8515 = vrot.lane.b32.xlu1 %v13106_v44, %s11189_s26  ;;  %v7239_v23 = vsel %vm663_vm3, %v7221_v40, %v7223_v54  ;;  %7849 = vmatmul.mubr.bf16.gmra.mrb[56].mxu1 %v13499_v33  ;;  %v11058_v54 = vld [vmem:[%s11244_s22 + $0xb0] ss:$60 sps:$4 sm:$0xff]  }
 0x4b9   : > { %8519 = vrot.lane.b32.xlu0 %v11043_v21, %s11189_s26  ;;  %7871 = vmatprep.subr.bf16.mxu1 %v7239_v23  ;;  %v13585_v21 = vld [vmem:[%s11244_s22 + $0xa8] ss:$60 sps:$4 sm:$0xff]  }
 0x4ba   : > { %v8280_v44 = vpop.permute.xlu1 %8279  ;;  %7858 = vmatprep.mubr.bf16.mxu1 %v13508_v34 }
 0x4bb   : > { %v7219_v35 = vpop.permute.xlu0 %7218 }
 0x4bc   : > { %v7238_v63 = vsel %vm663_vm3, %v7219_v35, %v7221_v40  ;;  %7466 = vrot.lane.b32.xlu1 %v11044_v42, %s11191_s28  ;;  %v11059_v42 = vld [vmem:[%s11244_s22 + $0x120] ss:$60 sps:$4 sm:$0xff]  }
 0x4bd   : > { %7464 = vrot.lane.b32.xlu0 %v13384_v17, %s11191_s28  ;;  %7872 = vmatpush1.bf16.msra.mxu1 %v7238_v63 }
 0x4be   : > { %v8278_v41 = vpop.permute.xlu1 %8277 }
 0x4bf   : > { %v8297_v45 = vsel %vm429_vm1, %v8278_v41, %v8280_v44  ;;  %v8282_v57 = vpop.permute.xlu0 %8281  ;;  %v13607_v41 = vld [vmem:[%s11244_s22 + $0x120] ss:$60 sps:$4 sm:$0xff]  }
 0x4c0   : > { %8523 = vrot.lane.b32.xlu1 %v13515_v58, %s11189_s26  ;;  %v8298_v55 = vsel %vm429_vm1, %v8280_v44, %v8282_v57  ;;  %7859 = vmatmul.mubr.bf16.gmra.mrb[60].mxu1 %v13530_v43  ;;  %v13598_v44 = vld [vmem:[%s11244_s22 + $0x124] ss:$60 sps:$4 sm:$0xff]  }
 0x4c1   : > { %7462 = vrot.lane.b32.xlu0 %v13394_v31, %s11191_s28  ;;  %9105 = vmatprep.subr.bf16.mxu0 %v8298_v55 }
 0x4c2   : > { %9106 = vmatpush1.bf16.msra.mxu0 %v8297_v45  ;;  %v7229_v16 = vpop.permute.xlu1 %7228  ;;  %7901 = vmatprep.mubr.bf16.mxu1 %v13541_v6  ;;  %v11063_v45 = vld [vmem:[%s11244_s22 + $0x128] ss:$60 sps:$4 sm:$0xff]  }
 0x4c3   : > { %v7227_v5 = vpop.permute.xlu0 %7226 }
 0x4c4   : > { %8521 = vrot.lane.b32.xlu1 %v13525_v12, %s11189_s26  ;;  %v7241_v11 = vsel %vm663_vm3, %v7227_v5, %v7229_v16 }
 0x4c5   : > { %8525 = vrot.lane.b32.xlu0 %v11048_v39, %s11189_s26  ;;  %7873 = vmatprep.subr.bf16.mxu1 %v7241_v11  ;;  %v11065_v11 = vld [vmem:[%s11244_s22 + $0x1a0] ss:$60 sps:$4 sm:$0xff]  }
 0x4c6   : > { %v8286_v50 = vpop.permute.xlu1 %8285 }
 0x4c7   : > { %v7225_v56 = vpop.permute.xlu0 %7224 }
 0x4c8   : > { %v7240_v10 = vsel %vm663_vm3, %v7225_v56, %v7227_v5  ;;  %7564 = vrot.lane.b32.xlu1 %v11049_v20, %s11192_s29  ;;  %v11066_v56 = vld [vmem:[%s11244_s22 + $0x38] ss:$60 sps:$4 sm:$0xff]  }
 0x4c9   : > { %7562 = vrot.lane.b32.xlu0 %v13295_v26, %s11192_s29  ;;  %7874 = vmatpush1.bf16.msra.mxu1 %v7240_v10 }
 0x4ca   : > { %v8284_v25 = vpop.permute.xlu1 %8283 }
 0x4cb   : > { %v8299_v2 = vsel %vm429_vm1, %v8284_v25, %v8286_v50  ;;  %v8288_v4 = vpop.permute.xlu0 %8287 }
 0x4cc   : > { %8621 = vrot.lane.b32.xlu1 %v13554_v60, %s11190_s27  ;;  %v8300_v14 = vsel %vm429_vm1, %v8286_v50, %v8288_v4 }
 0x4cd   : > { %7560 = vrot.lane.b32.xlu0 %v13308_v46, %s11192_s29  ;;  %9107 = vmatprep.subr.bf16.mxu0 %v8300_v14 }
 0x4ce   : > { %9108 = vmatpush1.bf16.msra.mxu0 %v8299_v2  ;;  %v7235_v26 = vpop.permute.xlu1 %7234 }
 0x4cf   : > { %v7233_v18 = vpop.permute.xlu0 %7232 }
 0x4d0   : > { %8619 = vrot.lane.b32.xlu1 %v13563_v28, %s11190_s27  ;;  %v7243_v15 = vsel %vm663_vm3, %v7233_v18, %v7235_v26  ;;  %v11067_v26 = vld [vmem:[%s11244_s22 + $0xb0] ss:$60 sps:$4 sm:$0xff]  }
 0x4d1   : > { %8623 = vrot.lane.b32.xlu0 %v11053_v61, %s11190_s27  ;;  %7875 = vmatprep.subr.bf16.mxu1 %v7243_v15 }
 0x4d2   : > { %v8292_v13 = vpop.permute.xlu1 %8291 }
 0x4d3   : > { %v7231_v29 = vpop.permute.xlu0 %7230 }
 0x4d4   : > { %v7242_v46 = vsel %vm663_vm3, %v7231_v29, %v7233_v18  ;;  %7570 = vrot.lane.b32.xlu1 %v11054_v22, %s11192_s29 }
 0x4d5   : > { %7568 = vrot.lane.b32.xlu0 %v13333_v3, %s11192_s29  ;;  %7876 = vmatpush1.bf16.msra.mxu1 %v7242_v46 }
 0x4d6   : > { %v8290_v36 = vpop.permute.xlu1 %8289 }
 0x4d7   : > { %v8301_v7 = vsel %vm429_vm1, %v8290_v36, %v8292_v13  ;;  %v8294_v1 = vpop.permute.xlu0 %8293 }
 0x4d8   : > { %8627 = vrot.lane.b32.xlu1 %v13576_v37, %s11190_s27  ;;  %v8302_v48 = vsel %vm429_vm1, %v8292_v13, %v8294_v1  ;;  %v11068_v13 = vld [vmem:[%s11244_s22 + $0x128] ss:$60 sps:$4 sm:$0xff]  }
 0x4d9   : > { %7566 = vrot.lane.b32.xlu0 %v13341_v51, %s11192_s29  ;;  %9109 = vmatprep.subr.bf16.mxu0 %v8302_v48 }
 0x4da   : > { %9110 = vmatpush1.bf16.msra.mxu0 %v8301_v7  ;;  %v7333_v3 = vpop.permute.xlu1 %7332 }
 0x4db   : > { %v7331_v40 = vpop.permute.xlu0 %7330 }
 0x4dc   : > { %8625 = vrot.lane.b32.xlu1 %v13585_v21, %s11190_s27  ;;  %v7353_v23 = vsel %vm780_vm4, %v7331_v40, %v7333_v3 }
 0x4dd   : > { %8629 = vrot.lane.b32.xlu0 %v11058_v54, %s11190_s27  ;;  %7877 = vmatprep.subr.bf16.mxu1 %v7353_v23 }
 0x4de   : > { %v8390_v8 = vpop.permute.xlu1 %8389 }
 0x4df   : > { %v7329_v52 = vpop.permute.xlu0 %7328 }
 0x4e0   : > { %v7352_v51 = vsel %vm780_vm4, %v7329_v52, %v7331_v40  ;;  %7576 = vrot.lane.b32.xlu1 %v11059_v42, %s11192_s29  ;;  %v11069_v42 = vld [vmem:[%s11244_s22 + $0x1a0] ss:$60 sps:$4 sm:$0xff]  }
 0x4e1   : > { %7574 = vrot.lane.b32.xlu0 %v13359_v32, %s11192_s29  ;;  %7878 = vmatpush1.bf16.msra.mxu1 %v7352_v51 }
 0x4e2   : > { %v8388_v53 = vpop.permute.xlu1 %8387 }
 0x4e3   : > { %v8411_v35 = vsel %vm546_vm2, %v8388_v53, %v8390_v8  ;;  %v8392_v38 = vpop.permute.xlu0 %8391 }
 0x4e4   : > { %8633 = vrot.lane.b32.xlu1 %v13598_v44, %s11190_s27  ;;  %v8412_v63 = vsel %vm546_vm2, %v8390_v8, %v8392_v38  ;;  %v11071_v38 = vld [vmem:[%s11244_s22 + $0x2c] ss:$60 sps:$4 sm:$0xff]  }
 0x4e5   : > { %7572 = vrot.lane.b32.xlu0 %v13369_v59, %s11192_s29  ;;  %9111 = vmatprep.subr.bf16.mxu0 %v8412_v63 }
 0x4e6   : > { %9112 = vmatpush1.bf16.msra.mxu0 %v8411_v35  ;;  %v7339_v32 = vpop.permute.xlu1 %7338  ;;  %v11070_v35 = vld [vmem:[%s11244_s22 + $0x30] ss:$60 sps:$4 sm:$0xff]  }
 0x4e7   : > { %v7337_v57 = vpop.permute.xlu0 %7336 }
 0x4e8   : > { %8631 = vrot.lane.b32.xlu1 %v13607_v41, %s11190_s27  ;;  %v7355_v55 = vsel %vm780_vm4, %v7337_v57, %v7339_v32 }
 0x4e9   : > { %8635 = vrot.lane.b32.xlu0 %v11063_v45, %s11190_s27  ;;  %7879 = vmatprep.subr.bf16.mxu1 %v7355_v55 }
 0x4ea   : > { %v8396_v39 = vpop.permute.xlu1 %8395 }
 0x4eb   : > { %v7335_v30 = vpop.permute.xlu0 %7334 }
 0x4ec   : > { %v7354_v16 = vsel %vm780_vm4, %v7335_v30, %v7337_v57  ;;  %7582 = vrot.lane.b32.xlu1 %v11064_v49, %s11192_s29  ;;  %v11073_v57 = vld [vmem:[%s11244_s22 + $0x28] ss:$60 sps:$4 sm:$0xff]  }
 0x4ed   : > { %7580 = vrot.lane.b32.xlu0 %v13384_v17, %s11192_s29  ;;  %7880 = vmatpush1.bf16.msra.mxu1 %v7354_v16 }
 0x4ee   : > { %v8394_v59 = vpop.permute.xlu1 %8393 }
 0x4ef   : > { %v8413_v62 = vsel %vm546_vm2, %v8394_v59, %v8396_v39  ;;  %v8398_v5 = vpop.permute.xlu0 %8397 }
 0x4f0   : > { %8639 = vrot.lane.b32.xlu1 %v13515_v58, %s11190_s27  ;;  %v8414_v9 = vsel %vm546_vm2, %v8396_v39, %v8398_v5  ;;  %v11076_v5 = vld [vmem:[%s11244_s22 + $0xa4] ss:$60 sps:$4 sm:$0xff]  }
 0x4f1   : > { %7578 = vrot.lane.b32.xlu0 %v13394_v31, %s11192_s29  ;;  %9113 = vmatprep.subr.bf16.mxu0 %v8414_v9 }
 0x4f2   : > { %9114 = vmatpush1.bf16.msra.mxu0 %v8413_v62  ;;  %v7345_v20 = vpop.permute.xlu1 %7344  ;;  %v11075_v62 = vld [vmem:[%s11244_s22 + $0xa8] ss:$60 sps:$4 sm:$0xff]  }
 0x4f3   : > { %v7343_v50 = vpop.permute.xlu0 %7342 }
 0x4f4   : > { %8637 = vrot.lane.b32.xlu1 %v13525_v12, %s11190_s27  ;;  %v7357_v17 = vsel %vm780_vm4, %v7343_v50, %v7345_v20 }
 0x4f5   : > { %8641 = vrot.lane.b32.xlu0 %v11065_v11, %s11190_s27  ;;  %7881 = vmatprep.subr.bf16.mxu1 %v7357_v17 }
 0x4f6   : > { %v8402_v10 = vpop.permute.xlu1 %8401 }
 0x4f7   : > { %v7341_v25 = vpop.permute.xlu0 %7340 }
 0x4f8   : > { %v7356_v2 = vsel %vm780_vm4, %v7341_v25, %v7343_v50  ;;  %8739 = vrot.lane.b32.xlu1 %v11066_v56, %s11191_s28 }
 0x4f9   : > { %8737 = vrot.lane.b32.xlu0 %v13554_v60, %s11191_s28  ;;  %7882 = vmatpush1.bf16.msra.mxu1 %v7356_v2 }
 0x4fa   : > { %v8400_v31 = vpop.permute.xlu1 %8399 }
 0x4fb   : > { %v8415_v4 = vsel %vm546_vm2, %v8400_v31, %v8402_v10  ;;  %v8404_v14 = vpop.permute.xlu0 %8403  ;;  %v11080_v31 = vld [vmem:[%s11244_s22 + $0x120] ss:$60 sps:$4 sm:$0xff]  }
 0x4fc   : > { %8743 = vrot.lane.b32.xlu1 %v13576_v37, %s11191_s28  ;;  %v8416_v61 = vsel %vm546_vm2, %v8402_v10, %v8404_v14  ;;  %v11079_v10 = vld [vmem:[%s11244_s22 + $0xb0] ss:$60 sps:$4 sm:$0xff]  }
 0x4fd   : > { %8735 = vrot.lane.b32.xlu0 %v13563_v28, %s11191_s28  ;;  %9115 = vmatprep.subr.bf16.mxu0 %v8416_v61 }
 0x4fe   : > { %9116 = vmatpush1.bf16.msra.mxu0 %v8415_v4  ;;  %v7351_v18 = vpop.permute.xlu1 %7350  ;;  %v11081_v4 = vld [vmem:[%s11244_s22 + $0x11c] ss:$60 sps:$4 sm:$0xff]  }
 0x4ff   : > { %v7349_v15 = vpop.permute.xlu0 %7348 }
 0x500   : > { %8741 = vrot.lane.b32.xlu1 %v13585_v21, %s11191_s28  ;;  %v7359_v22 = vsel %vm780_vm4, %v7349_v15, %v7351_v18 }
 0x501   : > { %8745 = vrot.lane.b32.xlu0 %v11067_v26, %s11191_s28  ;;  %7883 = vmatprep.subr.bf16.mxu1 %v7359_v22  ;;  %v11083_v26 = vld [vmem:[%s11244_s22 + $0x118] ss:$60 sps:$4 sm:$0xff]  }
 0x502   : > { %v8408_v29 = vpop.permute.xlu1 %8407  ;;  %v5394_v1 = vpop.f32.mrb[32].mxu1 }
 0x503   : > { %v7347_v46 = vpop.permute.xlu0 %7346  ;;  %5433 = vst [vmem:[%s13125_s9 + $0x30] sm:$0xff] %v5394_v1  ;;  %v5396_v3 = vpop.f32.mrb[33].mxu1 }
 0x504   : > { %v7358_v36 = vsel %vm780_vm4, %v7347_v46, %v7349_v15  ;;  %8751 = vrot.lane.b32.xlu1 %v11068_v13, %s11191_s28  ;;  %5434 = vst [vmem:[%s13125_s9 + $0x38] sm:$0xff] %v5396_v3  ;;  %v5398_v23 = vpop.f32.mrb[34].mxu1  ;;  %v11086_v3 = vld [vmem:[%s11244_s22 + $0x194] ss:$60 sps:$4 sm:$0xff]  }
 0x505   : > { %8749 = vrot.lane.b32.xlu0 %v13598_v44, %s11191_s28  ;;  %7884 = vmatpush1.bf16.msra.mxu1 %v7358_v36  ;;  %5435 = vst [vmem:[%s13125_s9 + $0xa0] sm:$0xff] %v5398_v23  ;;  %v5400_v8 = vpop.f32.mrb[35].mxu1 }
 0x506   : > { %v8406_v7 = vpop.permute.xlu1 %8405  ;;  %5436 = vst [vmem:[%s13125_s9 + $0xa8] sm:$0xff] %v5400_v8  ;;  %v11088_v8 = vld [vmem:[%s11244_s22 + $0x190] ss:$60 sps:$4 sm:$0xff]  }
 0x507   : > { %v8417_v48 = vsel %vm546_vm2, %v8406_v7, %v8408_v29  ;;  %v8410_v54 = vpop.permute.xlu0 %8409 }
 0x508   : > { %8755 = vrot.lane.b32.xlu1 %v13515_v58, %s11191_s28  ;;  %v8418_v40 = vsel %vm546_vm2, %v8408_v29, %v8410_v54 }
 0x509   : > { %8747 = vrot.lane.b32.xlu0 %v13607_v41, %s11191_s28  ;;  %9117 = vmatprep.subr.bf16.mxu0 %v8418_v40 }
 0x50a   : > { %9118 = vmatpush1.bf16.msra.mxu0 %v8417_v48  ;;  %v7449_v52 = vpop.permute.xlu1 %7448  ;;  %v5404_v13 = vpop.f32.mrb[36].mxu1  ;;  %v11085_v48 = vld [vmem:[%s11244_s22 + $0x198] ss:$60 sps:$4 sm:$0xff]  }
 0x50b   : > { %v7447_v51 = vpop.permute.xlu0 %7446  ;;  %5437 = vst [vmem:[%s13125_s9 + $0x110] sm:$0xff] %v5404_v13  ;;  %v5406_v46 = vpop.f32.mrb[37].mxu1 }
 0x50c   : > { %8753 = vrot.lane.b32.xlu1 %v13525_v12, %s11191_s28  ;;  %v7469_v53 = vsel %vm897_vm5, %v7447_v51, %v7449_v52  ;;  %5438 = vst [vmem:[%s13125_s9 + $0x118] sm:$0xff] %v5406_v46  ;;  %v5408_v7 = vpop.f32.mrb[38].mxu1 }
 0x50d   : > { %8757 = vrot.lane.b32.xlu0 %v11069_v42, %s11191_s28  ;;  %7885 = vmatprep.subr.bf16.mxu1 %v7469_v53  ;;  %5439 = vst [vmem:[%s13125_s9 + $0x180] sm:$0xff] %v5408_v7  ;;  %v5410_v54 = vpop.f32.mrb[39].mxu1 }
 0x50e   : > { %v8506_v63 = vpop.permute.xlu1 %8505  ;;  %9120 = vmatmul.mubr.bf16.vlgmr.msra.gmra.mrb[48].mxu0 %v13448_v19  ;;  %5440 = vst [vmem:[%s13125_s9 + $0x188] sm:$0xff] %v5410_v54 }
 0x50f   : > { %v7445_v45 = vpop.permute.xlu0 %7444  ;;  %9129 = vmatprep.mubr.bf16.mxu0 %v13457_v0  ;;  %v11074_v0 = vld [vmem:[%s11244_s22 + $0x38] ss:$60 sps:$4 sm:$0xff]  }
 0x510   : > { %v7468_v32 = vsel %vm897_vm5, %v7445_v45, %v7447_v51  ;;  %7680 = vrot.lane.b32.xlu1 %v11070_v35, %s11193_s6 }
 0x511   : > { %7678 = vrot.lane.b32.xlu0 %v11071_v38, %s11193_s6  ;;  %7886 = vmatpush1.bf16.msra.mxu1 %v7468_v32 }
 0x512   : > { %v8504_v55 = vpop.permute.xlu1 %8503 }
 0x513   : > { %v8527_v49 = vsel %vm663_vm3, %v8504_v55, %v8506_v63  ;;  %v8508_v39 = vpop.permute.xlu0 %8507  ;;  %v5414_v52 = vpop.f32.mrb[40].mxu1 }
 0x514   : > { %8853 = vrot.lane.b32.xlu1 %v13554_v60, %s11192_s29  ;;  %v8528_v19 = vsel %vm663_vm3, %v8506_v63, %v8508_v39  ;;  %5441 = vst [vmem:[%s13125_s9 + $0x1f0] sm:$0xff] %v5414_v52  ;;  %v5416_v53 = vpop.f32.mrb[41].mxu1 }
 0x515   : > { %7676 = vrot.lane.b32.xlu0 %v11073_v57, %s11193_s6  ;;  %9160 = vmatprep.subr.bf16.mxu0 %v8528_v19  ;;  %5442 = vst [vmem:[%s13125_s9 + $0x1f8] sm:$0xff] %v5416_v53  ;;  %v5418_v63 = vpop.f32.mrb[42].mxu1  ;;  %v11089_v57 = vld [vmem:[%s11244_s22 + $0x1a0] ss:$60 sps:$4 sm:$0xff]  }
 0x516   : > { %9161 = vmatpush1.bf16.msra.mxu0 %v8527_v49  ;;  %v7455_v30 = vpop.permute.xlu1 %7454  ;;  %5443 = vst [vmem:[%s13125_s9 + $0x260] sm:$0xff] %v5418_v63  ;;  %v5420_v32 = vpop.f32.mrb[43].mxu1 }
 0x517   : > { %v7453_v16 = vpop.permute.xlu0 %7452  ;;  %9130 = vmatmul.mubr.bf16.gmra.mrb[52].mxu0 %v13470_v27  ;;  %v11078_v27 = vld [vmem:[%s11244_s22 + $0xa0] ss:$60 sps:$4 sm:$0xff]   ;;  %5444 = vst [vmem:[%s13125_s9 + $0x268] sm:$0xff] %v5420_v32 }
 0x518   : > { %8851 = vrot.lane.b32.xlu1 %v13563_v28, %s11192_s29  ;;  %v7471_v59 = vsel %vm897_vm5, %v7453_v16, %v7455_v30  ;;  %9139 = vmatprep.mubr.bf16.mxu0 %v13480_v47 }
 0x519   : > { %8855 = vrot.lane.b32.xlu0 %v11074_v0, %s11192_s29  ;;  %7887 = vmatprep.subr.bf16.mxu1 %v7471_v59 }
 0x51a   : > { %v8512_v9 = vpop.permute.xlu1 %8511 }
 0x51b   : > { %v7451_v11 = vpop.permute.xlu0 %7450 }
 0x51c   : > { %v7470_v20 = vsel %vm897_vm5, %v7451_v11, %v7453_v16  ;;  %7686 = vrot.lane.b32.xlu1 %v11075_v62, %s11193_s6  ;;  %v11090_v16 = vld [vmem:[%s11244_s22 + $0x38] ss:$60 sps:$4 sm:$0xff]  }
 0x51d   : > { %7684 = vrot.lane.b32.xlu0 %v11076_v5, %s11193_s6  ;;  %7888 = vmatpush1.bf16.msra.mxu1 %v7470_v20  ;;  %v5424_v62 = vpop.f32.mrb[44].mxu1 }
 0x51e   : > { %v8510_v50 = vpop.permute.xlu1 %8509  ;;  %5445 = vst [vmem:[%s13125_s9 + $0x2d0] sm:$0xff] %v5424_v62 }
 0x51f   : > { %v8529_v17 = vsel %vm663_vm3, %v8510_v50, %v8512_v9  ;;  %v8514_v47 = vpop.permute.xlu0 %8513  ;;  %9140 = vmatmul.mubr.bf16.gmra.mrb[56].mxu0 %v13499_v33 }
 0x520   : > { %8859 = vrot.lane.b32.xlu1 %v13576_v37, %s11192_s29  ;;  %v8530_v56 = vsel %vm663_vm3, %v8512_v9, %v8514_v47  ;;  %9149 = vmatprep.mubr.bf16.mxu0 %v13508_v34  ;;  %v5426_v9 = vpop.f32.mrb[45].mxu1 }
 0x521   : > { %7682 = vrot.lane.b32.xlu0 %v11078_v27, %s11193_s6  ;;  %9162 = vmatprep.subr.bf16.mxu0 %v8530_v56  ;;  %5446 = vst [vmem:[%s13125_s9 + $0x2d8] sm:$0xff] %v5426_v9  ;;  %v5428_v20 = vpop.f32.mrb[46].mxu1  ;;  %v13830_v9 = vld [vmem:[%s14191_s1 + $0x5c] ss:$20 sps:$4 sm:$0xff]  }
 0x522   : > { %9163 = vmatpush1.bf16.msra.mxu0 %v8529_v17  ;;  %v7461_v25 = vpop.permute.xlu1 %7460  ;;  %5447 = vst [vmem:[%s13125_s9 + $0x340] sm:$0xff] %v5428_v20  ;;  %v5430_v50 = vpop.f32.mrb[47].mxu1 }
 0x523   : > { %v7459_v2 = vpop.permute.xlu0 %7458  ;;  %5448 = vst [vmem:[%s13125_s9 + $0x348] sm:$0xff] %v5430_v50 }
 0x524   : > { %8857 = vrot.lane.b32.xlu1 %v13585_v21, %s11192_s29  ;;  %v7473_v33 = vsel %vm897_vm5, %v7459_v2, %v7461_v25  ;;  %v11091_v25 = vld [vmem:[%s11244_s22 + $0xb0] ss:$60 sps:$4 sm:$0xff]  }
 0x525   : > { %8861 = vrot.lane.b32.xlu0 %v11079_v10, %s11192_s29  ;;  %7889 = vmatprep.subr.bf16.mxu1 %v7473_v33 }
 0x526   : > { %v8518_v14 = vpop.permute.xlu1 %8517 }
 0x527   : > { %v7457_v34 = vpop.permute.xlu0 %7456  ;;  %9150 = vmatmul.mubr.bf16.gmra.mrb[60].mxu0 %v13530_v43 }
 0x528   : > { %v7472_v61 = vsel %vm897_vm5, %v7457_v34, %v7459_v2  ;;  %7692 = vrot.lane.b32.xlu1 %v11080_v31, %s11193_s6  ;;  %9192 = vmatprep.mubr.bf16.mxu0 %v13541_v6  ;;  %v11084_v6 = vld [vmem:[%s11244_s22 + $0x128] ss:$60 sps:$4 sm:$0xff]  }
 0x529   : > { %7690 = vrot.lane.b32.xlu0 %v11081_v4, %s11193_s6  ;;  %7890 = vmatpush1.bf16.msra.mxu1 %v7472_v61  ;;  %v11092_v31 = vld [vmem:[%s11244_s22 + $0x128] ss:$60 sps:$4 sm:$0xff]  }
 0x52a   : > { %v8516_v18 = vpop.permute.xlu1 %8515 }
 0x52b   : > { %v8531_v15 = vsel %vm663_vm3, %v8516_v18, %v8518_v14  ;;  %v8520_v22 = vpop.permute.xlu0 %8519 }
 0x52c   : > { %8865 = vrot.lane.b32.xlu1 %v13598_v44, %s11192_s29  ;;  %v8532_v43 = vsel %vm663_vm3, %v8518_v14, %v8520_v22 }
 0x52d   : > { %7688 = vrot.lane.b32.xlu0 %v11083_v26, %s11193_s6  ;;  %9164 = vmatprep.subr.bf16.mxu0 %v8532_v43 }
 0x52e   : > { %9165 = vmatpush1.bf16.msra.mxu0 %v8531_v15  ;;  %v7467_v29 = vpop.permute.xlu1 %7466 }
 0x52f   : > { %v7465_v36 = vpop.permute.xlu0 %7464 }
 0x530   : > { %8863 = vrot.lane.b32.xlu1 %v13607_v41, %s11192_s29  ;;  %v7475_v1 = vsel %vm897_vm5, %v7465_v36, %v7467_v29 }
 0x531   : > { %8867 = vrot.lane.b32.xlu0 %v11084_v6, %s11192_s29  ;;  %7891 = vmatprep.subr.bf16.mxu1 %v7475_v1 }
 0x532   : > { %v8524_v40 = vpop.permute.xlu1 %8523 }
 0x533   : > { %v7463_v23 = vpop.permute.xlu0 %7462 }
 0x534   : > { %v7474_v42 = vsel %vm897_vm5, %v7463_v23, %v7465_v36  ;;  %7698 = vrot.lane.b32.xlu1 %v11085_v48, %s11193_s6 }
 0x535   : > { %7696 = vrot.lane.b32.xlu0 %v11086_v3, %s11193_s6  ;;  %7892 = vmatpush1.bf16.msra.mxu1 %v7474_v42 }
 0x536   : > { %v8522_v51 = vpop.permute.xlu1 %8521 }
 0x537   : > { %v8533_v35 = vsel %vm663_vm3, %v8522_v51, %v8524_v40  ;;  %v8526_v38 = vpop.permute.xlu0 %8525 }
 0x538   : > { %8871 = vrot.lane.b32.xlu1 %v13515_v58, %s11192_s29  ;;  %v8534_v45 = vsel %vm663_vm3, %v8524_v40, %v8526_v38  ;;  %v6685_v55 = vpop.f32.mrb[32].mxu0 }
 0x539   : > { %7694 = vrot.lane.b32.xlu0 %v11088_v8, %s11193_s6  ;;  %9166 = vmatprep.subr.bf16.mxu0 %v8534_v45  ;;  %6724 = vst [vmem:[%s13125_s9 + $0x40] sm:$0xff] %v6685_v55  ;;  %v6687_v39 = vpop.f32.mrb[33].mxu0 }
 0x53a   : > { %9167 = vmatpush1.bf16.msra.mxu0 %v8533_v35  ;;  %v7565_v49 = vpop.permute.xlu1 %7564  ;;  %6725 = vst [vmem:[%s13125_s9 + $0x48] sm:$0xff] %v6687_v39  ;;  %v6689_v0 = vpop.f32.mrb[34].mxu0  ;;  %v13816_v39 = vld [vmem:[%s14191_s1 + $0x34] ss:$20 sps:$4 sm:$0xff]  }
 0x53b   : > { %v7563_v19 = vpop.permute.xlu0 %7562  ;;  %6726 = vst [vmem:[%s13125_s9 + $0xb0] sm:$0xff] %v6689_v0  ;;  %v6691_v59 = vpop.f32.mrb[35].mxu0 }
 0x53c   : > { %8869 = vrot.lane.b32.xlu1 %v13525_v12, %s11192_s29  ;;  %v7585_v30 = vsel %vm1014_vm6, %v7563_v19, %v7565_v49  ;;  %6727 = vst [vmem:[%s13125_s9 + $0xb8] sm:$0xff] %v6691_v59  ;;  %v13810_v49 = vld [vmem:[%s14191_s1 + $0x8] ss:$20 sps:$4 sm:$0xff]  }
 0x53d   : > { %8873 = vrot.lane.b32.xlu0 %v11089_v57, %s11192_s29  ;;  %7893 = vmatprep.subr.bf16.mxu1 %v7585_v30 }
 0x53e   : > { %v8622_v5 = vpop.permute.xlu1 %8621 }
 0x53f   : > { %v7561_v11 = vpop.permute.xlu0 %7560 }
 0x540   : > { %v7584_v27 = vsel %vm1014_vm6, %v7561_v11, %v7563_v19  ;;  %8971 = vrot.lane.b32.xlu1 %v11090_v16, %s11193_s6 }
 0x541   : > { %8969 = vrot.lane.b32.xlu0 %v13554_v60, %s11193_s6  ;;  %7894 = vmatpush1.bf16.msra.mxu1 %v7584_v27  ;;  %v6695_v61 = vpop.f32.mrb[36].mxu0 }
 0x542   : > { %v8620_v17 = vpop.permute.xlu1 %8619  ;;  %6728 = vst [vmem:[%s13125_s9 + $0x120] sm:$0xff] %v6695_v61  ;;  %v6697_v18 = vpop.f32.mrb[37].mxu0 }
 0x543   : > { %v8643_v47 = vsel %vm780_vm4, %v8620_v17, %v8622_v5  ;;  %v8624_v56 = vpop.permute.xlu0 %8623  ;;  %6729 = vst [vmem:[%s13125_s9 + $0x128] sm:$0xff] %v6697_v18  ;;  %v6699_v15 = vpop.f32.mrb[38].mxu0 }
 0x544   : > { %8975 = vrot.lane.b32.xlu1 %v13576_v37, %s11193_s6  ;;  %v8644_v10 = vsel %vm780_vm4, %v8622_v5, %v8624_v56  ;;  %6730 = vst [vmem:[%s13125_s9 + $0x190] sm:$0xff] %v6699_v15  ;;  %v6701_v43 = vpop.f32.mrb[39].mxu0  ;;  %v13824_v5 = vld [vmem:[%s14191_s1 + $0x30] ss:$20 sps:$4 sm:$0xff]  }
 0x545   : > { %8967 = vrot.lane.b32.xlu0 %v13563_v28, %s11193_s6  ;;  %9168 = vmatprep.subr.bf16.mxu0 %v8644_v10  ;;  %6731 = vst [vmem:[%s13125_s9 + $0x198] sm:$0xff] %v6701_v43  ;;  %v13839_v10 = vld [vmem:[%s14191_s1 + $0x58] ss:$20 sps:$4 sm:$0xff]  }
 0x546   : > { %9169 = vmatpush1.bf16.msra.mxu0 %v8643_v47  ;;  %v7571_v2 = vpop.permute.xlu1 %7570 }
 0x547   : > { %v7569_v60 = vpop.permute.xlu0 %7568 }
 0x548   : > { %8973 = vrot.lane.b32.xlu1 %v13585_v21, %s11193_s6  ;;  %v7587_v33 = vsel %vm1014_vm6, %v7569_v60, %v7571_v2 }
 0x549   : > { %8977 = vrot.lane.b32.xlu0 %v11091_v25, %s11193_s6  ;;  %7895 = vmatprep.subr.bf16.mxu1 %v7587_v33  ;;  %v6705_v29 = vpop.f32.mrb[40].mxu0  ;;  %v13845_v25 = vld [vmem:[%s14191_s1 + $0x84] ss:$20 sps:$4 sm:$0xff]  }
 0x54a   : > { %v8628_v37 = vpop.permute.xlu1 %8627  ;;  %6732 = vst [vmem:[%s13125_s9 + $0x200] sm:$0xff] %v6705_v29  ;;  %v6707_v36 = vpop.f32.mrb[41].mxu0 }
 0x54b   : > { %v7567_v4 = vpop.permute.xlu0 %7566  ;;  %6733 = vst [vmem:[%s13125_s9 + $0x208] sm:$0xff] %v6707_v36  ;;  %v6709_v7 = vpop.f32.mrb[42].mxu0 }
 0x54c   : > { %v7586_v28 = vsel %vm1014_vm6, %v7567_v4, %v7569_v60  ;;  %8983 = vrot.lane.b32.xlu1 %v11092_v31, %s11193_s6  ;;  %6734 = vst [vmem:[%s13125_s9 + $0x270] sm:$0xff] %v6709_v7 }
 0x54d   : > { %8981 = vrot.lane.b32.xlu0 %v13598_v44, %s11193_s6  ;;  %7896 = vmatpush1.bf16.msra.mxu1 %v7586_v28  ;;  %v11093_v44 = vld [vmem:[%s11244_s22 + $0x1a0] ss:$60 sps:$4 sm:$0xff]   ;;  %s10406_s22 = smul.u32 (%p11235_p4), 112, %s11223_s12 }
 0x54e   : > { %v8626_v21 = vpop.permute.xlu1 %8625 }
 0x54f   : > { %v8645_v14 = vsel %vm780_vm4, %v8626_v21, %v8628_v37  ;;  %v8630_v34 = vpop.permute.xlu0 %8629  ;;  %v13854_v21 = vld [vmem:[%s14191_s1 + $0x80] ss:$20 sps:$4 sm:$0xff]   ;;  %s13960_s27 = scalar_lea.vmem (%p11235_p4), %s14192_s2, %s10406_s22 }
 0x550   : > { %v8646_v26 = vsel %vm780_vm4, %v8628_v37, %v8630_v34  ;;  %8987 = vrot.lane.b32.xlu1 %v13515_v58, %s11193_s6 }
 0x551   : > { %8979 = vrot.lane.b32.xlu0 %v13607_v41, %s11193_s6  ;;  %9170 = vmatprep.subr.bf16.mxu0 %v8646_v26 }
 0x552   : > { %9171 = vmatpush1.bf16.msra.mxu0 %v8645_v14  ;;  %v7577_v22 = vpop.permute.xlu1 %7576 }
 0x553   : > { %v7575_v6 = vpop.permute.xlu0 %7574 }
 0x554   : > { %v7589_v58 = vsel %vm1014_vm6, %v7575_v6, %v7577_v22  ;;  %8985 = vrot.lane.b32.xlu1 %v13525_v12, %s11193_s6  ;;  %v6711_v12 = vpop.f32.mrb[43].mxu0 }
 0x555   : > { %7897 = vmatprep.subr.bf16.mxu1 %v7589_v58  ;;  %8989 = vrot.lane.b32.xlu0 %v11093_v44, %s11193_s6  ;;  %6735 = vst [vmem:[%s13125_s9 + $0x278] sm:$0xff] %v6711_v12  ;;  %v6715_v40 = vpop.f32.mrb[44].mxu0 }
 0x556   : > { %v8634_v41 = vpop.permute.xlu1 %8633  ;;  %6736 = vst [vmem:[%s13125_s9 + $0x2e0] sm:$0xff] %v6715_v40  ;;  %v6717_v42 = vpop.f32.mrb[45].mxu0 }
 0x557   : > { %v7573_v13 = vpop.permute.xlu0 %7572  ;;  %6737 = vst [vmem:[%s13125_s9 + $0x2e8] sm:$0xff] %v6717_v42  ;;  %v6719_v52 = vpop.f32.mrb[46].mxu0 }
 0x558   : > { %v7588_v46 = vsel %vm1014_vm6, %v7573_v13, %v7575_v6  ;;  %6738 = vst [vmem:[%s13125_s9 + $0x350] sm:$0xff] %v6719_v52  ;;  %v6721_v53 = vpop.f32.mrb[47].mxu0 }
 0x559   : > { %7898 = vmatpush1.bf16.msra.mxu1 %v7588_v46  ;;  %6739 = vst [vmem:[%s13125_s9 + $0x358] sm:$0xff] %v6721_v53 }
 0x55a   : > { %v8632_v1 = vpop.permute.xlu1 %8631 }
 0x55b   : > { %v8647_v48 = vsel %vm780_vm4, %v8632_v1, %v8634_v41  ;;  %v8636_v54 = vpop.permute.xlu0 %8635 }
 0x55c   : > { %v8648_v3 = vsel %vm780_vm4, %v8634_v41, %v8636_v54 }
 0x55d   : > { %9172 = vmatprep.subr.bf16.mxu0 %v8648_v3 }
 0x55e   : > { %9173 = vmatpush1.bf16.msra.mxu0 %v8647_v48  ;;  %v7583_v23 = vpop.permute.xlu1 %7582 }
 0x55f   : > { %v7581_v8 = vpop.permute.xlu0 %7580 }
 0x560   : > { %v7591_v51 = vsel %vm1014_vm6, %v7581_v8, %v7583_v23 }
 0x561   : > { %7899 = vmatprep.subr.bf16.mxu1 %v7591_v51 }
 0x562   : > { %v8640_v35 = vpop.permute.xlu1 %8639 }
 0x563   : > { %v7579_v38 = vpop.permute.xlu0 %7578 }
 0x564   : > { %v7590_v63 = vsel %vm1014_vm6, %v7579_v38, %v7581_v8 }
 0x565   : > { %7900 = vmatpush1.bf16.msra.mxu1 %v7590_v63 }
 0x566   : > { %v8638_v45 = vpop.permute.xlu1 %8637 }
 0x567   : > { %v8649_v32 = vsel %vm780_vm4, %v8638_v45, %v8640_v35  ;;  %v8642_v57 = vpop.permute.xlu0 %8641 }
 0x568   : > { %v8650_v55 = vsel %vm780_vm4, %v8640_v35, %v8642_v57  ;;  %7902 = vmatmul.mubr.bf16.vlgmr.msra.gmra.mrb[48].mxu1 %v13810_v49 }
 0x569   : > { %9174 = vmatprep.subr.bf16.mxu0 %v8650_v55  ;;  %7911 = vmatprep.mubr.bf16.mxu1 %v13816_v39 }
 0x56a   : > { %9175 = vmatpush1.bf16.msra.mxu0 %v8649_v32  ;;  %v8740_v19 = vpop.permute.xlu1 %8739 }
 0x56b   : > { %v8738_v0 = vpop.permute.xlu0 %8737 }
 0x56c   : > { %v8760_v30 = vsel %vm897_vm5, %v8738_v0, %v8740_v19 }
 0x56d   : > { %9176 = vmatprep.subr.bf16.mxu0 %v8760_v30 }
 0x56e   : > { %v8744_v16 = vpop.permute.xlu1 %8743 }
 0x56f   : > { %v8736_v59 = vpop.permute.xlu0 %8735 }
 0x570   : > { %v8759_v62 = vsel %vm897_vm5, %v8736_v59, %v8738_v0  ;;  %7912 = vmatmul.mubr.bf16.gmra.mrb[52].mxu1 %v13824_v5 }
 0x571   : > { %9177 = vmatpush1.bf16.msra.mxu0 %v8759_v62  ;;  %7921 = vmatprep.mubr.bf16.mxu1 %v13830_v9 }
 0x572   : > { %v8742_v11 = vpop.permute.xlu1 %8741 }
 0x573   : > { %v8761_v20 = vsel %vm897_vm5, %v8742_v11, %v8744_v16  ;;  %v8746_v27 = vpop.permute.xlu0 %8745 }
 0x574   : > { %v8762_v50 = vsel %vm897_vm5, %v8744_v16, %v8746_v27  ;;  %v11158_v16 = vld [vmem:[%s14191_s1 + $0x10] ss:$20 sps:$4 sm:$0xff]  }
 0x575   : > { %9178 = vmatprep.subr.bf16.mxu0 %v8762_v50 }
 0x576   : > { %9179 = vmatpush1.bf16.msra.mxu0 %v8761_v20  ;;  %v8752_v17 = vpop.permute.xlu1 %8751 }
 0x577   : > { %v8750_v47 = vpop.permute.xlu0 %8749 }
 0x578   : > { %v8764_v56 = vsel %vm897_vm5, %v8750_v47, %v8752_v17  ;;  %7922 = vmatmul.mubr.bf16.gmra.mrb[56].mxu1 %v13839_v10 }
 0x579   : > { %9180 = vmatprep.subr.bf16.mxu0 %v8764_v56  ;;  %7931 = vmatprep.mubr.bf16.mxu1 %v13845_v25 }
 0x57a   : > { %v8756_v2 = vpop.permute.xlu1 %8755 }
 0x57b   : > { %v8748_v60 = vpop.permute.xlu0 %8747 }
 0x57c   : > { %v8763_v33 = vsel %vm897_vm5, %v8748_v60, %v8750_v47  ;;  %v11159_v47 = vld [vmem:[%s14191_s1 + $0x38] ss:$20 sps:$4 sm:$0xff]  }
 0x57d   : > { %9181 = vmatpush1.bf16.msra.mxu0 %v8763_v33 }
 0x57e   : > { %v8754_v31 = vpop.permute.xlu1 %8753 }
 0x57f   : > { %v8765_v37 = vsel %vm897_vm5, %v8754_v31, %v8756_v2  ;;  %v8758_v4 = vpop.permute.xlu0 %8757  ;;  %v11160_v31 = vld [vmem:[%s14191_s1 + $0x60] ss:$20 sps:$4 sm:$0xff]  }
 0x580   : > { %v8766_v28 = vsel %vm897_vm5, %v8756_v2, %v8758_v4  ;;  %7932 = vmatmul.mubr.bf16.gmra.mrb[60].mxu1 %v13854_v21 }
 0x581   : > { %9182 = vmatprep.subr.bf16.mxu0 %v8766_v28  ;;  %7974 = vmatprep.mubr.bf16.mxu1 %v11194_v24 }
 0x582   : > { %9183 = vmatpush1.bf16.msra.mxu0 %v8765_v37  ;;  %v7681_v14 = vpop.permute.xlu1 %7680 }
 0x583   : > { %v7679_v34 = vpop.permute.xlu0 %7678 }
 0x584   : > { %v7701_v61 = vsel %vm1131_vm7, %v7679_v34, %v7681_v14 }
 0x585   : > { %7942 = vmatprep.subr.bf16.mxu1 %v7701_v61  ;;  %v11161_v61 = vld [vmem:[%s14191_s1 + $0x88] ss:$20 sps:$4 sm:$0xff]  }
 0x586   : > { %v8854_v26 = vpop.permute.xlu1 %8853 }
 0x587   : > { %v7677_v18 = vpop.permute.xlu0 %7676 }
 0x588   : > { %v7700_v44 = vsel %vm1131_vm7, %v7677_v18, %v7679_v34 }
 0x589   : > { %7943 = vmatpush1.bf16.msra.mxu1 %v7700_v44 }
 0x58a   : > { %v8852_v15 = vpop.permute.xlu1 %8851 }
 0x58b   : > { %v8875_v22 = vsel %vm1014_vm6, %v8852_v15, %v8854_v26  ;;  %v8856_v43 = vpop.permute.xlu0 %8855 }
 0x58c   : > { %v8876_v6 = vsel %vm1014_vm6, %v8854_v26, %v8856_v43 }
 0x58d   : > { %9184 = vmatprep.subr.bf16.mxu0 %v8876_v6 }
 0x58e   : > { %9185 = vmatpush1.bf16.msra.mxu0 %v8875_v22  ;;  %v7687_v58 = vpop.permute.xlu1 %7686 }
 0x58f   : > { %v7685_v41 = vpop.permute.xlu0 %7684 }
 0x590   : > { %v7703_v13 = vsel %vm1131_vm7, %v7685_v41, %v7687_v58 }
 0x591   : > { %7944 = vmatprep.subr.bf16.mxu1 %v7703_v13 }
 0x592   : > { %v8860_v29 = vpop.permute.xlu1 %8859 }
 0x593   : > { %v7683_v46 = vpop.permute.xlu0 %7682 }
 0x594   : > { %v7702_v36 = vsel %vm1131_vm7, %v7683_v46, %v7685_v41 }
 0x595   : > { %7945 = vmatpush1.bf16.msra.mxu1 %v7702_v36 }
 0x596   : > { %v8858_v7 = vpop.permute.xlu1 %8857 }
 0x597   : > { %v8877_v1 = vsel %vm1014_vm6, %v8858_v7, %v8860_v29  ;;  %v8862_v12 = vpop.permute.xlu0 %8861 }
 0x598   : > { %v8878_v48 = vsel %vm1014_vm6, %v8860_v29, %v8862_v12 }
 0x599   : > { %9186 = vmatprep.subr.bf16.mxu0 %v8878_v48 }
 0x59a   : > { %9187 = vmatpush1.bf16.msra.mxu0 %v8877_v1  ;;  %v7693_v54 = vpop.permute.xlu1 %7692 }
 0x59b   : > { %v7691_v3 = vpop.permute.xlu0 %7690 }
 0x59c   : > { %v7705_v40 = vsel %vm1131_vm7, %v7691_v3, %v7693_v54 }
 0x59d   : > { %7946 = vmatprep.subr.bf16.mxu1 %v7705_v40 }
 0x59e   : > { %v8866_v23 = vpop.permute.xlu1 %8865 }
 0x59f   : > { %v7689_v42 = vpop.permute.xlu0 %7688 }
 0x5a0   : > { %v7704_v8 = vsel %vm1131_vm7, %v7689_v42, %v7691_v3 }
 0x5a1   : > { %7947 = vmatpush1.bf16.msra.mxu1 %v7704_v8 }
 0x5a2   : > { %v8864_v52 = vpop.permute.xlu1 %8863 }
 0x5a3   : > { %v8879_v51 = vsel %vm1014_vm6, %v8864_v52, %v8866_v23  ;;  %v8868_v53 = vpop.permute.xlu0 %8867 }
 0x5a4   : > { %v8880_v35 = vsel %vm1014_vm6, %v8866_v23, %v8868_v53 }
 0x5a5   : > { %9188 = vmatprep.subr.bf16.mxu0 %v8880_v35 }
 0x5a6   : > { %9189 = vmatpush1.bf16.msra.mxu0 %v8879_v51  ;;  %v7699_v38 = vpop.permute.xlu1 %7698 }
 0x5a7   : > { %v7697_v63 = vpop.permute.xlu0 %7696 }
 0x5a8   : > { %v7707_v45 = vsel %vm1131_vm7, %v7697_v63, %v7699_v38 }
 0x5a9   : > { %7948 = vmatprep.subr.bf16.mxu1 %v7707_v45 }
 0x5aa   : > { %v8872_v32 = vpop.permute.xlu1 %8871 }
 0x5ab   : > { %v7695_v57 = vpop.permute.xlu0 %7694 }
 0x5ac   : > { %v7706_v55 = vsel %vm1131_vm7, %v7695_v57, %v7697_v63 }
 0x5ad   : > { %7949 = vmatpush1.bf16.msra.mxu1 %v7706_v55 }
 0x5ae   : > { %v8870_v19 = vpop.permute.xlu1 %8869 }
 0x5af   : > { %v8881_v0 = vsel %vm1014_vm6, %v8870_v19, %v8872_v32  ;;  %v8874_v30 = vpop.permute.xlu0 %8873 }
 0x5b0   : > { %10291 = vmatmul.mubr.msk.bf16.vlgmr.msra.gmra.mrb[48].mxu1 %vm1328_vm8, %v11158_v16  ;;  %v8882_v59 = vsel %vm1014_vm6, %v8872_v32, %v8874_v30 }
 0x5b1   : > { %9190 = vmatprep.subr.bf16.mxu0 %v8882_v59  ;;  %7984 = vmatprep.mubr.bf16.mxu1 %v11194_v24 }
 0x5b2   : > { %9191 = vmatpush1.bf16.msra.mxu0 %v8881_v0  ;;  %v8972_v62 = vpop.permute.xlu1 %8971 }
 0x5b3   : > { %v8970_v11 = vpop.permute.xlu0 %8969 }
 0x5b4   : > { %v8992_v20 = vsel %vm1131_vm7, %v8970_v11, %v8972_v62 }
 0x5b5   : > { %9193 = vmatmul.mubr.bf16.vlgmr.msra.gmra.mrb[48].mxu0 %v13810_v49  ;;  %9233 = vmatprep.subr.bf16.mxu0 %v8992_v20 }
 0x5b6   : > { %10407 = vmatprep.subr.bf16.mxu1 %v8992_v20  ;;  %v8976_v27 = vpop.permute.xlu1 %8975  ;;  %9202 = vmatprep.mubr.bf16.mxu0 %v13816_v39 }
 0x5b7   : > { %v8968_v50 = vpop.permute.xlu0 %8967 }
 0x5b8   : > { %v8991_v17 = vsel %vm1131_vm7, %v8968_v50, %v8970_v11  ;;  %10292 = vmatmul.mubr.msk.bf16.gmra.mrb[52].mxu1 %vm1328_vm8, %v11159_v47 }
 0x5b9   : > { %9234 = vmatpush1.bf16.msra.mxu0 %v8991_v17  ;;  %10411 = vmatpush1.bf16.msra.mxu1 %v8991_v17 }
 0x5ba   : > { %v8974_v56 = vpop.permute.xlu1 %8973  ;;  %7994 = vmatprep.mubr.bf16.mxu1 %v11194_v24 }
 0x5bb   : > { %v8993_v49 = vsel %vm1131_vm7, %v8974_v56, %v8976_v27  ;;  %v8978_v2 = vpop.permute.xlu0 %8977  ;;  %v9344_v56 = vld [vmem:[%s13125_s9] sm:$0xff] (%p11235_p4) }
 0x5bc   : > { %v8994_v60 = vsel %vm1131_vm7, %v8976_v27, %v8978_v2  ;;  %v9348_v2 = vld [vmem:[%s13125_s9 + $0x10] sm:$0xff] (%p11235_p4)  ;;  %9345 = vst [vmem:[%s13960_s27] sm:$0xff] (%p11235_p4), %v9344_v56  ;;  %v9472_v56 = vld [vmem:[%s13125_s9 + $0x200] sm:$0xff] (%p11235_p4) }
 0x5bd   : > { %9203 = vmatmul.mubr.bf16.gmra.mrb[52].mxu0 %v13824_v5  ;;  %9235 = vmatprep.subr.bf16.mxu0 %v8994_v60  ;;  %9349 = vst [vmem:[%s13960_s27 + $0x10] sm:$0xff] (%p11235_p4), %v9348_v2  ;;  %9473 = vst [vmem:[%s13960_s27 + $0x3c0] sm:$0xff] (%p11235_p4), %v9472_v56 }
 0x5be   : > { %10408 = vmatprep.subr.bf16.mxu1 %v8994_v60  ;;  %9236 = vmatpush1.bf16.msra.mxu0 %v8993_v49  ;;  %v8984_v39 = vpop.permute.xlu1 %8983  ;;  %v9350_v60 = vld [vmem:[%s13125_s9 + $0x18] sm:$0xff] (%p11235_p4) }
 0x5bf   : > { %10412 = vmatpush1.bf16.msra.mxu1 %v8993_v49  ;;  %v8982_v33 = vpop.permute.xlu0 %8981  ;;  %9212 = vmatprep.mubr.bf16.mxu0 %v13830_v9  ;;  %v9346_v49 = vld [vmem:[%s13125_s9 + $0x8] sm:$0xff] (%p11235_p4)  ;;  %9351 = vst [vmem:[%s13960_s27 + $0x18] sm:$0xff] (%p11235_p4), %v9350_v60 }
 0x5c0   : > { %10293 = vmatmul.mubr.msk.bf16.gmra.mrb[56].mxu1 %vm1328_vm8, %v11160_v31  ;;  %v8996_v37 = vsel %vm1131_vm7, %v8982_v33, %v8984_v39  ;;  %v9352_v39 = vld [vmem:[%s13125_s9 + $0x20] sm:$0xff] (%p11235_p4)  ;;  %9347 = vst [vmem:[%s13960_s27 + $0x8] sm:$0xff] (%p11235_p4), %v9346_v49  ;;  %v9474_v49 = vld [vmem:[%s13125_s9 + $0x208] sm:$0xff] (%p11235_p4) }
 0x5c1   : > { %9237 = vmatprep.subr.bf16.mxu0 %v8996_v37  ;;  %10409 = vmatprep.subr.bf16.mxu1 %v8996_v37  ;;  %v9358_v37 = vld [vmem:[%s13125_s9 + $0x38] sm:$0xff] (%p11235_p4)  ;;  %9353 = vst [vmem:[%s13960_s27 + $0x20] sm:$0xff] (%p11235_p4), %v9352_v39  ;;  %9475 = vst [vmem:[%s13960_s27 + $0x3c8] sm:$0xff] (%p11235_p4), %v9474_v49 }
 0x5c2   : > { %v8988_v4 = vpop.permute.xlu1 %8987  ;;  %8004 = vmatprep.mubr.bf16.mxu1 %v11194_v24  ;;  %9359 = vst [vmem:[%s13960_s27 + $0x38] sm:$0xff] (%p11235_p4), %v9358_v37  ;;  %v9486_v37 = vld [vmem:[%s13125_s9 + $0x238] sm:$0xff] (%p11235_p4) }
 0x5c3   : > { %v8980_v5 = vpop.permute.xlu0 %8979  ;;  %9487 = vst [vmem:[%s13960_s27 + $0x468] sm:$0xff] (%p11235_p4), %v9486_v37 }
 0x5c4   : > { %v8995_v28 = vsel %vm1131_vm7, %v8980_v5, %v8982_v33  ;;  %v9354_v33 = vld [vmem:[%s13125_s9 + $0x28] sm:$0xff] (%p11235_p4) }
 0x5c5   : > { %9213 = vmatmul.mubr.bf16.gmra.mrb[56].mxu0 %v13839_v10  ;;  %10413 = vmatpush1.bf16.msra.mxu1 %v8995_v28  ;;  %9355 = vst [vmem:[%s13960_s27 + $0x28] sm:$0xff] (%p11235_p4), %v9354_v33  ;;  %v9362_v5 = vld [vmem:[%s13125_s9 + $0x48] sm:$0xff] (%p11235_p4) }
 0x5c6   : > { %9238 = vmatpush1.bf16.msra.mxu0 %v8995_v28  ;;  %v8986_v9 = vpop.permute.xlu1 %8985  ;;  %9222 = vmatprep.mubr.bf16.mxu0 %v13845_v25  ;;  %9363 = vst [vmem:[%s13960_s27 + $0x48] sm:$0xff] (%p11235_p4), %v9362_v5  ;;  %v9490_v5 = vld [vmem:[%s13125_s9 + $0x248] sm:$0xff] (%p11235_p4) }
 0x5c7   : > { %v8990_v14 = vpop.permute.xlu0 %8989  ;;  %v8997_v34 = vsel %vm1131_vm7, %v8986_v9, %v8988_v4  ;;  %9491 = vst [vmem:[%s13960_s27 + $0x478] sm:$0xff] (%p11235_p4), %v9490_v5 }
 0x5c8   : > { %10294 = vmatmul.mubr.msk.bf16.gmra.mrb[60].mxu1 %vm1328_vm8, %v11161_v61  ;;  %v8998_v26 = vsel %vm1131_vm7, %v8988_v4, %v8990_v14  ;;  %v9360_v4 = vld [vmem:[%s13125_s9 + $0x40] sm:$0xff] (%p11235_p4) }
 0x5c9   : > { %9239 = vmatprep.subr.bf16.mxu0 %v8998_v26  ;;  %10410 = vmatprep.subr.bf16.mxu1 %v8998_v26  ;;  %9361 = vst [vmem:[%s13960_s27 + $0x40] sm:$0xff] (%p11235_p4), %v9360_v4  ;;  %v9374_v26 = vld [vmem:[%s13125_s9 + $0x78] sm:$0xff] (%p11235_p4)  ;;  %v9488_v4 = vld [vmem:[%s13125_s9 + $0x240] sm:$0xff] (%p11235_p4) }
 0x5ca   : > { %9240 = vmatpush1.bf16.msra.mxu0 %v8997_v34  ;;  %10414 = vmatpush1.bf16.msra.mxu1 %v8997_v34  ;;  %9375 = vst [vmem:[%s13960_s27 + $0xe8] sm:$0xff] (%p11235_p4), %v9374_v26  ;;  %9489 = vst [vmem:[%s13960_s27 + $0x470] sm:$0xff] (%p11235_p4), %v9488_v4  ;;  %v9502_v26 = vld [vmem:[%s13125_s9 + $0x278] sm:$0xff] (%p11235_p4) }
 0x5cb   : > { %9285 = vmatprep.mubr.bf16.mxu1 %v11194_v24  ;;  %9503 = vst [vmem:[%s13960_s27 + $0x4a8] sm:$0xff] (%p11235_p4), %v9502_v26 }
 0x5cd   : > { %9223 = vmatmul.mubr.bf16.gmra.mrb[60].mxu0 %v13854_v21 }
 0x5ce   : > { %9265 = vmatprep.mubr.bf16.mxu0 %v11194_v24 }
 0x5d0   : > { %10401 = vmatmul.mubr.msk.bf16.vlgmr.msra.gmra.mrb[64].mxu1 %vm1328_vm8, %v11160_v31  ;;  %v9356_v31 = vld [vmem:[%s13125_s9 + $0x30] sm:$0xff] (%p11235_p4) }
 0x5d1   : > { %9295 = vmatprep.mubr.bf16.mxu1 %v11194_v24  ;;  %9357 = vst [vmem:[%s13960_s27 + $0x30] sm:$0xff] (%p11235_p4), %v9356_v31  ;;  %v9484_v31 = vld [vmem:[%s13125_s9 + $0x230] sm:$0xff] (%p11235_p4) }
 0x5d2   : > { %9485 = vst [vmem:[%s13960_s27 + $0x460] sm:$0xff] (%p11235_p4), %v9484_v31 }
 0x5d5   : > { %10399 = vmatmul.mubr.msk.bf16.vlgmr.msra.gmra.mrb[48].mxu0 %vm1328_vm8, %v11158_v16 }
 0x5d6   : > { %9275 = vmatprep.mubr.bf16.mxu0 %v11194_v24 }
 0x5d8   : > { %10402 = vmatmul.mubr.msk.bf16.gmra.mrb[68].mxu1 %vm1328_vm8, %v11161_v61  ;;  %v9372_v61 = vld [vmem:[%s13125_s9 + $0x70] sm:$0xff] (%p11235_p4) }
 0x5d9   : > { %9373 = vst [vmem:[%s13960_s27 + $0xe0] sm:$0xff] (%p11235_p4), %v9372_v61  ;;  %v9500_v61 = vld [vmem:[%s13125_s9 + $0x270] sm:$0xff] (%p11235_p4) }
 0x5da   : > { %9501 = vst [vmem:[%s13960_s27 + $0x4a0] sm:$0xff] (%p11235_p4), %v9500_v61 }
 0x5dd   : > { %10400 = vmatmul.mubr.msk.bf16.gmra.mrb[52].mxu0 %vm1328_vm8, %v11159_v47 }
 0x683   : > { %v7976_v10 = vpop.f32.mrb[48].mxu1 }
 0x684   : > { %8015 = vst [vmem:[%s13125_s9 + $0x50] sm:$0xff] %v7976_v10  ;;  %v7978_v25 = vpop.f32.mrb[49].mxu1  ;;  %v9376_v10 = vld [vmem:[%s13125_s9 + $0x80] sm:$0xff] (%p11235_p4) }
 0x685   : > { %8016 = vst [vmem:[%s13125_s9 + $0x58] sm:$0xff] %v7978_v25  ;;  %v7980_v21 = vpop.f32.mrb[50].mxu1  ;;  %v9378_v25 = vld [vmem:[%s13125_s9 + $0x88] sm:$0xff] (%p11235_p4)  ;;  %9377 = vst [vmem:[%s13960_s27 + $0xf0] sm:$0xff] (%p11235_p4), %v9376_v10 }
 0x686   : > { %8017 = vst [vmem:[%s13125_s9 + $0xc0] sm:$0xff] %v7980_v21  ;;  %v7982_v18 = vpop.f32.mrb[51].mxu1  ;;  %9379 = vst [vmem:[%s13960_s27 + $0xf8] sm:$0xff] (%p11235_p4), %v9378_v25  ;;  %v9380_v21 = vld [vmem:[%s13125_s9 + $0x90] sm:$0xff] (%p11235_p4) }
 0x687   : > { %8018 = vst [vmem:[%s13125_s9 + $0xc8] sm:$0xff] %v7982_v18  ;;  %v9382_v18 = vld [vmem:[%s13125_s9 + $0x98] sm:$0xff] (%p11235_p4)  ;;  %9381 = vst [vmem:[%s13960_s27 + $0x100] sm:$0xff] (%p11235_p4), %v9380_v21 }
 0x688   : > { %9383 = vst [vmem:[%s13960_s27 + $0x108] sm:$0xff] (%p11235_p4), %v9382_v18 }
 0x68b   : > { %v7986_v44 = vpop.f32.mrb[52].mxu1  ;;  %v9364_v28 = vld [vmem:[%s13125_s9 + $0x50] sm:$0xff] (%p11235_p4) }
 0x68c   : > { %8019 = vst [vmem:[%s13125_s9 + $0x130] sm:$0xff] %v7986_v44  ;;  %v7988_v24 = vpop.f32.mrb[53].mxu1  ;;  %v9366_v9 = vld [vmem:[%s13125_s9 + $0x58] sm:$0xff] (%p11235_p4)  ;;  %9365 = vst [vmem:[%s13960_s27 + $0x50] sm:$0xff] (%p11235_p4), %v9364_v28  ;;  %v9384_v44 = vld [vmem:[%s13125_s9 + $0xa0] sm:$0xff] (%p11235_p4) }
 0x68d   : > { %8020 = vst [vmem:[%s13125_s9 + $0x138] sm:$0xff] %v7988_v24  ;;  %v7990_v15 = vpop.f32.mrb[54].mxu1  ;;  %9367 = vst [vmem:[%s13960_s27 + $0x58] sm:$0xff] (%p11235_p4), %v9366_v9  ;;  %v9386_v24 = vld [vmem:[%s13125_s9 + $0xa8] sm:$0xff] (%p11235_p4)  ;;  %v9492_v28 = vld [vmem:[%s13125_s9 + $0x250] sm:$0xff] (%p11235_p4) }
 0x68e   : > { %8021 = vst [vmem:[%s13125_s9 + $0x1a0] sm:$0xff] %v7990_v15  ;;  %v7992_v22 = vpop.f32.mrb[55].mxu1  ;;  %9385 = vst [vmem:[%s13960_s27 + $0x110] sm:$0xff] (%p11235_p4), %v9384_v44  ;;  %v9388_v15 = vld [vmem:[%s13125_s9 + $0xb0] sm:$0xff] (%p11235_p4)  ;;  %v9494_v9 = vld [vmem:[%s13125_s9 + $0x258] sm:$0xff] (%p11235_p4) }
 0x68f   : > { %8022 = vst [vmem:[%s13125_s9 + $0x1a8] sm:$0xff] %v7992_v22  ;;  %v9390_v22 = vld [vmem:[%s13125_s9 + $0xb8] sm:$0xff] (%p11235_p4)  ;;  %9387 = vst [vmem:[%s13960_s27 + $0x118] sm:$0xff] (%p11235_p4), %v9386_v24  ;;  %v9512_v44 = vld [vmem:[%s13125_s9 + $0x2a0] sm:$0xff] (%p11235_p4) }
 0x690   : > { %9389 = vst [vmem:[%s13960_s27 + $0x120] sm:$0xff] (%p11235_p4), %v9388_v15  ;;  %9391 = vst [vmem:[%s13960_s27 + $0x128] sm:$0xff] (%p11235_p4), %v9390_v22  ;;  %v9514_v24 = vld [vmem:[%s13125_s9 + $0x2a8] sm:$0xff] (%p11235_p4)  ;;  %v9516_v15 = vld [vmem:[%s13125_s9 + $0x2b0] sm:$0xff] (%p11235_p4) }
 0x691   : > { %9493 = vst [vmem:[%s13960_s27 + $0x480] sm:$0xff] (%p11235_p4), %v9492_v28  ;;  %9495 = vst [vmem:[%s13960_s27 + $0x488] sm:$0xff] (%p11235_p4), %v9494_v9  ;;  %v9518_v22 = vld [vmem:[%s13125_s9 + $0x2b8] sm:$0xff] (%p11235_p4) }
 0x692   : > { %9513 = vst [vmem:[%s13960_s27 + $0x540] sm:$0xff] (%p11235_p4), %v9512_v44  ;;  %9515 = vst [vmem:[%s13960_s27 + $0x548] sm:$0xff] (%p11235_p4), %v9514_v24 }
 0x693   : > { %v7996_v43 = vpop.f32.mrb[56].mxu1  ;;  %9517 = vst [vmem:[%s13960_s27 + $0x550] sm:$0xff] (%p11235_p4), %v9516_v15  ;;  %9519 = vst [vmem:[%s13960_s27 + $0x558] sm:$0xff] (%p11235_p4), %v9518_v22 }
 0x694   : > { %8023 = vst [vmem:[%s13125_s9 + $0x210] sm:$0xff] %v7996_v43  ;;  %v7998_v6 = vpop.f32.mrb[57].mxu1  ;;  %v9392_v43 = vld [vmem:[%s13125_s9 + $0xc0] sm:$0xff] (%p11235_p4) }
 0x695   : > { %8024 = vst [vmem:[%s13125_s9 + $0x218] sm:$0xff] %v7998_v6  ;;  %v8000_v58 = vpop.f32.mrb[58].mxu1  ;;  %v9394_v6 = vld [vmem:[%s13125_s9 + $0xc8] sm:$0xff] (%p11235_p4)  ;;  %9393 = vst [vmem:[%s13960_s27 + $0x130] sm:$0xff] (%p11235_p4), %v9392_v43  ;;  %v9520_v43 = vld [vmem:[%s13125_s9 + $0x2c0] sm:$0xff] (%p11235_p4) }
 0x696   : > { %8025 = vst [vmem:[%s13125_s9 + $0x280] sm:$0xff] %v8000_v58  ;;  %v8002_v41 = vpop.f32.mrb[59].mxu1  ;;  %9395 = vst [vmem:[%s13960_s27 + $0x138] sm:$0xff] (%p11235_p4), %v9394_v6  ;;  %v9522_v6 = vld [vmem:[%s13125_s9 + $0x2c8] sm:$0xff] (%p11235_p4) }
 0x697   : > { %8026 = vst [vmem:[%s13125_s9 + $0x288] sm:$0xff] %v8002_v41  ;;  %9521 = vst [vmem:[%s13960_s27 + $0x560] sm:$0xff] (%p11235_p4), %v9520_v43 }
 0x698   : > { %v9214_v13 = vpop.f32.mrb[56].mxu0  ;;  %9523 = vst [vmem:[%s13960_s27 + $0x568] sm:$0xff] (%p11235_p4), %v9522_v6 }
 0x699   : > { %v9216_v29 = vpop.f32.mrb[57].mxu0 }
 0x69a   : > { %v9218_v46 = vpop.f32.mrb[58].mxu0 }
 0x69b   : > { %v8006_v36 = vpop.f32.mrb[60].mxu1  ;;  %v9220_v7 = vpop.f32.mrb[59].mxu0  ;;  %v9476_v2 = vld [vmem:[%s13125_s9 + $0x210] sm:$0xff] (%p11235_p4) }
 0x69c   : > { %8027 = vst [vmem:[%s13125_s9 + $0x2f0] sm:$0xff] %v8006_v36  ;;  %v8008_v1 = vpop.f32.mrb[61].mxu1  ;;  %v9406_v36 = vld [vmem:[%s13125_s9 + $0xf8] sm:$0xff] (%p11235_p4)  ;;  %9477 = vst [vmem:[%s13960_s27 + $0x3d0] sm:$0xff] (%p11235_p4), %v9476_v2 }
 0x69d   : > { %8028 = vst [vmem:[%s13125_s9 + $0x2f8] sm:$0xff] %v8008_v1  ;;  %v8010_v12 = vpop.f32.mrb[62].mxu1  ;;  %9407 = vst [vmem:[%s13960_s27 + $0x1d8] sm:$0xff] (%p11235_p4), %v9406_v36  ;;  %v9410_v1 = vld [vmem:[%s13125_s9 + $0x108] sm:$0xff] (%p11235_p4)  ;;  %v9478_v60 = vld [vmem:[%s13125_s9 + $0x218] sm:$0xff] (%p11235_p4) }
 0x69e   : > { %8029 = vst [vmem:[%s13125_s9 + $0x360] sm:$0xff] %v8010_v12  ;;  %v8012_v48 = vpop.f32.mrb[63].mxu1  ;;  %v9412_v12 = vld [vmem:[%s13125_s9 + $0x110] sm:$0xff] (%p11235_p4)  ;;  %9411 = vst [vmem:[%s13960_s27 + $0x1e8] sm:$0xff] (%p11235_p4), %v9410_v1  ;;  %v9504_v10 = vld [vmem:[%s13125_s9 + $0x280] sm:$0xff] (%p11235_p4) }
 0x69f   : > { %8030 = vst [vmem:[%s13125_s9 + $0x368] sm:$0xff] %v8012_v48  ;;  %v9414_v48 = vld [vmem:[%s13125_s9 + $0x118] sm:$0xff] (%p11235_p4)  ;;  %9413 = vst [vmem:[%s13960_s27 + $0x1f0] sm:$0xff] (%p11235_p4), %v9412_v12  ;;  %v9506_v25 = vld [vmem:[%s13125_s9 + $0x288] sm:$0xff] (%p11235_p4) }
 0x6a0   : > { %v9224_v54 = vpop.f32.mrb[60].mxu0  ;;  %9415 = vst [vmem:[%s13960_s27 + $0x1f8] sm:$0xff] (%p11235_p4), %v9414_v48  ;;  %9479 = vst [vmem:[%s13960_s27 + $0x3d8] sm:$0xff] (%p11235_p4), %v9478_v60  ;;  %v9540_v12 = vld [vmem:[%s13125_s9 + $0x310] sm:$0xff] (%p11235_p4)  ;;  %v9542_v48 = vld [vmem:[%s13125_s9 + $0x318] sm:$0xff] (%p11235_p4) }
 0x6a1   : > { %v9226_v3 = vpop.f32.mrb[61].mxu0  ;;  %9505 = vst [vmem:[%s13960_s27 + $0x4b0] sm:$0xff] (%p11235_p4), %v9504_v10  ;;  %9507 = vst [vmem:[%s13960_s27 + $0x4b8] sm:$0xff] (%p11235_p4), %v9506_v25 }
 0x6a2   : > { %v9228_v40 = vpop.f32.mrb[62].mxu0  ;;  %9541 = vst [vmem:[%s13960_s27 + $0x620] sm:$0xff] (%p11235_p4), %v9540_v12  ;;  %9543 = vst [vmem:[%s13960_s27 + $0x628] sm:$0xff] (%p11235_p4), %v9542_v48 }
 0x6a3   : > { %v9230_v23 = vpop.f32.mrb[63].mxu0  ;;  %v9287_v42 = vpop.f32.mrb[64].mxu1 }
 0x6a4   : > { %v10431_v8 = vadd.f32 %v9287_v42, %v9214_v13  ;;  %v9289_v52 = vpop.f32.mrb[65].mxu1  ;;  %v9400_v13 = vld [vmem:[%s13125_s9 + $0xe0] sm:$0xff] (%p11235_p4)  ;;  %v9534_v36 = vld [vmem:[%s13125_s9 + $0x2f8] sm:$0xff] (%p11235_p4) }
 0x6a5   : > { %v10432_v51 = vadd.f32 %v9289_v52, %v9216_v29  ;;  %v9291_v53 = vpop.f32.mrb[66].mxu1  ;;  %v9402_v29 = vld [vmem:[%s13125_s9 + $0xe8] sm:$0xff] (%p11235_p4)  ;;  %9401 = vst [vmem:[%s13960_s27 + $0x1c0] sm:$0xff] (%p11235_p4), %v9400_v13  ;;  %v9428_v52 = vld [vmem:[%s13125_s9 + $0x150] sm:$0xff] (%p11235_p4)  ;;  %v9528_v13 = vld [vmem:[%s13125_s9 + $0x2e0] sm:$0xff] (%p11235_p4) }
 0x6a6   : > { %9314 = vst [vmem:[%s13125_s9 + $0x220] sm:$0xff] %v10431_v8  ;;  %v10433_v35 = vadd.f32 %v9291_v53, %v9218_v46  ;;  %v9293_v38 = vpop.f32.mrb[67].mxu1  ;;  %9403 = vst [vmem:[%s13960_s27 + $0x1c8] sm:$0xff] (%p11235_p4), %v9402_v29  ;;  %v9404_v46 = vld [vmem:[%s13125_s9 + $0xf0] sm:$0xff] (%p11235_p4)  ;;  %v9432_v53 = vld [vmem:[%s13125_s9 + $0x160] sm:$0xff] (%p11235_p4) }
 0x6a7   : > { %9315 = vst [vmem:[%s13125_s9 + $0x228] sm:$0xff] %v10432_v51  ;;  %v10434_v63 = vadd.f32 %v9293_v38, %v9220_v7  ;;  %v9408_v7 = vld [vmem:[%s13125_s9 + $0x100] sm:$0xff] (%p11235_p4)  ;;  %9405 = vst [vmem:[%s13960_s27 + $0x1d0] sm:$0xff] (%p11235_p4), %v9404_v46  ;;  %v9430_v51 = vld [vmem:[%s13125_s9 + $0x158] sm:$0xff] (%p11235_p4) }
 0x6a8   : > { %9316 = vst [vmem:[%s13125_s9 + $0x290] sm:$0xff] %v10433_v35  ;;  %v9267_v45 = vpop.f32.mrb[48].mxu0  ;;  %9409 = vst [vmem:[%s13960_s27 + $0x1e0] sm:$0xff] (%p11235_p4), %v9408_v7  ;;  %v9434_v35 = vld [vmem:[%s13125_s9 + $0x168] sm:$0xff] (%p11235_p4)  ;;  %v9436_v38 = vld [vmem:[%s13125_s9 + $0x170] sm:$0xff] (%p11235_p4) }
 0x6a9   : > { %9317 = vst [vmem:[%s13125_s9 + $0x298] sm:$0xff] %v10434_v63  ;;  %9306 = vst [vmem:[%s13125_s9 + $0x60] sm:$0xff] %v9267_v45  ;;  %v9269_v32 = vpop.f32.mrb[49].mxu0  ;;  %v9438_v63 = vld [vmem:[%s13125_s9 + $0x178] sm:$0xff] (%p11235_p4)  ;;  %v9440_v45 = vld [vmem:[%s13125_s9 + $0x180] sm:$0xff] (%p11235_p4) }
 0x6aa   : > { %9307 = vst [vmem:[%s13125_s9 + $0x68] sm:$0xff] %v9269_v32  ;;  %v9271_v57 = vpop.f32.mrb[50].mxu0  ;;  %9429 = vst [vmem:[%s13960_s27 + $0x2a0] sm:$0xff] (%p11235_p4), %v9428_v52  ;;  %v9442_v32 = vld [vmem:[%s13125_s9 + $0x188] sm:$0xff] (%p11235_p4)  ;;  %v9532_v46 = vld [vmem:[%s13125_s9 + $0x2f0] sm:$0xff] (%p11235_p4) }
 0x6ab   : > { %9308 = vst [vmem:[%s13125_s9 + $0xd0] sm:$0xff] %v9271_v57  ;;  %v9273_v55 = vpop.f32.mrb[51].mxu0  ;;  %v9297_v19 = vpop.f32.mrb[68].mxu1  ;;  %9431 = vst [vmem:[%s13960_s27 + $0x2a8] sm:$0xff] (%p11235_p4), %v9430_v51  ;;  %v9444_v57 = vld [vmem:[%s13125_s9 + $0x190] sm:$0xff] (%p11235_p4)  ;;  %v9530_v29 = vld [vmem:[%s13125_s9 + $0x2e8] sm:$0xff] (%p11235_p4) }
 0x6ac   : > { %9309 = vst [vmem:[%s13125_s9 + $0xd8] sm:$0xff] %v9273_v55  ;;  %v10435_v0 = vadd.f32 %v9297_v19, %v9224_v54  ;;  %v9299_v30 = vpop.f32.mrb[69].mxu1  ;;  %v9416_v54 = vld [vmem:[%s13125_s9 + $0x120] sm:$0xff] (%p11235_p4)  ;;  %9433 = vst [vmem:[%s13960_s27 + $0x2b0] sm:$0xff] (%p11235_p4), %v9432_v53  ;;  %v9446_v55 = vld [vmem:[%s13125_s9 + $0x198] sm:$0xff] (%p11235_p4) }
 0x6ad   : > { %v10436_v16 = vadd.f32 %v9299_v30, %v9226_v3  ;;  %v9301_v59 = vpop.f32.mrb[70].mxu1  ;;  %v9418_v3 = vld [vmem:[%s13125_s9 + $0x128] sm:$0xff] (%p11235_p4)  ;;  %9417 = vst [vmem:[%s13960_s27 + $0x200] sm:$0xff] (%p11235_p4), %v9416_v54  ;;  %9435 = vst [vmem:[%s13960_s27 + $0x2b8] sm:$0xff] (%p11235_p4), %v9434_v35  ;;  %v9448_v19 = vld [vmem:[%s13125_s9 + $0x1a0] sm:$0xff] (%p11235_p4) }
 0x6ae   : > { %9318 = vst [vmem:[%s13125_s9 + $0x300] sm:$0xff] %v10435_v0  ;;  %v10437_v62 = vadd.f32 %v9301_v59, %v9228_v40  ;;  %v9303_v11 = vpop.f32.mrb[71].mxu1  ;;  %9328 = sbr.rel (!%p11235_p4) target bundleno = 1741 (0x6cd), region = 32  ;;  %v9420_v40 = vld [vmem:[%s13125_s9 + $0x130] sm:$0xff] (%p11235_p4)  ;;  %9419 = vst [vmem:[%s13960_s27 + $0x208] sm:$0xff] (%p11235_p4), %v9418_v3  ;;  %v9450_v0 = vld [vmem:[%s13125_s9 + $0x1a8] sm:$0xff] (%p11235_p4) }
 0x6af   : > { %9319 = vst [vmem:[%s13125_s9 + $0x308] sm:$0xff] %v10436_v16  ;;  %v10438_v20 = vadd.f32 %v9303_v11, %v9230_v23  ;;  %9421 = vst [vmem:[%s13960_s27 + $0x210] sm:$0xff] (%p11235_p4), %v9420_v40  ;;  %v9422_v23 = vld [vmem:[%s13125_s9 + $0x138] sm:$0xff] (%p11235_p4)  ;;  %v9456_v59 = vld [vmem:[%s13125_s9 + $0x1c0] sm:$0xff] (%p11235_p4) }
 0x6b0   : > { %9320 = vst [vmem:[%s13125_s9 + $0x370] sm:$0xff] %v10437_v62  ;;  %v9277_v27 = vpop.f32.mrb[52].mxu0  ;;  %v9368_v14 = vld [vmem:[%s13125_s9 + $0x60] sm:$0xff] (%p11235_p4)  ;;  %9423 = vst [vmem:[%s13960_s27 + $0x218] sm:$0xff] (%p11235_p4), %v9422_v23  ;;  %v9458_v62 = vld [vmem:[%s13125_s9 + $0x1c8] sm:$0xff] (%p11235_p4) }
 0x6b1   : > { %9321 = vst [vmem:[%s13125_s9 + $0x378] sm:$0xff] %v10438_v20  ;;  %9310 = vst [vmem:[%s13125_s9 + $0x140] sm:$0xff] %v9277_v27  ;;  %v9279_v50 = vpop.f32.mrb[53].mxu0  ;;  %v9370_v34 = vld [vmem:[%s13125_s9 + $0x68] sm:$0xff] (%p11235_p4)  ;;  %v9460_v11 = vld [vmem:[%s13125_s9 + $0x1d0] sm:$0xff] (%p11235_p4) }
 0x6b2   : > { %9311 = vst [vmem:[%s13125_s9 + $0x148] sm:$0xff] %v9279_v50  ;;  %v9281_v17 = vpop.f32.mrb[54].mxu0  ;;  %9369 = vst [vmem:[%s13960_s27 + $0x60] sm:$0xff] (%p11235_p4), %v9368_v14  ;;  %v9396_v58 = vld [vmem:[%s13125_s9 + $0xd0] sm:$0xff] (%p11235_p4)  ;;  %v9462_v20 = vld [vmem:[%s13125_s9 + $0x1d8] sm:$0xff] (%p11235_p4) }
 0x6b3   : > { %9312 = vst [vmem:[%s13125_s9 + $0x1b0] sm:$0xff] %v9281_v17  ;;  %v9283_v47 = vpop.f32.mrb[55].mxu0  ;;  %9371 = vst [vmem:[%s13960_s27 + $0x68] sm:$0xff] (%p11235_p4), %v9370_v34  ;;  %v9398_v41 = vld [vmem:[%s13125_s9 + $0xd8] sm:$0xff] (%p11235_p4)  ;;  %v9464_v27 = vld [vmem:[%s13125_s9 + $0x1e0] sm:$0xff] (%p11235_p4) }
 0x6b4   : > { %9313 = vst [vmem:[%s13125_s9 + $0x1b8] sm:$0xff] %v9283_v47  ;;  %9397 = vst [vmem:[%s13960_s27 + $0x140] sm:$0xff] (%p11235_p4), %v9396_v58  ;;  %v9466_v50 = vld [vmem:[%s13125_s9 + $0x1e8] sm:$0xff] (%p11235_p4)  ;;  %v9468_v17 = vld [vmem:[%s13125_s9 + $0x1f0] sm:$0xff] (%p11235_p4) }
 0x6b5   : > { %9399 = vst [vmem:[%s13960_s27 + $0x148] sm:$0xff] %v9398_v41  ;;  %9437 = vst [vmem:[%s13960_s27 + $0x2c0] sm:$0xff] %v9436_v38  ;;  %v9470_v47 = vld [vmem:[%s13125_s9 + $0x1f8] sm:$0xff]  ;;  %v9480_v39 = vld [vmem:[%s13125_s9 + $0x220] sm:$0xff] }
 0x6b6   : > { %9439 = vst [vmem:[%s13960_s27 + $0x2c8] sm:$0xff] %v9438_v63  ;;  %9441 = vst [vmem:[%s13960_s27 + $0x2d0] sm:$0xff] %v9440_v45  ;;  %v9482_v33 = vld [vmem:[%s13125_s9 + $0x228] sm:$0xff]  ;;  %v9496_v14 = vld [vmem:[%s13125_s9 + $0x260] sm:$0xff] }
 0x6b7   : > { %9443 = vst [vmem:[%s13960_s27 + $0x2d8] sm:$0xff] %v9442_v32  ;;  %9445 = vst [vmem:[%s13960_s27 + $0x2e0] sm:$0xff] %v9444_v57  ;;  %v9498_v34 = vld [vmem:[%s13125_s9 + $0x268] sm:$0xff]  ;;  %v9508_v21 = vld [vmem:[%s13125_s9 + $0x290] sm:$0xff] }
 0x6b8   : > { %v9424_v42 = vld [vmem:[%s13125_s9 + $0x140] sm:$0xff]  ;;  %9447 = vst [vmem:[%s13960_s27 + $0x2e8] sm:$0xff] %v9446_v55  ;;  %9449 = vst [vmem:[%s13960_s27 + $0x2f0] sm:$0xff] %v9448_v19  ;;  %v9510_v18 = vld [vmem:[%s13125_s9 + $0x298] sm:$0xff] }
 0x6b9   : > { %v9426_v8 = vld [vmem:[%s13125_s9 + $0x148] sm:$0xff]  ;;  %9425 = vst [vmem:[%s13960_s27 + $0x220] sm:$0xff] %v9424_v42  ;;  %9451 = vst [vmem:[%s13960_s27 + $0x2f8] sm:$0xff] %v9450_v0  ;;  %v9524_v58 = vld [vmem:[%s13125_s9 + $0x2d0] sm:$0xff] }
 0x6ba   : > { %9427 = vst [vmem:[%s13960_s27 + $0x228] sm:$0xff] %v9426_v8  ;;  %v9452_v30 = vld [vmem:[%s13125_s9 + $0x1b0] sm:$0xff]  ;;  %9457 = vst [vmem:[%s13960_s27 + $0x380] sm:$0xff] %v9456_v59  ;;  %v9526_v41 = vld [vmem:[%s13125_s9 + $0x2d8] sm:$0xff] }
 0x6bb   : > { %v9454_v16 = vld [vmem:[%s13125_s9 + $0x1b8] sm:$0xff]  ;;  %9453 = vst [vmem:[%s13960_s27 + $0x300] sm:$0xff] %v9452_v30  ;;  %9459 = vst [vmem:[%s13960_s27 + $0x388] sm:$0xff] %v9458_v62  ;;  %v9536_v7 = vld [vmem:[%s13125_s9 + $0x300] sm:$0xff] }
 0x6bc   : > { %9455 = vst [vmem:[%s13960_s27 + $0x308] sm:$0xff] %v9454_v16  ;;  %9461 = vst [vmem:[%s13960_s27 + $0x390] sm:$0xff] %v9460_v11  ;;  %v9538_v1 = vld [vmem:[%s13125_s9 + $0x308] sm:$0xff]  ;;  %v9544_v54 = vld [vmem:[%s13125_s9 + $0x320] sm:$0xff] }
 0x6bd   : > { %9463 = vst [vmem:[%s13960_s27 + $0x398] sm:$0xff] %v9462_v20  ;;  %9465 = vst [vmem:[%s13960_s27 + $0x3a0] sm:$0xff] %v9464_v27  ;;  %v9546_v3 = vld [vmem:[%s13125_s9 + $0x328] sm:$0xff]  ;;  %v9548_v40 = vld [vmem:[%s13125_s9 + $0x330] sm:$0xff] }
 0x6be   : > { %9467 = vst [vmem:[%s13960_s27 + $0x3a8] sm:$0xff] %v9466_v50  ;;  %9469 = vst [vmem:[%s13960_s27 + $0x3b0] sm:$0xff] %v9468_v17  ;;  %v9550_v23 = vld [vmem:[%s13125_s9 + $0x338] sm:$0xff]  ;;  %v9552_v42 = vld [vmem:[%s13125_s9 + $0x340] sm:$0xff] }
 0x6bf   : > { %9471 = vst [vmem:[%s13960_s27 + $0x3b8] sm:$0xff] %v9470_v47  ;;  %9481 = vst [vmem:[%s13960_s27 + $0x3e0] sm:$0xff] %v9480_v39  ;;  %v9554_v8 = vld [vmem:[%s13125_s9 + $0x348] sm:$0xff]  ;;  %v9556_v52 = vld [vmem:[%s13125_s9 + $0x350] sm:$0xff] }
 0x6c0   : > { %9483 = vst [vmem:[%s13960_s27 + $0x3e8] sm:$0xff] %v9482_v33  ;;  %9497 = vst [vmem:[%s13960_s27 + $0x490] sm:$0xff] %v9496_v14  ;;  %v9558_v51 = vld [vmem:[%s13125_s9 + $0x358] sm:$0xff]  ;;  %v9560_v53 = vld [vmem:[%s13125_s9 + $0x360] sm:$0xff] }
 0x6c1   : > { %9499 = vst [vmem:[%s13960_s27 + $0x498] sm:$0xff] %v9498_v34  ;;  %9509 = vst [vmem:[%s13960_s27 + $0x4c0] sm:$0xff] %v9508_v21  ;;  %v9562_v35 = vld [vmem:[%s13125_s9 + $0x368] sm:$0xff]  ;;  %v9564_v38 = vld [vmem:[%s13125_s9 + $0x370] sm:$0xff] }
 0x6c2   : > { %9511 = vst [vmem:[%s13960_s27 + $0x4c8] sm:$0xff] %v9510_v18  ;;  %9525 = vst [vmem:[%s13960_s27 + $0x570] sm:$0xff] %v9524_v58  ;;  %v9566_v63 = vld [vmem:[%s13125_s9 + $0x378] sm:$0xff] }
 0x6c3   : > { %9527 = vst [vmem:[%s13960_s27 + $0x578] sm:$0xff] %v9526_v41  ;;  %9529 = vst [vmem:[%s13960_s27 + $0x580] sm:$0xff] %v9528_v13 }
 0x6c4   : > { %9531 = vst [vmem:[%s13960_s27 + $0x588] sm:$0xff] %v9530_v29  ;;  %9533 = vst [vmem:[%s13960_s27 + $0x590] sm:$0xff] %v9532_v46 }
 0x6c5   : > { %9535 = vst [vmem:[%s13960_s27 + $0x598] sm:$0xff] %v9534_v36  ;;  %9537 = vst [vmem:[%s13960_s27 + $0x5a0] sm:$0xff] %v9536_v7 }
 0x6c6   : > { %9539 = vst [vmem:[%s13960_s27 + $0x5a8] sm:$0xff] %v9538_v1  ;;  %9545 = vst [vmem:[%s13960_s27 + $0x630] sm:$0xff] %v9544_v54 }
 0x6c7   : > { %9547 = vst [vmem:[%s13960_s27 + $0x638] sm:$0xff] %v9546_v3  ;;  %9549 = vst [vmem:[%s13960_s27 + $0x640] sm:$0xff] %v9548_v40 }
 0x6c8   : > { %9551 = vst [vmem:[%s13960_s27 + $0x648] sm:$0xff] %v9550_v23  ;;  %9553 = vst [vmem:[%s13960_s27 + $0x650] sm:$0xff] %v9552_v42 }
 0x6c9   : > { %9555 = vst [vmem:[%s13960_s27 + $0x658] sm:$0xff] %v9554_v8  ;;  %9557 = vst [vmem:[%s13960_s27 + $0x660] sm:$0xff] %v9556_v52 }
 0x6ca   : > { %9559 = vst [vmem:[%s13960_s27 + $0x668] sm:$0xff] %v9558_v51  ;;  %9561 = vst [vmem:[%s13960_s27 + $0x670] sm:$0xff] %v9560_v53 }
 0x6cb   : > { %9563 = vst [vmem:[%s13960_s27 + $0x678] sm:$0xff] %v9562_v35  ;;  %9565 = vst [vmem:[%s13960_s27 + $0x680] sm:$0xff] %v9564_v38 }
 0x6cc   : > { %9567 = vst [vmem:[%s13960_s27 + $0x688] sm:$0xff] %v9566_v63 }
 0x6cd PF: > { %p9_p8 = scmp.ge.s32.totalorder %s11225_s13, 4   ;;  %s14194_s9 = smov %s11180_s10 }
 0x6ce   : > { %s14195_s10 = smov %s11233_s16  ;;  %s14196_s11 = smov %s11225_s13 }
 0x6cf   :  { %11 = sbr.rel (!%p9_p8) target bundleno = 2 (0x2), region = 81 }

</bundles_post_ra>
